<compile_context>
chip_gen: v7x
topology: tpu7x:2x2x1
jax: 0.10.0
libtpu: 0.0.40
codegen_flags: <defaults>
</compile_context>

<pallas_src>
import functools
import math

import jax
import jax.numpy as jnp
from jax import lax
from jax.experimental import pallas as pl
from jax.experimental.pallas import tpu as pltpu

# ----------------------------------------------------------------------------
# Static geometry: fc1 expects 64*16*4 features => input spatial 64x16.
# ----------------------------------------------------------------------------
H1, W1, C0, C1 = 64, 16, 3, 32        # conv1: 64x16 spatial, 3 -> 32 ch
H2, W2, C2 = 32, 8, 64                # conv2: 32x8 spatial, 32 -> 64 ch
H3, W3 = 16, 4                        # spatial after second pool
HW1, HW2 = H1 * W1, H2 * W2           # 1024, 256
K1P = 32                              # conv1 im2col K: 27 padded to 32
PAD2 = 16                             # zero-row gap for conv2 shifts (>= W2+1, mult of 8)
IMG2 = HW2 + PAD2                     # 272 scratch rows per image
FC_IN = H3 * W3 * C2                  # 4096
FC_PAD = 128                          # fc output dims padded to one full lane width


# ----------------------------------------------------------------------------
# Kernel A: conv1 + relu + pool + conv2 + relu + pool   (B_TILE images / step)
# ----------------------------------------------------------------------------
def _conv_block_kernel(p_ref, w1_ref, b1_ref, w2_ref, b2_ref, out_ref,
                       x2_scr, hp2_scr, *, bt):
    m2 = bt * IMG2

    # ---------------- conv1 + relu: single im2col matmul ----------------
    y1 = jnp.dot(p_ref[...], w1_ref[...], preferred_element_type=jnp.float32)
    y1 = jnp.maximum(y1 + b1_ref[...], 0.0)                      # (bt*1024, 32)

    # ---------------- maxpool1 2x2, fully in registers ----------------
    # Patch rows were pre-ordered (img, quad, h2, w2): each pooling window's 4
    # outputs live in 4 tile-aligned row blocks -> 3 elementwise maxima.
    y1 = y1.reshape(bt, 4, HW2, C1)
    p1 = jnp.maximum(jnp.maximum(y1[:, 0], y1[:, 1]),
                     jnp.maximum(y1[:, 2], y1[:, 3]))             # (bt, 256, 32)
    p1 = p1.astype(jnp.bfloat16)

    # -------- lay pooled maps into the flat conv2 scratch (zero-row gaps) -------
    # Pad rows are re-zeroed every step (cheap: ~1 KB each) so the kernel stays
    # correct when the "parallel" batch axis is split across megacore TCs.
    zrows = jnp.zeros((PAD2, C1), jnp.bfloat16)
    x2_scr[pl.ds(0, PAD2), :] = zrows
    for b in range(bt):
        base = PAD2 + b * IMG2
        x2_scr[pl.ds(base, HW2), :] = p1[b]
        x2_scr[pl.ds(base + HW2, PAD2), :] = zrows
    x2_scr[pl.ds(PAD2 + m2, PAD2), :] = zrows                     # hygiene only

    # ---------------- conv2 + relu: 9 shifted matmul-accumulates ----------------
    # Horizontal padding: mask the bf16 LHS rows (not the f32 products).
    wpos = lax.broadcasted_iota(jnp.int32, (m2, 1), 0) % W2
    lmask = wpos > 0
    rmask = wpos < W2 - 1
    acc = jnp.zeros((m2, C2), jnp.float32)
    k = 0
    for dh in (-1, 0, 1):
        for dw in (-1, 0, 1):
            lhs = x2_scr[pl.ds(PAD2 + dh * W2 + dw, m2), :]       # (m2, 32) bf16
            if dw == -1:
                lhs = jnp.where(lmask, lhs, 0)
            elif dw == 1:
                lhs = jnp.where(rmask, lhs, 0)
            acc = acc + jnp.dot(lhs, w2_ref[pl.ds(k * C1, C1), :],
                                preferred_element_type=jnp.float32)
            k += 1
    y2 = jnp.maximum(acc + b2_ref[...], 0.0)                      # (m2, 64)

    # ---------------- maxpool2 2x2 ----------------
    # Groups of 16 raster rows = one h-pair (8 cols each); group 17 of each image
    # is the junk gap block and is dropped by the :H3 slice (all tile-aligned).
    y2 = y2.reshape(bt, IMG2 // 16, 16, C2)
    hp = jnp.maximum(y2[:, :H3, 0:W2, :], y2[:, :H3, W2:2 * W2, :])  # (bt,16,8,64)
    # w-pairs: small scratch + stride-2 sublane reads.
    hp2_scr[...] = hp.reshape(bt * H3 * W2, C2)
    p2 = jnp.maximum(hp2_scr[pl.ds(0, bt * H3 * W3, stride=2), :],
                     hp2_scr[pl.ds(1, bt * H3 * W3, stride=2), :])   # (bt*64, 64)

    out_ref[...] = p2.reshape(bt, H3 * W3, C2).astype(out_ref.dtype)


# ----------------------------------------------------------------------------
# Kernel B: fc1 + relu + fc2 + relu + fc3  (weights VMEM-resident, lane-padded)
# ----------------------------------------------------------------------------
def _fc_kernel(f_ref, w1_ref, b1_ref, w2_ref, b2_ref, w3_ref, b3_ref, o_ref):
    h = jnp.dot(f_ref[...], w1_ref[...], preferred_element_type=jnp.float32)
    h = jnp.maximum(h + b1_ref[...], 0.0)
    h = jnp.dot(h.astype(jnp.bfloat16), w2_ref[...],
                preferred_element_type=jnp.float32)
    h = jnp.maximum(h + b2_ref[...], 0.0)
    h = jnp.dot(h.astype(jnp.bfloat16), w3_ref[...],
                preferred_element_type=jnp.float32)
    o_ref[...] = (h + b3_ref[...]).astype(o_ref.dtype)


# ----------------------------------------------------------------------------
# Parameters (deterministic synthetic, PyTorch-style 1/sqrt(fan_in) uniform)
# ----------------------------------------------------------------------------
def _uniform(key, shape, fan_in, dtype=jnp.float32):
    bound = 1.0 / math.sqrt(fan_in)
    return jax.random.uniform(key, shape, jnp.float32, -bound, bound).astype(dtype)


def init_params(seed=42):
    ks = jax.random.split(jax.random.PRNGKey(seed), 10)
    p = {}
    w1 = _uniform(ks[0], (9 * C0, C1), 9 * C0)               # rows (kh, kw, cin)
    p["w_conv1"] = jnp.pad(w1, ((0, K1P - 9 * C0), (0, 0))).astype(jnp.bfloat16)
    p["b_conv1"] = _uniform(ks[1], (1, C1), 9 * C0)
    p["w_conv2"] = _uniform(ks[2], (9 * C1, C2), 9 * C1, jnp.bfloat16)
    p["b_conv2"] = _uniform(ks[3], (1, C2), 9 * C1)
    # fc weights: rows in (h, w, c) feature order; output dims zero-padded to 128.
    w_fc1 = _uniform(ks[4], (FC_IN, 120), FC_IN)
    p["w_fc1"] = jnp.pad(w_fc1, ((0, 0), (0, FC_PAD - 120))).astype(jnp.bfloat16)
    p["b_fc1"] = jnp.pad(_uniform(ks[5], (1, 120), FC_IN), ((0, 0), (0, FC_PAD - 120)))
    w_fc2 = _uniform(ks[6], (120, 84), 120)
    p["w_fc2"] = jnp.pad(w_fc2, ((0, FC_PAD - 120), (0, FC_PAD - 84))).astype(jnp.bfloat16)
    p["b_fc2"] = jnp.pad(_uniform(ks[7], (1, 84), 120), ((0, 0), (0, FC_PAD - 84)))
    w_fc3 = _uniform(ks[8], (84, 10), 84)
    p["w_fc3"] = jnp.pad(w_fc3, ((0, FC_PAD - 84), (0, FC_PAD - 10))).astype(jnp.bfloat16)
    p["b_fc3"] = jnp.pad(_uniform(ks[9], (1, 10), 84), ((0, 0), (0, FC_PAD - 10)))
    return p


# ----------------------------------------------------------------------------
# XLA-side conv1 im2col (tiny; ~64 KB/img bf16), rows ordered (img, quad, h2, w2)
# ----------------------------------------------------------------------------
def _conv1_patches(x_nchw):
    n = x_nchw.shape[0]
    x = jnp.transpose(x_nchw, (0, 2, 3, 1))                       # NHWC (n,64,16,3)
    xp = jnp.pad(x, ((0, 0), (1, 1), (1, 1), (0, 0)))
    pat = jnp.concatenate(
        [xp[:, kh:kh + H1, kw:kw + W1, :] for kh in range(3) for kw in range(3)],
        axis=-1)                                                   # (n,64,16,27)
    pat = jnp.pad(pat, ((0, 0), (0, 0), (0, 0), (0, K1P - 9 * C0)))
    pat = pat.reshape(n, H1 // 2, 2, W1 // 2, 2, K1P)              # (n,h2,hl,w2,wl,K)
    pat = jnp.transpose(pat, (0, 2, 4, 1, 3, 5))                   # (n,hl,wl,h2,w2,K)
    return pat.reshape(n * HW1, K1P).astype(jnp.bfloat16)


def _pick_batch_tile(n):
    # largest tile dividing n that still leaves >= 2 grid steps (v7x: keep both TCs busy)
    for bt in (8, 4, 2):
        if n % bt == 0 and n // bt >= 2:
            return bt
    return 1


# ----------------------------------------------------------------------------
# Forward pass (matches SimpleCNN_v2.forward)
# ----------------------------------------------------------------------------
@jax.jit
def simple_cnn_v2_forward(x_nchw, params):
    n = x_nchw.shape[0]
    bt = _pick_batch_tile(n)

    patches = _conv1_patches(x_nchw)                               # (n*1024, 32) bf16

    feats = pl.pallas_call(
        functools.partial(_conv_block_kernel, bt=bt),
        out_shape=jax.ShapeDtypeStruct((n, H3 * W3, C2), jnp.bfloat16),
        grid=(n // bt,),
        in_specs=[
            pl.BlockSpec((bt * HW1, K1P), lambda i: (i, 0)),
            pl.BlockSpec((K1P, C1), lambda i: (0, 0)),
            pl.BlockSpec((1, C1), lambda i: (0, 0)),
            pl.BlockSpec((9 * C1, C2), lambda i: (0, 0)),
            pl.BlockSpec((1, C2), lambda i: (0, 0)),
        ],
        out_specs=pl.BlockSpec((bt, H3 * W3, C2), lambda i: (i, 0, 0)),
        scratch_shapes=[
            pltpu.VMEM((bt * IMG2 + 2 * PAD2, C1), jnp.bfloat16),  # flat conv2 input
            pltpu.VMEM((bt * H3 * W2, C2), jnp.float32),           # h-pooled conv2
        ],
        compiler_params=pltpu.CompilerParams(dimension_semantics=("parallel",)),
    )(patches, params["w_conv1"], params["b_conv1"],
      params["w_conv2"], params["b_conv2"])

    # Free metadata reshape: feature rows are already in (h, w, c) order.
    f2d = feats.reshape(n, FC_IN)

    # Batch-tile the FC kernel so large batches never blow VMEM (v7x: 64 MiB).
    tb = n if n <= 512 else 256
    n_pad = ((n + tb - 1) // tb) * tb
    if n_pad != n:
        f2d = jnp.pad(f2d, ((0, n_pad - n), (0, 0)))

    logits = pl.pallas_call(
        _fc_kernel,
        out_shape=jax.ShapeDtypeStruct((n_pad, FC_PAD), jnp.float32),
        grid=(n_pad // tb,),
        in_specs=[
            pl.BlockSpec((tb, FC_IN), lambda i: (i, 0)),
            pl.BlockSpec((FC_IN, FC_PAD), lambda i: (0, 0)),
            pl.BlockSpec((1, FC_PAD), lambda i: (0, 0)),
            pl.BlockSpec((FC_PAD, FC_PAD), lambda i: (0, 0)),
            pl.BlockSpec((1, FC_PAD), lambda i: (0, 0)),
            pl.BlockSpec((FC_PAD, FC_PAD), lambda i: (0, 0)),
            pl.BlockSpec((1, FC_PAD), lambda i: (0, 0)),
        ],
        out_specs=pl.BlockSpec((tb, FC_PAD), lambda i: (i, 0)),
        compiler_params=pltpu.CompilerParams(dimension_semantics=("parallel",)),
    )(f2d, params["w_fc1"], params["b_fc1"], params["w_fc2"], params["b_fc2"],
      params["w_fc3"], params["b_fc3"])

    return logits[:n, :10]


# ----------------------------------------------------------------------------
if __name__ == "__main__":
    # fc1 expects 64*16*4 features after two 2x2 pools -> input spatial 64x16.
    x = jax.random.normal(jax.random.PRNGKey(0), (2, 3, H1, W1), jnp.float32)
    params = init_params(seed=42)
    out = simple_cnn_v2_forward(x, params)
    out = jax.block_until_ready(out)
    assert out.shape == (2, 10), out.shape
    assert bool(jnp.all(jnp.isfinite(out)))
    print("KERNEL_OK")
</pallas_src>

<mosaic_0001>
module attributes {stable_mosaic.version = 11 : i64} {
  func.func @_conv_block_kernel(%arg0: i32, %arg1: memref<1024x32xbf16, #tpu.memory_space<vmem>>, %arg2: memref<32x32xbf16, #tpu.memory_space<vmem>>, %arg3: memref<1x32xf32, #tpu.memory_space<vmem>>, %arg4: memref<288x64xbf16, #tpu.memory_space<vmem>>, %arg5: memref<1x64xf32, #tpu.memory_space<vmem>>, %arg6: memref<1x64x64xbf16, #tpu.memory_space<vmem>>, %arg7: memref<304x32xbf16, #tpu.memory_space<vmem>>, %arg8: memref<128x64xf32, #tpu.memory_space<vmem>>) attributes {dimension_semantics = [#tpu.dimension_semantics<parallel>], iteration_bounds = array<i64: 2>, scalar_prefetch = 0 : i64, scratch_operands = 2 : i64, tpu.core_type = #tpu.core_type<tc>, window_params = [{transform_indices = @transform_0, window_bounds = array<i64: 1024, 32>}, {pipeline_mode = #tpu.pipeline_mode<synchronous>, transform_indices = @transform_1, window_bounds = array<i64: 32, 32>}, {pipeline_mode = #tpu.pipeline_mode<synchronous>, transform_indices = @transform_2, window_bounds = array<i64: 1, 32>}, {pipeline_mode = #tpu.pipeline_mode<synchronous>, transform_indices = @transform_3, window_bounds = array<i64: 288, 64>}, {pipeline_mode = #tpu.pipeline_mode<synchronous>, transform_indices = @transform_4, window_bounds = array<i64: 1, 64>}, {transform_indices = @transform_5, window_bounds = array<i64: 1, 64, 64>}]} {
    %c0 = arith.constant 0 : index
    %c0_0 = arith.constant 0 : index
    %0 = vector.load %arg1[%c0, %c0_0] : memref<1024x32xbf16, #tpu.memory_space<vmem>>, vector<1024x32xbf16>
    %c0_1 = arith.constant 0 : index
    %c0_2 = arith.constant 0 : index
    %1 = vector.load %arg2[%c0_1, %c0_2] : memref<32x32xbf16, #tpu.memory_space<vmem>>, vector<32x32xbf16>
    %cst = arith.constant dense<0.000000e+00> : vector<1024x32xf32>
    %2 = tpu.matmul %0, %1, %cst {dimension_numbers = #tpu.dot_dimension_numbers<[1], [0], [0], [1], [0, 0, 1, 1], [], []>} : vector<1024x32xbf16>, vector<32x32xbf16>, vector<1024x32xf32> -> vector<1024x32xf32>
    %c0_3 = arith.constant 0 : index
    %c0_4 = arith.constant 0 : index
    %3 = vector.load %arg3[%c0_3, %c0_4] : memref<1x32xf32, #tpu.memory_space<vmem>>, vector<1x32xf32>
    %4 = vector.broadcast %3 : vector<1x32xf32> to vector<1024x32xf32>
    %5 = arith.addf %2, %4 : vector<1024x32xf32>
    %cst_5 = arith.constant 0.000000e+00 : f32
    %6 = vector.broadcast %cst_5 : f32 to vector<1024x32xf32>
    %7 = arith.maximumf %5, %6 : vector<1024x32xf32>
    %8 = vector.shape_cast %7 : vector<1024x32xf32> to vector<1x4x256x32xf32>
    %9 = vector.extract_strided_slice %8 {offsets = [0, 0, 0, 0], sizes = [1, 1, 256, 32], strides = [1, 1, 1, 1]} : vector<1x4x256x32xf32> to vector<1x1x256x32xf32>
    %10 = vector.shape_cast %9 : vector<1x1x256x32xf32> to vector<1x256x32xf32>
    %11 = vector.extract_strided_slice %8 {offsets = [0, 1, 0, 0], sizes = [1, 1, 256, 32], strides = [1, 1, 1, 1]} : vector<1x4x256x32xf32> to vector<1x1x256x32xf32>
    %12 = vector.shape_cast %11 : vector<1x1x256x32xf32> to vector<1x256x32xf32>
    %13 = arith.maximumf %10, %12 : vector<1x256x32xf32>
    %14 = vector.extract_strided_slice %8 {offsets = [0, 2, 0, 0], sizes = [1, 1, 256, 32], strides = [1, 1, 1, 1]} : vector<1x4x256x32xf32> to vector<1x1x256x32xf32>
    %15 = vector.shape_cast %14 : vector<1x1x256x32xf32> to vector<1x256x32xf32>
    %16 = vector.extract_strided_slice %8 {offsets = [0, 3, 0, 0], sizes = [1, 1, 256, 32], strides = [1, 1, 1, 1]} : vector<1x4x256x32xf32> to vector<1x1x256x32xf32>
    %17 = vector.shape_cast %16 : vector<1x1x256x32xf32> to vector<1x256x32xf32>
    %18 = arith.maximumf %15, %17 : vector<1x256x32xf32>
    %19 = arith.maximumf %13, %18 : vector<1x256x32xf32>
    %20 = arith.truncf %19 : vector<1x256x32xf32> to vector<1x256x32xbf16>
    %cst_6 = arith.constant 0.000000e+00 : bf16
    %21 = vector.broadcast %cst_6 : bf16 to vector<16x32xbf16>
    %c0_7 = arith.constant 0 : index
    %c0_8 = arith.constant 0 : index
    %22 = vector.load %arg7[%c0_7, %c0_8] : memref<304x32xbf16, #tpu.memory_space<vmem>>, vector<16x32xbf16>
    tpu.vector_store %arg7[%c0_7, %c0_8], %21 {strides = array<i32>} : memref<304x32xbf16, #tpu.memory_space<vmem>>, vector<16x32xbf16>,
    %23 = vector.shape_cast %20 : vector<1x256x32xbf16> to vector<256x32xbf16>
    %c16 = arith.constant 16 : index
    %c0_9 = arith.constant 0 : index
    %24 = vector.load %arg7[%c16, %c0_9] : memref<304x32xbf16, #tpu.memory_space<vmem>>, vector<256x32xbf16>
    tpu.vector_store %arg7[%c16, %c0_9], %23 {strides = array<i32>} : memref<304x32xbf16, #tpu.memory_space<vmem>>, vector<256x32xbf16>,
    %c272 = arith.constant 272 : index
    %c0_10 = arith.constant 0 : index
    %25 = vector.load %arg7[%c272, %c0_10] : memref<304x32xbf16, #tpu.memory_space<vmem>>, vector<16x32xbf16>
    tpu.vector_store %arg7[%c272, %c0_10], %21 {strides = array<i32>} : memref<304x32xbf16, #tpu.memory_space<vmem>>, vector<16x32xbf16>,
    %c288 = arith.constant 288 : index
    %c0_11 = arith.constant 0 : index
    %26 = vector.load %arg7[%c288, %c0_11] : memref<304x32xbf16, #tpu.memory_space<vmem>>, vector<16x32xbf16>
    tpu.vector_store %arg7[%c288, %c0_11], %21 {strides = array<i32>} : memref<304x32xbf16, #tpu.memory_space<vmem>>, vector<16x32xbf16>,
    %27 = tpu.iota {dimensions = array<i32: 0>} : vector<272x1xi32>
    %c8_i32 = arith.constant 8 : i32
    %c0_i32 = arith.constant 0 : i32
    %28 = arith.cmpi eq, %c8_i32, %c0_i32 : i32
    %c1_i32 = arith.constant 1 : i32
    %29 = arith.select %28, %c1_i32, %c8_i32 : i32
    %30 = vector.broadcast %29 : i32 to vector<272x1xi32>
    %31 = arith.remsi %27, %30 : vector<272x1xi32>
    %c0_i32_12 = arith.constant 0 : i32
    %32 = vector.broadcast %c0_i32_12 : i32 to vector<272x1xi32>
    %33 = arith.cmpi ne, %31, %32 : vector<272x1xi32>
    %c0_i32_13 = arith.constant 0 : i32
    %34 = vector.broadcast %c0_i32_13 : i32 to vector<272x1xi32>
    %35 = arith.cmpi slt, %31, %34 : vector<272x1xi32>
    %c0_i32_14 = arith.constant 0 : i32
    %36 = arith.cmpi slt, %29, %c0_i32_14 : i32
    %37 = vector.broadcast %36 : i1 to vector<272x1xi1>
    %38 = vector.broadcast %37 : vector<272x1xi1> to vector<272x1xi1>
    %39 = arith.xori %35, %38 : vector<272x1xi1>
    %40 = arith.andi %39, %33 : vector<272x1xi1>
    %41 = vector.broadcast %29 : i32 to vector<272x1xi32>
    %42 = arith.addi %31, %41 : vector<272x1xi32>
    %43 = arith.select %40, %42, %31 : vector<272x1xi1>, vector<272x1xi32>
    %c0_i32_15 = arith.constant 0 : i32
    %44 = vector.broadcast %c0_i32_15 : i32 to vector<272x1xi32>
    %45 = arith.cmpi sgt, %43, %44 : vector<272x1xi32>
    %c7_i32 = arith.constant 7 : i32
    %46 = vector.broadcast %c7_i32 : i32 to vector<272x1xi32>
    %47 = arith.cmpi slt, %43, %46 : vector<272x1xi32>
    %cst_16 = arith.constant 0.000000e+00 : f32
    %48 = vector.broadcast %cst_16 : f32 to vector<272x64xf32>
    %c7 = arith.constant 7 : index
    %c0_17 = arith.constant 0 : index
    %49 = vector.load %arg7[%c7, %c0_17] : memref<304x32xbf16, #tpu.memory_space<vmem>>, vector<272x32xbf16>
    %c0_i32_18 = arith.constant 0 : i32
    %50 = arith.sitofp %c0_i32_18 : i32 to bf16
    %51 = vector.shape_cast %45 : vector<272x1xi1> to vector<272x1xi1>
    %52 = vector.broadcast %51 : vector<272x1xi1> to vector<272x32xi1>
    %53 = vector.broadcast %50 : bf16 to vector<272x32xbf16>
    %54 = arith.select %52, %49, %53 : vector<272x32xi1>, vector<272x32xbf16>
    %c0_19 = arith.constant 0 : index
    %c0_20 = arith.constant 0 : index
    %55 = vector.load %arg4[%c0_19, %c0_20] : memref<288x64xbf16, #tpu.memory_space<vmem>>, vector<32x64xbf16>
    %cst_21 = arith.constant dense<0.000000e+00> : vector<272x64xf32>
    %56 = tpu.matmul %54, %55, %cst_21 {dimension_numbers = #tpu.dot_dimension_numbers<[1], [0], [0], [1], [0, 0, 1, 1], [], []>} : vector<272x32xbf16>, vector<32x64xbf16>, vector<272x64xf32> -> vector<272x64xf32>
    %57 = arith.addf %48, %56 : vector<272x64xf32>
    %c8 = arith.constant 8 : index
    %c0_22 = arith.constant 0 : index
    %58 = vector.load %arg7[%c8, %c0_22] : memref<304x32xbf16, #tpu.memory_space<vmem>>, vector<272x32xbf16>
    %c32 = arith.constant 32 : index
    %c0_23 = arith.constant 0 : index
    %59 = vector.load %arg4[%c32, %c0_23] : memref<288x64xbf16, #tpu.memory_space<vmem>>, vector<32x64xbf16>
    %cst_24 = arith.constant dense<0.000000e+00> : vector<272x64xf32>
    %60 = tpu.matmul %58, %59, %cst_24 {dimension_numbers = #tpu.dot_dimension_numbers<[1], [0], [0], [1], [0, 0, 1, 1], [], []>} : vector<272x32xbf16>, vector<32x64xbf16>, vector<272x64xf32> -> vector<272x64xf32>
    %61 = arith.addf %57, %60 : vector<272x64xf32>
    %c9 = arith.constant 9 : index
    %c0_25 = arith.constant 0 : index
    %62 = vector.load %arg7[%c9, %c0_25] : memref<304x32xbf16, #tpu.memory_space<vmem>>, vector<272x32xbf16>
    %c0_i32_26 = arith.constant 0 : i32
    %63 = arith.sitofp %c0_i32_26 : i32 to bf16
    %64 = vector.shape_cast %47 : vector<272x1xi1> to vector<272x1xi1>
    %65 = vector.broadcast %64 : vector<272x1xi1> to vector<272x32xi1>
    %66 = vector.broadcast %63 : bf16 to vector<272x32xbf16>
    %67 = arith.select %65, %62, %66 : vector<272x32xi1>, vector<272x32xbf16>
    %c64 = arith.constant 64 : index
    %c0_27 = arith.constant 0 : index
    %68 = vector.load %arg4[%c64, %c0_27] : memref<288x64xbf16, #tpu.memory_space<vmem>>, vector<32x64xbf16>
    %cst_28 = arith.constant dense<0.000000e+00> : vector<272x64xf32>
    %69 = tpu.matmul %67, %68, %cst_28 {dimension_numbers = #tpu.dot_dimension_numbers<[1], [0], [0], [1], [0, 0, 1, 1], [], []>} : vector<272x32xbf16>, vector<32x64xbf16>, vector<272x64xf32> -> vector<272x64xf32>
    %70 = arith.addf %61, %69 : vector<272x64xf32>
    %c15 = arith.constant 15 : index
    %c0_29 = arith.constant 0 : index
    %71 = vector.load %arg7[%c15, %c0_29] : memref<304x32xbf16, #tpu.memory_space<vmem>>, vector<272x32xbf16>
    %c0_i32_30 = arith.constant 0 : i32
    %72 = arith.sitofp %c0_i32_30 : i32 to bf16
    %73 = vector.shape_cast %45 : vector<272x1xi1> to vector<272x1xi1>
    %74 = vector.broadcast %73 : vector<272x1xi1> to vector<272x32xi1>
    %75 = vector.broadcast %72 : bf16 to vector<272x32xbf16>
    %76 = arith.select %74, %71, %75 : vector<272x32xi1>, vector<272x32xbf16>
    %c96 = arith.constant 96 : index
    %c0_31 = arith.constant 0 : index
    %77 = vector.load %arg4[%c96, %c0_31] : memref<288x64xbf16, #tpu.memory_space<vmem>>, vector<32x64xbf16>
    %cst_32 = arith.constant dense<0.000000e+00> : vector<272x64xf32>
    %78 = tpu.matmul %76, %77, %cst_32 {dimension_numbers = #tpu.dot_dimension_numbers<[1], [0], [0], [1], [0, 0, 1, 1], [], []>} : vector<272x32xbf16>, vector<32x64xbf16>, vector<272x64xf32> -> vector<272x64xf32>
    %79 = arith.addf %70, %78 : vector<272x64xf32>
    %c16_33 = arith.constant 16 : index
    %c0_34 = arith.constant 0 : index
    %80 = vector.load %arg7[%c16_33, %c0_34] : memref<304x32xbf16, #tpu.memory_space<vmem>>, vector<272x32xbf16>
    %c128 = arith.constant 128 : index
    %c0_35 = arith.constant 0 : index
    %81 = vector.load %arg4[%c128, %c0_35] : memref<288x64xbf16, #tpu.memory_space<vmem>>, vector<32x64xbf16>
    %cst_36 = arith.constant dense<0.000000e+00> : vector<272x64xf32>
    %82 = tpu.matmul %80, %81, %cst_36 {dimension_numbers = #tpu.dot_dimension_numbers<[1], [0], [0], [1], [0, 0, 1, 1], [], []>} : vector<272x32xbf16>, vector<32x64xbf16>, vector<272x64xf32> -> vector<272x64xf32>
    %83 = arith.addf %79, %82 : vector<272x64xf32>
    %c17 = arith.constant 17 : index
    %c0_37 = arith.constant 0 : index
    %84 = vector.load %arg7[%c17, %c0_37] : memref<304x32xbf16, #tpu.memory_space<vmem>>, vector<272x32xbf16>
    %c0_i32_38 = arith.constant 0 : i32
    %85 = arith.sitofp %c0_i32_38 : i32 to bf16
    %86 = vector.shape_cast %47 : vector<272x1xi1> to vector<272x1xi1>
    %87 = vector.broadcast %86 : vector<272x1xi1> to vector<272x32xi1>
    %88 = vector.broadcast %85 : bf16 to vector<272x32xbf16>
    %89 = arith.select %87, %84, %88 : vector<272x32xi1>, vector<272x32xbf16>
    %c160 = arith.constant 160 : index
    %c0_39 = arith.constant 0 : index
    %90 = vector.load %arg4[%c160, %c0_39] : memref<288x64xbf16, #tpu.memory_space<vmem>>, vector<32x64xbf16>
    %cst_40 = arith.constant dense<0.000000e+00> : vector<272x64xf32>
    %91 = tpu.matmul %89, %90, %cst_40 {dimension_numbers = #tpu.dot_dimension_numbers<[1], [0], [0], [1], [0, 0, 1, 1], [], []>} : vector<272x32xbf16>, vector<32x64xbf16>, vector<272x64xf32> -> vector<272x64xf32>
    %92 = arith.addf %83, %91 : vector<272x64xf32>
    %c23 = arith.constant 23 : index
    %c0_41 = arith.constant 0 : index
    %93 = vector.load %arg7[%c23, %c0_41] : memref<304x32xbf16, #tpu.memory_space<vmem>>, vector<272x32xbf16>
    %c0_i32_42 = arith.constant 0 : i32
    %94 = arith.sitofp %c0_i32_42 : i32 to bf16
    %95 = vector.shape_cast %45 : vector<272x1xi1> to vector<272x1xi1>
    %96 = vector.broadcast %95 : vector<272x1xi1> to vector<272x32xi1>
    %97 = vector.broadcast %94 : bf16 to vector<272x32xbf16>
    %98 = arith.select %96, %93, %97 : vector<272x32xi1>, vector<272x32xbf16>
    %c192 = arith.constant 192 : index
    %c0_43 = arith.constant 0 : index
    %99 = vector.load %arg4[%c192, %c0_43] : memref<288x64xbf16, #tpu.memory_space<vmem>>, vector<32x64xbf16>
    %cst_44 = arith.constant dense<0.000000e+00> : vector<272x64xf32>
    %100 = tpu.matmul %98, %99, %cst_44 {dimension_numbers = #tpu.dot_dimension_numbers<[1], [0], [0], [1], [0, 0, 1, 1], [], []>} : vector<272x32xbf16>, vector<32x64xbf16>, vector<272x64xf32> -> vector<272x64xf32>
    %101 = arith.addf %92, %100 : vector<272x64xf32>
    %c24 = arith.constant 24 : index
    %c0_45 = arith.constant 0 : index
    %102 = vector.load %arg7[%c24, %c0_45] : memref<304x32xbf16, #tpu.memory_space<vmem>>, vector<272x32xbf16>
    %c224 = arith.constant 224 : index
    %c0_46 = arith.constant 0 : index
    %103 = vector.load %arg4[%c224, %c0_46] : memref<288x64xbf16, #tpu.memory_space<vmem>>, vector<32x64xbf16>
    %cst_47 = arith.constant dense<0.000000e+00> : vector<272x64xf32>
    %104 = tpu.matmul %102, %103, %cst_47 {dimension_numbers = #tpu.dot_dimension_numbers<[1], [0], [0], [1], [0, 0, 1, 1], [], []>} : vector<272x32xbf16>, vector<32x64xbf16>, vector<272x64xf32> -> vector<272x64xf32>
    %105 = arith.addf %101, %104 : vector<272x64xf32>
    %c25 = arith.constant 25 : index
    %c0_48 = arith.constant 0 : index
    %106 = vector.load %arg7[%c25, %c0_48] : memref<304x32xbf16, #tpu.memory_space<vmem>>, vector<272x32xbf16>
    %c0_i32_49 = arith.constant 0 : i32
    %107 = arith.sitofp %c0_i32_49 : i32 to bf16
    %108 = vector.shape_cast %47 : vector<272x1xi1> to vector<272x1xi1>
    %109 = vector.broadcast %108 : vector<272x1xi1> to vector<272x32xi1>
    %110 = vector.broadcast %107 : bf16 to vector<272x32xbf16>
    %111 = arith.select %109, %106, %110 : vector<272x32xi1>, vector<272x32xbf16>
    %c256 = arith.constant 256 : index
    %c0_50 = arith.constant 0 : index
    %112 = vector.load %arg4[%c256, %c0_50] : memref<288x64xbf16, #tpu.memory_space<vmem>>, vector<32x64xbf16>
    %cst_51 = arith.constant dense<0.000000e+00> : vector<272x64xf32>
    %113 = tpu.matmul %111, %112, %cst_51 {dimension_numbers = #tpu.dot_dimension_numbers<[1], [0], [0], [1], [0, 0, 1, 1], [], []>} : vector<272x32xbf16>, vector<32x64xbf16>, vector<272x64xf32> -> vector<272x64xf32>
    %114 = arith.addf %105, %113 : vector<272x64xf32>
    %c0_52 = arith.constant 0 : index
    %c0_53 = arith.constant 0 : index
    %115 = vector.load %arg5[%c0_52, %c0_53] : memref<1x64xf32, #tpu.memory_space<vmem>>, vector<1x64xf32>
    %116 = vector.broadcast %115 : vector<1x64xf32> to vector<272x64xf32>
    %117 = arith.addf %114, %116 : vector<272x64xf32>
    %cst_54 = arith.constant 0.000000e+00 : f32
    %118 = vector.broadcast %cst_54 : f32 to vector<272x64xf32>
    %119 = arith.maximumf %117, %118 : vector<272x64xf32>
    %120 = vector.shape_cast %119 : vector<272x64xf32> to vector<1x17x16x64xf32>
    %121 = vector.extract_strided_slice %120 {offsets = [0, 0, 0, 0], sizes = [1, 16, 8, 64], strides = [1, 1, 1, 1]} : vector<1x17x16x64xf32> to vector<1x16x8x64xf32>
    %122 = vector.extract_strided_slice %120 {offsets = [0, 0, 8, 0], sizes = [1, 16, 8, 64], strides = [1, 1, 1, 1]} : vector<1x17x16x64xf32> to vector<1x16x8x64xf32>
    %123 = arith.maximumf %121, %122 : vector<1x16x8x64xf32>
    %124 = vector.shape_cast %123 : vector<1x16x8x64xf32> to vector<128x64xf32>
    %c0_55 = arith.constant 0 : index
    %c0_56 = arith.constant 0 : index
    %125 = vector.load %arg8[%c0_55, %c0_56] : memref<128x64xf32, #tpu.memory_space<vmem>>, vector<128x64xf32>
    tpu.vector_store %arg8[%c0_55, %c0_56], %124 {strides = array<i32>} : memref<128x64xf32, #tpu.memory_space<vmem>>, vector<128x64xf32>,
    %c0_57 = arith.constant 0 : index
    %c0_58 = arith.constant 0 : index
    %126 = tpu.strided_load %arg8[%c0_57, %c0_58] {strides = array<i32: 2, 1>} : memref<128x64xf32, #tpu.memory_space<vmem>>, vector<64x64xf32>
    %c1 = arith.constant 1 : index
    %c0_59 = arith.constant 0 : index
    %127 = tpu.strided_load %arg8[%c1, %c0_59] {strides = array<i32: 2, 1>} : memref<128x64xf32, #tpu.memory_space<vmem>>, vector<64x64xf32>
    %128 = arith.maximumf %126, %127 : vector<64x64xf32>
    %129 = vector.shape_cast %128 : vector<64x64xf32> to vector<1x64x64xf32>
    %130 = arith.truncf %129 : vector<1x64x64xf32> to vector<1x64x64xbf16>
    %c0_60 = arith.constant 0 : index
    %c0_61 = arith.constant 0 : index
    %c0_62 = arith.constant 0 : index
    %131 = vector.load %arg6[%c0_60, %c0_61, %c0_62] : memref<1x64x64xbf16, #tpu.memory_space<vmem>>, vector<1x64x64xbf16>
    tpu.vector_store %arg6[%c0_60, %c0_61, %c0_62], %130 {strides = array<i32>} : memref<1x64x64xbf16, #tpu.memory_space<vmem>>, vector<1x64x64xbf16>,
    return
  }
  func.func @transform_0(%arg0: i32) -> (i32, i32) {
    %c0_i32 = arith.constant 0 : i32
    %c0_i32_0 = arith.constant 0 : i32
    return %arg0, %c0_i32 : i32, i32
  }
  func.func @transform_1(%arg0: i32) -> (i32, i32) {
    %c0_i32 = arith.constant 0 : i32
    %c0_i32_0 = arith.constant 0 : i32
    %c0_i32_1 = arith.constant 0 : i32
    return %c0_i32, %c0_i32_0 : i32, i32
  }
  func.func @transform_2(%arg0: i32) -> (i32, i32) {
    %c0_i32 = arith.constant 0 : i32
    %c0_i32_0 = arith.constant 0 : i32
    %c0_i32_1 = arith.constant 0 : i32
    return %c0_i32, %c0_i32_0 : i32, i32
  }
  func.func @transform_3(%arg0: i32) -> (i32, i32) {
    %c0_i32 = arith.constant 0 : i32
    %c0_i32_0 = arith.constant 0 : i32
    %c0_i32_1 = arith.constant 0 : i32
    return %c0_i32, %c0_i32_0 : i32, i32
  }
  func.func @transform_4(%arg0: i32) -> (i32, i32) {
    %c0_i32 = arith.constant 0 : i32
    %c0_i32_0 = arith.constant 0 : i32
    %c0_i32_1 = arith.constant 0 : i32
    return %c0_i32, %c0_i32_0 : i32, i32
  }
  func.func @transform_5(%arg0: i32) -> (i32, i32, i32) {
    %c0_i32 = arith.constant 0 : i32
    %c0_i32_0 = arith.constant 0 : i32
    %c0_i32_1 = arith.constant 0 : i32
    return %arg0, %c0_i32, %c0_i32_0 : i32, i32, i32
  }
}

module attributes {stable_mosaic.version = 11 : i64} {
  func.func @_fc_kernel(%arg0: i32, %arg1: memref<2x4096xbf16, #tpu.memory_space<vmem>>, %arg2: memref<4096x128xbf16, #tpu.memory_space<vmem>>, %arg3: memref<1x128xf32, #tpu.memory_space<vmem>>, %arg4: memref<128x128xbf16, #tpu.memory_space<vmem>>, %arg5: memref<1x128xf32, #tpu.memory_space<vmem>>, %arg6: memref<128x128xbf16, #tpu.memory_space<vmem>>, %arg7: memref<1x128xf32, #tpu.memory_space<vmem>>, %arg8: memref<2x128xf32, #tpu.memory_space<vmem>>) attributes {dimension_semantics = [#tpu.dimension_semantics<parallel>], iteration_bounds = array<i64: 1>, scalar_prefetch = 0 : i64, scratch_operands = 0 : i64, tpu.core_type = #tpu.core_type<tc>, window_params = [{transform_indices = @transform_0, window_bounds = array<i64: 2, 4096>}, {pipeline_mode = #tpu.pipeline_mode<synchronous>, transform_indices = @transform_1, window_bounds = array<i64: 4096, 128>}, {pipeline_mode = #tpu.pipeline_mode<synchronous>, transform_indices = @transform_2, window_bounds = array<i64: 1, 128>}, {pipeline_mode = #tpu.pipeline_mode<synchronous>, transform_indices = @transform_3, window_bounds = array<i64: 128, 128>}, {pipeline_mode = #tpu.pipeline_mode<synchronous>, transform_indices = @transform_4, window_bounds = array<i64: 1, 128>}, {pipeline_mode = #tpu.pipeline_mode<synchronous>, transform_indices = @transform_5, window_bounds = array<i64: 128, 128>}, {pipeline_mode = #tpu.pipeline_mode<synchronous>, transform_indices = @transform_6, window_bounds = array<i64: 1, 128>}, {transform_indices = @transform_7, window_bounds = array<i64: 2, 128>}]} {
    %c0 = arith.constant 0 : index
    %c0_0 = arith.constant 0 : index
    %0 = vector.load %arg1[%c0, %c0_0] : memref<2x4096xbf16, #tpu.memory_space<vmem>>, vector<2x4096xbf16>
    %c0_1 = arith.constant 0 : index
    %c0_2 = arith.constant 0 : index
    %1 = vector.load %arg2[%c0_1, %c0_2] : memref<4096x128xbf16, #tpu.memory_space<vmem>>, vector<4096x128xbf16>
    %cst = arith.constant dense<0.000000e+00> : vector<2x128xf32>
    %2 = tpu.matmul %0, %1, %cst {dimension_numbers = #tpu.dot_dimension_numbers<[1], [0], [0], [1], [0, 0, 1, 1], [], []>} : vector<2x4096xbf16>, vector<4096x128xbf16>, vector<2x128xf32> -> vector<2x128xf32>
    %c0_3 = arith.constant 0 : index
    %c0_4 = arith.constant 0 : index
    %3 = vector.load %arg3[%c0_3, %c0_4] : memref<1x128xf32, #tpu.memory_space<vmem>>, vector<1x128xf32>
    %4 = vector.broadcast %3 : vector<1x128xf32> to vector<2x128xf32>
    %5 = arith.addf %2, %4 : vector<2x128xf32>
    %cst_5 = arith.constant 0.000000e+00 : f32
    %6 = vector.broadcast %cst_5 : f32 to vector<2x128xf32>
    %7 = arith.maximumf %5, %6 : vector<2x128xf32>
    %8 = arith.truncf %7 : vector<2x128xf32> to vector<2x128xbf16>
    %c0_6 = arith.constant 0 : index
    %c0_7 = arith.constant 0 : index
    %9 = vector.load %arg4[%c0_6, %c0_7] : memref<128x128xbf16, #tpu.memory_space<vmem>>, vector<128x128xbf16>
    %cst_8 = arith.constant dense<0.000000e+00> : vector<2x128xf32>
    %10 = tpu.matmul %8, %9, %cst_8 {dimension_numbers = #tpu.dot_dimension_numbers<[1], [0], [0], [1], [0, 0, 1, 1], [], []>} : vector<2x128xbf16>, vector<128x128xbf16>, vector<2x128xf32> -> vector<2x128xf32>
    %c0_9 = arith.constant 0 : index
    %c0_10 = arith.constant 0 : index
    %11 = vector.load %arg5[%c0_9, %c0_10] : memref<1x128xf32, #tpu.memory_space<vmem>>, vector<1x128xf32>
    %12 = vector.broadcast %11 : vector<1x128xf32> to vector<2x128xf32>
    %13 = arith.addf %10, %12 : vector<2x128xf32>
    %cst_11 = arith.constant 0.000000e+00 : f32
    %14 = vector.broadcast %cst_11 : f32 to vector<2x128xf32>
    %15 = arith.maximumf %13, %14 : vector<2x128xf32>
    %16 = arith.truncf %15 : vector<2x128xf32> to vector<2x128xbf16>
    %c0_12 = arith.constant 0 : index
    %c0_13 = arith.constant 0 : index
    %17 = vector.load %arg6[%c0_12, %c0_13] : memref<128x128xbf16, #tpu.memory_space<vmem>>, vector<128x128xbf16>
    %cst_14 = arith.constant dense<0.000000e+00> : vector<2x128xf32>
    %18 = tpu.matmul %16, %17, %cst_14 {dimension_numbers = #tpu.dot_dimension_numbers<[1], [0], [0], [1], [0, 0, 1, 1], [], []>} : vector<2x128xbf16>, vector<128x128xbf16>, vector<2x128xf32> -> vector<2x128xf32>
    %c0_15 = arith.constant 0 : index
    %c0_16 = arith.constant 0 : index
    %19 = vector.load %arg7[%c0_15, %c0_16] : memref<1x128xf32, #tpu.memory_space<vmem>>, vector<1x128xf32>
    %20 = vector.broadcast %19 : vector<1x128xf32> to vector<2x128xf32>
    %21 = arith.addf %18, %20 : vector<2x128xf32>
    %c0_17 = arith.constant 0 : index
    %c0_18 = arith.constant 0 : index
    %22 = vector.load %arg8[%c0_17, %c0_18] : memref<2x128xf32, #tpu.memory_space<vmem>>, vector<2x128xf32>
    tpu.vector_store %arg8[%c0_17, %c0_18], %21 {strides = array<i32>} : memref<2x128xf32, #tpu.memory_space<vmem>>, vector<2x128xf32>,
    return
  }
  func.func @transform_0(%arg0: i32) -> (i32, i32) {
    %c0_i32 = arith.constant 0 : i32
    %c0_i32_0 = arith.constant 0 : i32
    return %arg0, %c0_i32 : i32, i32
  }
  func.func @transform_1(%arg0: i32) -> (i32, i32) {
    %c0_i32 = arith.constant 0 : i32
    %c0_i32_0 = arith.constant 0 : i32
    %c0_i32_1 = arith.constant 0 : i32
    return %c0_i32, %c0_i32_0 : i32, i32
  }
  func.func @transform_2(%arg0: i32) -> (i32, i32) {
    %c0_i32 = arith.constant 0 : i32
    %c0_i32_0 = arith.constant 0 : i32
    %c0_i32_1 = arith.constant 0 : i32
    return %c0_i32, %c0_i32_0 : i32, i32
  }
  func.func @transform_3(%arg0: i32) -> (i32, i32) {
    %c0_i32 = arith.constant 0 : i32
    %c0_i32_0 = arith.constant 0 : i32
    %c0_i32_1 = arith.constant 0 : i32
    return %c0_i32, %c0_i32_0 : i32, i32
  }
  func.func @transform_4(%arg0: i32) -> (i32, i32) {
    %c0_i32 = arith.constant 0 : i32
    %c0_i32_0 = arith.constant 0 : i32
    %c0_i32_1 = arith.constant 0 : i32
    return %c0_i32, %c0_i32_0 : i32, i32
  }
  func.func @transform_5(%arg0: i32) -> (i32, i32) {
    %c0_i32 = arith.constant 0 : i32
    %c0_i32_0 = arith.constant 0 : i32
    %c0_i32_1 = arith.constant 0 : i32
    return %c0_i32, %c0_i32_0 : i32, i32
  }
  func.func @transform_6(%arg0: i32) -> (i32, i32) {
    %c0_i32 = arith.constant 0 : i32
    %c0_i32_0 = arith.constant 0 : i32
    %c0_i32_1 = arith.constant 0 : i32
    return %c0_i32, %c0_i32_0 : i32, i32
  }
  func.func @transform_7(%arg0: i32) -> (i32, i32) {
    %c0_i32 = arith.constant 0 : i32
    %c0_i32_0 = arith.constant 0 : i32
    return %arg0, %c0_i32 : i32, i32
  }
}

</mosaic_0001>

<bundles_post_ra>
// kernel: simple_cnn_v2_forward.3
= control target key start
LH: loop header
LB: loop body
LE: loop exit
PB: predicated region body
PF: predicated region fallthrough
CT: control target
= control target key end

     0   :  { %v559_v28 = vlaneseq  ;;  %v4189_v36 = vmov 1966171168   ;;  %s5146_s0 = inlined_call_operand.vmem [shape: bf16[2,4096], index: 0, kind: input, shape index: {}]   ;;  %s5147_s1 = inlined_call_operand.vmem [shape: bf16[4096,128], index: 1, kind: input, shape index: {}]   ;;  %s5148_s2 = inlined_call_operand.vmem [shape: f32[1,128], index: 2, kind: input, shape index: {}]   ;;  %s5149_s3 = inlined_call_operand.vmem [shape: bf16[128,128], index: 3, kind: input, shape index: {}]   ;;  %s5150_s4 = inlined_call_operand.vmem [shape: f32[1,128], index: 4, kind: input, shape index: {}]   ;;  %s5151_s5 = inlined_call_operand.vmem [shape: bf16[128,128], index: 5, kind: input, shape index: {}]   ;;  %s5152_s6 = inlined_call_operand.vmem [shape: f32[1,128], index: 6, kind: input, shape index: {}]   ;;  %s5153_s7 = inlined_call_operand.hbm [shape: f32[2,128], index: 7, kind: output, shape index: {}]  }
   0x1   :  { %v3889_v0 = vld [vmem:[%s5147_s1 + $0x40] sm:$0xff]   ;;  %v3893_v4 = vld [vmem:[%s5147_s1 + $0x48] sm:$0xff]   ;;  %v3897_v8 = vld [vmem:[%s5147_s1 + $0x50] sm:$0xff]   ;;  %v557_v37 = vunpack.c.l.s4 %v4189_v36 }
   0x2   :  { %v3890_v1 = vld [vmem:[%s5147_s1 + $0xc0] sm:$0xff]   ;;  %3475 = vmatprep.subr.bf16.mxu0 %v3889_v0  ;;  %v3894_v5 = vld [vmem:[%s5147_s1 + $0xc8] sm:$0xff]   ;;  %v3898_v9 = vld [vmem:[%s5147_s1 + $0xd0] sm:$0xff]   ;;  %v560_v33 = vshrl.u32 %v559_v28, 7 }
   0x3   :  { %v3891_v2 = vld [vmem:[%s5147_s1] sm:$0xff]   ;;  %3497 = vmatprep.subr.bf16.mxu1 %v3890_v1  ;;  %v3895_v6 = vld [vmem:[%s5147_s1 + $0x8] sm:$0xff]   ;;  %v3899_v10 = vld [vmem:[%s5147_s1 + $0x10] sm:$0xff]   ;;  %v558_v40 = vunpack.c.0.s8 %v557_v37 }
   0x4   :  { %v3892_v3 = vld [vmem:[%s5147_s1 + $0x80] sm:$0xff]   ;;  %3476 = vmatpush3.bf16.msra.mxu0 %v3891_v2  ;;  %v3896_v7 = vld [vmem:[%s5147_s1 + $0x88] sm:$0xff]   ;;  %v3900_v11 = vld [vmem:[%s5147_s1 + $0x90] sm:$0xff]  }
   0x5   :  { %3498 = vmatpush3.bf16.msra.mxu1 %v3892_v3  ;;  %3477 = vmatprep.subr.bf16.mxu0 %v3893_v4  ;;  %v3901_v12 = vld [vmem:[%s5147_s1 + $0x58] sm:$0xff]   ;;  %v3905_v16 = vld [vmem:[%s5147_s1 + $0x60] sm:$0xff]   ;;  %v3909_v20 = vld [vmem:[%s5147_s1 + $0x68] sm:$0xff]   ;;  %v4338_v41 = vsub.s32 %v558_v40, %v560_v33 }
   0x6   :  { %3499 = vmatprep.subr.bf16.mxu1 %v3894_v5  ;;  %v3902_v13 = vld [vmem:[%s5147_s1 + $0xd8] sm:$0xff]   ;;  %v3906_v17 = vld [vmem:[%s5147_s1 + $0xe0] sm:$0xff]   ;;  %v3910_v21 = vld [vmem:[%s5147_s1 + $0xe8] sm:$0xff]  }
   0x7   :  { %v3903_v14 = vld [vmem:[%s5147_s1 + $0x18] sm:$0xff]   ;;  %v3907_v18 = vld [vmem:[%s5147_s1 + $0x20] sm:$0xff]   ;;  %v3911_v22 = vld [vmem:[%s5147_s1 + $0x28] sm:$0xff]  }
   0x8   :  { %3478 = vmatpush3.bf16.msra.mxu0 %v3895_v6  ;;  %v3904_v15 = vld [vmem:[%s5147_s1 + $0x98] sm:$0xff]   ;;  %v3908_v19 = vld [vmem:[%s5147_s1 + $0xa0] sm:$0xff]   ;;  %v3912_v23 = vld [vmem:[%s5147_s1 + $0xa8] sm:$0xff]  }
   0x9   :  { %3500 = vmatpush3.bf16.msra.mxu1 %v3896_v7  ;;  %3479 = vmatprep.subr.bf16.mxu0 %v3897_v8  ;;  %v3913_v24 = vld [vmem:[%s5147_s1 + $0x70] sm:$0xff]   ;;  %v3917_v29 = vld [vmem:[%s5147_s1 + $0x78] sm:$0xff]   ;;  %v28_v34 = vld [vmem:[%s5146_s0] sm:$0xff] }
   0xa   :  { %3501 = vmatprep.subr.bf16.mxu1 %v3898_v9  ;;  %v3914_v25 = vld [vmem:[%s5147_s1 + $0xf0] sm:$0xff]   ;;  %v3918_v30 = vld [vmem:[%s5147_s1 + $0xf8] sm:$0xff]   ;;  %v3922_v35 = vld [vmem:[%s5147_s1 + $0x140] sm:$0xff]   ;;  %v555_v39 = vcombine.high %v28_v34, %v28_v34  ;;  %v562_v42 = vrot.slane %v28_v34, %v4338_v41 }
   0xb   :  { %v3915_v26 = vld [vmem:[%s5147_s1 + $0x30] sm:$0xff]   ;;  %v3919_v31 = vld [vmem:[%s5147_s1 + $0x38] sm:$0xff]   ;;  %v3923_v38 = vld [vmem:[%s5147_s1 + $0x1c0] sm:$0xff]  }
   0xc   :  { %3480 = vmatpush3.bf16.msra.mxu0 %v3899_v10  ;;  %v3916_v27 = vld [vmem:[%s5147_s1 + $0xb0] sm:$0xff]   ;;  %v3920_v32 = vld [vmem:[%s5147_s1 + $0xb8] sm:$0xff]   ;;  %v4342_v43 = vrot.slane %v555_v39, %v4338_v41  ;;  %v570_v44 = vcombine.high %v562_v42, %v562_v42  ;;  %v578_v45 = vrot.slane %v562_v42, %v4338_v41  ;;  %v3924_v47 = vld [vmem:[%s5147_s1 + $0x100] sm:$0xff]  }
   0xd   :  { %3502 = vmatpush3.bf16.msra.mxu1 %v3900_v11  ;;  %3481 = vmatprep.subr.bf16.mxu0 %v3901_v12  ;;  %v3925_v49 = vld [vmem:[%s5147_s1 + $0x180] sm:$0xff]   ;;  %v3926_v52 = vld [vmem:[%s5147_s1 + $0x148] sm:$0xff]   ;;  %v3930_v58 = vld [vmem:[%s5147_s1 + $0x150] sm:$0xff]  }
   0xe   :  { %3503 = vmatprep.subr.bf16.mxu1 %v3902_v13  ;;  %v571_v46 = vcombine.high %v4342_v43, %v4342_v43  ;;  %v592_v48 = vrot.slane %v570_v44, %v4338_v41  ;;  %v600_v51 = vcombine.high %v578_v45, %v578_v45  ;;  %v3927_v54 = vld [vmem:[%s5147_s1 + $0x1c8] sm:$0xff]   ;;  %v3931_v59 = vld [vmem:[%s5147_s1 + $0x1d0] sm:$0xff]   ;;  %v3934_v62 = vld [vmem:[%s5147_s1 + $0x158] sm:$0xff]  }
   0xf   :  { %v3928_v55 = vld [vmem:[%s5147_s1 + $0x108] sm:$0xff]   ;;  %v3932_v60 = vld [vmem:[%s5147_s1 + $0x110] sm:$0xff]   ;;  %v3935_v63 = vld [vmem:[%s5147_s1 + $0x1d8] sm:$0xff]  }
  0x10   :  { %3482 = vmatpush3.bf16.msra.mxu0 %v3903_v14  ;;  %v599_v50 = vrot.slane %v571_v46, %v4338_v41  ;;  %2351 = vmatprep.mubr.bf16.mxu0 %v592_v48  ;;  %v602_v53 = vcombine.high %v592_v48, %v592_v48  ;;  %v3929_v57 = vld [vmem:[%s5147_s1 + $0x188] sm:$0xff]   ;;  %v3933_v61 = vld [vmem:[%s5147_s1 + $0x190] sm:$0xff]   ;;  %v3936_v0 = vld [vmem:[%s5147_s1 + $0x118] sm:$0xff]  }
  0x11   :  { %3504 = vmatpush3.bf16.msra.mxu1 %v3904_v15  ;;  %3483 = vmatprep.subr.bf16.mxu0 %v3905_v16  ;;  %v3937_v1 = vld [vmem:[%s5147_s1 + $0x198] sm:$0xff]   ;;  %v3938_v2 = vld [vmem:[%s5147_s1 + $0x160] sm:$0xff]   ;;  %v3942_v6 = vld [vmem:[%s5147_s1 + $0x168] sm:$0xff]  }
  0x12   :  { %3505 = vmatprep.subr.bf16.mxu1 %v3906_v17  ;;  %v603_v56 = vcombine.high %v599_v50, %v599_v50  ;;  %2391 = vmatprep.mubr.bf16.mxu1 %v602_v53  ;;  %v3939_v3 = vld [vmem:[%s5147_s1 + $0x1e0] sm:$0xff]   ;;  %v3943_v7 = vld [vmem:[%s5147_s1 + $0x1e8] sm:$0xff]   ;;  %v3946_v10 = vld [vmem:[%s5147_s1 + $0x170] sm:$0xff]  }
  0x13   :  { %v3940_v4 = vld [vmem:[%s5147_s1 + $0x120] sm:$0xff]   ;;  %v3944_v8 = vld [vmem:[%s5147_s1 + $0x128] sm:$0xff]   ;;  %v3947_v11 = vld [vmem:[%s5147_s1 + $0x1f0] sm:$0xff]  }
  0x14   :  { %3484 = vmatpush3.bf16.msra.mxu0 %v3907_v18  ;;  %v3941_v5 = vld [vmem:[%s5147_s1 + $0x1a0] sm:$0xff]   ;;  %v3945_v9 = vld [vmem:[%s5147_s1 + $0x1a8] sm:$0xff]   ;;  %v3948_v12 = vld [vmem:[%s5147_s1 + $0x130] sm:$0xff]   ;;  %v585_v18 = vrot.slane %v4342_v43, %v4338_v41 }
  0x15   :  { %3506 = vmatpush3.bf16.msra.mxu1 %v3908_v19  ;;  %3485 = vmatprep.subr.bf16.mxu0 %v3909_v20  ;;  %v3949_v13 = vld [vmem:[%s5147_s1 + $0x1b0] sm:$0xff]   ;;  %v3950_v14 = vld [vmem:[%s5147_s1 + $0x178] sm:$0xff]   ;;  %v3954_v19 = vld [vmem:[%s5147_s1 + $0x240] sm:$0xff]  }
  0x16   :  { %3507 = vmatprep.subr.bf16.mxu1 %v3910_v21  ;;  %v3951_v15 = vld [vmem:[%s5147_s1 + $0x1f8] sm:$0xff]   ;;  %v3955_v20 = vld [vmem:[%s5147_s1 + $0x2c0] sm:$0xff]   ;;  %v3962_v28 = vld [vmem:[%s5147_s1 + $0x250] sm:$0xff]  }
  0x17   :  { %v3952_v16 = vld [vmem:[%s5147_s1 + $0x138] sm:$0xff]   ;;  %v3956_v21 = vld [vmem:[%s5147_s1 + $0x200] sm:$0xff]   ;;  %v3974_v40 = vld [vmem:[%s5147_s1 + $0x268] sm:$0xff]  }
  0x18   :  { %3486 = vmatpush3.bf16.msra.mxu0 %v3911_v22  ;;  %v3953_v17 = vld [vmem:[%s5147_s1 + $0x1b8] sm:$0xff]   ;;  %v3957_v22 = vld [vmem:[%s5147_s1 + $0x280] sm:$0xff]   ;;  %v3975_v42 = vld [vmem:[%s5147_s1 + $0x2e8] sm:$0xff]  }
  0x19   :  { %3508 = vmatpush3.bf16.msra.mxu1 %v3912_v23  ;;  %3487 = vmatprep.subr.bf16.mxu0 %v3913_v24  ;;  %v601_v23 = vcombine.high %v585_v18, %v585_v18  ;;  %v3958_v24 = vld [vmem:[%s5147_s1 + $0x248] sm:$0xff]   ;;  %v3967_v33 = vld [vmem:[%s5147_s1 + $0x2d8] sm:$0xff]   ;;  %v3970_v36 = vld [vmem:[%s5147_s1 + $0x260] sm:$0xff]  }
  0x1a   :  { %3509 = vmatprep.subr.bf16.mxu1 %v3914_v25  ;;  %v3959_v25 = vld [vmem:[%s5147_s1 + $0x2c8] sm:$0xff]   ;;  %v3968_v34 = vld [vmem:[%s5147_s1 + $0x218] sm:$0xff]   ;;  %v3971_v37 = vld [vmem:[%s5147_s1 + $0x2e0] sm:$0xff]  }
  0x1b   :  { %v3973_v39 = vld [vmem:[%s5147_s1 + $0x2a0] sm:$0xff]   ;;  %v3976_v43 = vld [vmem:[%s5147_s1 + $0x228] sm:$0xff]  }
  0x1c   :  { %3488 = vmatpush3.bf16.msra.mxu0 %v3915_v26  ;;  %v3960_v26 = vld [vmem:[%s5147_s1 + $0x208] sm:$0xff]  }
  0x1d   :  { %3510 = vmatpush3.bf16.msra.mxu1 %v3916_v27  ;;  %3489 = vmatprep.subr.bf16.mxu0 %v3917_v29  ;;  %v3961_v27 = vld [vmem:[%s5147_s1 + $0x288] sm:$0xff]   ;;  %v3963_v29 = vld [vmem:[%s5147_s1 + $0x2d0] sm:$0xff]  }
  0x1e   :  { %3511 = vmatprep.subr.bf16.mxu1 %v3918_v30  ;;  %v3964_v30 = vld [vmem:[%s5147_s1 + $0x210] sm:$0xff]   ;;  %v3977_v44 = vld [vmem:[%s5147_s1 + $0x2a8] sm:$0xff]  }
  0x1f   :  { %v29_v46 = vld [vmem:[%s5146_s0 + $0x8] sm:$0xff] }
  0x20   :  { %3490 = vmatpush3.bf16.msra.mxu0 %v3919_v31  ;;  %v3965_v31 = vld [vmem:[%s5147_s1 + $0x290] sm:$0xff]   ;;  %v611_v48 = vrot.slane %v29_v46, %v4338_v41 }
  0x21   :  { %3512 = vmatpush3.bf16.msra.mxu1 %v3920_v32  ;;  %3519 = vmatprep.subr.bf16.mxu0 %v3922_v35  ;;  %v3966_v32 = vld [vmem:[%s5147_s1 + $0x258] sm:$0xff]  }
  0x22   :  { %3541 = vmatprep.subr.bf16.mxu1 %v3923_v38  ;;  %v3969_v35 = vld [vmem:[%s5147_s1 + $0x298] sm:$0xff]   ;;  %v3972_v38 = vld [vmem:[%s5147_s1 + $0x220] sm:$0xff]  }
  0x23   :  { %2352 = vmatmul.mubr.bf16.vlgmr.msra.gmra.mrb[0].mxu0 %v578_v45  ;;  %v3978_v45 = vld [vmem:[%s5147_s1 + $0x270] sm:$0xff]  }
  0x24   :  { %3520 = vmatpush3.bf16.msra.mxu0 %v3924_v47  ;;  %2392 = vmatmul.mubr.bf16.vlgmr.msra.gmra.mrb[0].mxu1 %v600_v51  ;;  %v3979_v47 = vld [vmem:[%s5147_s1 + $0x2f0] sm:$0xff]  }
  0x25   :  { %3521 = vmatprep.subr.bf16.mxu0 %v3926_v52  ;;  %3542 = vmatpush3.bf16.msra.mxu1 %v3925_v49  ;;  %v604_v49 = vcombine.high %v29_v46, %v29_v46  ;;  %v3981_v51 = vld [vmem:[%s5147_s1 + $0x2b0] sm:$0xff]   ;;  %v619_v52 = vcombine.high %v611_v48, %v611_v48 }
  0x26   :  { %2431 = vmatprep.mubr.bf16.mxu0 %v599_v50  ;;  %3543 = vmatprep.subr.bf16.mxu1 %v3927_v54  ;;  %v3980_v50 = vld [vmem:[%s5147_s1 + $0x230] sm:$0xff]   ;;  %v3982_v54 = vld [vmem:[%s5147_s1 + $0x278] sm:$0xff]  }
  0x27   :  { %2471 = vmatprep.mubr.bf16.mxu1 %v603_v56  ;;  %v4530_v53 = vrot.slane %v604_v49, %v4338_v41  ;;  %v641_v56 = vrot.slane %v619_v52, %v4338_v41  ;;  %v4029_v46 = vld [vmem:[%s5147_s1 + $0x410] sm:$0xff]   ;;  %v4032_v49 = vld [vmem:[%s5147_s1 + $0x4d8] sm:$0xff]   ;;  %v4035_v52 = vld [vmem:[%s5147_s1 + $0x460] sm:$0xff]  }
  0x28   :  { %3522 = vmatpush3.bf16.msra.mxu0 %v3928_v55  ;;  %v3983_v55 = vld [vmem:[%s5147_s1 + $0x2f8] sm:$0xff]  }
  0x29   :  { %3523 = vmatprep.subr.bf16.mxu0 %v3930_v58  ;;  %3544 = vmatpush3.bf16.msra.mxu1 %v3929_v57  ;;  %v620_v57 = vcombine.high %v4530_v53, %v4530_v53  ;;  %v3984_v58 = vld [vmem:[%s5147_s1 + $0x238] sm:$0xff]  }
  0x2a   :  { %3545 = vmatprep.subr.bf16.mxu1 %v3931_v59  ;;  %v3985_v59 = vld [vmem:[%s5147_s1 + $0x2b8] sm:$0xff]  }
  0x2c   :  { %3524 = vmatpush3.bf16.msra.mxu0 %v3932_v60  ;;  %v651_v60 = vcombine.high %v641_v56, %v641_v56 }
  0x2d   :  { %3525 = vmatprep.subr.bf16.mxu0 %v3934_v62  ;;  %3546 = vmatpush3.bf16.msra.mxu1 %v3933_v61  ;;  %v627_v61 = vrot.slane %v611_v48, %v4338_v41  ;;  %v3986_v62 = vld [vmem:[%s5147_s1 + $0x340] sm:$0xff]   ;;  %v4031_v48 = vld [vmem:[%s5147_s1 + $0x458] sm:$0xff]  }
  0x2e   :  { %3547 = vmatprep.subr.bf16.mxu1 %v3935_v63  ;;  %v3987_v63 = vld [vmem:[%s5147_s1 + $0x3c0] sm:$0xff]  }
  0x30   :  { %3526 = vmatpush3.bf16.msra.mxu0 %v3936_v0  ;;  %v648_v0 = vrot.slane %v620_v57, %v4338_v41  ;;  %v4040_v57 = vld [vmem:[%s5147_s1 + $0x4e8] sm:$0xff]  }
  0x31   :  { %3527 = vmatprep.subr.bf16.mxu0 %v3938_v2  ;;  %3548 = vmatpush3.bf16.msra.mxu1 %v3937_v1  ;;  %v3988_v1 = vld [vmem:[%s5147_s1 + $0x300] sm:$0xff]  }
  0x32   :  { %3549 = vmatprep.subr.bf16.mxu1 %v3939_v3  ;;  %v3989_v2 = vld [vmem:[%s5147_s1 + $0x380] sm:$0xff]   ;;  %v649_v3 = vcombine.high %v627_v61, %v627_v61 }
  0x34   :  { %3528 = vmatpush3.bf16.msra.mxu0 %v3940_v4  ;;  %v3990_v4 = vld [vmem:[%s5147_s1 + $0x348] sm:$0xff]  }
  0x35   :  { %3529 = vmatprep.subr.bf16.mxu0 %v3942_v6  ;;  %3550 = vmatpush3.bf16.msra.mxu1 %v3941_v5  ;;  %v3991_v5 = vld [vmem:[%s5147_s1 + $0x3c8] sm:$0xff]   ;;  %v652_v6 = vcombine.high %v648_v0, %v648_v0 }
  0x36   :  { %3551 = vmatprep.subr.bf16.mxu1 %v3943_v7  ;;  %v3992_v7 = vld [vmem:[%s5147_s1 + $0x308] sm:$0xff]  }
  0x38   :  { %3530 = vmatpush3.bf16.msra.mxu0 %v3944_v8  ;;  %v3993_v8 = vld [vmem:[%s5147_s1 + $0x388] sm:$0xff]  }
  0x39   :  { %3531 = vmatprep.subr.bf16.mxu0 %v3946_v10  ;;  %3552 = vmatpush3.bf16.msra.mxu1 %v3945_v9  ;;  %v3994_v9 = vld [vmem:[%s5147_s1 + $0x350] sm:$0xff]  }
  0x3a   :  { %3553 = vmatprep.subr.bf16.mxu1 %v3947_v11  ;;  %v3995_v10 = vld [vmem:[%s5147_s1 + $0x3d0] sm:$0xff]  }
  0x3b   :  { %v3996_v11 = vld [vmem:[%s5147_s1 + $0x310] sm:$0xff]  }
  0x3c   :  { %3532 = vmatpush3.bf16.msra.mxu0 %v3948_v12  ;;  %v3997_v12 = vld [vmem:[%s5147_s1 + $0x390] sm:$0xff]  }
  0x3d   :  { %3533 = vmatprep.subr.bf16.mxu0 %v3950_v14  ;;  %3554 = vmatpush3.bf16.msra.mxu1 %v3949_v13  ;;  %v3998_v13 = vld [vmem:[%s5147_s1 + $0x358] sm:$0xff]  }
  0x3e   :  { %3555 = vmatprep.subr.bf16.mxu1 %v3951_v15  ;;  %v3999_v14 = vld [vmem:[%s5147_s1 + $0x3d8] sm:$0xff]  }
  0x3f   :  { %v4000_v15 = vld [vmem:[%s5147_s1 + $0x318] sm:$0xff]  }
  0x40   :  { %3534 = vmatpush3.bf16.msra.mxu0 %v3952_v16  ;;  %v4001_v16 = vld [vmem:[%s5147_s1 + $0x398] sm:$0xff]  }
  0x41   :  { %3563 = vmatprep.subr.bf16.mxu0 %v3954_v19  ;;  %3556 = vmatpush3.bf16.msra.mxu1 %v3953_v17  ;;  %v4002_v17 = vld [vmem:[%s5147_s1 + $0x360] sm:$0xff]  }
  0x42   :  { %3585 = vmatprep.subr.bf16.mxu1 %v3955_v20  ;;  %v4004_v19 = vld [vmem:[%s5147_s1 + $0x320] sm:$0xff]  }
  0x43   :  { %2432 = vmatmul.mubr.bf16.vlgmr.msra.gmra.mrb[4].mxu0 %v585_v18  ;;  %v4003_v18 = vld [vmem:[%s5147_s1 + $0x3e0] sm:$0xff]  }
  0x44   :  { %3564 = vmatpush3.bf16.msra.mxu0 %v3956_v21  ;;  %2472 = vmatmul.mubr.bf16.vlgmr.msra.gmra.mrb[4].mxu1 %v601_v23  ;;  %v4005_v20 = vld [vmem:[%s5147_s1 + $0x3a0] sm:$0xff]   ;;  %v4006_v21 = vld [vmem:[%s5147_s1 + $0x368] sm:$0xff]  }
  0x45   :  { %3565 = vmatprep.subr.bf16.mxu0 %v3958_v24  ;;  %3586 = vmatpush3.bf16.msra.mxu1 %v3957_v22  ;;  %v4007_v22 = vld [vmem:[%s5147_s1 + $0x3e8] sm:$0xff]  }
  0x46   :  { %3587 = vmatprep.subr.bf16.mxu1 %v3959_v25  ;;  %2511 = vmatprep.mubr.bf16.mxu0 %v641_v56  ;;  %v4008_v23 = vld [vmem:[%s5147_s1 + $0x328] sm:$0xff]   ;;  %v4010_v25 = vld [vmem:[%s5147_s1 + $0x370] sm:$0xff]  }
  0x47   :  { %2551 = vmatprep.mubr.bf16.mxu1 %v651_v60  ;;  %v4009_v24 = vld [vmem:[%s5147_s1 + $0x3a8] sm:$0xff]   ;;  %v4043_v60 = vld [vmem:[%s5147_s1 + $0x470] sm:$0xff]  }
  0x48   :  { %3566 = vmatpush3.bf16.msra.mxu0 %v3960_v26  ;;  %v4011_v26 = vld [vmem:[%s5147_s1 + $0x3f0] sm:$0xff]   ;;  %v4039_v56 = vld [vmem:[%s5147_s1 + $0x468] sm:$0xff]  }
  0x49   :  { %3567 = vmatprep.subr.bf16.mxu0 %v3962_v28  ;;  %3588 = vmatpush3.bf16.msra.mxu1 %v3961_v27  ;;  %v4012_v27 = vld [vmem:[%s5147_s1 + $0x330] sm:$0xff]  }
  0x4a   :  { %3589 = vmatprep.subr.bf16.mxu1 %v3963_v29  ;;  %v4013_v28 = vld [vmem:[%s5147_s1 + $0x3b0] sm:$0xff]   ;;  %v4014_v29 = vld [vmem:[%s5147_s1 + $0x378] sm:$0xff]  }
  0x4c   :  { %3568 = vmatpush3.bf16.msra.mxu0 %v3964_v30  ;;  %v4015_v30 = vld [vmem:[%s5147_s1 + $0x3f8] sm:$0xff]  }
  0x4d   :  { %3569 = vmatprep.subr.bf16.mxu0 %v3966_v32  ;;  %3590 = vmatpush3.bf16.msra.mxu1 %v3965_v31  ;;  %v4016_v31 = vld [vmem:[%s5147_s1 + $0x338] sm:$0xff]  }
  0x4e   :  { %3591 = vmatprep.subr.bf16.mxu1 %v3967_v33  ;;  %v4017_v32 = vld [vmem:[%s5147_s1 + $0x3b8] sm:$0xff]   ;;  %v634_v33 = vrot.slane %v4530_v53, %v4338_v41  ;;  %v4036_v53 = vld [vmem:[%s5147_s1 + $0x4e0] sm:$0xff]  }
  0x50   :  { %3570 = vmatpush3.bf16.msra.mxu0 %v3968_v34  ;;  %v4019_v34 = vld [vmem:[%s5147_s1 + $0x440] sm:$0xff]  }
  0x51   :  { %3571 = vmatprep.subr.bf16.mxu0 %v3970_v36  ;;  %3592 = vmatpush3.bf16.msra.mxu1 %v3969_v35  ;;  %v4020_v35 = vld [vmem:[%s5147_s1 + $0x4c0] sm:$0xff]  }
  0x52   :  { %3593 = vmatprep.subr.bf16.mxu1 %v3971_v37  ;;  %v4021_v36 = vld [vmem:[%s5147_s1 + $0x400] sm:$0xff]  }
  0x53   :  { %v4022_v37 = vld [vmem:[%s5147_s1 + $0x480] sm:$0xff]  }
  0x54   :  { %3572 = vmatpush3.bf16.msra.mxu0 %v3972_v38  ;;  %v650_v38 = vcombine.high %v634_v33, %v634_v33 }
  0x55   :  { %3573 = vmatprep.subr.bf16.mxu0 %v3974_v40  ;;  %3594 = vmatpush3.bf16.msra.mxu1 %v3973_v39  ;;  %v4023_v39 = vld [vmem:[%s5147_s1 + $0x448] sm:$0xff]  }
  0x56   :  { %3595 = vmatprep.subr.bf16.mxu1 %v3975_v42  ;;  %v4024_v40 = vld [vmem:[%s5147_s1 + $0x4c8] sm:$0xff]  }
  0x57   :  { %v4025_v42 = vld [vmem:[%s5147_s1 + $0x408] sm:$0xff]  }
  0x58   :  { %3574 = vmatpush3.bf16.msra.mxu0 %v3976_v43  ;;  %v4026_v43 = vld [vmem:[%s5147_s1 + $0x488] sm:$0xff]  }
  0x59   :  { %3575 = vmatprep.subr.bf16.mxu0 %v3978_v45  ;;  %3596 = vmatpush3.bf16.msra.mxu1 %v3977_v44  ;;  %v4027_v44 = vld [vmem:[%s5147_s1 + $0x450] sm:$0xff]  }
  0x5a   :  { %3597 = vmatprep.subr.bf16.mxu1 %v3979_v47  ;;  %v4028_v45 = vld [vmem:[%s5147_s1 + $0x4d0] sm:$0xff]  }
  0x5b   :  { %v4030_v47 = vld [vmem:[%s5147_s1 + $0x490] sm:$0xff]  }
  0x5c   :  { %3576 = vmatpush3.bf16.msra.mxu0 %v3980_v50  ;;  %v4033_v50 = vld [vmem:[%s5147_s1 + $0x418] sm:$0xff]  }
  0x5d   :  { %3577 = vmatprep.subr.bf16.mxu0 %v3982_v54  ;;  %3598 = vmatpush3.bf16.msra.mxu1 %v3981_v51  ;;  %v4034_v51 = vld [vmem:[%s5147_s1 + $0x498] sm:$0xff]   ;;  %v4037_v54 = vld [vmem:[%s5147_s1 + $0x420] sm:$0xff]  }
  0x5e   :  { %3599 = vmatprep.subr.bf16.mxu1 %v3983_v55  ;;  %v4038_v55 = vld [vmem:[%s5147_s1 + $0x4a0] sm:$0xff]  }
  0x60   :  { %3578 = vmatpush3.bf16.msra.mxu0 %v3984_v58  ;;  %v4041_v58 = vld [vmem:[%s5147_s1 + $0x428] sm:$0xff]  }
  0x61   :  { %3607 = vmatprep.subr.bf16.mxu0 %v3986_v62  ;;  %3600 = vmatpush3.bf16.msra.mxu1 %v3985_v59  ;;  %v4042_v59 = vld [vmem:[%s5147_s1 + $0x4a8] sm:$0xff]   ;;  %v4044_v62 = vld [vmem:[%s5147_s1 + $0x4f0] sm:$0xff]  }
  0x62   :  { %3629 = vmatprep.subr.bf16.mxu1 %v3987_v63 }
  0x63   :  { %2512 = vmatmul.mubr.bf16.vlgmr.msra.gmra.mrb[8].mxu0 %v627_v61  ;;  %v30_v61 = vld [vmem:[%s5146_s0 + $0x10] sm:$0xff] }
  0x64   :  { %3608 = vmatpush3.bf16.msra.mxu0 %v3988_v1  ;;  %2591 = vmatprep.mubr.bf16.mxu0 %v648_v0  ;;  %v660_v63 = vrot.slane %v30_v61, %v4338_v41  ;;  %v653_v0 = vcombine.high %v30_v61, %v30_v61  ;;  %v4045_v1 = vld [vmem:[%s5147_s1 + $0x430] sm:$0xff]  }
  0x65   :  { %2552 = vmatmul.mubr.bf16.vlgmr.msra.gmra.mrb[8].mxu1 %v649_v3  ;;  %3609 = vmatprep.subr.bf16.mxu0 %v3990_v4  ;;  %v4094_v61 = vld [vmem:[%s5147_s1 + $0x610] sm:$0xff]  }
  0x66   :  { %3630 = vmatpush3.bf16.msra.mxu1 %v3989_v2  ;;  %2631 = vmatprep.mubr.bf16.mxu1 %v652_v6  ;;  %v4046_v2 = vld [vmem:[%s5147_s1 + $0x4b0] sm:$0xff]   ;;  %v668_v3 = vcombine.high %v660_v63, %v660_v63  ;;  %v4736_v4 = vrot.slane %v653_v0, %v4338_v41  ;;  %v4048_v6 = vld [vmem:[%s5147_s1 + $0x4f8] sm:$0xff]  }
  0x67   :  { %3631 = vmatprep.subr.bf16.mxu1 %v3991_v5  ;;  %v4047_v5 = vld [vmem:[%s5147_s1 + $0x478] sm:$0xff]  }
  0x68   :  { %3610 = vmatpush3.bf16.msra.mxu0 %v3992_v7  ;;  %v690_v7 = vrot.slane %v668_v3, %v4338_v41  ;;  %v4097_v0 = vld [vmem:[%s5147_s1 + $0x6d8] sm:$0xff]   ;;  %v4100_v3 = vld [vmem:[%s5147_s1 + $0x660] sm:$0xff]  }
  0x69   :  { %3611 = vmatprep.subr.bf16.mxu0 %v3994_v9  ;;  %v4049_v9 = vld [vmem:[%s5147_s1 + $0x438] sm:$0xff]  }
  0x6a   :  { %3632 = vmatpush3.bf16.msra.mxu1 %v3993_v8  ;;  %v669_v8 = vcombine.high %v4736_v4, %v4736_v4 }
  0x6b   :  { %3633 = vmatprep.subr.bf16.mxu1 %v3995_v10  ;;  %v4050_v10 = vld [vmem:[%s5147_s1 + $0x4b8] sm:$0xff]  }
  0x6c   :  { %3612 = vmatpush3.bf16.msra.mxu0 %v3996_v11  ;;  %v700_v11 = vcombine.high %v690_v7, %v690_v7 }
  0x6d   :  { %3613 = vmatprep.subr.bf16.mxu0 %v3998_v13  ;;  %v4051_v13 = vld [vmem:[%s5147_s1 + $0x540] sm:$0xff]  }
  0x6e   :  { %3634 = vmatpush3.bf16.msra.mxu1 %v3997_v12  ;;  %v676_v12 = vrot.slane %v660_v63, %v4338_v41  ;;  %v4096_v63 = vld [vmem:[%s5147_s1 + $0x658] sm:$0xff]  }
  0x6f   :  { %3635 = vmatprep.subr.bf16.mxu1 %v3999_v14  ;;  %v4052_v14 = vld [vmem:[%s5147_s1 + $0x5c0] sm:$0xff]  }
  0x70   :  { %3614 = vmatpush3.bf16.msra.mxu0 %v4000_v15  ;;  %v697_v15 = vrot.slane %v669_v8, %v4338_v41  ;;  %v4105_v8 = vld [vmem:[%s5147_s1 + $0x6e8] sm:$0xff]  }
  0x71   :  { %3615 = vmatprep.subr.bf16.mxu0 %v4002_v17  ;;  %v4054_v17 = vld [vmem:[%s5147_s1 + $0x580] sm:$0xff]  }
  0x72   :  { %3636 = vmatpush3.bf16.msra.mxu1 %v4001_v16  ;;  %v4053_v16 = vld [vmem:[%s5147_s1 + $0x500] sm:$0xff]  }
  0x73   :  { %3637 = vmatprep.subr.bf16.mxu1 %v4003_v18  ;;  %v698_v18 = vcombine.high %v676_v12, %v676_v12 }
  0x74   :  { %3616 = vmatpush3.bf16.msra.mxu0 %v4004_v19  ;;  %v4055_v19 = vld [vmem:[%s5147_s1 + $0x548] sm:$0xff]  }
  0x75   :  { %3617 = vmatprep.subr.bf16.mxu0 %v4006_v21  ;;  %v701_v21 = vcombine.high %v697_v15, %v697_v15 }
  0x76   :  { %3638 = vmatpush3.bf16.msra.mxu1 %v4005_v20  ;;  %v4056_v20 = vld [vmem:[%s5147_s1 + $0x5c8] sm:$0xff]  }
  0x77   :  { %3639 = vmatprep.subr.bf16.mxu1 %v4007_v22  ;;  %v4057_v22 = vld [vmem:[%s5147_s1 + $0x508] sm:$0xff]  }
  0x78   :  { %3618 = vmatpush3.bf16.msra.mxu0 %v4008_v23  ;;  %v4058_v23 = vld [vmem:[%s5147_s1 + $0x588] sm:$0xff]  }
  0x79   :  { %3619 = vmatprep.subr.bf16.mxu0 %v4010_v25  ;;  %v4060_v25 = vld [vmem:[%s5147_s1 + $0x5d0] sm:$0xff]  }
  0x7a   :  { %3640 = vmatpush3.bf16.msra.mxu1 %v4009_v24  ;;  %v4059_v24 = vld [vmem:[%s5147_s1 + $0x550] sm:$0xff]  }
  0x7b   :  { %3641 = vmatprep.subr.bf16.mxu1 %v4011_v26  ;;  %v4061_v26 = vld [vmem:[%s5147_s1 + $0x510] sm:$0xff]  }
  0x7c   :  { %3620 = vmatpush3.bf16.msra.mxu0 %v4012_v27  ;;  %v4062_v27 = vld [vmem:[%s5147_s1 + $0x590] sm:$0xff]  }
  0x7d   :  { %3621 = vmatprep.subr.bf16.mxu0 %v4014_v29  ;;  %v4064_v29 = vld [vmem:[%s5147_s1 + $0x5d8] sm:$0xff]  }
  0x7e   :  { %3642 = vmatpush3.bf16.msra.mxu1 %v4013_v28  ;;  %v4063_v28 = vld [vmem:[%s5147_s1 + $0x558] sm:$0xff]  }
  0x7f   :  { %3643 = vmatprep.subr.bf16.mxu1 %v4015_v30  ;;  %v4065_v30 = vld [vmem:[%s5147_s1 + $0x518] sm:$0xff]  }
  0x80   :  { %3622 = vmatpush3.bf16.msra.mxu0 %v4016_v31  ;;  %v4066_v31 = vld [vmem:[%s5147_s1 + $0x598] sm:$0xff]  }
  0x81   :  { %3651 = vmatprep.subr.bf16.mxu0 %v4019_v34  ;;  %v4069_v34 = vld [vmem:[%s5147_s1 + $0x520] sm:$0xff]  }
  0x82   :  { %3644 = vmatpush3.bf16.msra.mxu1 %v4017_v32  ;;  %v4067_v32 = vld [vmem:[%s5147_s1 + $0x560] sm:$0xff]  }
  0x83   :  { %2592 = vmatmul.mubr.bf16.vlgmr.msra.gmra.mrb[12].mxu0 %v634_v33  ;;  %3673 = vmatprep.subr.bf16.mxu1 %v4020_v35  ;;  %v4068_v33 = vld [vmem:[%s5147_s1 + $0x5e0] sm:$0xff]  }
  0x84   :  { %3652 = vmatpush3.bf16.msra.mxu0 %v4021_v36  ;;  %2671 = vmatprep.mubr.bf16.mxu0 %v690_v7  ;;  %v4070_v35 = vld [vmem:[%s5147_s1 + $0x5a0] sm:$0xff]   ;;  %v4071_v36 = vld [vmem:[%s5147_s1 + $0x568] sm:$0xff]  }
  0x85   :  { %2632 = vmatmul.mubr.bf16.vlgmr.msra.gmra.mrb[12].mxu1 %v650_v38  ;;  %3653 = vmatprep.subr.bf16.mxu0 %v4023_v39  ;;  %v4073_v38 = vld [vmem:[%s5147_s1 + $0x528] sm:$0xff]  }
  0x86   :  { %3674 = vmatpush3.bf16.msra.mxu1 %v4022_v37  ;;  %2711 = vmatprep.mubr.bf16.mxu1 %v700_v11  ;;  %v4072_v37 = vld [vmem:[%s5147_s1 + $0x5e8] sm:$0xff]   ;;  %v4108_v11 = vld [vmem:[%s5147_s1 + $0x670] sm:$0xff]  }
  0x87   :  { %3675 = vmatprep.subr.bf16.mxu1 %v4024_v40  ;;  %v4074_v39 = vld [vmem:[%s5147_s1 + $0x5a8] sm:$0xff]   ;;  %v4075_v40 = vld [vmem:[%s5147_s1 + $0x570] sm:$0xff]  }
  0x88   :  { %3654 = vmatpush3.bf16.msra.mxu0 %v4025_v42  ;;  %v4076_v42 = vld [vmem:[%s5147_s1 + $0x5f0] sm:$0xff]   ;;  %v4104_v7 = vld [vmem:[%s5147_s1 + $0x668] sm:$0xff]  }
  0x89   :  { %3655 = vmatprep.subr.bf16.mxu0 %v4027_v44  ;;  %v4078_v44 = vld [vmem:[%s5147_s1 + $0x5b0] sm:$0xff]  }
  0x8a   :  { %3676 = vmatpush3.bf16.msra.mxu1 %v4026_v43  ;;  %v4077_v43 = vld [vmem:[%s5147_s1 + $0x530] sm:$0xff]  }
  0x8b   :  { %3677 = vmatprep.subr.bf16.mxu1 %v4028_v45  ;;  %v4079_v45 = vld [vmem:[%s5147_s1 + $0x578] sm:$0xff]  }
  0x8c   :  { %3656 = vmatpush3.bf16.msra.mxu0 %v4029_v46  ;;  %v4080_v46 = vld [vmem:[%s5147_s1 + $0x5f8] sm:$0xff]  }
  0x8d   :  { %3657 = vmatprep.subr.bf16.mxu0 %v4031_v48  ;;  %v4082_v48 = vld [vmem:[%s5147_s1 + $0x5b8] sm:$0xff]  }
  0x8e   :  { %3678 = vmatpush3.bf16.msra.mxu1 %v4030_v47  ;;  %v4081_v47 = vld [vmem:[%s5147_s1 + $0x538] sm:$0xff]  }
  0x8f   :  { %3679 = vmatprep.subr.bf16.mxu1 %v4032_v49  ;;  %v683_v49 = vrot.slane %v4736_v4, %v4338_v41  ;;  %v4101_v4 = vld [vmem:[%s5147_s1 + $0x6e0] sm:$0xff]  }
  0x90   :  { %3658 = vmatpush3.bf16.msra.mxu0 %v4033_v50  ;;  %v4084_v50 = vld [vmem:[%s5147_s1 + $0x640] sm:$0xff]  }
  0x91   :  { %3659 = vmatprep.subr.bf16.mxu0 %v4035_v52  ;;  %v4086_v52 = vld [vmem:[%s5147_s1 + $0x600] sm:$0xff]  }
  0x92   :  { %3680 = vmatpush3.bf16.msra.mxu1 %v4034_v51  ;;  %v4085_v51 = vld [vmem:[%s5147_s1 + $0x6c0] sm:$0xff]  }
  0x93   :  { %3681 = vmatprep.subr.bf16.mxu1 %v4036_v53  ;;  %v4087_v53 = vld [vmem:[%s5147_s1 + $0x680] sm:$0xff]  }
  0x94   :  { %3660 = vmatpush3.bf16.msra.mxu0 %v4037_v54  ;;  %v699_v54 = vcombine.high %v683_v49, %v683_v49 }
  0x95   :  { %3661 = vmatprep.subr.bf16.mxu0 %v4039_v56  ;;  %v4089_v56 = vld [vmem:[%s5147_s1 + $0x6c8] sm:$0xff]  }
  0x96   :  { %3682 = vmatpush3.bf16.msra.mxu1 %v4038_v55  ;;  %v4088_v55 = vld [vmem:[%s5147_s1 + $0x648] sm:$0xff]  }
  0x97   :  { %3683 = vmatprep.subr.bf16.mxu1 %v4040_v57  ;;  %v4090_v57 = vld [vmem:[%s5147_s1 + $0x608] sm:$0xff]  }
  0x98   :  { %3662 = vmatpush3.bf16.msra.mxu0 %v4041_v58  ;;  %v4091_v58 = vld [vmem:[%s5147_s1 + $0x688] sm:$0xff]  }
  0x99   :  { %3663 = vmatprep.subr.bf16.mxu0 %v4043_v60  ;;  %v4093_v60 = vld [vmem:[%s5147_s1 + $0x6d0] sm:$0xff]  }
  0x9a   :  { %3684 = vmatpush3.bf16.msra.mxu1 %v4042_v59  ;;  %v4092_v59 = vld [vmem:[%s5147_s1 + $0x650] sm:$0xff]  }
  0x9b   :  { %3685 = vmatprep.subr.bf16.mxu1 %v4044_v62  ;;  %v4095_v62 = vld [vmem:[%s5147_s1 + $0x690] sm:$0xff]  }
  0x9c   :  { %3664 = vmatpush3.bf16.msra.mxu0 %v4045_v1  ;;  %v4098_v1 = vld [vmem:[%s5147_s1 + $0x618] sm:$0xff]  }
  0x9d   :  { %3665 = vmatprep.subr.bf16.mxu0 %v4047_v5  ;;  %v4102_v5 = vld [vmem:[%s5147_s1 + $0x620] sm:$0xff]  }
  0x9e   :  { %3686 = vmatpush3.bf16.msra.mxu1 %v4046_v2  ;;  %v4099_v2 = vld [vmem:[%s5147_s1 + $0x698] sm:$0xff]  }
  0x9f   :  { %3687 = vmatprep.subr.bf16.mxu1 %v4048_v6  ;;  %v4103_v6 = vld [vmem:[%s5147_s1 + $0x6a0] sm:$0xff]  }
  0xa0   :  { %3666 = vmatpush3.bf16.msra.mxu0 %v4049_v9  ;;  %v4106_v9 = vld [vmem:[%s5147_s1 + $0x628] sm:$0xff]  }
  0xa1   :  { %3695 = vmatprep.subr.bf16.mxu0 %v4051_v13  ;;  %v4109_v13 = vld [vmem:[%s5147_s1 + $0x6f0] sm:$0xff]  }
  0xa2   :  { %3688 = vmatpush3.bf16.msra.mxu1 %v4050_v10  ;;  %v4107_v10 = vld [vmem:[%s5147_s1 + $0x6a8] sm:$0xff]  }
  0xa3   :  { %2672 = vmatmul.mubr.bf16.vlgmr.msra.gmra.mrb[16].mxu0 %v676_v12  ;;  %3717 = vmatprep.subr.bf16.mxu1 %v4052_v14  ;;  %v31_v12 = vld [vmem:[%s5146_s0 + $0x18] sm:$0xff] }
  0xa4   :  { %3696 = vmatpush3.bf16.msra.mxu0 %v4053_v16  ;;  %2751 = vmatprep.mubr.bf16.mxu0 %v697_v15  ;;  %v709_v14 = vrot.slane %v31_v12, %v4338_v41  ;;  %v702_v15 = vcombine.high %v31_v12, %v31_v12  ;;  %v4110_v16 = vld [vmem:[%s5147_s1 + $0x630] sm:$0xff]   ;;  %v4147_v12 = vld [vmem:[%s5147_s1 + $0x7b8] sm:$0xff]  }
  0xa5   :  { %2712 = vmatmul.mubr.bf16.vlgmr.msra.gmra.mrb[16].mxu1 %v698_v18  ;;  %3697 = vmatprep.subr.bf16.mxu0 %v4055_v19 }
  0xa6   :  { %3718 = vmatpush3.bf16.msra.mxu1 %v4054_v17  ;;  %2791 = vmatprep.mubr.bf16.mxu1 %v701_v21  ;;  %v4112_v17 = vld [vmem:[%s5147_s1 + $0x678] sm:$0xff]   ;;  %v717_v18 = vcombine.high %v709_v14, %v709_v14  ;;  %v4942_v19 = vrot.slane %v702_v15, %v4338_v41 }
  0xa7   :  { %3719 = vmatprep.subr.bf16.mxu1 %v4056_v20  ;;  %v4111_v20 = vld [vmem:[%s5147_s1 + $0x6b0] sm:$0xff]   ;;  %v4113_v21 = vld [vmem:[%s5147_s1 + $0x6f8] sm:$0xff]  }
  0xa8   :  { %3698 = vmatpush3.bf16.msra.mxu0 %v4057_v22  ;;  %v739_v22 = vrot.slane %v717_v18, %v4338_v41 }
  0xa9   :  { %3699 = vmatprep.subr.bf16.mxu0 %v4059_v24  ;;  %v4114_v24 = vld [vmem:[%s5147_s1 + $0x638] sm:$0xff]  }
  0xaa   :  { %3720 = vmatpush3.bf16.msra.mxu1 %v4058_v23  ;;  %v718_v23 = vcombine.high %v4942_v19, %v4942_v19 }
  0xab   :  { %3721 = vmatprep.subr.bf16.mxu1 %v4060_v25  ;;  %v749_v25 = vcombine.high %v739_v22, %v739_v22 }
  0xac   :  { %3700 = vmatpush3.bf16.msra.mxu0 %v4061_v26  ;;  %v725_v26 = vrot.slane %v709_v14, %v4338_v41 }
  0xad   :  { %3701 = vmatprep.subr.bf16.mxu0 %v4063_v28  ;;  %v4115_v28 = vld [vmem:[%s5147_s1 + $0x6b8] sm:$0xff]  }
  0xae   :  { %3722 = vmatpush3.bf16.msra.mxu1 %v4062_v27  ;;  %v4116_v27 = vld [vmem:[%s5147_s1 + $0x740] sm:$0xff]  }
  0xaf   :  { %3723 = vmatprep.subr.bf16.mxu1 %v4064_v29  ;;  %v746_v29 = vrot.slane %v718_v23, %v4338_v41 }
  0xb0   :  { %3702 = vmatpush3.bf16.msra.mxu0 %v4065_v30  ;;  %v4117_v30 = vld [vmem:[%s5147_s1 + $0x7c0] sm:$0xff]  }
  0xb1   :  { %3703 = vmatprep.subr.bf16.mxu0 %v4067_v32  ;;  %v747_v32 = vcombine.high %v725_v26, %v725_v26 }
  0xb2   :  { %3724 = vmatpush3.bf16.msra.mxu1 %v4066_v31  ;;  %v4118_v31 = vld [vmem:[%s5147_s1 + $0x700] sm:$0xff]  }
  0xb3   :  { %3725 = vmatprep.subr.bf16.mxu1 %v4068_v33  ;;  %v4120_v33 = vld [vmem:[%s5147_s1 + $0x748] sm:$0xff]  }
  0xb4   :  { %3704 = vmatpush3.bf16.msra.mxu0 %v4069_v34  ;;  %v4119_v34 = vld [vmem:[%s5147_s1 + $0x780] sm:$0xff]  }
  0xb5   :  { %3705 = vmatprep.subr.bf16.mxu0 %v4071_v36  ;;  %v4121_v36 = vld [vmem:[%s5147_s1 + $0x7c8] sm:$0xff]  }
  0xb6   :  { %3726 = vmatpush3.bf16.msra.mxu1 %v4070_v35  ;;  %v750_v35 = vcombine.high %v746_v29, %v746_v29 }
  0xb7   :  { %3727 = vmatprep.subr.bf16.mxu1 %v4072_v37  ;;  %v4122_v37 = vld [vmem:[%s5147_s1 + $0x708] sm:$0xff]  }
  0xb8   :  { %3706 = vmatpush3.bf16.msra.mxu0 %v4073_v38  ;;  %v4124_v38 = vld [vmem:[%s5147_s1 + $0x750] sm:$0xff]  }
  0xb9   :  { %3707 = vmatprep.subr.bf16.mxu0 %v4075_v40  ;;  %v4125_v40 = vld [vmem:[%s5147_s1 + $0x7d0] sm:$0xff]  }
  0xba   :  { %3728 = vmatpush3.bf16.msra.mxu1 %v4074_v39  ;;  %v4123_v39 = vld [vmem:[%s5147_s1 + $0x788] sm:$0xff]  }
  0xbb   :  { %3729 = vmatprep.subr.bf16.mxu1 %v4076_v42  ;;  %v4126_v42 = vld [vmem:[%s5147_s1 + $0x710] sm:$0xff]  }
  0xbc   :  { %3708 = vmatpush3.bf16.msra.mxu0 %v4077_v43  ;;  %v4128_v43 = vld [vmem:[%s5147_s1 + $0x758] sm:$0xff]  }
  0xbd   :  { %3709 = vmatprep.subr.bf16.mxu0 %v4079_v45  ;;  %v4129_v45 = vld [vmem:[%s5147_s1 + $0x7d8] sm:$0xff]  }
  0xbe   :  { %3730 = vmatpush3.bf16.msra.mxu1 %v4078_v44  ;;  %v4127_v44 = vld [vmem:[%s5147_s1 + $0x790] sm:$0xff]  }
  0xbf   :  { %3731 = vmatprep.subr.bf16.mxu1 %v4080_v46  ;;  %v4130_v46 = vld [vmem:[%s5147_s1 + $0x718] sm:$0xff]  }
  0xc0   :  { %3710 = vmatpush3.bf16.msra.mxu0 %v4081_v47  ;;  %v4131_v47 = vld [vmem:[%s5147_s1 + $0x798] sm:$0xff]  }
  0xc1   :  { %3739 = vmatprep.subr.bf16.mxu0 %v4084_v50  ;;  %v4134_v50 = vld [vmem:[%s5147_s1 + $0x720] sm:$0xff]  }
  0xc2   :  { %3732 = vmatpush3.bf16.msra.mxu1 %v4082_v48  ;;  %v4132_v48 = vld [vmem:[%s5147_s1 + $0x760] sm:$0xff]  }
  0xc3   :  { %2752 = vmatmul.mubr.bf16.vlgmr.msra.gmra.mrb[20].mxu0 %v683_v49  ;;  %3761 = vmatprep.subr.bf16.mxu1 %v4085_v51  ;;  %v4133_v49 = vld [vmem:[%s5147_s1 + $0x7e0] sm:$0xff]  }
  0xc4   :  { %3740 = vmatpush3.bf16.msra.mxu0 %v4086_v52  ;;  %2831 = vmatprep.mubr.bf16.mxu0 %v739_v22  ;;  %v4135_v51 = vld [vmem:[%s5147_s1 + $0x7a0] sm:$0xff]   ;;  %v4136_v52 = vld [vmem:[%s5147_s1 + $0x768] sm:$0xff]  }
  0xc5   :  { %2792 = vmatmul.mubr.bf16.vlgmr.msra.gmra.mrb[20].mxu1 %v699_v54  ;;  %3741 = vmatprep.subr.bf16.mxu0 %v4088_v55  ;;  %v4138_v54 = vld [vmem:[%s5147_s1 + $0x728] sm:$0xff]  }
  0xc6   :  { %3762 = vmatpush3.bf16.msra.mxu1 %v4087_v53  ;;  %2871 = vmatprep.mubr.bf16.mxu1 %v749_v25  ;;  %v4137_v53 = vld [vmem:[%s5147_s1 + $0x7e8] sm:$0xff]  }
  0xc7   :  { %3763 = vmatprep.subr.bf16.mxu1 %v4089_v56  ;;  %v4139_v55 = vld [vmem:[%s5147_s1 + $0x7a8] sm:$0xff]   ;;  %v4140_v56 = vld [vmem:[%s5147_s1 + $0x770] sm:$0xff]  }
  0xc8   :  { %3742 = vmatpush3.bf16.msra.mxu0 %v4090_v57  ;;  %v3200_v57 = vld [vmem:[%s5148_s2] ss:$0 sm:$0xff] }
  0xc9   :  { %3743 = vmatprep.subr.bf16.mxu0 %v4092_v59 }
  0xca   :  { %3764 = vmatpush3.bf16.msra.mxu1 %v4091_v58  ;;  %v4141_v58 = vld [vmem:[%s5147_s1 + $0x7f0] sm:$0xff]  }
  0xcb   :  { %3765 = vmatprep.subr.bf16.mxu1 %v4093_v60  ;;  %v4142_v60 = vld [vmem:[%s5147_s1 + $0x730] sm:$0xff]  }
  0xcc   :  { %3744 = vmatpush3.bf16.msra.mxu0 %v4094_v61 }
  0xcd   :  { %3745 = vmatprep.subr.bf16.mxu0 %v4096_v63 }
  0xce   :  { %3766 = vmatpush3.bf16.msra.mxu1 %v4095_v62  ;;  %v4144_v62 = vld [vmem:[%s5147_s1 + $0x778] sm:$0xff]  }
  0xcf   :  { %3767 = vmatprep.subr.bf16.mxu1 %v4097_v0 }
  0xd0   :  { %3746 = vmatpush3.bf16.msra.mxu0 %v4098_v1 }
  0xd1   :  { %3747 = vmatprep.subr.bf16.mxu0 %v4100_v3 }
  0xd2   :  { %3768 = vmatpush3.bf16.msra.mxu1 %v4099_v2  ;;  %v4143_v2 = vld [vmem:[%s5147_s1 + $0x7b0] sm:$0xff]  }
  0xd3   :  { %3769 = vmatprep.subr.bf16.mxu1 %v4101_v4 }
  0xd4   :  { %3748 = vmatpush3.bf16.msra.mxu0 %v4102_v5 }
  0xd5   :  { %3749 = vmatprep.subr.bf16.mxu0 %v4104_v7 }
  0xd6   :  { %3770 = vmatpush3.bf16.msra.mxu1 %v4103_v6 }
  0xd7   :  { %3771 = vmatprep.subr.bf16.mxu1 %v4105_v8  ;;  %v4145_v8 = vld [vmem:[%s5147_s1 + $0x7f8] sm:$0xff]  }
  0xd8   :  { %3750 = vmatpush3.bf16.msra.mxu0 %v4106_v9 }
  0xd9   :  { %3751 = vmatprep.subr.bf16.mxu0 %v4108_v11 }
  0xda   :  { %3772 = vmatpush3.bf16.msra.mxu1 %v4107_v10  ;;  %v4146_v10 = vld [vmem:[%s5147_s1 + $0x738] sm:$0xff]  }
  0xdb   :  { %3773 = vmatprep.subr.bf16.mxu1 %v4109_v13  ;;  %v732_v13 = vrot.slane %v4942_v19, %v4338_v41 }
  0xdc   :  { %3752 = vmatpush3.bf16.msra.mxu0 %v4110_v16 }
  0xdd   :  { %3753 = vmatprep.subr.bf16.mxu0 %v4112_v17  ;;  %v748_v14 = vcombine.high %v732_v13, %v732_v13 }
  0xde   :  { %3774 = vmatpush3.bf16.msra.mxu1 %v4111_v20 }
  0xdf   :  { %3775 = vmatprep.subr.bf16.mxu1 %v4113_v21 }
  0xe0   :  { %3754 = vmatpush3.bf16.msra.mxu0 %v4114_v24 }
  0xe1   :  { %3783 = vmatprep.subr.bf16.mxu0 %v4116_v27 }
  0xe2   :  { %3776 = vmatpush3.bf16.msra.mxu1 %v4115_v28 }
  0xe3   :  { %2832 = vmatmul.mubr.bf16.vlgmr.msra.gmra.mrb[24].mxu0 %v725_v26  ;;  %3805 = vmatprep.subr.bf16.mxu1 %v4117_v30 }
  0xe4   :  { %3784 = vmatpush3.bf16.msra.mxu0 %v4118_v31  ;;  %2911 = vmatprep.mubr.bf16.mxu0 %v746_v29 }
  0xe5   :  { %2872 = vmatmul.mubr.bf16.vlgmr.msra.gmra.mrb[24].mxu1 %v747_v32  ;;  %3785 = vmatprep.subr.bf16.mxu0 %v4120_v33 }
  0xe6   :  { %3806 = vmatpush3.bf16.msra.mxu1 %v4119_v34  ;;  %2951 = vmatprep.mubr.bf16.mxu1 %v750_v35 }
  0xe7   :  { %3807 = vmatprep.subr.bf16.mxu1 %v4121_v36 }
  0xe8   :  { %3786 = vmatpush3.bf16.msra.mxu0 %v4122_v37 }
  0xe9   :  { %3787 = vmatprep.subr.bf16.mxu0 %v4124_v38 }
  0xea   :  { %3808 = vmatpush3.bf16.msra.mxu1 %v4123_v39 }
  0xeb   :  { %3809 = vmatprep.subr.bf16.mxu1 %v4125_v40 }
  0xec   :  { %3788 = vmatpush3.bf16.msra.mxu0 %v4126_v42 }
  0xed   :  { %3789 = vmatprep.subr.bf16.mxu0 %v4128_v43 }
  0xee   :  { %3810 = vmatpush3.bf16.msra.mxu1 %v4127_v44 }
  0xef   :  { %3811 = vmatprep.subr.bf16.mxu1 %v4129_v45 }
  0xf0   :  { %3790 = vmatpush3.bf16.msra.mxu0 %v4130_v46 }
  0xf1   :  { %3791 = vmatprep.subr.bf16.mxu0 %v4132_v48 }
  0xf2   :  { %3812 = vmatpush3.bf16.msra.mxu1 %v4131_v47 }
  0xf3   :  { %3813 = vmatprep.subr.bf16.mxu1 %v4133_v49 }
  0xf4   :  { %3792 = vmatpush3.bf16.msra.mxu0 %v4134_v50 }
  0xf5   :  { %3793 = vmatprep.subr.bf16.mxu0 %v4136_v52 }
  0xf6   :  { %3814 = vmatpush3.bf16.msra.mxu1 %v4135_v51  ;;  %v3491_v59 = vpop.f32.mrb[0].mxu0 }
  0xf7   :  { %v3492_v61 = vpop.f32.mrb[1].mxu0  ;;  %3815 = vmatprep.subr.bf16.mxu1 %v4137_v53  ;;  %v3513_v63 = vpop.f32.mrb[0].mxu1 }
  0xf8   :  { %v3493_v0 = vadd.f32 %v3492_v61, %v3491_v59  ;;  %v3494_v1 = vpop.f32.mrb[2].mxu0  ;;  %3794 = vmatpush3.bf16.msra.mxu0 %v4138_v54  ;;  %v3514_v3 = vpop.f32.mrb[1].mxu1 }
  0xf9   :  { %v3495_v4 = vpop.f32.mrb[3].mxu0  ;;  %3795 = vmatprep.subr.bf16.mxu0 %v4140_v56  ;;  %v3515_v6 = vadd.f32 %v3514_v3, %v3513_v63  ;;  %v3516_v7 = vpop.f32.mrb[2].mxu1 }
  0xfa   :  { %v2354_v5 = vadd.f32 %v3493_v0, %v3200_v57  ;;  %3816 = vmatpush3.bf16.msra.mxu1 %v4139_v55  ;;  %v3517_v9 = vpop.f32.mrb[3].mxu1 }
  0xfb   :  { %3817 = vmatprep.subr.bf16.mxu1 %v4141_v58 }
  0xfc   :  { %v2394_v11 = vadd.f32 %v3515_v6, %v2354_v5  ;;  %3796 = vmatpush3.bf16.msra.mxu0 %v4142_v60 }
  0xfd   :  { %3797 = vmatprep.subr.bf16.mxu0 %v4144_v62 }
  0xfe   :  { %3818 = vmatpush3.bf16.msra.mxu1 %v4143_v2 }
  0xff   :  { %3819 = vmatprep.subr.bf16.mxu1 %v4145_v8 }
 0x100   :  { %3798 = vmatpush3.bf16.msra.mxu0 %v4146_v10 }
 0x102   :  { %3820 = vmatpush3.bf16.msra.mxu1 %v4147_v12 }
 0x103   :  { %2912 = vmatmul.mubr.bf16.vlgmr.msra.gmra.mrb[28].mxu0 %v732_v13 }
 0x104   :  { %12 = vsyncpa [#allocation3], 0  ;;  %v4149_v38 = vld [vmem:[%s5149_s3] sm:$0xff]   ;;  %v4190_v39 = vmov 0.0   ;;  %v4150_v40 = vld [vmem:[%s5149_s3 + $0x8] sm:$0xff]   ;;  %vm4191_vm0 = vmmov 0  }
 0x105   :  { %2952 = vmatmul.mubr.bf16.vlgmr.msra.gmra.mrb[28].mxu1 %v748_v14  ;;  %3845 = vmatprep.subr.bf16.mxu0 %v4190_v39  ;;  %v4151_v42 = vld [vmem:[%s5149_s3 + $0x10] sm:$0xff]   ;;  %v4152_v43 = vld [vmem:[%s5149_s3 + $0x18] sm:$0xff]   ;;  %v4153_v44 = vld [vmem:[%s5149_s3 + $0x20] sm:$0xff]   ;;  %s4192_s20 = smov [#allocation2]  }
 0x106   :  { %3865 = vmatprep.subr.bf16.mxu1 %v4190_v39  ;;  %3846 = vmatpush3.bf16.msra.mxu0 %v4149_v38  ;;  %v4154_v47 = vld [vmem:[%s5149_s3 + $0x28] sm:$0xff]   ;;  %v4155_v57 = vld [vmem:[%s5149_s3 + $0x30] sm:$0xff]   ;;  %v4156_v59 = vld [vmem:[%s5149_s3 + $0x38] sm:$0xff]   ;;  %s3192_s21 = sshll.u32 %s4192_s20, 4  ;;  %s3193_s21 = int_to_ptr.vmem [resolvable:$true] %s3192_s21 }
 0x107   :  { %3847 = vmatprep.subr.bf16.mxu0 %v4190_v39  ;;  %3861 = vmatprep.mubr.msk.bf16.mxu0 %vm4191_vm0, %v4190_v39  ;;  %v4157_v60 = vld [vmem:[%s5151_s5] sm:$0xff]   ;;  %v4158_v61 = vld [vmem:[%s5151_s5 + $0x8] sm:$0xff]   ;;  %v4159_v62 = vld [vmem:[%s5151_s5 + $0x10] sm:$0xff]   ;;  %p4170_p1 = scmp.lt.s32.totalorder %s3193_s21, %s3193_s21 }
 0x108   :  { %3881 = vmatprep.mubr.msk.bf16.mxu1 %vm4191_vm0, %v4190_v39  ;;  %3866 = vmatpush3.bf16.msra.mxu1 %v4157_v60  ;;  %v4160_v63 = vld [vmem:[%s5151_s5 + $0x18] sm:$0xff]   ;;  %v4161_v0 = vld [vmem:[%s5151_s5 + $0x20] sm:$0xff]   ;;  %v4162_v1 = vld [vmem:[%s5151_s5 + $0x28] sm:$0xff]  }
 0x109   :  { %3867 = vmatprep.subr.bf16.mxu1 %v4190_v39 }
 0x10a   :  { %3848 = vmatpush3.bf16.msra.mxu0 %v4150_v40 }
 0x10b   :  { %3849 = vmatprep.subr.bf16.mxu0 %v4190_v39 }
 0x10c   :  { %3868 = vmatpush3.bf16.msra.mxu1 %v4158_v61 }
 0x10d   :  { %3869 = vmatprep.subr.bf16.mxu1 %v4190_v39 }
 0x10e   :  { %3850 = vmatpush3.bf16.msra.mxu0 %v4151_v42 }
 0x10f   :  { %3851 = vmatprep.subr.bf16.mxu0 %v4190_v39 }
 0x110   :  { %3870 = vmatpush3.bf16.msra.mxu1 %v4159_v62 }
 0x111   :  { %3871 = vmatprep.subr.bf16.mxu1 %v4190_v39 }
 0x112   :  { %3852 = vmatpush3.bf16.msra.mxu0 %v4152_v43 }
 0x113   :  { %3853 = vmatprep.subr.bf16.mxu0 %v4190_v39 }
 0x114   :  { %3872 = vmatpush3.bf16.msra.mxu1 %v4160_v63 }
 0x115   :  { %3873 = vmatprep.subr.bf16.mxu1 %v4190_v39 }
 0x116   :  { %v3535_v15 = vpop.f32.mrb[4].mxu0  ;;  %3854 = vmatpush3.bf16.msra.mxu0 %v4153_v44 }
 0x117   :  { %v3536_v16 = vpop.f32.mrb[5].mxu0  ;;  %v3557_v17 = vpop.f32.mrb[4].mxu1  ;;  %3855 = vmatprep.subr.bf16.mxu0 %v4190_v39 }
 0x118   :  { %v3537_v18 = vadd.f32 %v3536_v16, %v3535_v15  ;;  %v3538_v20 = vpop.f32.mrb[6].mxu0  ;;  %v3558_v21 = vpop.f32.mrb[5].mxu1  ;;  %3874 = vmatpush3.bf16.msra.mxu1 %v4161_v0 }
 0x119   :  { %v3539_v22 = vpop.f32.mrb[7].mxu0  ;;  %v3559_v24 = vadd.f32 %v3558_v21, %v3557_v17  ;;  %v3560_v25 = vpop.f32.mrb[6].mxu1  ;;  %3875 = vmatprep.subr.bf16.mxu1 %v4190_v39 }
 0x11a   :  { %v2434_v23 = vadd.f32 %v3537_v18, %v2394_v11  ;;  %v3561_v26 = vpop.f32.mrb[7].mxu1  ;;  %3856 = vmatpush3.bf16.msra.mxu0 %v4154_v47 }
 0x11b   :  { %3857 = vmatprep.subr.bf16.mxu0 %v4190_v39 }
 0x11c   :  { %v2474_v41 = vadd.f32 %v3559_v24, %v2434_v23  ;;  %3876 = vmatpush3.bf16.msra.mxu1 %v4162_v1 }
 0x11d   :  { %3877 = vmatprep.subr.bf16.mxu1 %v4190_v39 }
 0x11e   :  { %3858 = vmatpush3.bf16.msra.mxu0 %v4155_v57 }
 0x11f   :  { %3859 = vmatprep.subr.bf16.mxu0 %v4190_v39 }
 0x122   :  { %3860 = vmatpush3.bf16.msra.mxu0 %v4156_v59 }
 0x136   :  { %v3579_v19 = vpop.f32.mrb[8].mxu0 }
 0x137   :  { %v3580_v27 = vpop.f32.mrb[9].mxu0 }
 0x138   :  { %v3601_v28 = vpop.f32.mrb[8].mxu1  ;;  %v3581_v29 = vadd.f32 %v3580_v27, %v3579_v19  ;;  %v3582_v30 = vpop.f32.mrb[10].mxu0 }
 0x139   :  { %v3602_v31 = vpop.f32.mrb[9].mxu1  ;;  %v3583_v32 = vpop.f32.mrb[11].mxu0 }
 0x13a   :  { %v2514_v33 = vadd.f32 %v3581_v29, %v2474_v41  ;;  %v3603_v34 = vadd.f32 %v3602_v31, %v3601_v28  ;;  %v3604_v35 = vpop.f32.mrb[10].mxu1 }
 0x13b   :  { %v3605_v36 = vpop.f32.mrb[11].mxu1 }
 0x13c   :  { %v2554_v37 = vadd.f32 %v3603_v34, %v2514_v33 }
 0x156   :  { %v3623_v45 = vpop.f32.mrb[12].mxu0 }
 0x157   :  { %v3624_v46 = vpop.f32.mrb[13].mxu0 }
 0x158   :  { %v3645_v48 = vpop.f32.mrb[12].mxu1  ;;  %v3625_v49 = vadd.f32 %v3624_v46, %v3623_v45  ;;  %v3626_v50 = vpop.f32.mrb[14].mxu0 }
 0x159   :  { %v3646_v51 = vpop.f32.mrb[13].mxu1  ;;  %v3627_v52 = vpop.f32.mrb[15].mxu0 }
 0x15a   :  { %v2594_v53 = vadd.f32 %v3625_v49, %v2554_v37  ;;  %v3647_v54 = vadd.f32 %v3646_v51, %v3645_v48  ;;  %v3648_v55 = vpop.f32.mrb[14].mxu1 }
 0x15b   :  { %v3649_v56 = vpop.f32.mrb[15].mxu1  ;;  %v3457_v55 = vld [vmem:[%s5150_s4] ss:$0 sm:$0xff]  ;;  %s4165_s4 = scalar_lea.vmem %s3193_s21, 32 }
 0x15c   :  { %v2634_v58 = vadd.f32 %v3647_v54, %v2594_v53  ;;  %v4163_v53 = vld [vmem:[%s5151_s5 + $0x30] sm:$0xff]   ;;  %v4164_v54 = vld [vmem:[%s5151_s5 + $0x38] sm:$0xff]   ;;  %p4166_p0 = scmp.ne.s32.totalorder %s3193_s21, %s4165_s4  ;;  %p4171_p2 = scmp.lt.s32.totalorder %s4165_s4, %s4165_s4 }
 0x15d   :  { %3878 = vmatpush3.bf16.msra.mxu1 %v4163_v53 }
 0x15e   :  { %3879 = vmatprep.subr.bf16.mxu1 %v4190_v39  ;;  %v3466_v39 = vld [vmem:[%s5152_s6] ss:$0 sm:$0xff]  ;;  %p4172_p3 = por %p4171_p2, %p4170_p1 }
 0x160   :  { %p4173_p4 = pnand %p4172_p3, %p4166_p0 }
 0x161   :  { %3880 = vmatpush3.bf16.msra.mxu1 %v4164_v54 }
 0x176   :  { %v3667_v2 = vpop.f32.mrb[16].mxu0 }
 0x177   :  { %v3668_v3 = vpop.f32.mrb[17].mxu0 }
 0x178   :  { %v3689_v4 = vpop.f32.mrb[16].mxu1  ;;  %v3669_v5 = vadd.f32 %v3668_v3, %v3667_v2  ;;  %v3670_v6 = vpop.f32.mrb[18].mxu0 }
 0x179   :  { %v3690_v7 = vpop.f32.mrb[17].mxu1  ;;  %v3671_v8 = vpop.f32.mrb[19].mxu0 }
 0x17a   :  { %v2674_v9 = vadd.f32 %v3669_v5, %v2634_v58  ;;  %v3691_v10 = vadd.f32 %v3690_v7, %v3689_v4  ;;  %v3692_v11 = vpop.f32.mrb[18].mxu1 }
 0x17b   :  { %v3693_v12 = vpop.f32.mrb[19].mxu1 }
 0x17c   :  { %v2714_v13 = vadd.f32 %v3691_v10, %v2674_v9 }
 0x196   :  { %v3711_v14 = vpop.f32.mrb[20].mxu0 }
 0x197   :  { %v3712_v15 = vpop.f32.mrb[21].mxu0 }
 0x198   :  { %v3733_v16 = vpop.f32.mrb[20].mxu1  ;;  %v3713_v17 = vadd.f32 %v3712_v15, %v3711_v14  ;;  %v3714_v18 = vpop.f32.mrb[22].mxu0 }
 0x199   :  { %v3734_v20 = vpop.f32.mrb[21].mxu1  ;;  %v3715_v21 = vpop.f32.mrb[23].mxu0 }
 0x19a   :  { %v2754_v22 = vadd.f32 %v3713_v17, %v2714_v13  ;;  %v3735_v23 = vadd.f32 %v3734_v20, %v3733_v16  ;;  %v3736_v24 = vpop.f32.mrb[22].mxu1 }
 0x19b   :  { %v3737_v25 = vpop.f32.mrb[23].mxu1 }
 0x19c   :  { %v2794_v26 = vadd.f32 %v3735_v23, %v2754_v22 }
 0x1b6   :  { %v3755_v41 = vpop.f32.mrb[24].mxu0 }
 0x1b7   :  { %v3756_v19 = vpop.f32.mrb[25].mxu0 }
 0x1b8   :  { %v3777_v27 = vpop.f32.mrb[24].mxu1  ;;  %v3757_v28 = vadd.f32 %v3756_v19, %v3755_v41  ;;  %v3758_v29 = vpop.f32.mrb[26].mxu0 }
 0x1b9   :  { %v3778_v30 = vpop.f32.mrb[25].mxu1  ;;  %v3759_v31 = vpop.f32.mrb[27].mxu0 }
 0x1ba   :  { %v2834_v32 = vadd.f32 %v3757_v28, %v2794_v26  ;;  %v3779_v33 = vadd.f32 %v3778_v30, %v3777_v27  ;;  %v3780_v34 = vpop.f32.mrb[26].mxu1 }
 0x1bb   :  { %v3781_v35 = vpop.f32.mrb[27].mxu1 }
 0x1bc   :  { %v2874_v36 = vadd.f32 %v3779_v33, %v2834_v32 }
 0x1d6   :  { %v3799_v37 = vpop.f32.mrb[28].mxu0 }
 0x1d7   :  { %v3800_v38 = vpop.f32.mrb[29].mxu0 }
 0x1d8   :  { %v3821_v40 = vpop.f32.mrb[28].mxu1  ;;  %v3801_v42 = vadd.f32 %v3800_v38, %v3799_v37  ;;  %v3802_v43 = vpop.f32.mrb[30].mxu0 }
 0x1d9   :  { %v3822_v44 = vpop.f32.mrb[29].mxu1  ;;  %v3803_v45 = vpop.f32.mrb[31].mxu0 }
 0x1da   :  { %v2914_v46 = vadd.f32 %v3801_v42, %v2874_v36  ;;  %v3823_v47 = vadd.f32 %v3822_v44, %v3821_v40  ;;  %v3824_v48 = vpop.f32.mrb[30].mxu1 }
 0x1db   :  { %v3825_v49 = vpop.f32.mrb[31].mxu1 }
 0x1dc   :  { %v2954_v50 = vadd.f32 %v3823_v47, %v2914_v46 }
 0x1de   :  { %v2959_v51 = vmax.f32 %v2954_v50, 0.0 }
 0x1e0   :  { %v2960_v52 = vpack.c.bf16 %v2959_v51, %v2959_v51 }
 0x1e2   :  { %3862 = vmatmul.mubr.bf16.vlgmr.msra.gmra.mrb[32].mxu0 %v2960_v52 }
 0x2b5   :  { %v3066_v56 = vpop.f32.mrb[32].mxu0 }
 0x2b6   :  { %v3067_v57 = vadd.f32 %v3457_v55, %v3066_v56  ;;  %v3863_v58 = vpop.f32.mrb[33].mxu0 }
 0x2b7   :  { %v3069_v59 = vpop.f32.mrb[34].mxu0 }
 0x2b8   :  { %v3072_v60 = vmax.f32 %v3067_v57, 0.0  ;;  %v3864_v61 = vpop.f32.mrb[35].mxu0 }
 0x2ba   :  { %v3073_v62 = vpack.c.bf16 %v3072_v60, %v3072_v60 }
 0x2bc   :  { %3882 = vmatmul.mubr.bf16.vlgmr.msra.gmra.mrb[32].mxu1 %v3073_v62 }
 0x38f   :  { %v3179_v63 = vpop.f32.mrb[32].mxu1 }
 0x390   :  { %v3180_v0 = vadd.f32 %v3466_v39, %v3179_v63  ;;  %v3883_v1 = vpop.f32.mrb[33].mxu1 }
 0x391   :  { %v3182_v2 = vpop.f32.mrb[34].mxu1 }
 0x392   :  { %3185 = vst [vmem:[#allocation2] sm:$0x3] %v3180_v0  ;;  %v3884_v3 = vpop.f32.mrb[35].mxu1 }
 0x393   :  { %4176 = shalt.err (!%p4173_p4)
}
 0x394   :  { %s4177_s6 = scalar_lea.hbm %s5153_s7, 32 }
 0x395   :  { %p4178_p5 = scmp.ne.s32.totalorder %s5153_s7, %s4177_s6  ;;  %p4181_p6 = scmp.lt.u32.totalorder %s4177_s6, %s5153_s7 }
 0x397   :  { %p4183_p7 = pnand %p4181_p6, %p4178_p5 }
 0x399   :  { %4186 = shalt.err (!%p4183_p7)
}
 0x39a   :  { %3195 = dma.vmem_to_hbm [thread:$0]  %s3193_s21, 32, %s5153_s7, [#allocation3]  }
 0x39b   :  { %4187 = dma.done.wait [#allocation3], 32  }
 0x39c   :  { %4188 = vsyncadd [#allocation3], 4294967264 }
 0x39d   :  { %3199 = vsyncpa [#allocation3], 1 }

// kernel: simple_cnn_v2_forward.2
= control target key start
LH: loop header
LB: loop body
LE: loop exit
PB: predicated region body
PF: predicated region fallthrough
CT: control target
= control target key end

     0   :  { %s8380_s18 = smov 0   ;;  %s12793_s0 = inlined_call_operand.vmem [shape: bf16[2048,32], index: 0, kind: input, shape index: {}]   ;;  %s12794_s1 = inlined_call_operand.vmem [shape: bf16[32,32], index: 1, kind: input, shape index: {}]   ;;  %s12795_s2 = inlined_call_operand.vmem [shape: f32[1,32], index: 2, kind: input, shape index: {}]   ;;  %s12796_s3 = inlined_call_operand.vmem [shape: bf16[288,64], index: 3, kind: input, shape index: {}]   ;;  %s12797_s4 = inlined_call_operand.vmem [shape: f32[1,64], index: 4, kind: input, shape index: {}]   ;;  %s12798_s5 = inlined_call_operand.vmem [shape: bf16[2,64,64], index: 5, kind: output, shape index: {}]  }
   0x1 LB: > { %s8386_s19 = sadd.s32 4294967295, %s8345_s18   ;;  %p6819_p0 = scmp.ge.s32.totalorder %s8345_s18, 1  ;;  %s8345_s18 = sphi %s8380_s18, %s15_s18  }
   0x2   : > { %p188_p1 = scmp.lt.s32.totalorder %s8345_s18, 3 }
   0x4   : > { %p189_p2 = pnand %p6819_p0, %p188_p1 }
   0x6   : > { %192 = sbr.rel (%p189_p2) target bundleno = 1359 (0x54f), region = 40 }
   0xd   : > { %v8212_v0 = vld [vmem:[%s12794_s1] sm:$0xff]   ;;  %s6820_s22 = sshll.u32 %s8386_s19, 7  ;;  %v8213_v1 = vld [vmem:[%s12794_s1 + $0x8] sm:$0xff]   ;;  %vm701_vm0 = vcmask 261120   ;;  %vm8349_vm9 = vmmov 0   ;;  %p222_p4 = scmp.lt.s32.totalorder %s8386_s19, 1 }
   0xe   : > { %p217_p3 = scmp.lt.s32.totalorder %s6820_s22, 255  ;;  %7417 = vmatprep.subr.bf16.mxu0 %v8212_v0  ;;  %8197 = vmatprep.subr.bf16.mxu1 %v8212_v0 }
   0xf   : > { %7418 = vmatpush3.bf16.msra.mxu0 %v8212_v0  ;;  %8199 = vmatpush3.bf16.msra.mxu1 %v8212_v0  ;;  %s13797_s19 = smov (!%p222_p4, %s8386_s19), 1 }
  0x10   : > { %s13795_s22 = smov (!%p217_p3, %s6820_s22), 255  ;;  %7419 = vmatprep.subr.bf16.mxu0 %v8213_v1  ;;  %8198 = vmatprep.subr.bf16.mxu1 %v8213_v1 }
  0x11   : > { %s6821_s25 = sshll.u32 %s13795_s22, 2 }
  0x12   : > { %s8400_s28 = scalar_lea.vmem %s12793_s0, %s6821_s25  ;;  %s7171_s25 = sshll.u32 %s13797_s19, 5 }
  0x13   : > { %7420 = vmatpush3.bf16.msra.mxu0 %v8213_v1  ;;  %v8214_v2 = vld [vmem:[%s8400_s28] sm:$0xff]   ;;  %8200 = vmatpush3.bf16.msra.mxu1 %v8213_v1  ;;  %v8215_v3 = vld [vmem:[%s8400_s28 + $0x8] sm:$0xff]   ;;  %v8216_v4 = vld [vmem:[%s8400_s28 + $0x10] sm:$0xff]  }
  0x14   : > { %7421 = vmatprep.mubr.msk.bf16.mxu0 %vm701_vm0, %v8214_v2  ;;  %v8217_v5 = vld [vmem:[%s8400_s28 + $0x18] sm:$0xff]   ;;  %v8218_v6 = vld [vmem:[%s8400_s28 + $0x20] sm:$0xff]   ;;  %v8219_v7 = vld [vmem:[%s8400_s28 + $0x28] sm:$0xff]  }
  0x15   : > { %v8220_v8 = vld [vmem:[%s8400_s28 + $0x30] sm:$0xff]   ;;  %v8221_v9 = vld [vmem:[%s8400_s28 + $0x38] sm:$0xff]   ;;  %v8222_v10 = vld [vmem:[%s8400_s28 + $0x40] sm:$0xff]  }
  0x16   : > { %7422 = vmatmul.mubr.msk.bf16.vlgmr.msra.gmra.mrb[0].mxu0 %vm701_vm0, %v8215_v3  ;;  %v8223_v11 = vld [vmem:[%s8400_s28 + $0x48] sm:$0xff]   ;;  %v8224_v12 = vld [vmem:[%s8400_s28 + $0x50] sm:$0xff]   ;;  %v8251_v14 = vld [vmem:[%s8400_s28 + $0x198] sm:$0xff]  }
  0x17   : > { %7425 = vmatprep.mubr.msk.bf16.mxu0 %vm701_vm0, %v8216_v4  ;;  %v8249_v13 = vld [vmem:[%s8400_s28 + $0x190] sm:$0xff]   ;;  %v8225_v15 = vld [vmem:[%s8400_s28 + $0x58] sm:$0xff]   ;;  %v8253_v16 = vld [vmem:[%s8400_s28 + $0x1a0] sm:$0xff]  }
  0x18   : > { %7521 = vmatprep.mubr.msk.bf16.mxu1 %vm701_vm0, %v8249_v13  ;;  %v8226_v17 = vld [vmem:[%s8400_s28 + $0x60] sm:$0xff]   ;;  %v8255_v18 = vld [vmem:[%s8400_s28 + $0x1a8] sm:$0xff]   ;;  %v8257_v19 = vld [vmem:[%s8400_s28 + $0x1b0] sm:$0xff]   ;;  %v12804_v13 = vmov 0  }
  0x19   : > { %7522 = vmatmul.mubr.msk.bf16.vlgmr.msra.gmra.mrb[0].mxu1 %vm701_vm0, %v8251_v14  ;;  %v8227_v20 = vld [vmem:[%s8400_s28 + $0x68] sm:$0xff]   ;;  %v8228_v21 = vld [vmem:[%s8400_s28 + $0x70] sm:$0xff]   ;;  %v8259_v22 = vld [vmem:[%s8400_s28 + $0x1b8] sm:$0xff]   ;;  %1679 = vst.msk [vmem:[#allocation2] sm:$0xff] %vm701_vm0, %v12804_v13 }
  0x1a   : > { %7525 = vmatprep.mubr.msk.bf16.mxu1 %vm701_vm0, %v8253_v16  ;;  %v8261_v23 = vld [vmem:[%s8400_s28 + $0x1c0] sm:$0xff]   ;;  %v8229_v24 = vld [vmem:[%s8400_s28 + $0x78] sm:$0xff]   ;;  %v8263_v26 = vld [vmem:[%s8400_s28 + $0x1c8] sm:$0xff]   ;;  %1696 = vst.msk [vmem:[#allocation2 + $0x88] sm:$0xff] %vm701_vm0, %v12804_v13 }
  0x1b   : > { %v8230_v25 = vld [vmem:[%s8400_s28 + $0x80] sm:$0xff]   ;;  %v8265_v27 = vld [vmem:[%s8400_s28 + $0x1d0] sm:$0xff]   ;;  %v8231_v28 = vld [vmem:[%s8400_s28 + $0x88] sm:$0xff]   ;;  %1697 = vst.msk [vmem:[#allocation2 + $0x90] sm:$0xff] %vm701_vm0, %v12804_v13 }
  0x1c   : > { %v8232_v29 = vld [vmem:[%s8400_s28 + $0x90] sm:$0xff]   ;;  %v8267_v30 = vld [vmem:[%s8400_s28 + $0x1d8] sm:$0xff]   ;;  %v8269_v31 = vld [vmem:[%s8400_s28 + $0x1e0] sm:$0xff]  }
  0x1d   : > { %v8233_v32 = vld [vmem:[%s8400_s28 + $0x98] sm:$0xff]   ;;  %v8234_v33 = vld [vmem:[%s8400_s28 + $0xa0] sm:$0xff]   ;;  %v8271_v34 = vld [vmem:[%s8400_s28 + $0x1e8] sm:$0xff]  }
  0x1e   : > { %7426 = vmatmul.mubr.msk.bf16.gmra.mrb[4].mxu0 %vm701_vm0, %v8217_v5  ;;  %v8273_v35 = vld [vmem:[%s8400_s28 + $0x1f0] sm:$0xff]   ;;  %v8235_v36 = vld [vmem:[%s8400_s28 + $0xa8] sm:$0xff]   ;;  %v8275_v38 = vld [vmem:[%s8400_s28 + $0x1f8] sm:$0xff]  }
  0x1f   : > { %7429 = vmatprep.mubr.msk.bf16.mxu0 %vm701_vm0, %v8218_v6  ;;  %v8236_v37 = vld [vmem:[%s8400_s28 + $0xb0] sm:$0xff]   ;;  %v8237_v39 = vld [vmem:[%s8400_s28 + $0xb8] sm:$0xff]   ;;  %v8238_v40 = vld [vmem:[%s8400_s28 + $0xc0] sm:$0xff]  }
  0x20   : > { %v8239_v41 = vld [vmem:[%s8400_s28 + $0xc8] sm:$0xff]   ;;  %v8240_v42 = vld [vmem:[%s8400_s28 + $0xd0] sm:$0xff]   ;;  %v8241_v43 = vld [vmem:[%s8400_s28 + $0xd8] sm:$0xff]  }
  0x21   : > { %7526 = vmatmul.mubr.msk.bf16.gmra.mrb[4].mxu1 %vm701_vm0, %v8255_v18  ;;  %v8242_v44 = vld [vmem:[%s8400_s28 + $0xe0] sm:$0xff]   ;;  %v8243_v45 = vld [vmem:[%s8400_s28 + $0xe8] sm:$0xff]   ;;  %v8244_v46 = vld [vmem:[%s8400_s28 + $0xf0] sm:$0xff]  }
  0x22   : > { %7529 = vmatprep.mubr.msk.bf16.mxu1 %vm701_vm0, %v8257_v19  ;;  %v8245_v47 = vld [vmem:[%s8400_s28 + $0xf8] sm:$0xff]   ;;  %v8246_v48 = vld [vmem:[%s8400_s28 + $0x100] sm:$0xff]   ;;  %v8247_v49 = vld [vmem:[%s8400_s28 + $0x108] sm:$0xff]  }
  0x23   : > { %v8248_v50 = vld [vmem:[%s8400_s28 + $0x110] sm:$0xff]   ;;  %v8250_v51 = vld [vmem:[%s8400_s28 + $0x118] sm:$0xff]   ;;  %v8252_v52 = vld [vmem:[%s8400_s28 + $0x120] sm:$0xff]  }
  0x24   : > { %v8254_v53 = vld [vmem:[%s8400_s28 + $0x128] sm:$0xff]   ;;  %v8256_v54 = vld [vmem:[%s8400_s28 + $0x130] sm:$0xff]   ;;  %v8258_v55 = vld [vmem:[%s8400_s28 + $0x138] sm:$0xff]  }
  0x25   : > { %v8260_v56 = vld [vmem:[%s8400_s28 + $0x140] sm:$0xff]   ;;  %v8262_v57 = vld [vmem:[%s8400_s28 + $0x148] sm:$0xff]   ;;  %v8264_v58 = vld [vmem:[%s8400_s28 + $0x150] sm:$0xff]  }
  0x26   : > { %7430 = vmatmul.mubr.msk.bf16.gmra.mrb[8].mxu0 %vm701_vm0, %v8219_v7  ;;  %v8266_v59 = vld [vmem:[%s8400_s28 + $0x158] sm:$0xff]   ;;  %v8268_v60 = vld [vmem:[%s8400_s28 + $0x160] sm:$0xff]   ;;  %v8270_v61 = vld [vmem:[%s8400_s28 + $0x168] sm:$0xff]  }
  0x27   : > { %7433 = vmatprep.mubr.msk.bf16.mxu0 %vm701_vm0, %v8220_v8  ;;  %v8272_v62 = vld [vmem:[%s8400_s28 + $0x170] sm:$0xff]   ;;  %v8274_v63 = vld [vmem:[%s8400_s28 + $0x178] sm:$0xff]   ;;  %v8276_v0 = vld [vmem:[%s8400_s28 + $0x180] sm:$0xff]  }
  0x28   : > { %v8277_v1 = vld [vmem:[%s8400_s28 + $0x188] sm:$0xff]   ;;  %s12686_s28 = scalar_lea.vmem %s12798_s5, %s7171_s25 }
  0x29   : > { %7530 = vmatmul.mubr.msk.bf16.gmra.mrb[8].mxu1 %vm701_vm0, %v8259_v22 }
  0x2a   : > { %7533 = vmatprep.mubr.msk.bf16.mxu1 %vm701_vm0, %v8261_v23 }
  0x2e   : > { %7434 = vmatmul.mubr.msk.bf16.gmra.mrb[12].mxu0 %vm701_vm0, %v8221_v9 }
  0x2f   : > { %7437 = vmatprep.mubr.msk.bf16.mxu0 %vm701_vm0, %v8222_v10 }
  0x31   : > { %7534 = vmatmul.mubr.msk.bf16.gmra.mrb[12].mxu1 %vm701_vm0, %v8263_v26  ;;  %v12802_v26 = vmov 0.0  }
  0x32   : > { %7537 = vmatprep.mubr.msk.bf16.mxu1 %vm701_vm0, %v8265_v27  ;;  %7693 = vmatprep.subr.bf16.mxu0 %v12802_v26  ;;  %v8278_v27 = vld [vmem:[%s12796_s3 + $0x20] sm:$0xff]  }
  0x33   : > { %7549 = vmatprep.subr.bf16.mxu1 %v12802_v26  ;;  %7694 = vmatpush3.bf16.msra.mxu0 %v8278_v27 }
  0x34   : > { %7695 = vmatprep.subr.bf16.mxu0 %v12802_v26 }
  0x36   : > { %7438 = vmatmul.mubr.msk.bf16.gmra.mrb[16].mxu0 %vm701_vm0, %v8223_v11 }
  0x37   : > { %7441 = vmatprep.mubr.msk.bf16.mxu0 %vm701_vm0, %v8224_v12 }
  0x39   : > { %7538 = vmatmul.mubr.msk.bf16.gmra.mrb[16].mxu1 %vm701_vm0, %v8267_v30  ;;  %v8279_v30 = vld [vmem:[%s12796_s3 + $0x10] sm:$0xff]  }
  0x3a   : > { %7541 = vmatprep.mubr.msk.bf16.mxu1 %vm701_vm0, %v8269_v31  ;;  %7550 = vmatpush3.bf16.msra.mxu1 %v8279_v30 }
  0x3b   : > { %7551 = vmatprep.subr.bf16.mxu1 %v12802_v26 }
  0x3e   : > { %7442 = vmatmul.mubr.msk.bf16.gmra.mrb[20].mxu0 %vm701_vm0, %v8225_v15 }
  0x3f   : > { %7445 = vmatprep.mubr.msk.bf16.mxu0 %vm701_vm0, %v8226_v17 }
  0x41   : > { %7542 = vmatmul.mubr.msk.bf16.gmra.mrb[20].mxu1 %vm701_vm0, %v8271_v34  ;;  %v1698_v34 = vlaneseq }
  0x42   : > { %7545 = vmatprep.mubr.msk.bf16.mxu1 %vm701_vm0, %v8273_v35 }
  0x46   : > { %7446 = vmatmul.mubr.msk.bf16.gmra.mrb[24].mxu0 %vm701_vm0, %v8227_v20 }
  0x47   : > { %7449 = vmatprep.mubr.msk.bf16.mxu0 %vm701_vm0, %v8228_v21 }
  0x49   : > { %7546 = vmatmul.mubr.msk.bf16.gmra.mrb[24].mxu1 %vm701_vm0, %v8275_v38 }
  0x4e   : > { %7450 = vmatmul.mubr.msk.bf16.gmra.mrb[28].mxu0 %vm701_vm0, %v8229_v24 }
  0x4f   : > { %7453 = vmatprep.mubr.msk.bf16.mxu0 %vm701_vm0, %v8230_v25 }
  0x56   : > { %7454 = vmatmul.mubr.msk.bf16.gmra.mrb[32].mxu0 %vm701_vm0, %v8231_v28 }
  0x57   : > { %7457 = vmatprep.mubr.msk.bf16.mxu0 %vm701_vm0, %v8232_v29 }
  0x5e   : > { %7458 = vmatmul.mubr.msk.bf16.gmra.mrb[36].mxu0 %vm701_vm0, %v8233_v32 }
  0x5f   : > { %7461 = vmatprep.mubr.msk.bf16.mxu0 %vm701_vm0, %v8234_v33 }
  0x66   : > { %7462 = vmatmul.mubr.msk.bf16.gmra.mrb[40].mxu0 %vm701_vm0, %v8235_v36 }
  0x67   : > { %7465 = vmatprep.mubr.msk.bf16.mxu0 %vm701_vm0, %v8236_v37 }
  0x6e   : > { %7466 = vmatmul.mubr.msk.bf16.gmra.mrb[44].mxu0 %vm701_vm0, %v8237_v39  ;;  %v8610_v39 = vshrl.u32 %v1698_v34, 7 }
  0x6f   : > { %7469 = vmatprep.mubr.msk.bf16.mxu0 %vm701_vm0, %v8238_v40 }
  0x76   : > { %7470 = vmatmul.mubr.msk.bf16.gmra.mrb[48].mxu0 %vm701_vm0, %v8239_v41 }
  0x77   : > { %7473 = vmatprep.mubr.msk.bf16.mxu0 %vm701_vm0, %v8240_v42  ;;  %v8617_v42 = vadd.s32 112, %v8610_v39 }
  0x79   : > { %13007 = vst [vmem:[#allocation4_spill] sm:$0xff] %v8617_v42 }
  0x7e   : > { %7474 = vmatmul.mubr.msk.bf16.gmra.mrb[52].mxu0 %vm701_vm0, %v8241_v43 }
  0x7f   : > { %7477 = vmatprep.mubr.msk.bf16.mxu0 %vm701_vm0, %v8242_v44 }
  0x86   : > { %7478 = vmatmul.mubr.msk.bf16.gmra.mrb[56].mxu0 %vm701_vm0, %v8243_v45  ;;  %v8624_v45 = vadd.s32 120, %v8610_v39 }
  0x87   : > { %7481 = vmatprep.mubr.msk.bf16.mxu0 %vm701_vm0, %v8244_v46 }
  0x88   : > { %13008 = vst [vmem:[#allocation5_spill] sm:$0xff] %v8624_v45 }
  0x8e   : > { %7482 = vmatmul.mubr.msk.bf16.gmra.mrb[60].mxu0 %vm701_vm0, %v8245_v47 }
  0x8f   : > { %7485 = vmatprep.mubr.msk.bf16.mxu0 %vm701_vm0, %v8246_v48  ;;  %v12800_v48 = vand.u32 7, %v8617_v42 }
  0x91   : > { %vm2189_vm1 = vcmp.lt.s32.totalorder %v12800_v48, 7 }
  0x92   : > { %vm3371_vm3 = vmpackc.low %vm2189_vm1, %vm2189_vm1 }
  0x96   : > { %7486 = vmatmul.mubr.msk.bf16.gmra.mrb[64].mxu0 %vm701_vm0, %v8247_v49  ;;  %v12799_v49 = vand.u32 7, %v8624_v45 }
  0x97   : > { %7489 = vmatprep.mubr.msk.bf16.mxu0 %vm701_vm0, %v8248_v50 }
  0x98   : > { %vm2190_vm2 = vcmp.lt.s32.totalorder %v12799_v49, 7 }
  0x99   : > { %vm3372_vm4 = vmpackc.low %vm2190_vm2, %vm2190_vm2 }
  0x9e   : > { %7490 = vmatmul.mubr.msk.bf16.gmra.mrb[68].mxu0 %vm701_vm0, %v8250_v51 }
  0x9f   : > { %7493 = vmatprep.mubr.msk.bf16.mxu0 %vm701_vm0, %v8252_v52 }
  0xa6   : > { %7494 = vmatmul.mubr.msk.bf16.gmra.mrb[72].mxu0 %vm701_vm0, %v8254_v53  ;;  %v8643_v53 = vadd.s32 128, %v8610_v39 }
  0xa7   : > { %7497 = vmatprep.mubr.msk.bf16.mxu0 %vm701_vm0, %v8256_v54 }
  0xa8   : > { %13009 = vst [vmem:[#allocation6_spill] sm:$0xff] %v8643_v53 }
  0xae   : > { %7498 = vmatmul.mubr.msk.bf16.gmra.mrb[76].mxu0 %vm701_vm0, %v8258_v55  ;;  %v3405_v55 = vsel %vm3371_vm3, 65537, %v12804_v13 }
  0xaf   : > { %7501 = vmatprep.mubr.msk.bf16.mxu0 %vm701_vm0, %v8260_v56  ;;  %v8649_v56 = vadd.s32 136, %v8610_v39 }
  0xb1   : > { %13010 = vst [vmem:[#allocation7_spill] sm:$0xff] %v8649_v56 }
  0xb6   : > { %7502 = vmatmul.mubr.msk.bf16.gmra.mrb[80].mxu0 %vm701_vm0, %v8262_v57 }
  0xb7   : > { %7505 = vmatprep.mubr.msk.bf16.mxu0 %vm701_vm0, %v8264_v58  ;;  %v3406_v58 = vsel %vm3372_vm4, 65537, %v12804_v13 }
  0xbe   : > { %7506 = vmatmul.mubr.msk.bf16.gmra.mrb[84].mxu0 %vm701_vm0, %v8266_v59  ;;  %v8657_v59 = vld [vmem:[%s12795_s2] ss:$0 sm:$0xff] }
  0xbf   : > { %7509 = vmatprep.mubr.msk.bf16.mxu0 %vm701_vm0, %v8268_v60 }
  0xc6   : > { %7510 = vmatmul.mubr.msk.bf16.gmra.mrb[88].mxu0 %vm701_vm0, %v8270_v61  ;;  %v8661_v61 = vcombine.low %v3405_v55, %v3406_v58 }
  0xc7   : > { %7513 = vmatprep.mubr.msk.bf16.mxu0 %vm701_vm0, %v8272_v62 }
  0xc8   : > { %13011 = vst [vmem:[#allocation8_spill] sm:$0xff] %v8661_v61  ;;  %v12810_v27 = vshrl.u32 %v8661_v61, 16  ;;  %v12814_v13 = vshll.u32 %v8661_v61, 16 }
  0xce   : > { %7514 = vmatmul.mubr.msk.bf16.gmra.mrb[92].mxu0 %vm701_vm0, %v8274_v63  ;;  %v12801_v63 = vand.u32 7, %v8643_v53 }
  0xcf   : > { %7517 = vmatprep.mubr.msk.bf16.mxu0 %vm701_vm0, %v8276_v0  ;;  %v12807_v0 = vand.u32 7, %v8649_v56 }
  0xd0   : > { %vm8676_vm5 = vcmp.lt.s32.totalorder %v12801_v63, 7 }
  0xd1   : > { %vm8688_vm6 = vcmp.lt.s32.totalorder %v12807_v0, 7  ;;  %vm3373_vm7 = vmpackc.low %vm8676_vm5, %vm8676_vm5 }
  0xd2   : > { %vm3374_vm8 = vmpackc.low %vm8688_vm6, %vm8688_vm6 }
  0xd6   : > { %7518 = vmatmul.mubr.msk.bf16.gmra.mrb[96].mxu0 %vm701_vm0, %v8277_v1 }
  0xe9   : > { %v8530_v2 = vpop.f32.mrb[0].mxu0 }
  0xea   : > { %v8532_v3 = vpop.f32.mrb[1].mxu0  ;;  %v937_v30 = vadd.f32 %v8530_v2, %v8657_v59 }
  0xeb   : > { %v8534_v4 = vpop.f32.mrb[2].mxu0  ;;  %v929_v58 = vadd.f32 %v8657_v59, %v8532_v3  ;;  %v8697_v3 = vrot.slane %v12810_v27, 7 }
  0xec   : > { %v8536_v5 = vpop.f32.mrb[3].mxu0  ;;  %v8576_v23 = vpop.f32.mrb[0].mxu1  ;;  %v940_v49 = vadd.f32 %v8534_v4, %v8657_v59  ;;  %v1441_v0 = vmax.f32 %v937_v30, 0.0 }
  0xed   : > { %v8578_v24 = vpop.f32.mrb[1].mxu1  ;;  %v932_v63 = vadd.f32 %v8657_v59, %v8536_v5  ;;  %13020 = vst [vmem:[#allocation13_spill] sm:$0xff] %v8697_v3  ;;  %v8707_v5 = vor.u32 %v8697_v3, %v12814_v13  ;;  %v1439_v27 = vmax.f32 %v929_v58, 0.0  ;;  %v13025_v58 = vmov 0  }
  0xee   : > { %v8580_v25 = vpop.f32.mrb[2].mxu1 }
  0xef   : > { %v8587_v28 = vpop.f32.mrb[3].mxu1  ;;  %13021 = vst [vmem:[#allocation14_spill] sm:$0xff] %v8707_v5 }
  0xf1   : > { %v8538_v6 = vpop.f32.mrb[4].mxu0 }
  0xf2   : > { %v8540_v7 = vpop.f32.mrb[5].mxu0 }
  0xf3   : > { %v8542_v8 = vpop.f32.mrb[6].mxu0 }
  0xf4   : > { %v8544_v9 = vpop.f32.mrb[7].mxu0  ;;  %v8602_v35 = vpop.f32.mrb[4].mxu1 }
  0xf5   : > { %v8604_v36 = vpop.f32.mrb[5].mxu1 }
  0xf6   : > { %v8606_v37 = vpop.f32.mrb[6].mxu1 }
  0xf7   : > { %v8608_v38 = vpop.f32.mrb[7].mxu1 }
  0xf9   : > { %v8546_v10 = vpop.f32.mrb[8].mxu0 }
  0xfa   : > { %v8548_v11 = vpop.f32.mrb[9].mxu0 }
  0xfb   : > { %v8550_v12 = vpop.f32.mrb[10].mxu0 }
  0xfc   : > { %v8558_v14 = vpop.f32.mrb[11].mxu0  ;;  %v8626_v46 = vpop.f32.mrb[8].mxu1 }
  0xfd   : > { %v8628_v47 = vpop.f32.mrb[9].mxu1 }
  0xfe   : > { %v8632_v50 = vpop.f32.mrb[10].mxu1 }
  0xff   : > { %v8634_v51 = vpop.f32.mrb[11].mxu1 }
 0x101   : > { %v8560_v15 = vpop.f32.mrb[12].mxu0 }
 0x102   : > { %v8562_v16 = vpop.f32.mrb[13].mxu0 }
 0x103   : > { %v8564_v17 = vpop.f32.mrb[14].mxu0 }
 0x104   : > { %v8566_v18 = vpop.f32.mrb[15].mxu0  ;;  %v8663_v62 = vpop.f32.mrb[12].mxu1 }
 0x105   : > { %13012 = vst [vmem:[#allocation9_spill] sm:$0xff] %v8663_v62  ;;  %v8667_v1 = vpop.f32.mrb[13].mxu1 }
 0x106   : > { %13013 = vst [vmem:[#allocation10_spill] sm:$0xff] %v8667_v1  ;;  %v8672_v34 = vpop.f32.mrb[14].mxu1  ;;  %v1440_v1 = vmax.f32 %v932_v63, 0.0 }
 0x107   : > { %13014 = vst [vmem:[#allocation11_spill] sm:$0xff] %v8672_v34  ;;  %v8684_v48 = vpop.f32.mrb[15].mxu1 }
 0x108   : > { %13017 = vst [vmem:[#allocation12_spill] sm:$0xff] %v8684_v48 }
 0x109   : > { %v8568_v19 = vpop.f32.mrb[16].mxu0 }
 0x10a   : > { %v8570_v20 = vpop.f32.mrb[17].mxu0 }
 0x10b   : > { %v8572_v21 = vpop.f32.mrb[18].mxu0 }
 0x10c   : > { %v8574_v22 = vpop.f32.mrb[19].mxu0  ;;  %v8716_v62 = vpop.f32.mrb[16].mxu1 }
 0x10d   : > { %13022 = vst [vmem:[#allocation15_spill] sm:$0xff] %v8716_v62  ;;  %v8720_v3 = vpop.f32.mrb[17].mxu1 }
 0x10e   : > { %13024 = vst [vmem:[#allocation17_spill] sm:$0xff] %v8720_v3  ;;  %v8735_v63 = vpop.f32.mrb[18].mxu1 }
 0x10f   : > { %13027 = vst [vmem:[#allocation19_spill] sm:$0xff] %v8735_v63 }
 0x111   : > { %v8589_v29 = vpop.f32.mrb[20].mxu0 }
 0x112   : > { %v8594_v31 = vpop.f32.mrb[21].mxu0 }
 0x113   : > { %v8597_v32 = vpop.f32.mrb[22].mxu0 }
 0x114   : > { %v8599_v33 = vpop.f32.mrb[23].mxu0 }
 0x119   : > { %v8612_v40 = vpop.f32.mrb[24].mxu0 }
 0x11a   : > { %v8614_v41 = vpop.f32.mrb[25].mxu0 }
 0x11b   : > { %v8619_v43 = vpop.f32.mrb[26].mxu0 }
 0x11c   : > { %v8621_v44 = vpop.f32.mrb[27].mxu0 }
 0x121   : > { %v8640_v52 = vpop.f32.mrb[28].mxu0 }
 0x122   : > { %v8645_v54 = vpop.f32.mrb[29].mxu0 }
 0x123   : > { %v8651_v57 = vpop.f32.mrb[30].mxu0 }
 0x124   : > { %v8659_v60 = vpop.f32.mrb[31].mxu0 }
 0x129   : > { %v7455_v26 = vpop.f32.mrb[32].mxu0 }
 0x12a   : > { %v1065_v4 = vadd.f32 %v7455_v26, %v8657_v59  ;;  %v1056_v53 = vpop.f32.mrb[33].mxu0  ;;  %v1442_v26 = vmax.f32 %v940_v49, 0.0  ;;  %v3408_v49 = vsel %vm3374_vm8, 65537, %v13025_v58 }
 0x12b   : > { %v1057_v56 = vadd.f32 %v8657_v59, %v1056_v53  ;;  %v7456_v45 = vpop.f32.mrb[34].mxu0  ;;  %v953_v53 = vadd.f32 %v8538_v6, %v8657_v59  ;;  %v945_v6 = vadd.f32 %v8657_v59, %v8540_v7 }
 0x12c   : > { %v1473_v42 = vmax.f32 %v1065_v4, 0.0  ;;  %v1068_v48 = vadd.f32 %v7456_v45, %v8657_v59  ;;  %v1059_v34 = vpop.f32.mrb[35].mxu0  ;;  %v3407_v45 = vsel %vm3373_vm7, 65537, %v13025_v58  ;;  %v8744_v4 = vpop.f32.mrb[19].mxu1 }
 0x12d   : > { %v1471_v30 = vmax.f32 %v1057_v56, 0.0  ;;  %v1060_v61 = vadd.f32 %v8657_v59, %v1059_v34  ;;  %v956_v56 = vadd.f32 %v8542_v8, %v8657_v59  ;;  %v948_v34 = vadd.f32 %v8657_v59, %v8544_v9  ;;  %13029 = vst [vmem:[#allocation21_spill] sm:$0xff] %v8744_v4 }
 0x12e   : > { %v8718_v13 = vmax.f32 %v1441_v0, %v1473_v42  ;;  %v1474_v2 = vmax.f32 %v1068_v48, 0.0  ;;  %v8280_v0 = vld [vmem:[%s12796_s3 + $0x18] sm:$0xff]   ;;  %v8748_v8 = vcombine.low %v3407_v45, %v3408_v49 }
 0x12f   : > { %v8733_v42 = vmax.f32 %v1439_v27, %v1471_v30  ;;  %v1472_v48 = vmax.f32 %v1060_v61, 0.0  ;;  %7552 = vmatpush3.bf16.msra.mxu1 %v8280_v0  ;;  %v13032_v30 = vmov 0.0   ;;  %v1446_v63 = vmax.f32 %v956_v56, 0.0 }
 0x130   : > { %13023 = vst [vmem:[#allocation16_spill] sm:$0xff] %v8718_v13  ;;  %v8742_v55 = vmax.f32 %v1442_v26, %v1474_v2  ;;  %13031 = vst [vmem:[#allocation23_spill] sm:$0xff] %v8748_v8  ;;  %7621 = vmatprep.subr.bf16.mxu1 %v13032_v30  ;;  %v1443_v13 = vmax.f32 %v945_v6, 0.0  ;;  %v1444_v2 = vmax.f32 %v948_v34, 0.0  ;;  %v12816_v6 = vshrl.u32 %v8748_v8, 16  ;;  %7553 = vmatprep.mubr.msk.bf16.mxu1 %vm8349_vm9, %v13032_v30 }
 0x131   : > { %13026 = vst [vmem:[#allocation18_spill] sm:$0xff] %v8733_v42  ;;  %v8746_v7 = vmax.f32 %v1440_v1, %v1472_v48  ;;  %v7459_v5 = vpop.f32.mrb[36].mxu0  ;;  %v1445_v42 = vmax.f32 %v953_v53, 0.0  ;;  %v969_v1 = vadd.f32 %v8546_v10, %v8657_v59  ;;  %v8759_v53 = vpop.f32.mrb[20].mxu1  ;;  %v972_v56 = vadd.f32 %v8550_v12, %v8657_v59  ;;  %7697 = vmatprep.mubr.msk.bf16.mxu0 %vm8349_vm9, %v13032_v30 }
 0x132   : > { %13028 = vst [vmem:[#allocation20_spill] sm:$0xff] %v8742_v55  ;;  %v1081_v61 = vadd.f32 %v7459_v5, %v8657_v59  ;;  %v1072_v27 = vpop.f32.mrb[37].mxu0  ;;  %v961_v5 = vadd.f32 %v8657_v59, %v8548_v11  ;;  %13033 = vst [vmem:[#allocation24_spill] sm:$0xff] %v8759_v53  ;;  %v964_v10 = vadd.f32 %v8657_v59, %v8558_v14 }
 0x133   : > { %13030 = vst [vmem:[#allocation22_spill] sm:$0xff] %v8746_v7  ;;  %v1073_v9 = vadd.f32 %v8657_v59, %v1072_v27  ;;  %v7460_v26 = vpop.f32.mrb[38].mxu0  ;;  %v8768_v27 = vpop.f32.mrb[21].mxu1 }
 0x134   : > { %v1477_v48 = vmax.f32 %v1081_v61, 0.0  ;;  %v1084_v0 = vadd.f32 %v7460_v26, %v8657_v59  ;;  %v1075_v45 = vpop.f32.mrb[39].mxu0  ;;  %13034 = vst [vmem:[#allocation25_spill] sm:$0xff] %v8768_v27 }
 0x135   : > { %v1475_v49 = vmax.f32 %v1073_v9, 0.0  ;;  %v1076_v7 = vadd.f32 %v8657_v59, %v1075_v45  ;;  %v8772_v9 = vpop.f32.mrb[22].mxu1  ;;  %v8776_v45 = vrot.slane %v12816_v6, 7 }
 0x136   : > { %v8766_v34 = vmax.f32 %v1445_v42, %v1477_v48  ;;  %v1478_v61 = vmax.f32 %v1084_v0, 0.0  ;;  %13035 = vst [vmem:[#allocation26_spill] sm:$0xff] %v8772_v9  ;;  %v8780_v12 = vpop.f32.mrb[23].mxu1  ;;  %v8789_v42 = vadd.s32 16, %v8610_v39  ;;  %v1449_v48 = vmax.f32 %v969_v1, 0.0 }
 0x137   : > { %v8770_v26 = vmax.f32 %v1443_v13, %v1475_v49  ;;  %v1476_v11 = vmax.f32 %v1076_v7, 0.0  ;;  %13036 = vst [vmem:[#allocation27_spill] sm:$0xff] %v8776_v45  ;;  %13037 = vst [vmem:[#allocation28_spill] sm:$0xff] %v8780_v12  ;;  %v8792_v7 = vadd.s32 24, %v8610_v39  ;;  %v1447_v0 = vmax.f32 %v961_v5, 0.0 }
 0x138   : > { %v8778_v55 = vmax.f32 %v1446_v63, %v1478_v61  ;;  %13038 = vst [vmem:[#allocation29_spill] sm:$0xff] %v8789_v42  ;;  %v12819_v63 = vshll.u32 %v8748_v8, 16  ;;  %v1450_v49 = vmax.f32 %v972_v56, 0.0  ;;  %v1448_v12 = vmax.f32 %v964_v10, 0.0  ;;  %v8813_v8 = vpop.f32.mrb[24].mxu1 }
 0x139   : > { %v8786_v13 = vmax.f32 %v1444_v2, %v1476_v11  ;;  %v7463_v14 = vpop.f32.mrb[40].mxu0  ;;  %v985_v2 = vadd.f32 %v8560_v15, %v8657_v59  ;;  %v977_v1 = vadd.f32 %v8657_v59, %v8562_v16  ;;  %v8808_v10 = vadd.s32 144, %v8610_v39  ;;  %13041 = vst [vmem:[#allocation32_spill] sm:$0xff] %v8813_v8 }
 0x13a   : > { %v1097_v61 = vadd.f32 %v7463_v14, %v8657_v59  ;;  %v1088_v6 = vpop.f32.mrb[41].mxu0  ;;  %v8802_v27 = vor.u32 %v8776_v45, %v12819_v63  ;;  %v988_v15 = vadd.f32 %v8564_v17, %v8657_v59  ;;  %v8816_v63 = vadd.s32 152, %v8610_v39 }
 0x13b   : > { %v1089_v11 = vadd.f32 %v8657_v59, %v1088_v6  ;;  %v7464_v9 = vpop.f32.mrb[42].mxu0  ;;  %13040 = vst [vmem:[#allocation31_spill] sm:$0xff] %v8808_v10  ;;  %v980_v16 = vadd.f32 %v8657_v59, %v8566_v18  ;;  %v8830_v17 = vadd.f32 %v8657_v59, %v8570_v20  ;;  %v8849_v20 = vadd.s32 32, %v8610_v39 }
 0x13c   : > { %13039 = vst [vmem:[#allocation30_spill] sm:$0xff] %v8802_v27  ;;  %v1481_v5 = vmax.f32 %v1097_v61, 0.0  ;;  %v1100_v56 = vadd.f32 %v7464_v9, %v8657_v59  ;;  %v1091_v14 = vpop.f32.mrb[43].mxu0  ;;  %13042 = vst [vmem:[#allocation33_spill] sm:$0xff] %v8816_v63  ;;  %v8822_v9 = vadd.f32 %v8568_v19, %v8657_v59  ;;  %v8826_v27 = vpop.f32.mrb[25].mxu1  ;;  %v8842_v19 = vadd.f32 %v8657_v59, %v8574_v22 }
 0x13d   : > { %v1479_v6 = vmax.f32 %v1089_v11, 0.0  ;;  %v1092_v53 = vadd.f32 %v8657_v59, %v1091_v14  ;;  %13043 = vst [vmem:[#allocation34_spill] sm:$0xff] %v8826_v27  ;;  %v8834_v11 = vadd.f32 %v8572_v21, %v8657_v59  ;;  %v8838_v8 = vpop.f32.mrb[26].mxu1  ;;  %v1453_v21 = vmax.f32 %v985_v2, 0.0 }
 0x13e   : > { %v8824_v61 = vmax.f32 %v1449_v48, %v1481_v5  ;;  %v1482_v45 = vmax.f32 %v1100_v56, 0.0  ;;  %13044 = vst [vmem:[#allocation35_spill] sm:$0xff] %v8838_v8  ;;  %v8846_v5 = vpop.f32.mrb[27].mxu1  ;;  %v1451_v27 = vmax.f32 %v977_v1, 0.0  ;;  %v1454_v8 = vmax.f32 %v988_v15, 0.0 }
 0x13f   : > { %v8836_v14 = vmax.f32 %v1447_v0, %v1479_v6  ;;  %v1480_v18 = vmax.f32 %v1092_v53, 0.0  ;;  %13045 = vst [vmem:[#allocation36_spill] sm:$0xff] %v8846_v5  ;;  %v1452_v4 = vmax.f32 %v980_v16, 0.0  ;;  %v1457_v22 = vmax.f32 %v8822_v9, 0.0  ;;  %v8282_v5 = vld [vmem:[%s12796_s3 + $0x28] sm:$0xff]  }
 0x140   : > { %v8844_v48 = vmax.f32 %v1450_v49, %v1482_v45  ;;  %v1455_v56 = vmax.f32 %v8830_v17, 0.0  ;;  %7696 = vmatpush3.bf16.msra.mxu0 %v8282_v5  ;;  %v13046_v6 = vand.u32 7, %v8808_v10  ;;  %v8873_v17 = vadd.f32 %v8657_v59, %v8594_v31 }
 0x141   : > { %v8852_v0 = vmax.f32 %v1448_v12, %v1480_v18  ;;  %v7467_v53 = vpop.f32.mrb[44].mxu0  ;;  %v8864_v12 = vadd.f32 %v8589_v29, %v8657_v59  ;;  %7837 = vmatprep.subr.bf16.mxu0 %v13032_v30 }
 0x142   : > { %v1113_v45 = vadd.f32 %v7467_v53, %v8657_v59  ;;  %v1104_v49 = vpop.f32.mrb[45].mxu0  ;;  %vm2193_vm10 = vcmp.lt.s32.totalorder %v13046_v6, 7  ;;  %v8883_v6 = vadd.s32 160, %v8610_v39 }
 0x143   : > { %v1105_v1 = vadd.f32 %v8657_v59, %v1104_v49  ;;  %v7468_v15 = vpop.f32.mrb[46].mxu0  ;;  %v13047_v49 = vand.u32 7, %v8816_v63  ;;  %vm3375_vm12 = vmpackc.low %vm2193_vm10, %vm2193_vm10 }
 0x144   : > { %v1485_v9 = vmax.f32 %v1113_v45, 0.0  ;;  %v1116_v18 = vadd.f32 %v7468_v15, %v8657_v59  ;;  %v1107_v53 = vpop.f32.mrb[47].mxu0  ;;  %v3409_v5 = vsel %vm3375_vm12, 65537, %v13025_v58  ;;  %13048 = vst [vmem:[#allocation37_spill] sm:$0xff] %v8883_v6  ;;  %v13054_v30 = vand.u32 7, %v8883_v6 }
 0x145   : > { %v1483_v2 = vmax.f32 %v1105_v1, 0.0  ;;  %v1108_v29 = vadd.f32 %v8657_v59, %v1107_v53  ;;  %vm2194_vm11 = vcmp.lt.s32.totalorder %v13047_v49, 7 }
 0x146   : > { %v8879_v45 = vmax.f32 %v1453_v21, %v1485_v9  ;;  %v1486_v15 = vmax.f32 %v1116_v18, 0.0  ;;  %vm3376_vm13 = vmpackc.low %vm2194_vm11, %vm2194_vm11  ;;  %v8894_v21 = vadd.s32 168, %v8610_v39  ;;  %v8899_v18 = vadd.f32 %v8597_v32, %v8657_v59 }
 0x147   : > { %v8886_v1 = vmax.f32 %v1451_v27, %v1483_v2  ;;  %v1484_v53 = vmax.f32 %v1108_v29, 0.0  ;;  %v3410_v16 = vsel %vm3376_vm13, 65537, %v13025_v58  ;;  %v8904_v2 = vadd.s32 176, %v8610_v39 }
 0x148   : > { %v8889_v49 = vmax.f32 %v1454_v8, %v1486_v15  ;;  %v8891_v63 = vcombine.low %v3409_v5, %v3410_v16  ;;  %13050 = vst [vmem:[#allocation39_spill] sm:$0xff] %v8894_v21  ;;  %v8907_v8 = vadd.s32 184, %v8610_v39  ;;  %v8915_v32 = vadd.f32 %v8657_v59, %v8599_v33 }
 0x149   : > { %v8901_v10 = vmax.f32 %v1452_v4, %v1484_v53  ;;  %v7471_v27 = vpop.f32.mrb[48].mxu0  ;;  %13052 = vst [vmem:[#allocation41_spill] sm:$0xff] %v8904_v2  ;;  %vm2195_vm14 = vcmp.lt.s32.totalorder %v13054_v30, 7  ;;  %v13057_v9 = vand.u32 7, %v8894_v21  ;;  %v8935_v5 = vadd.s32 192, %v8610_v39 }
 0x14a   : > { %13049 = vst [vmem:[#allocation38_spill] sm:$0xff] %v8891_v63  ;;  %13053 = vst [vmem:[#allocation42_spill] sm:$0xff] %v8907_v8  ;;  %v1129_v29 = vadd.f32 %v7471_v27, %v8657_v59  ;;  %v1120_v15 = vpop.f32.mrb[49].mxu0  ;;  %v13064_v6 = vand.u32 7, %v8904_v2 }
 0x14b   : > { %13051 = vst [vmem:[#allocation40_spill] sm:$0xff] %v8901_v10  ;;  %v1121_v4 = vadd.f32 %v8657_v59, %v1120_v15  ;;  %v7472_v53 = vpop.f32.mrb[50].mxu0  ;;  %vm3377_vm15 = vmpackc.low %vm2195_vm14, %vm2195_vm14  ;;  %v13055_v15 = vshrl.u32 %v8891_v63, 16  ;;  %vm2196_vm1 = vcmp.lt.s32.totalorder %v13057_v9, 7  ;;  %v13061_v9 = vmax.f32 %v8834_v11, 0.0 }
 0x14c   : > { %v1489_v16 = vmax.f32 %v1129_v29, 0.0  ;;  %v1132_v27 = vadd.f32 %v7472_v53, %v8657_v59  ;;  %v1123_v3 = vpop.f32.mrb[51].mxu0  ;;  %vm3378_vm2 = vmpackc.low %vm2196_vm1, %vm2196_vm1  ;;  %v3411_v53 = vsel %vm3377_vm15, 65537, %v13025_v58  ;;  %13058 = vst [vmem:[#allocation44_spill] sm:$0xff] %v8935_v5  ;;  %vm2197_vm3 = vcmp.lt.s32.totalorder %v13064_v6, 7 }
 0x14d   : > { %v1487_v62 = vmax.f32 %v1121_v4, 0.0  ;;  %v1124_v33 = vadd.f32 %v8657_v59, %v1123_v3  ;;  %v8927_v10 = vrot.slane %v13055_v15, 7  ;;  %v13059_v3 = vshll.u32 %v8891_v63, 16  ;;  %vm3379_vm5 = vmpackc.low %vm2197_vm3, %vm2197_vm3 }
 0x14e   : > { %v8931_v30 = vmax.f32 %v1457_v22, %v1489_v16  ;;  %v1490_v29 = vmax.f32 %v1132_v27, 0.0  ;;  %v3412_v21 = vsel %vm3378_vm2, 65537, %v13025_v58  ;;  %v1462_v22 = vmax.f32 %v8899_v18, 0.0 }
 0x14f   : > { %13056 = vst [vmem:[#allocation43_spill] sm:$0xff] %v8927_v10  ;;  %v8937_v31 = vmax.f32 %v1455_v56, %v1487_v62  ;;  %v1488_v4 = vmax.f32 %v1124_v33, 0.0  ;;  %v8942_v15 = vor.u32 %v8927_v10, %v13059_v3  ;;  %v8950_v27 = vcombine.low %v3411_v53, %v3412_v21 }
 0x150   : > { %v8948_v16 = vmax.f32 %v13061_v9, %v1490_v29  ;;  %v1460_v62 = vmax.f32 %v8915_v32, 0.0  ;;  %v13065_v56 = vmax.f32 %v8842_v19, 0.0  ;;  %v13067_v10 = vand.u32 7, %v8907_v8 }
 0x151   : > { %13060 = vst [vmem:[#allocation45_spill] sm:$0xff] %v8942_v15  ;;  %13063 = vst [vmem:[#allocation47_spill] sm:$0xff] %v8950_v27  ;;  %v7475_v3 = vpop.f32.mrb[52].mxu0  ;;  %v8962_v11 = vadd.s32 200, %v8610_v39  ;;  %v1033_v21 = vadd.f32 %v8612_v40, %v8657_v59  ;;  %v8968_v6 = vadd.f32 %v8657_v59, %v8614_v41  ;;  %v3413_v32 = vsel %vm3379_vm5, 65537, %v13025_v58 }
 0x152   : > { %13062 = vst [vmem:[#allocation46_spill] sm:$0xff] %v8948_v16  ;;  %v8957_v33 = vmax.f32 %v13065_v56, %v1488_v4  ;;  %vm2198_vm4 = vcmp.lt.s32.totalorder %v13067_v10, 7  ;;  %v1145_v18 = vadd.f32 %v7475_v3, %v8657_v59  ;;  %v1136_v19 = vpop.f32.mrb[53].mxu0  ;;  %v12831_v53 = vshrl.u32 %v8950_v27, 16 }
 0x153   : > { %13068 = vst [vmem:[#allocation49_spill] sm:$0xff] %v8962_v11  ;;  %vm3380_vm6 = vmpackc.low %vm2198_vm4, %vm2198_vm4  ;;  %v1137_v29 = vadd.f32 %v8657_v59, %v1136_v19  ;;  %v7476_v10 = vpop.f32.mrb[54].mxu0  ;;  %v12832_v3 = vand.u32 7, %v8962_v11  ;;  %v13071_v9 = vmax.f32 %v8864_v12, 0.0  ;;  %v13072_v16 = vand.u32 7, %v8935_v5 }
 0x154   : > { %13066 = vst [vmem:[#allocation48_spill] sm:$0xff] %v8957_v33  ;;  %v3414_v4 = vsel %vm3380_vm6, 65537, %v13025_v58  ;;  %v1493_v40 = vmax.f32 %v1145_v18, 0.0  ;;  %v1148_v56 = vadd.f32 %v7476_v10, %v8657_v59  ;;  %v1139_v41 = vpop.f32.mrb[55].mxu0  ;;  %v8982_v19 = vrot.slane %v12831_v53, 7 }
 0x155   : > { %v1491_v8 = vmax.f32 %v1137_v29, 0.0  ;;  %v1140_v2 = vadd.f32 %v8657_v59, %v1139_v41  ;;  %v8984_v63 = vcombine.low %v3413_v32, %v3414_v4  ;;  %v1465_v33 = vmax.f32 %v1033_v21, 0.0 }
 0x156   : > { %13069 = vst [vmem:[#allocation50_spill] sm:$0xff] %v8982_v19  ;;  %v8988_v18 = vmax.f32 %v13071_v9, %v1493_v40  ;;  %v1494_v10 = vmax.f32 %v1148_v56, 0.0  ;;  %vm8992_vm7 = vcmp.lt.s32.totalorder %v13072_v16, 7  ;;  %v13075_v29 = vmax.f32 %v8873_v17, 0.0 }
 0x157   : > { %13070 = vst [vmem:[#allocation51_spill] sm:$0xff] %v8984_v63  ;;  %v1492_v53 = vmax.f32 %v1140_v2, 0.0  ;;  %v13076_v32 = vshll.u32 %v8950_v27, 16  ;;  %v12833_v12 = vshrl.u32 %v8984_v63, 16  ;;  %vm3381_vm8 = vmpackc.low %vm8992_vm7, %vm8992_vm7  ;;  %v1463_v16 = vmax.f32 %v8968_v6, 0.0 }
 0x158   : > { %v8998_v41 = vmax.f32 %v13075_v29, %v1491_v8  ;;  %v1036_v4 = vadd.f32 %v8619_v43, %v8657_v59  ;;  %v9012_v17 = vmax.f32 %v1462_v22, %v1494_v10  ;;  %vm2200_vm10 = vcmp.lt.s32.totalorder %v12832_v3, 7 }
 0x159   : > { %v9003_v21 = vor.u32 %v8982_v19, %v13076_v32  ;;  %v1028_v2 = vadd.f32 %v8657_v59, %v8621_v44  ;;  %v9018_v8 = vmax.f32 %v1460_v62, %v1492_v53  ;;  %v7479_v9 = vpop.f32.mrb[56].mxu0  ;;  %v12836_v15 = vshll.u32 %v8984_v63, 16  ;;  %vm3382_vm11 = vmpackc.low %vm2200_vm10, %vm2200_vm10 }
 0x15a   : > { %v9023_v40 = vrot.slane %v12833_v12, 7  ;;  %v1049_v43 = vadd.f32 %v8640_v52, %v8657_v59  ;;  %v1161_v22 = vadd.f32 %v7479_v9, %v8657_v59  ;;  %v1152_v6 = vpop.f32.mrb[57].mxu0  ;;  %v3415_v56 = vsel %vm3381_vm8, 65537, %v13025_v58 }
 0x15b   : > { %13077 = vst [vmem:[#allocation52_spill] sm:$0xff] %v9003_v21  ;;  %v3416_v44 = vsel %vm3382_vm11, 65537, %v13025_v58  ;;  %v1153_v62 = vadd.f32 %v8657_v59, %v1152_v6  ;;  %v7480_v53 = vpop.f32.mrb[58].mxu0  ;;  %v9039_v32 = vadd.s32 208, %v8610_v39  ;;  %v1466_v52 = vmax.f32 %v1036_v4, 0.0 }
 0x15c   : > { %13078 = vst [vmem:[#allocation53_spill] sm:$0xff] %v9023_v40  ;;  %v9034_v10 = vor.u32 %v9023_v40, %v12836_v15  ;;  %v9036_v29 = vcombine.low %v3415_v56, %v3416_v44  ;;  %v1497_v9 = vmax.f32 %v1161_v22, 0.0  ;;  %v1164_v3 = vadd.f32 %v7480_v53, %v8657_v59  ;;  %v1155_v12 = vpop.f32.mrb[59].mxu0 }
 0x15d   : > { %13081 = vst [vmem:[#allocation56_spill] sm:$0xff] %v9039_v32  ;;  %v9043_v19 = vadd.s32 216, %v8610_v39  ;;  %v1464_v6 = vmax.f32 %v1028_v2, 0.0  ;;  %v1041_v21 = vadd.f32 %v8657_v59, %v8645_v54  ;;  %v1495_v11 = vmax.f32 %v1153_v62, 0.0 }
 0x15e   : > { %13079 = vst [vmem:[#allocation54_spill] sm:$0xff] %v9034_v10  ;;  %13080 = vst [vmem:[#allocation55_spill] sm:$0xff] %v9036_v29  ;;  %v1156_v15 = vadd.f32 %v8657_v59, %v1155_v12  ;;  %v9048_v56 = vmax.f32 %v1465_v33, %v1497_v9  ;;  %v1498_v44 = vmax.f32 %v1164_v3, 0.0  ;;  %v12840_v40 = vshrl.u32 %v9036_v29, 16 }
 0x15f   : > { %13082 = vst [vmem:[#allocation57_spill] sm:$0xff] %v9043_v19  ;;  %v12839_v4 = vand.u32 7, %v9039_v32  ;;  %v1469_v22 = vmax.f32 %v1049_v43, 0.0  ;;  %v1052_v53 = vadd.f32 %v8651_v57, %v8657_v59  ;;  %v9054_v10 = vmax.f32 %v1463_v16, %v1495_v11 }
 0x160   : > { %v1496_v2 = vmax.f32 %v1156_v15, 0.0  ;;  %v9056_v5 = vmax.f32 %v1466_v52, %v1498_v44  ;;  %v12841_v54 = vshll.u32 %v9036_v29, 16  ;;  %v9061_v33 = vrot.slane %v12840_v40, 7 }
 0x161   : > { %v12843_v3 = vand.u32 7, %v9043_v19  ;;  %v7483_v62 = vpop.f32.mrb[60].mxu0  ;;  %vm2201_vm12 = vcmp.lt.s32.totalorder %v12839_v4, 7  ;;  %v9069_v57 = vadd.s32 224, %v8610_v39  ;;  %v9072_v11 = vadd.s32 232, %v8610_v39 }
 0x162   : > { %13083 = vst [vmem:[#allocation58_spill] sm:$0xff] %v9061_v33  ;;  %v9064_v12 = vmax.f32 %v1464_v6, %v1496_v2  ;;  %v1044_v16 = vadd.f32 %v8657_v59, %v8659_v60  ;;  %v1177_v15 = vadd.f32 %v7483_v62, %v8657_v59  ;;  %v1168_v43 = vpop.f32.mrb[61].mxu0  ;;  %v9080_v52 = vor.u32 %v9061_v33, %v12841_v54  ;;  %vm3383_vm14 = vmpackc.low %vm2201_vm12, %vm2201_vm12 }
 0x163   : > { %13084 = vst [vmem:[#allocation59_spill] sm:$0xff] %v9069_v57  ;;  %13085 = vst [vmem:[#allocation60_spill] sm:$0xff] %v9072_v11  ;;  %vm2202_vm13 = vcmp.lt.s32.totalorder %v12843_v3, 7  ;;  %v1169_v9 = vadd.f32 %v8657_v59, %v1168_v43  ;;  %v7484_v6 = vpop.f32.mrb[62].mxu0  ;;  %v3417_v44 = vsel %vm3383_vm14, 65537, %v13025_v58  ;;  %v12849_v60 = vand.u32 7, %v9069_v57 }
 0x164   : > { %13086 = vst [vmem:[#allocation61_spill] sm:$0xff] %v9080_v52  ;;  %vm3384_vm15 = vmpackc.low %vm2202_vm13, %vm2202_vm13  ;;  %v12848_v2 = vand.u32 7, %v9072_v11  ;;  %v1467_v62 = vmax.f32 %v1041_v21, 0.0  ;;  %v1501_v4 = vmax.f32 %v1177_v15, 0.0  ;;  %v1180_v40 = vadd.f32 %v7484_v6, %v8657_v59  ;;  %v1171_v54 = vpop.f32.mrb[63].mxu0 }
 0x165   : > { %v3418_v33 = vsel %vm3384_vm15, 65537, %v13025_v58  ;;  %v1470_v52 = vmax.f32 %v1052_v53, 0.0  ;;  %v1499_v3 = vmax.f32 %v1169_v9, 0.0  ;;  %v1172_v19 = vadd.f32 %v8657_v59, %v1171_v54 }
 0x166   : > { %v9091_v43 = vcombine.low %v3417_v44, %v3418_v33  ;;  %v9093_v32 = vmax.f32 %v1469_v22, %v1501_v4  ;;  %v1502_v29 = vmax.f32 %v1180_v40, 0.0  ;;  %vm2203_vm1 = vcmp.lt.s32.totalorder %v12849_v60, 7 }
 0x167   : > { %vm9099_vm2 = vcmp.lt.s32.totalorder %v12848_v2, 7  ;;  %v1468_v15 = vmax.f32 %v1044_v16, 0.0  ;;  %v9103_v6 = vmax.f32 %v1467_v62, %v1499_v3  ;;  %v1500_v53 = vmax.f32 %v1172_v19, 0.0  ;;  %vm3385_vm3 = vmpackc.low %vm2203_vm1, %vm2203_vm1 }
 0x168   : > { %13087 = vst [vmem:[#allocation62_spill] sm:$0xff] %v9091_v43  ;;  %v12850_v54 = vshrl.u32 %v9091_v43, 16  ;;  %v9106_v33 = vmax.f32 %v1470_v52, %v1502_v29  ;;  %vm3386_vm4 = vmpackc.low %vm9099_vm2, %vm9099_vm2  ;;  %v3419_v40 = vsel %vm3385_vm3, 65537, %v13025_v58  ;;  %v9113_v4 = vadd.s32 240, %v8610_v39 }
 0x169   : > { %v9116_v22 = vadd.s32 248, %v8610_v39  ;;  %v9118_v3 = vmax.f32 %v1468_v15, %v1500_v53  ;;  %v9120_v19 = vpop.f32.mrb[64].mxu0  ;;  %v9123_v16 = vadd.s32 40, %v8610_v39  ;;  %v12853_v29 = vshll.u32 %v9091_v43, 16 }
 0x16a   : > { %13090 = vst [vmem:[#allocation63_spill] sm:$0xff] %v9106_v33  ;;  %13091 = vst [vmem:[#allocation64_spill] sm:$0xff] %v9113_v4  ;;  %v9128_v52 = vrot.slane %v12850_v54, 7  ;;  %v9130_v9 = vpop.f32.mrb[65].mxu0  ;;  %v3420_v44 = vsel %vm3386_vm4, 65537, %v13025_v58  ;;  %v12854_v62 = vand.u32 7, %v9113_v4  ;;  %v1337_v53 = vadd.f32 %v8576_v23, %v8657_v59 }
 0x16b   : > { %13092 = vst [vmem:[#allocation65_spill] sm:$0xff] %v9116_v22  ;;  %13093 = vst [vmem:[#allocation66_spill] sm:$0xff] %v9118_v3  ;;  %v12855_v21 = vand.u32 7, %v9116_v22  ;;  %v9135_v15 = vpop.f32.mrb[66].mxu0  ;;  %v9143_v60 = vcombine.low %v3419_v40, %v3420_v44  ;;  %v1340_v57 = vadd.f32 %v8580_v25, %v8657_v59  ;;  %v9164_v11 = vadd.s32 48, %v8610_v39 }
 0x16c   : > { %13094 = vst [vmem:[#allocation67_spill] sm:$0xff] %v9128_v52  ;;  %13095 = vst [vmem:[#allocation68_spill] sm:$0xff] %v9135_v15  ;;  %v9141_v2 = vor.u32 %v9128_v52, %v12853_v29  ;;  %v9145_v54 = vpop.f32.mrb[67].mxu0  ;;  %vm2205_vm5 = vcmp.lt.s32.totalorder %v12854_v62, 7  ;;  %v1329_v29 = vadd.f32 %v8657_v59, %v8578_v24  ;;  %v1332_v62 = vadd.f32 %v8657_v59, %v8587_v28 }
 0x16d   : > { %13097 = vst [vmem:[#allocation70_spill] sm:$0xff] %v9143_v60  ;;  %13098 = vst [vmem:[#allocation71_spill] sm:$0xff] %v9145_v54  ;;  %vm2206_vm6 = vcmp.lt.s32.totalorder %v12855_v21, 7  ;;  %v12861_v44 = vshrl.u32 %v9143_v60, 16  ;;  %v9169_v24 = vadd.f32 %v8602_v35, %v8657_v59  ;;  %v9179_v28 = vadd.f32 %v8657_v59, %v8604_v36 }
 0x16e   : > { %13096 = vst [vmem:[#allocation69_spill] sm:$0xff] %v9141_v2  ;;  %vm3387_vm7 = vmpackc.low %vm2205_vm5, %vm2205_vm5  ;;  %v1731_v2 = vadd.s32 256, %v8610_v39  ;;  %v1732_v22 = vadd.s32 264, %v8610_v39  ;;  %v1541_v4 = vmax.f32 %v1337_v53, 0.0  ;;  %v1539_v43 = vmax.f32 %v1329_v29, 0.0 }
 0x16f   : > { %vm3388_vm8 = vmpackc.low %vm2206_vm6, %vm2206_vm6  ;;  %v3421_v23 = vsel %vm3387_vm7, 65537, %v13025_v58  ;;  %v9174_v40 = vrot.slane %v12861_v44, 7  ;;  %v9186_v21 = vadd.s32 56, %v8610_v39  ;;  %v13100_v44 = vshll.u32 %v9143_v60, 16 }
 0x170   : > { %v3422_v25 = vsel %vm3388_vm8, 65537, %v13025_v58  ;;  %v9198_v29 = vadd.f32 %v8606_v37, %v8657_v59  ;;  %v1961_v53 = vand.u32 7, %v1731_v2  ;;  %v1968_v15 = vand.u32 7, %v1732_v22 }
 0x171   : > { %13099 = vst [vmem:[#allocation72_spill] sm:$0xff] %v9174_v40  ;;  %v9181_v52 = vcombine.low %v3421_v23, %v3422_v25  ;;  %v7491_v35 = vpop.f32.mrb[68].mxu0  ;;  %v9191_v63 = vor.u32 %v9174_v40, %v13100_v44  ;;  %v1542_v23 = vmax.f32 %v1340_v57, 0.0  ;;  %v1540_v25 = vmax.f32 %v1332_v62, 0.0 }
 0x172   : > { %v1209_v36 = vadd.f32 %v7491_v35, %v8657_v59  ;;  %v1200_v27 = vpop.f32.mrb[69].mxu0  ;;  %v1545_v35 = vmax.f32 %v9169_v24, 0.0  ;;  %v1543_v57 = vmax.f32 %v9179_v28, 0.0  ;;  %v13102_v37 = vand.u32 7, %v8789_v42 }
 0x173   : > { %13101 = vst [vmem:[#allocation73_spill] sm:$0xff] %v9191_v63  ;;  %v1201_v54 = vadd.f32 %v8657_v59, %v1200_v27  ;;  %v7492_v33 = vpop.f32.mrb[70].mxu0  ;;  %v9206_v27 = vadd.f32 %v8657_v59, %v8608_v38  ;;  %v13105_v24 = vshrl.u32 %v9181_v52, 16  ;;  %vm2207_vm11 = vcmp.lt.s32.totalorder %v1961_v53, 7 }
 0x174   : > { %v1509_v60 = vmax.f32 %v1209_v36, 0.0  ;;  %v1212_v44 = vadd.f32 %v7492_v33, %v8657_v59  ;;  %v1203_v40 = vpop.f32.mrb[71].mxu0  ;;  %vm9210_vm10 = vcmp.lt.s32.totalorder %v13102_v37, 7  ;;  %v1546_v38 = vmax.f32 %v9198_v29, 0.0  ;;  %vm3389_vm13 = vmpackc.low %vm2207_vm11, %vm2207_vm11 }
 0x175   : > { %v1507_v62 = vmax.f32 %v1201_v54, 0.0  ;;  %v1204_v3 = vadd.f32 %v8657_v59, %v1203_v40  ;;  %v9217_v28 = vrot.slane %v13105_v24, 7  ;;  %vm2208_vm12 = vcmp.lt.s32.totalorder %v1968_v15, 7  ;;  %vm3359_vm7 = vmpackc.low %vm9210_vm10, %vm9210_vm10 }
 0x176   : > { %v1605_v22 = vmax.f32 %v1509_v60, %v1541_v4  ;;  %v1510_v36 = vmax.f32 %v1212_v44, 0.0  ;;  %v13107_v42 = vand.u32 7, %v8792_v7  ;;  %v13110_v60 = vshll.u32 %v9181_v52, 16  ;;  %vm3390_vm15 = vmpackc.low %vm2208_vm12, %vm2208_vm12 }
 0x177   : > { %13106 = vst [vmem:[#allocation74_spill] sm:$0xff] %v9217_v28  ;;  %v1603_v54 = vmax.f32 %v1507_v62, %v1539_v43  ;;  %v1508_v40 = vmax.f32 %v1204_v3, 0.0  ;;  %v3423_v43 = vsel %vm3389_vm13, 65537, %v13025_v58  ;;  %vm9244_vm1 = vcmp.gt.s32.totalorder %v1961_v53, 0 }
 0x178   : > { %v1637_v37 = vmax.f32 %v8766_v34, %v1605_v22  ;;  %v1606_v63 = vmax.f32 %v1510_v36, %v1542_v23  ;;  %vm9223_vm14 = vcmp.lt.s32.totalorder %v13107_v42, 7  ;;  %v9230_v4 = vor.u32 %v9217_v28, %v13110_v60  ;;  %vm2327_vm4 = vmpackc.low %vm9244_vm1, %vm9244_vm1 }
 0x179   : > { %v1635_v3 = vmax.f32 %v8770_v26, %v1603_v54  ;;  %v1604_v29 = vmax.f32 %v1508_v40, %v1540_v25  ;;  %v7495_v44 = vpop.f32.mrb[72].mxu0  ;;  %v1544_v34 = vmax.f32 %v9206_v27, 0.0  ;;  %v3424_v23 = vsel %vm3390_vm15, 65537, %v13025_v58  ;;  %vm3360_vm8 = vmpackc.low %vm9223_vm14, %vm9223_vm14 }
 0x17a   : > { %13111 = vst [vmem:[#allocation75_spill] sm:$0xff] %v9230_v4  ;;  %v1638_v42 = vmax.f32 %v8778_v55, %v1606_v63  ;;  %v1225_v62 = vadd.f32 %v7495_v44, %v8657_v59  ;;  %v1216_v22 = vpop.f32.mrb[73].mxu0  ;;  %v1369_v36 = vadd.f32 %v8626_v46, %v8657_v59  ;;  %v9240_v24 = vcombine.low %v3423_v43, %v3424_v23 }
 0x17b   : > { %v1636_v60 = vmax.f32 %v8786_v13, %v1604_v29  ;;  %v1217_v26 = vadd.f32 %v8657_v59, %v1216_v22  ;;  %v7496_v25 = vpop.f32.mrb[74].mxu0  ;;  %vm9248_vm2 = vcmp.gt.s32.totalorder %v1968_v15, 0  ;;  %v13116_v43 = vand.u32 7, %v8849_v20 }
 0x17c   : > { %v1666_v55 = vpack.c.bf16 %v1638_v42, %v1637_v37  ;;  %v1513_v63 = vmax.f32 %v1225_v62, 0.0  ;;  %v1228_v40 = vadd.f32 %v7496_v25, %v8657_v59  ;;  %v1219_v46 = vpop.f32.mrb[75].mxu0  ;;  %v12893_v53 = vshrl.u32 %v9240_v24, 16  ;;  %vm2328_vm6 = vmpackc.low %vm9248_vm2, %vm9248_vm2 }
 0x17d   : > { %vm9255_vm3 = vcmp.lt.s32.totalorder %v13116_v43, 7  ;;  %v1665_v15 = vpack.c.bf16 %v1636_v60, %v1635_v3  ;;  %v1511_v29 = vmax.f32 %v1217_v26, 0.0  ;;  %v1220_v37 = vadd.f32 %v8657_v59, %v1219_v46 }
 0x17e   : > { %v1361_v44 = vadd.f32 %v8657_v59, %v8628_v47  ;;  %v13119_v23 = vand.u32 7, %v9123_v16  ;;  %1683 = vst.msk [vmem:[#allocation2 + $0x20] sm:$0xff] %vm701_vm0, %v1666_v55  ;;  %v1609_v62 = vmax.f32 %v1513_v63, %v1545_v35  ;;  %v1514_v3 = vmax.f32 %v1228_v40, 0.0  ;;  %vm3361_vm10 = vmpackc.low %vm9255_vm3, %vm9255_vm3 }
 0x17f   : > { %v12892_v22 = vshll.u32 %v9240_v24, 16  ;;  %v9279_v60 = vrot.slane %v12893_v53, 7  ;;  %1682 = vst.msk [vmem:[#allocation2 + $0x18] sm:$0xff] %vm701_vm0, %v1665_v15  ;;  %v1607_v47 = vmax.f32 %v1511_v29, %v1543_v57  ;;  %v1512_v26 = vmax.f32 %v1220_v37, 0.0 }
 0x180   : > { %vm9268_vm5 = vcmp.lt.s32.totalorder %v13119_v23, 7  ;;  %v1372_v25 = vadd.f32 %v8632_v50, %v8657_v59  ;;  %v2361_v35 = vsel %vm2327_vm4, 65537, %v13025_v58  ;;  %v1641_v27 = vmax.f32 %v8824_v61, %v1609_v62 }
 0x181   : > { %13122 = vst [vmem:[#allocation76_spill] sm:$0xff] %v9279_v60  ;;  %v1610_v55 = vmax.f32 %v1514_v3, %v1546_v38  ;;  %v9297_v57 = vor.u32 %v9279_v60, %v12892_v22  ;;  %v2362_v50 = vsel %vm2328_vm6, 65537, %v13025_v58  ;;  %v1639_v63 = vmax.f32 %v8836_v14, %v1607_v47  ;;  %v7499_v54 = vpop.f32.mrb[76].mxu0  ;;  %vm3362_vm11 = vmpackc.low %vm9268_vm5, %vm9268_vm5 }
 0x182   : > { %v1608_v40 = vmax.f32 %v1512_v26, %v1544_v34  ;;  %v1364_v46 = vadd.f32 %v8657_v59, %v8634_v51  ;;  %v9303_v61 = vcombine.low %v2361_v35, %v2362_v50  ;;  %v1241_v43 = vadd.f32 %v7499_v54, %v8657_v59  ;;  %v1232_v29 = vpop.f32.mrb[77].mxu0 }
 0x183   : > { %13123 = vst [vmem:[#allocation77_spill] sm:$0xff] %v9297_v57  ;;  %v1642_v38 = vmax.f32 %v8844_v48, %v1610_v55  ;;  %v1549_v15 = vmax.f32 %v1369_v36, 0.0  ;;  %v12871_v37 = vand.u32 7, %v9164_v11  ;;  %v1233_v62 = vadd.f32 %v8657_v59, %v1232_v29  ;;  %v7500_v34 = vpop.f32.mrb[78].mxu0 }
 0x184   : > { %13124 = vst [vmem:[#allocation78_spill] sm:$0xff] %v9303_v61  ;;  %v1640_v23 = vmax.f32 %v8852_v0, %v1608_v40  ;;  %v1547_v14 = vmax.f32 %v1361_v44, 0.0  ;;  %v3393_v51 = vsel %vm3359_vm7, 65537, %v13025_v58  ;;  %v1517_v36 = vmax.f32 %v1241_v43, 0.0  ;;  %v1235_v47 = vpop.f32.mrb[79].mxu0  ;;  %v13125_v40 = vld [vmem:[#allocation9_spill] sm:$0xff] }
 0x185   : > { %v1668_v48 = vpack.c.bf16 %v1642_v38, %v1641_v27  ;;  %v1244_v3 = vadd.f32 %v7500_v34, %v8657_v59  ;;  %v1550_v0 = vmax.f32 %v1372_v25, 0.0  ;;  %v1515_v44 = vmax.f32 %v1233_v62, 0.0  ;;  %v13126_v25 = vld [vmem:[#allocation10_spill] sm:$0xff] }
 0x186   : > { %v1667_v26 = vpack.c.bf16 %v1640_v23, %v1639_v63  ;;  %v1236_v35 = vadd.f32 %v8657_v59, %v1235_v47  ;;  %v1548_v33 = vmax.f32 %v1364_v46, 0.0  ;;  %v1613_v55 = vmax.f32 %v1517_v36, %v1549_v15  ;;  %v13127_v15 = vld [vmem:[#allocation11_spill] sm:$0xff] }
 0x187   : > { %1685 = vst.msk [vmem:[#allocation2 + $0x30] sm:$0xff] %vm701_vm0, %v1668_v48  ;;  %v1518_v50 = vmax.f32 %v1244_v3, 0.0  ;;  %v1385_v2 = vadd.f32 %v13125_v40, %v8657_v59  ;;  %v3394_v54 = vsel %vm3360_vm8, 65537, %v13025_v58  ;;  %v1611_v27 = vmax.f32 %v1515_v44, %v1547_v14  ;;  %v13128_v48 = vld [vmem:[#allocation12_spill] sm:$0xff] }
 0x188   : > { %1684 = vst.msk [vmem:[#allocation2 + $0x28] sm:$0xff] %vm701_vm0, %v1667_v26  ;;  %v1516_v38 = vmax.f32 %v1236_v35, 0.0  ;;  %v1377_v63 = vadd.f32 %v8657_v59, %v13126_v25  ;;  %v1645_v46 = vmax.f32 %v8879_v45, %v1613_v55  ;;  %v1388_v29 = vadd.f32 %v13127_v15, %v8657_v59  ;;  %v13132_v44 = vld [vmem:[#allocation40_spill] sm:$0xff] }
 0x189   : > { %v1614_v43 = vmax.f32 %v1518_v50, %v1550_v0  ;;  %v12870_v23 = vand.u32 7, %v9186_v21  ;;  %v1643_v62 = vmax.f32 %v8886_v1, %v1611_v27  ;;  %v7503_v34 = vpop.f32.mrb[80].mxu0  ;;  %v1380_v13 = vadd.f32 %v8657_v59, %v13128_v48 }
 0x18a   : > { %v1612_v14 = vmax.f32 %v1516_v38, %v1548_v33  ;;  %v9341_v36 = vcombine.low %v3393_v51, %v3394_v54  ;;  %v1257_v3 = vadd.f32 %v7503_v34, %v8657_v59  ;;  %v1553_v0 = vmax.f32 %v1385_v2, 0.0  ;;  %v1248_v47 = vpop.f32.mrb[81].mxu0 }
 0x18b   : > { %v1646_v45 = vmax.f32 %v8889_v49, %v1614_v43  ;;  %v9346_v26 = vsel %vm3361_vm10, 65537, %v13025_v58  ;;  %vm9350_vm12 = vcmp.lt.s32.totalorder %v12871_v37, 7  ;;  %v1249_v51 = vadd.f32 %v8657_v59, %v1248_v47  ;;  %v7504_v55 = vpop.f32.mrb[82].mxu0 }
 0x18c   : > { %13129 = vst [vmem:[#allocation9_spill] sm:$0xff] %v9341_v36  ;;  %v1644_v35 = vmax.f32 %v13132_v44, %v1612_v14  ;;  %v1551_v33 = vmax.f32 %v1377_v63, 0.0  ;;  %v3396_v49 = vsel %vm3362_vm11, 65537, %v13025_v58  ;;  %v1521_v40 = vmax.f32 %v1257_v3, 0.0  ;;  %v1251_v27 = vpop.f32.mrb[83].mxu0  ;;  %v13135_v14 = vld [vmem:[#allocation15_spill] sm:$0xff]  ;;  %vm3363_vm14 = vmpackc.low %vm9350_vm12, %vm9350_vm12 }
 0x18d   : > { %v1670_v50 = vpack.c.bf16 %v1646_v45, %v1645_v46  ;;  %v1260_v2 = vadd.f32 %v7504_v55, %v8657_v59  ;;  %v1554_v54 = vmax.f32 %v1388_v29, 0.0  ;;  %v1519_v25 = vmax.f32 %v1249_v51, 0.0  ;;  %v13136_v45 = vld [vmem:[#allocation17_spill] sm:$0xff]  ;;  %v13137_v44 = vld [vmem:[#allocation19_spill] sm:$0xff] }
 0x18e   : > { %v1669_v38 = vpack.c.bf16 %v1644_v35, %v1643_v62  ;;  %v1252_v43 = vadd.f32 %v8657_v59, %v1251_v27  ;;  %v1552_v15 = vmax.f32 %v1380_v13, 0.0  ;;  %vm9366_vm13 = vcmp.lt.s32.totalorder %v12870_v23, 7  ;;  %v9380_v13 = vld [vmem:[%s12795_s2] ss:$0 sm:$0xff] }
 0x18f   : > { %1687 = vst.msk [vmem:[#allocation2 + $0x40] sm:$0xff] %vm701_vm0, %v1670_v50  ;;  %v1617_v42 = vmax.f32 %v1521_v40, %v1553_v0  ;;  %v1522_v46 = vmax.f32 %v1260_v2, 0.0  ;;  %v1401_v34 = vadd.f32 %v13135_v14, %v8657_v59  ;;  %v9374_v29 = vadd.s32 64, %v8610_v39  ;;  %v13138_v40 = vld [vmem:[#allocation21_spill] sm:$0xff]  ;;  %vm3364_vm15 = vmpackc.low %vm9366_vm13, %vm9366_vm13 }
 0x190   : > { %1686 = vst.msk [vmem:[#allocation2 + $0x38] sm:$0xff] %vm701_vm0, %v1669_v38  ;;  %v1615_v62 = vmax.f32 %v1519_v25, %v1551_v33  ;;  %v1520_v48 = vmax.f32 %v1252_v43, 0.0  ;;  %v1393_v3 = vadd.f32 %v9380_v13, %v13136_v45  ;;  %v9385_v0 = vadd.s32 72, %v8610_v39  ;;  %v13139_v38 = vld [vmem:[#allocation46_spill] sm:$0xff] }
 0x191   : > { %v1649_v59 = vmax.f32 %v8931_v30, %v1617_v42  ;;  %v1618_v47 = vmax.f32 %v1522_v46, %v1554_v54  ;;  %v1404_v35 = vadd.f32 %v9380_v13, %v13137_v44  ;;  %v12872_v51 = vshrl.u32 %v9341_v36, 16  ;;  %v7507_v50 = vpop.f32.mrb[84].mxu0  ;;  %v13140_v46 = vld [vmem:[#allocation48_spill] sm:$0xff] }
 0x192   : > { %v1647_v33 = vmax.f32 %v8937_v31, %v1615_v62  ;;  %v1616_v55 = vmax.f32 %v1520_v48, %v1552_v15  ;;  %v1396_v2 = vadd.f32 %v9380_v13, %v13138_v40  ;;  %v12879_v27 = vshll.u32 %v9341_v36, 16  ;;  %v1264_v54 = vpop.f32.mrb[85].mxu0 }
 0x193   : > { %v1650_v25 = vmax.f32 %v13139_v38, %v1618_v47  ;;  %v1273_v43 = vadd.f32 %v9380_v13, %v7507_v50  ;;  %v1557_v30 = vmax.f32 %v1401_v34, 0.0  ;;  %v9398_v42 = vadd.s32 8, %v8610_v39  ;;  %v7508_v62 = vpop.f32.mrb[86].mxu0 }
 0x194   : > { %v1648_v14 = vmax.f32 %v13140_v46, %v1616_v55  ;;  %v1265_v31 = vadd.f32 %v9380_v13, %v1264_v54  ;;  %v1555_v15 = vmax.f32 %v1393_v3, 0.0  ;;  %v1737_v48 = vand.u32 7, %v8610_v39  ;;  %v1267_v38 = vpop.f32.mrb[87].mxu0  ;;  %v13141_v54 = vld [vmem:[#allocation24_spill] sm:$0xff] }
 0x195   : > { %v1672_v45 = vpack.c.bf16 %v1650_v25, %v1649_v59  ;;  %v1525_v44 = vmax.f32 %v1273_v43, 0.0  ;;  %v1276_v40 = vadd.f32 %v9380_v13, %v7508_v62  ;;  %v1558_v47 = vmax.f32 %v1404_v35, 0.0  ;;  %v13142_v43 = vld [vmem:[#allocation25_spill] sm:$0xff] }
 0x196   : > { %v1671_v50 = vpack.c.bf16 %v1648_v14, %v1647_v33  ;;  %v1523_v34 = vmax.f32 %v1265_v31, 0.0  ;;  %v1268_v23 = vadd.f32 %v9380_v13, %v1267_v38  ;;  %v1556_v37 = vmax.f32 %v1396_v2, 0.0 }
 0x197   : > { %1689 = vst.msk [vmem:[#allocation2 + $0x50] sm:$0xff] %vm701_vm0, %v1672_v45  ;;  %v1621_v3 = vmax.f32 %v1525_v44, %v1557_v30  ;;  %v1526_v55 = vmax.f32 %v1276_v40, 0.0  ;;  %v1417_v59 = vadd.f32 %v9380_v13, %v13141_v54  ;;  %v1744_v25 = vand.u32 7, %v9398_v42  ;;  %v13144_v30 = vld [vmem:[#allocation26_spill] sm:$0xff] }
 0x198   : > { %1688 = vst.msk [vmem:[#allocation2 + $0x48] sm:$0xff] %vm701_vm0, %v1671_v50  ;;  %v1619_v35 = vmax.f32 %v1523_v34, %v1555_v15  ;;  %v1524_v33 = vmax.f32 %v1268_v23, 0.0  ;;  %v1409_v2 = vadd.f32 %v9380_v13, %v13142_v43  ;;  %v9416_v46 = vcombine.low %v9346_v26, %v3396_v49  ;;  %v13145_v15 = vld [vmem:[#allocation28_spill] sm:$0xff] }
 0x199   : > { %v1653_v14 = vmax.f32 %v8988_v18, %v1621_v3  ;;  %v1622_v31 = vmax.f32 %v1526_v55, %v1558_v47  ;;  %v1420_v62 = vadd.f32 %v9380_v13, %v13144_v30  ;;  %v9430_v23 = vsel %vm3363_vm14, 65537, %v13025_v58  ;;  %v7511_v18 = vpop.f32.mrb[88].mxu0  ;;  %v13150_v30 = vld [vmem:[#allocation32_spill] sm:$0xff] }
 0x19a   : > { %13143 = vst [vmem:[#allocation10_spill] sm:$0xff] %v9416_v46  ;;  %v1651_v26 = vmax.f32 %v8998_v41, %v1619_v35  ;;  %v1620_v49 = vmax.f32 %v1524_v33, %v1556_v37  ;;  %v1412_v45 = vadd.f32 %v9380_v13, %v13145_v15  ;;  %vm9437_vm1 = vcmp.lt.s32.totalorder %v1737_v48, 7  ;;  %v1280_v38 = vpop.f32.mrb[89].mxu0  ;;  %v13151_v15 = vld [vmem:[#allocation34_spill] sm:$0xff] }
 0x19b   : > { %v1654_v40 = vmax.f32 %v9012_v17, %v1622_v31  ;;  %v1289_v1 = vadd.f32 %v9380_v13, %v7511_v18  ;;  %v1561_v47 = vmax.f32 %v1417_v59, 0.0  ;;  %vm9445_vm2 = vcmp.lt.s32.totalorder %v1744_v25, 7  ;;  %v7512_v3 = vpop.f32.mrb[90].mxu0  ;;  %vm3357_vm3 = vmpackc.low %vm9437_vm1, %vm9437_vm1 }
 0x19c   : > { %v1652_v37 = vmax.f32 %v9018_v8, %v1620_v49  ;;  %v1281_v50 = vadd.f32 %v9380_v13, %v1280_v38  ;;  %v1559_v34 = vmax.f32 %v1409_v2, 0.0  ;;  %v9457_v17 = vsel %vm3364_vm15, 65537, %v13025_v58  ;;  %v1283_v33 = vpop.f32.mrb[91].mxu0  ;;  %vm3358_vm4 = vmpackc.low %vm9445_vm2, %vm9445_vm2  ;;  %v13152_v38 = vld [vmem:[#allocation35_spill] sm:$0xff] }
 0x19d   : > { %v1674_v55 = vpack.c.bf16 %v1654_v40, %v1653_v14  ;;  %v1529_v54 = vmax.f32 %v1289_v1, 0.0  ;;  %v1292_v59 = vadd.f32 %v9380_v13, %v7512_v3  ;;  %v1562_v35 = vmax.f32 %v1420_v62, 0.0 }
 0x19e   : > { %v1673_v8 = vpack.c.bf16 %v1652_v37, %v1651_v26  ;;  %v1527_v43 = vmax.f32 %v1281_v50, 0.0  ;;  %v1284_v2 = vadd.f32 %v9380_v13, %v1283_v33  ;;  %v1560_v31 = vmax.f32 %v1412_v45, 0.0 }
 0x19f   : > { %1691 = vst.msk [vmem:[#allocation2 + $0x60] sm:$0xff] %vm701_vm0, %v1674_v55  ;;  %v1625_v63 = vmax.f32 %v1529_v54, %v1561_v47  ;;  %v1530_v14 = vmax.f32 %v1292_v59, 0.0  ;;  %v1433_v62 = vadd.f32 %v9380_v13, %v13150_v30  ;;  %v12891_v49 = vand.u32 7, %v9374_v29  ;;  %v13153_v55 = vld [vmem:[#allocation36_spill] sm:$0xff] }
 0x1a0   : > { %1690 = vst.msk [vmem:[#allocation2 + $0x58] sm:$0xff] %vm701_vm0, %v1673_v8  ;;  %v1623_v26 = vmax.f32 %v1527_v43, %v1559_v34  ;;  %v1528_v18 = vmax.f32 %v1284_v2, 0.0  ;;  %v1425_v45 = vadd.f32 %v9380_v13, %v13151_v15  ;;  %v3391_v44 = vsel %vm3357_vm3, 65537, %v13025_v58 }
 0x1a1   : > { %v1657_v40 = vmax.f32 %v9048_v56, %v1625_v63  ;;  %v1626_v1 = vmax.f32 %v1530_v14, %v1562_v35  ;;  %v1436_v47 = vadd.f32 %v9380_v13, %v13152_v38  ;;  %v3392_v41 = vsel %vm3358_vm4, 65537, %v13025_v58  ;;  %v7515_v3 = vpop.f32.mrb[92].mxu0 }
 0x1a2   : > { %v1655_v37 = vmax.f32 %v9054_v10, %v1623_v26  ;;  %v1624_v50 = vmax.f32 %v1528_v18, %v1560_v31  ;;  %v1428_v34 = vadd.f32 %v9380_v13, %v13153_v55  ;;  %v12890_v54 = vand.u32 7, %v9385_v0  ;;  %v1296_v35 = vpop.f32.mrb[93].mxu0 }
 0x1a3   : > { %v1658_v59 = vmax.f32 %v9056_v5, %v1626_v1  ;;  %v1305_v33 = vadd.f32 %v9380_v13, %v7515_v3  ;;  %v1565_v56 = vmax.f32 %v1433_v62, 0.0  ;;  %v9487_v8 = vrot.slane %v12872_v51, 3  ;;  %v7516_v31 = vpop.f32.mrb[94].mxu0 }
 0x1a4   : > { %v1656_v43 = vmax.f32 %v9064_v12, %v1624_v50  ;;  %v1297_v10 = vadd.f32 %v9380_v13, %v1296_v35  ;;  %v1563_v2 = vmax.f32 %v1425_v45, 0.0  ;;  %v9491_v63 = vcombine.low %v3391_v44, %v3392_v41  ;;  %v1299_v18 = vpop.f32.mrb[95].mxu0 }
 0x1a5   : > { %v1676_v14 = vpack.c.bf16 %v1658_v59, %v1657_v40  ;;  %v1533_v30 = vmax.f32 %v1305_v33, 0.0  ;;  %v1308_v5 = vadd.f32 %v9380_v13, %v7516_v31  ;;  %v1566_v26 = vmax.f32 %v1436_v47, 0.0 }
 0x1a6   : > { %13154 = vst [vmem:[#allocation11_spill] sm:$0xff] %v9491_v63  ;;  %v1675_v62 = vpack.c.bf16 %v1656_v43, %v1655_v37  ;;  %v1531_v15 = vmax.f32 %v1297_v10, 0.0  ;;  %v1300_v1 = vadd.f32 %v9380_v13, %v1299_v18  ;;  %v1564_v38 = vmax.f32 %v1428_v34, 0.0  ;;  %v13162_v18 = vld [vmem:[#allocation66_spill] sm:$0xff] }
 0x1a7   : > { %1693 = vst.msk [vmem:[#allocation2 + $0x70] sm:$0xff] %vm701_vm0, %v1676_v14  ;;  %v1629_v12 = vmax.f32 %v1533_v30, %v1565_v56  ;;  %v1534_v50 = vmax.f32 %v1308_v5, 0.0  ;;  %v12877_v45 = vshrl.u32 %v9416_v46, 16  ;;  %v12876_v44 = vshll.u32 %v9416_v46, 16 }
 0x1a8   : > { %1692 = vst.msk [vmem:[#allocation2 + $0x68] sm:$0xff] %vm701_vm0, %v1675_v62  ;;  %v1627_v40 = vmax.f32 %v1531_v15, %v1563_v2  ;;  %v1532_v41 = vmax.f32 %v1300_v1, 0.0  ;;  %v12883_v47 = vshrl.u32 %v9491_v63, 16  ;;  %vm9502_vm5 = vcmp.lt.s32.totalorder %v12891_v49, 7  ;;  %v13160_v2 = vld [vmem:[#allocation63_spill] sm:$0xff] }
 0x1a9   : > { %v1193_v3 = vadd.f32 %v9380_v13, %v9120_v19  ;;  %v1661_v55 = vmax.f32 %v9093_v32, %v1629_v12  ;;  %v1630_v34 = vmax.f32 %v1534_v50, %v1566_v26  ;;  %vm9511_vm6 = vcmp.lt.s32.totalorder %v12890_v54, 7  ;;  %v7519_v43 = vpop.f32.mrb[96].mxu0  ;;  %v13159_v19 = vld [vmem:[#allocation68_spill] sm:$0xff]  ;;  %v13161_v26 = vld [vmem:[#allocation71_spill] sm:$0xff]  ;;  %vm3365_vm7 = vmpackc.low %vm9502_vm5, %vm9502_vm5 }
 0x1aa   : > { %v1185_v33 = vadd.f32 %v9380_v13, %v9130_v9  ;;  %v1659_v56 = vmax.f32 %v9103_v6, %v1627_v40  ;;  %v1628_v35 = vmax.f32 %v1532_v41, %v1564_v38  ;;  %v9519_v10 = vadd.s32 80, %v8610_v39  ;;  %v1312_v30 = vpop.f32.mrb[97].mxu0  ;;  %vm3366_vm8 = vmpackc.low %vm9511_vm6, %vm9511_vm6 }
 0x1ab   : > { %v1196_v32 = vadd.f32 %v9380_v13, %v13159_v19  ;;  %v1662_v31 = vmax.f32 %v13160_v2, %v1630_v34  ;;  %v1321_v14 = vadd.f32 %v9380_v13, %v7519_v43  ;;  %v12880_v5 = vshll.u32 %v9491_v63, 16  ;;  %v7520_v15 = vpop.f32.mrb[98].mxu0 }
 0x1ac   : > { %v1188_v9 = vadd.f32 %v9380_v13, %v13161_v26  ;;  %v1660_v6 = vmax.f32 %v13162_v18, %v1628_v35  ;;  %v1313_v62 = vadd.f32 %v9380_v13, %v1312_v30  ;;  %v3479_v1 = vrot.slane %v12883_v47, 3  ;;  %v1315_v41 = vpop.f32.mrb[99].mxu0 }
 0x1ad   : > { %v1505_v38 = vmax.f32 %v1193_v3, 0.0  ;;  %v1678_v12 = vpack.c.bf16 %v1662_v31, %v1661_v55  ;;  %v1537_v50 = vmax.f32 %v1321_v14, 0.0  ;;  %v1324_v40 = vadd.f32 %v9380_v13, %v7520_v15 }
 0x1ae   : > { %v1503_v34 = vmax.f32 %v1185_v33, 0.0  ;;  %v1677_v43 = vpack.c.bf16 %v1660_v6, %v1659_v56  ;;  %v1535_v19 = vmax.f32 %v1313_v62, 0.0  ;;  %v1316_v2 = vadd.f32 %v9380_v13, %v1315_v41  ;;  %v13163_v13 = vld [vmem:[#allocation16_spill] sm:$0xff]  ;;  %v13168_v41 = vld [vmem:[#allocation22_spill] sm:$0xff] }
 0x1af   : > { %v1506_v26 = vmax.f32 %v1196_v32, 0.0  ;;  %1695 = vst.msk [vmem:[#allocation2 + $0x80] sm:$0xff] %vm701_vm0, %v1678_v12  ;;  %v1601_v35 = vmax.f32 %v1505_v38, %v1537_v50  ;;  %v1538_v30 = vmax.f32 %v1324_v40, 0.0  ;;  %v3482_v18 = vrot.slane %v12880_v5, 4  ;;  %v13166_v38 = vld [vmem:[#allocation20_spill] sm:$0xff] }
 0x1b0   : > { %v1504_v51 = vmax.f32 %v1188_v9, 0.0  ;;  %1694 = vst.msk [vmem:[#allocation2 + $0x78] sm:$0xff] %vm701_vm0, %v1677_v43  ;;  %v1599_v3 = vmax.f32 %v1503_v34, %v1535_v19  ;;  %v1536_v55 = vmax.f32 %v1316_v2, 0.0  ;;  %v9542_v33 = vadd.s32 88, %v8610_v39  ;;  %v13164_v9 = vld [vmem:[#allocation18_spill] sm:$0xff] }
 0x1b1   : > { %v1633_v56 = vmax.f32 %v13163_v13, %v1601_v35  ;;  %v1602_v32 = vmax.f32 %v1506_v26, %v1538_v30  ;;  %v3490_v31 = vrot.slane %v12879_v27, 4  ;;  %v3496_v14 = vrot.slane %v12877_v45, 3  ;;  %v2607_v2 = vld [vmem:[#allocation2] sm:$0xf0] }
 0x1b2   : > { %v1631_v37 = vmax.f32 %v13164_v9, %v1599_v3  ;;  %v1600_v6 = vmax.f32 %v1504_v51, %v1536_v55  ;;  %v3499_v62 = vrot.slane %v12876_v44, 4  ;;  %v9557_v15 = vcombine.low %v9430_v23, %v9457_v17 }
 0x1b3   : > { %v1634_v12 = vmax.f32 %v13166_v38, %v1602_v32  ;;  %v9560_v50 = vor.u32 %v3482_v18, %v3479_v1  ;;  %v12889_v40 = vand.u32 7, %v9519_v10  ;;  %v3399_v34 = vsel %vm3365_vm7, 65537, %v13025_v58 }
 0x1b4   : > { %13165 = vst [vmem:[#allocation12_spill] sm:$0xff] %v9557_v15  ;;  %v1632_v59 = vmax.f32 %v13168_v41, %v1600_v6  ;;  %v3400_v43 = vsel %vm3366_vm8, 65537, %v13025_v58  ;;  %v12888_v51 = vand.u32 7, %v9542_v33  ;;  %v3491_v23 = vor.u32 %v3490_v31, %v9487_v8 }
 0x1b5   : > { %13167 = vst [vmem:[#allocation40_spill] sm:$0xff] %v9560_v50  ;;  %v1664_v19 = vpack.c.bf16 %v1634_v12, %v1633_v56  ;;  %vm12911_vm10 = vcmp.ne.s16.totalorder %v9560_v50, 0  ;;  %v3500_v26 = vor.u32 %v3499_v62, %v3496_v14  ;;  %v12875_v1 = vshrl.u32 %v9557_v15, 16 }
 0x1b6   : > { %v1663_v17 = vpack.c.bf16 %v1632_v59, %v1631_v37  ;;  %v12874_v35 = vshll.u32 %v9557_v15, 16  ;;  %vm12923_vm11 = vsmask.f32 4352  ;;  %v9572_v30 = vcombine.low %v3399_v34, %v3400_v43 }
 0x1b7   : > { %1681 = vst.msk [vmem:[#allocation2 + $0x10] sm:$0xff] %vm701_vm0, %v1664_v19  ;;  %vm9576_vm12 = vcmp.lt.s32.totalorder %v12889_v40, 7  ;;  %v9581_v3 = vadd.s32 96, %v8610_v39  ;;  %v3646_v8 = vsel %vm12911_vm10, %v2607_v2, 0  ;;  %vm9588_vm13 = vcmp.lt.s32.totalorder %v12888_v51, 7 }
 0x1b8   : > { %13169 = vst [vmem:[#allocation15_spill] sm:$0xff] %v9572_v30  ;;  %1680 = vst.msk [vmem:[#allocation2 + $0x8] sm:$0xff] %vm701_vm0, %v1663_v17  ;;  %v9593_v13 = vadd.s32 104, %v8610_v39  ;;  %v9597_v56 = vsel %vm12923_vm11, %v9560_v50, %v3491_v23  ;;  %v9600_v32 = vsel %vm12923_vm11, %v3491_v23, %v3500_v26  ;;  %v3505_v31 = vrot.slane %v12875_v1, 3 }
 0x1b9   : > { %13174 = vst [vmem:[#allocation17_spill] sm:$0xff] %v9597_v56  ;;  %v3508_v14 = vrot.slane %v12874_v35, 4  ;;  %vm3367_vm14 = vmpackc.low %vm9576_vm12, %vm9576_vm12  ;;  %v3669_v9 = vshrl.u32 %v3646_v8, 16  ;;  %v3672_v37 = vshll.u32 %v3646_v8, 16  ;;  %v12873_v6 = vshrl.u32 %v9572_v30, 16 }
 0x1ba   : > { %vm3368_vm15 = vmpackc.low %vm9588_vm13, %vm9588_vm13  ;;  %v12885_v62 = vand.u32 7, %v9581_v3  ;;  %v12878_v38 = vshll.u32 %v9572_v30, 16  ;;  %v12884_v12 = vand.u32 7, %v9593_v13  ;;  %vm12953_vm1 = vcmask 1043456  }
 0x1bb   : > { %vm12912_vm2 = vcmp.ne.s16.totalorder %v9597_v56, 0  ;;  %vm3630_vm3 = vcmp.ne.s16.totalorder %v9600_v32, 0  ;;  %v2631_v41 = vrot.slane %v2607_v2, 4  ;;  %v3509_v34 = vor.u32 %v3508_v14, %v3505_v31  ;;  %v8281_v31 = vld [vmem:[%s12796_s3] sm:$0xff]  }
 0x1bc   : > { %v3401_v43 = vsel %vm3367_vm14, 65537, %v13025_v58  ;;  %v3402_v19 = vsel %vm3368_vm15, 65537, %v13025_v58  ;;  %v3671_v17 = vrot.slane %v3669_v9, 4  ;;  %v3674_v18 = vrot.slane %v3672_v37, 5  ;;  %v8284_v37 = vld [vmem:[%s12796_s3 + $0x40] sm:$0xff]  }
 0x1bd   : > { %v3514_v8 = vrot.slane %v12873_v6, 3  ;;  %vm9628_vm4 = vcmp.lt.s32.totalorder %v12885_v62, 7  ;;  %v3517_v9 = vrot.slane %v12878_v38, 4  ;;  %vm9643_vm5 = vcmp.lt.s32.totalorder %v12884_v12, 7 }
 0x1be   : > { %v9618_v59 = vld [vmem:[#allocation2 + $0x10] sm:$0xff]  ;;  %v9650_v44 = vcombine.low %v3401_v43, %v3402_v19  ;;  %vm3369_vm6 = vmpackc.low %vm9628_vm4, %vm9628_vm4  ;;  %v3675_v38 = vor.u32 %v3674_v18, %v3671_v17  ;;  %vm2414_vm8 = vsmask.f32 3328  ;;  %vm9760_vm15 = vcmp.gt.s32.totalorder %v1737_v48, 0 }
 0x1bf   : > { %v9622_v23 = vld [vmem:[#allocation2 + $0x8] sm:$0xff]  ;;  %v3648_v1 = vsel %vm3630_vm3, %v9618_v59, 0  ;;  %vm3370_vm7 = vmpackc.low %vm9643_vm5, %vm9643_vm5  ;;  %v9671_v18 = vrot.slane %v9618_v59, 4  ;;  %vm9767_vm4 = vcmp.gt.s32.totalorder %v1744_v25, 0 }
 0x1c0   : > { %v2632_v2 = vrot.slane %v9622_v23, 4  ;;  %v3647_v14 = vsel %vm12912_vm2, %v9622_v23, 0  ;;  %13179 = vst [vmem:[#allocation19_spill] sm:$0xff] %v9650_v44  ;;  %v3686_v43 = vshrl.u32 %v3648_v1, 16  ;;  %v3689_v19 = vshll.u32 %v3648_v1, 16 }
 0x1c1   : > { %v3677_v6 = vshrl.u32 %v3647_v14, 16  ;;  %v3680_v35 = vshll.u32 %v3647_v14, 16  ;;  %v13180_v14 = vmov 0.0   ;;  %v12881_v17 = vshrl.u32 %v9650_v44, 16  ;;  %13181 = vst [vmem:[#allocation21_spill] sm:$0xff] %v9671_v18 }
 0x1c2   : > { %v2633_v45 = vsel %vm12953_vm1, %v2631_v41, %v2632_v2  ;;  %v9663_v41 = vsel %vm12923_vm11, %v3500_v26, %v3509_v34  ;;  %v3403_v26 = vsel %vm3369_vm6, 65537, %v13025_v58  ;;  %v3404_v1 = vsel %vm3370_vm7, 65537, %v13025_v58  ;;  %vm2295_vm6 = vmpackc.low %vm9760_vm15, %vm9760_vm15 }
 0x1c3   : > { %7554 = vmatmul.mubr.msk.bf16.vlgmr.msra.gmra.mrb[28].mxu1 %vm701_vm0, %v2633_v45  ;;  %v3679_v27 = vrot.slane %v3677_v6, 4  ;;  %v3682_v5 = vrot.slane %v3680_v35, 5  ;;  %v8283_v45 = vld [vmem:[%s12796_s3 + $0x8] sm:$0xff]   ;;  %v3518_v35 = vor.u32 %v3517_v9, %v3514_v8  ;;  %v3691_v8 = vrot.slane %v3689_v19, 5  ;;  %v9682_v9 = vld [vmem:[#allocation2 + $0x18] sm:$0xff]  ;;  %vm2296_vm7 = vmpackc.low %vm9767_vm4, %vm9767_vm4 }
 0x1c4   : > { %7622 = vmatpush3.bf16.msra.mxu1 %v8281_v31  ;;  %7557 = vmatprep.mubr.msk.bf16.mxu1 %vm8349_vm9, %v13180_v14  ;;  %v12882_v31 = vshll.u32 %v9650_v44, 16  ;;  %vm3631_vm12 = vcmp.ne.s16.totalorder %v9663_v41, 0 }
 0x1c5   : > { %v3683_v6 = vor.u32 %v3682_v5, %v3679_v27  ;;  %7623 = vmatprep.subr.bf16.mxu1 %v13180_v14  ;;  %v3688_v5 = vrot.slane %v3686_v43, 4  ;;  %v9692_v55 = vsel %vm12923_vm11, %v3509_v34, %v3518_v35  ;;  %v2635_v43 = vsel %vm12953_vm1, %v2632_v2, %v9671_v18  ;;  %v8286_v2 = vld [vmem:[%s12796_s3 + $0x48] sm:$0xff]  }
 0x1c6   : > { %v3649_v19 = vsel %vm3631_vm12, %v9682_v9, 0  ;;  %vm3632_vm13 = vcmp.ne.s16.totalorder %v9692_v55, 0 }
 0x1c7   : > { %v3684_v27 = vsel %vm2414_vm8, %v3675_v38, %v3683_v6  ;;  %v9694_v38 = vcombine.low %v3403_v26, %v3404_v1  ;;  %v3692_v34 = vor.u32 %v3691_v8, %v3688_v5  ;;  %v3695_v26 = vshrl.u32 %v3649_v19, 16 }
 0x1c8   : > { %7698 = vmatmul.mubr.msk.bf16.vlgmr.msra.gmra.mrb[100].mxu0 %vm701_vm0, %v3684_v27  ;;  %7624 = vmatpush3.bf16.msra.mxu1 %v8283_v45  ;;  %v3523_v45 = vrot.slane %v12881_v17, 3  ;;  %v3526_v27 = vrot.slane %v12882_v31, 4  ;;  %v3698_v1 = vshll.u32 %v3649_v19, 16  ;;  %v9714_v17 = vld [vmem:[#allocation2 + $0x20] sm:$0xff]  ;;  %v2636_v31 = vrot.slane %v9682_v9, 4 }
 0x1c9   : > { %7701 = vmatprep.mubr.msk.bf16.mxu0 %vm8349_vm9, %v13180_v14  ;;  %13182 = vst [vmem:[#allocation46_spill] sm:$0xff] %v9694_v38  ;;  %7765 = vmatprep.subr.bf16.mxu1 %v13180_v14  ;;  %v3693_v8 = vsel %vm2414_vm8, %v3683_v6, %v3692_v34  ;;  %v3650_v19 = vsel %vm3632_vm13, %v9714_v17, 0  ;;  %v3697_v47 = vrot.slane %v3695_v26, 4 }
 0x1ca   : > { %7838 = vmatpush3.bf16.msra.mxu0 %v8284_v37  ;;  %v12886_v37 = vshrl.u32 %v9694_v38, 16  ;;  %v3527_v5 = vor.u32 %v3526_v27, %v3523_v45  ;;  %v3700_v12 = vrot.slane %v3698_v1, 5  ;;  %v2637_v27 = vsel %vm12953_vm1, %v9671_v18, %v2636_v31  ;;  %v9739_v1 = vld [vmem:[#allocation2 + $0x28] sm:$0xff] }
 0x1cb   : > { %7558 = vmatmul.mubr.msk.bf16.gmra.mrb[32].mxu1 %vm701_vm0, %v2635_v43  ;;  %7839 = vmatprep.subr.bf16.mxu0 %v13180_v14  ;;  %v12887_v43 = vshll.u32 %v9694_v38, 16  ;;  %v3707_v62 = vshll.u32 %v3650_v19, 16  ;;  %v2640_v39 = vrot.slane %v9739_v1, 4  ;;  %v9849_v18 = vld [vmem:[#allocation2 + $0x48] sm:$0xff] }
 0x1cc   : > { %7561 = vmatprep.mubr.msk.bf16.mxu1 %vm8349_vm9, %v13180_v14  ;;  %v3532_v45 = vrot.slane %v12886_v37, 3  ;;  %v3701_v26 = vor.u32 %v3700_v12, %v3697_v47 }
 0x1cd   : > { %v3535_v6 = vrot.slane %v12887_v43, 4  ;;  %v2638_v43 = vrot.slane %v9714_v17, 4 }
 0x1ce   : > { %7840 = vmatpush3.bf16.msra.mxu0 %v8286_v2  ;;  %v9734_v2 = vsel %vm12923_vm11, %v3518_v35, %v3527_v5  ;;  %v3702_v51 = vsel %vm2414_vm8, %v3692_v34, %v3701_v26  ;;  %v3709_v35 = vrot.slane %v3707_v62, 5 }
 0x1cf   : > { %7981 = vmatprep.subr.bf16.mxu0 %v13180_v14  ;;  %vm3633_vm14 = vcmp.ne.s16.totalorder %v9734_v2, 0  ;;  %v3536_v37 = vor.u32 %v3535_v6, %v3532_v45  ;;  %v2639_v12 = vsel %vm12953_vm1, %v2636_v31, %v2638_v43  ;;  %v13183_v45 = vld [vmem:[#allocation8_spill] sm:$0xff] }
 0x1d0   : > { %7702 = vmatmul.mubr.msk.bf16.gmra.mrb[104].mxu0 %vm701_vm0, %v3693_v8  ;;  %v3704_v8 = vshrl.u32 %v3650_v19, 16  ;;  %v3651_v19 = vsel %vm3633_vm14, %v9739_v1, 0  ;;  %v13184_v6 = vshrl.u32 %v13183_v45, 16  ;;  %v13185_v34 = vshll.u32 %v13183_v45, 16  ;;  %v9773_v45 = vld [vmem:[#allocation2 + $0x30] sm:$0xff] }
 0x1d1   : > { %7705 = vmatprep.mubr.msk.bf16.mxu0 %vm8349_vm9, %v13180_v14  ;;  %v9751_v47 = vsel %vm12923_vm11, %v3527_v5, %v3536_v37  ;;  %v3713_v54 = vshrl.u32 %v3651_v19, 16  ;;  %v3716_v5 = vshll.u32 %v3651_v19, 16  ;;  %v2329_v19 = vsel %vm2295_vm6, 65537, %v13025_v58 }
 0x1d2   : > { %v3706_v40 = vrot.slane %v3704_v8, 4  ;;  %v3544_v62 = vrot.slane %v13185_v34, 4  ;;  %vm3634_vm5 = vcmp.ne.s16.totalorder %v9751_v47, 0 }
 0x1d3   : > { %7562 = vmatmul.mubr.msk.bf16.gmra.mrb[36].mxu1 %vm701_vm0, %v2637_v27  ;;  %v3541_v27 = vrot.slane %v13184_v6, 3  ;;  %v3715_v25 = vrot.slane %v3713_v54, 4  ;;  %v2641_v6 = vsel %vm12953_vm1, %v2638_v43, %v2640_v39  ;;  %v13190_v54 = vld [vmem:[#allocation23_spill] sm:$0xff]  ;;  %v9805_v43 = vld [vmem:[#allocation2 + $0x38] sm:$0xff] }
 0x1d4   : > { %7565 = vmatprep.mubr.msk.bf16.mxu1 %vm8349_vm9, %v13180_v14  ;;  %v3710_v8 = vor.u32 %v3709_v35, %v3706_v40  ;;  %v3718_v40 = vrot.slane %v3716_v5, 5  ;;  %v3652_v35 = vsel %vm3634_vm5, %v9773_v45, 0 }
 0x1d5   : > { %v3545_v48 = vor.u32 %v3544_v62, %v3541_v27  ;;  %v13192_v62 = vshll.u32 %v13190_v54, 16  ;;  %v3722_v31 = vshrl.u32 %v3652_v35, 16 }
 0x1d6   : > { %v3711_v42 = vsel %vm2414_vm8, %v3701_v26, %v3710_v8  ;;  %v13191_v26 = vshrl.u32 %v13190_v54, 16  ;;  %v3719_v5 = vor.u32 %v3718_v40, %v3715_v25 }
 0x1d7   : > { %v9794_v27 = vsel %vm12923_vm11, %v3536_v37, %v3545_v48  ;;  %v2642_v37 = vrot.slane %v9773_v45, 4 }
 0x1d8   : > { %7706 = vmatmul.mubr.msk.bf16.gmra.mrb[108].mxu0 %vm701_vm0, %v3702_v51  ;;  %v3550_v34 = vrot.slane %v13191_v26, 3  ;;  %v3553_v51 = vrot.slane %v13192_v62, 4  ;;  %vm3635_vm15 = vcmp.ne.s16.totalorder %v9794_v27, 0  ;;  %v3720_v54 = vsel %vm2414_vm8, %v3710_v8, %v3719_v5 }
 0x1d9   : > { %7709 = vmatprep.mubr.msk.bf16.mxu0 %vm8349_vm9, %v13180_v14  ;;  %v3724_v62 = vrot.slane %v3722_v31, 4  ;;  %v3653_v25 = vsel %vm3635_vm15, %v9805_v43, 0  ;;  %v2643_v40 = vsel %vm12953_vm1, %v2640_v39, %v2642_v37  ;;  %v2644_v39 = vrot.slane %v9805_v43, 4 }
 0x1da   : > { %v3554_v26 = vor.u32 %v3553_v51, %v3550_v34  ;;  %v3731_v31 = vshrl.u32 %v3653_v25, 16 }
 0x1db   : > { %7566 = vmatmul.mubr.msk.bf16.gmra.mrb[40].mxu1 %vm701_vm0, %v2639_v12  ;;  %v2330_v12 = vsel %vm2296_vm7, 65537, %v13025_v58 }
 0x1dc   : > { %7569 = vmatprep.mubr.msk.bf16.mxu1 %vm8349_vm9, %v13180_v14  ;;  %v9801_v49 = vcombine.low %v2329_v19, %v2330_v12  ;;  %v13194_v19 = vld [vmem:[#allocation38_spill] sm:$0xff]  ;;  %v3733_v53 = vrot.slane %v3731_v31, 4 }
 0x1dd   : > { %v13195_v12 = vshrl.u32 %v13194_v19, 16  ;;  %v13196_v8 = vshll.u32 %v13194_v19, 16 }
 0x1de   : > { %13193 = vst [vmem:[#allocation48_spill] sm:$0xff] %v9801_v49 }
 0x1df   : > { %v3562_v34 = vrot.slane %v13196_v8, 4 }
 0x1e0   : > { %7710 = vmatmul.mubr.msk.bf16.gmra.mrb[112].mxu0 %vm701_vm0, %v3711_v42  ;;  %v3725_v42 = vshll.u32 %v3652_v35, 16  ;;  %v9818_v35 = vsel %vm12923_vm11, %v3545_v48, %v3554_v26 }
 0x1e1   : > { %7713 = vmatprep.mubr.msk.bf16.mxu0 %vm8349_vm9, %v13180_v14  ;;  %vm3636_vm4 = vcmp.ne.s16.totalorder %v9818_v35, 0 }
 0x1e2   : > { %v3727_v22 = vrot.slane %v3725_v42, 5  ;;  %v3734_v42 = vshll.u32 %v3653_v25, 16 }
 0x1e3   : > { %7570 = vmatmul.mubr.msk.bf16.gmra.mrb[44].mxu1 %vm701_vm0, %v2641_v6  ;;  %v3559_v6 = vrot.slane %v13195_v12, 3 }
 0x1e4   : > { %7573 = vmatprep.mubr.msk.bf16.mxu1 %vm8349_vm9, %v13180_v14  ;;  %v3728_v51 = vor.u32 %v3727_v22, %v3724_v62  ;;  %v3736_v19 = vrot.slane %v3734_v42, 5  ;;  %v2645_v62 = vsel %vm12953_vm1, %v2642_v37, %v2644_v39  ;;  %v13200_v37 = vld [vmem:[#allocation51_spill] sm:$0xff] }
 0x1e5   : > { %v3563_v48 = vor.u32 %v3562_v34, %v3559_v6 }
 0x1e6   : > { %v3729_v12 = vsel %vm2414_vm8, %v3719_v5, %v3728_v51  ;;  %v3737_v31 = vor.u32 %v3736_v19, %v3733_v53 }
 0x1e7   : > { %v9840_v25 = vsel %vm12923_vm11, %v3554_v26, %v3563_v48  ;;  %v13201_v26 = vshrl.u32 %v13200_v37, 16 }
 0x1e8   : > { %7714 = vmatmul.mubr.msk.bf16.gmra.mrb[116].mxu0 %vm701_vm0, %v3720_v54  ;;  %v9827_v54 = vld [vmem:[#allocation2 + $0x40] sm:$0xff]  ;;  %vm12922_vm6 = vcmp.ne.s16.totalorder %v9840_v25, 0  ;;  %v3738_v15 = vsel %vm2414_vm8, %v3728_v51, %v3737_v31 }
 0x1e9   : > { %7717 = vmatprep.mubr.msk.bf16.mxu0 %vm8349_vm9, %v13180_v14  ;;  %v3654_v22 = vsel %vm3636_vm4, %v9827_v54, 0  ;;  %v3577_v44 = vrot.slane %v13201_v26, 3 }
 0x1ea   : > { %v3740_v42 = vshrl.u32 %v3654_v22, 16 }
 0x1eb   : > { %7574 = vmatmul.mubr.msk.bf16.gmra.mrb[48].mxu1 %vm701_vm0, %v2643_v40  ;;  %v13197_v40 = vld [vmem:[#allocation47_spill] sm:$0xff] }
 0x1ec   : > { %7577 = vmatprep.mubr.msk.bf16.mxu1 %vm8349_vm9, %v13180_v14  ;;  %v13198_v6 = vshrl.u32 %v13197_v40, 16  ;;  %v13199_v5 = vshll.u32 %v13197_v40, 16  ;;  %v2646_v40 = vrot.slane %v9827_v54, 4  ;;  %v3742_v50 = vrot.slane %v3740_v42, 4 }
 0x1ee   : > { %v3568_v8 = vrot.slane %v13198_v6, 3  ;;  %v3571_v34 = vrot.slane %v13199_v5, 4  ;;  %v13202_v6 = vshll.u32 %v13200_v37, 16  ;;  %v3655_v37 = vsel %vm12922_vm6, %v9849_v18, 0 }
 0x1ef   : > { %v2647_v51 = vsel %vm12953_vm1, %v2644_v39, %v2646_v40  ;;  %v3752_v36 = vshll.u32 %v3655_v37, 16  ;;  %v13213_v39 = vshrl.u32 %v9181_v52, 16 }
 0x1f0   : > { %7718 = vmatmul.mubr.msk.bf16.gmra.mrb[120].mxu0 %vm701_vm0, %v3729_v12  ;;  %v3743_v12 = vshll.u32 %v3654_v22, 16  ;;  %v3580_v60 = vrot.slane %v13202_v6, 4  ;;  %v3572_v5 = vor.u32 %v3571_v34, %v3568_v8  ;;  %v13206_v34 = vld [vmem:[#allocation62_spill] sm:$0xff] }
 0x1f1   : > { %7721 = vmatprep.mubr.msk.bf16.mxu0 %vm8349_vm9, %v13180_v14  ;;  %v13207_v26 = vshrl.u32 %v13206_v34, 16  ;;  %v3613_v63 = vrot.slane %v13213_v39, 3  ;;  %v9901_v39 = vld [vmem:[#allocation2 + $0x88] sm:$0xf]  ;;  %v3754_v57 = vrot.slane %v3752_v36, 5 }
 0x1f2   : > { %v3745_v46 = vrot.slane %v3743_v12, 5  ;;  %v3581_v8 = vor.u32 %v3580_v60, %v3577_v44  ;;  %v9874_v42 = vsel %vm12923_vm11, %v3563_v48, %v3572_v5  ;;  %v13210_v60 = vld [vmem:[#allocation70_spill] sm:$0xff]  ;;  %v13214_v48 = vshll.u32 %v9181_v52, 16 }
 0x1f3   : > { %7578 = vmatmul.mubr.msk.bf16.gmra.mrb[52].mxu1 %vm701_vm0, %v2645_v62  ;;  %v13203_v62 = vld [vmem:[#allocation55_spill] sm:$0xff]  ;;  %v3595_v6 = vrot.slane %v13207_v26, 3  ;;  %13209 = vst [vmem:[#allocation24_spill] sm:$0xff] %v9874_v42  ;;  %v13211_v44 = vshrl.u32 %v13210_v60, 16  ;;  %vm12921_vm7 = vcmp.ne.s16.totalorder %v9874_v42, 0 }
 0x1f4   : > { %7581 = vmatprep.mubr.msk.bf16.mxu1 %vm8349_vm9, %v13180_v14  ;;  %v13204_v53 = vshrl.u32 %v13203_v62, 16  ;;  %v13205_v22 = vshll.u32 %v13203_v62, 16  ;;  %v13208_v62 = vshll.u32 %v13206_v34, 16  ;;  %v3746_v12 = vor.u32 %v3745_v46, %v3742_v50 }
 0x1f5   : > { %v3604_v26 = vrot.slane %v13211_v44, 3  ;;  %v13212_v34 = vshll.u32 %v13210_v60, 16  ;;  %v9891_v46 = vsel %vm12923_vm11, %v3572_v5, %v3581_v8  ;;  %v13216_v60 = vshrl.u32 %v9240_v24, 16 }
 0x1f6   : > { %v3586_v19 = vrot.slane %v13204_v53, 3  ;;  %v3589_v30 = vrot.slane %v13205_v22, 4  ;;  %v3598_v53 = vrot.slane %v13208_v62, 4  ;;  %v3749_v22 = vshrl.u32 %v3655_v37, 16  ;;  %13215 = vst [vmem:[#allocation25_spill] sm:$0xff] %v9891_v46 }
 0x1f7   : > { %v3607_v62 = vrot.slane %v13212_v34, 4  ;;  %v12913_v37 = vrot.slane %v9849_v18, 4  ;;  %v3622_v44 = vrot.slane %v13216_v60, 3  ;;  %v13217_v34 = vshll.u32 %v9240_v24, 16 }
 0x1f8   : > { %7722 = vmatmul.mubr.msk.bf16.gmra.mrb[124].mxu0 %vm701_vm0, %v3738_v15  ;;  %v3590_v15 = vor.u32 %v3589_v30, %v3586_v19  ;;  %v3616_v30 = vrot.slane %v13214_v48, 4  ;;  %v9887_v19 = vld [vmem:[#allocation2 + $0x50] sm:$0xff]  ;;  %v3599_v50 = vor.u32 %v3598_v53, %v3595_v6  ;;  %v3747_v48 = vsel %vm2414_vm8, %v3737_v31, %v3746_v12 }
 0x1f9   : > { %7725 = vmatprep.mubr.msk.bf16.mxu0 %vm8349_vm9, %v13180_v14  ;;  %v3625_v52 = vrot.slane %v13217_v34, 4  ;;  %v3751_v28 = vrot.slane %v3749_v22, 4  ;;  %v3656_v5 = vsel %vm12921_vm7, %v9887_v19, 0  ;;  %vm12920_vm10 = vcmp.ne.s16.totalorder %v9891_v46, 0 }
 0x1fa   : > { %v3617_v6 = vor.u32 %v3616_v30, %v3613_v63  ;;  %v6133_v24 = vsel %vm3630_vm3, %v9682_v9, 0  ;;  %v9916_v36 = vsel %vm12923_vm11, %v3590_v15, %v3599_v50  ;;  %v6134_v53 = vsel %vm3631_vm12, %v9714_v17, 0  ;;  %v13219_v30 = vld [vmem:[#allocation29_spill] sm:$0xff] }
 0x1fb   : > { %7582 = vmatmul.mubr.msk.bf16.gmra.mrb[56].mxu1 %vm701_vm0, %v2647_v51  ;;  %v9895_v51 = vsel %vm12923_vm11, %v3581_v8, %v3590_v15  ;;  %v3608_v8 = vor.u32 %v3607_v62, %v3604_v26  ;;  %v6135_v63 = vsel %vm3632_vm13, %v9739_v1, 0  ;;  %v2649_v32 = vsel %vm12953_vm1, %v2646_v40, %v12913_v37  ;;  %v9970_v37 = vld [vmem:[#allocation2 + $0x60] sm:$0xff] }
 0x1fc   : > { %7585 = vmatprep.mubr.msk.bf16.mxu1 %vm8349_vm9, %v13180_v14  ;;  %vm12919_vm2 = vcmp.ne.s16.totalorder %v9895_v51, 0  ;;  %v9928_v22 = vor.u32 %v3625_v52, %v3622_v44  ;;  %v6136_v15 = vsel %vm3633_vm14, %v9773_v45, 0  ;;  %v3755_v26 = vor.u32 %v3754_v57, %v3751_v28 }
 0x1fd   : > { %v3758_v62 = vshrl.u32 %v3656_v5, 16  ;;  %v3761_v41 = vshll.u32 %v3656_v5, 16  ;;  %v13220_v60 = vand.u32 7, %v13219_v30  ;;  %v6171_v34 = vshrl.u32 %v6133_v24, 16  ;;  %v9957_v5 = vld [vmem:[#allocation2 + $0x58] sm:$0xff] }
 0x1fe   : > { %13218 = vst [vmem:[#allocation26_spill] sm:$0xff] %v9928_v22  ;;  %v9943_v40 = vsel %vm12923_vm11, %v3599_v50, %v3608_v8  ;;  %v9946_v2 = vsel %vm12923_vm11, %v3608_v8, %v3617_v6  ;;  %v13223_v28 = vand.u32 7, %v8792_v7  ;;  %v6174_v45 = vshll.u32 %v6133_v24, 16 }
 0x1ff   : > { %vm9936_vm3 = vcmp.gt.s32.totalorder %v13220_v60, 0  ;;  %v6180_v44 = vshrl.u32 %v6134_v53, 16  ;;  %v6183_v52 = vshll.u32 %v6134_v53, 16  ;;  %v6189_v50 = vshrl.u32 %v6135_v63, 16 }
 0x200   : > { %7726 = vmatmul.mubr.msk.bf16.gmra.mrb[128].mxu0 %vm701_vm0, %v3747_v48  ;;  %vm9950_vm12 = vcmp.gt.s32.totalorder %v13223_v28, 0  ;;  %v6137_v48 = vsel %vm3634_vm5, %v9805_v43, 0  ;;  %v6198_v30 = vshrl.u32 %v6136_v15, 16  ;;  %v2650_v8 = vrot.slane %v9887_v19, 4 }
 0x201   : > { %7729 = vmatprep.mubr.msk.bf16.mxu0 %vm8349_vm9, %v13180_v14  ;;  %vm3641_vm13 = vcmp.ne.s16.totalorder %v9916_v36, 0  ;;  %v3756_v7 = vsel %vm2414_vm8, %v3746_v12, %v3755_v26  ;;  %v3760_v60 = vrot.slane %v3758_v62, 4  ;;  %v3763_v28 = vrot.slane %v3761_v41, 5  ;;  %vm2298_vm7 = vmpackc.low %vm9950_vm12, %vm9950_vm12 }
 0x202   : > { %v9964_v24 = vsel %vm12923_vm11, %v3617_v6, %v9928_v22  ;;  %v6201_v53 = vshll.u32 %v6136_v15, 16  ;;  %v6207_v47 = vshrl.u32 %v6137_v48, 16  ;;  %v6210_v31 = vshll.u32 %v6137_v48, 16 }
 0x203   : > { %7586 = vmatmul.mubr.msk.bf16.gmra.mrb[60].mxu1 %vm701_vm0, %v2649_v32  ;;  %v6192_v32 = vshll.u32 %v6135_v63, 16  ;;  %13226 = vst [vmem:[#allocation28_spill] sm:$0xff] %v9964_v24  ;;  %v3657_v63 = vsel %vm12920_vm10, %v9957_v5, 0  ;;  %vm3642_vm14 = vcmp.ne.s16.totalorder %v9943_v40, 0  ;;  %v6173_v12 = vrot.slane %v6171_v34, 4 }
 0x204   : > { %7589 = vmatprep.mubr.msk.bf16.mxu1 %vm8349_vm9, %v13180_v14  ;;  %v6176_v62 = vrot.slane %v6174_v45, 5  ;;  %v6182_v41 = vrot.slane %v6180_v44, 4  ;;  %v6185_v4 = vrot.slane %v6183_v52, 5  ;;  %v6191_v6 = vrot.slane %v6189_v50, 4 }
 0x205   : > { %v6194_v15 = vrot.slane %v6192_v32, 5  ;;  %v6200_v48 = vrot.slane %v6198_v30, 4  ;;  %v9979_v46 = vor.u32 %v3763_v28, %v3760_v60  ;;  %v3767_v42 = vshrl.u32 %v3657_v63, 16  ;;  %v10083_v30 = vld [vmem:[#allocation2 + $0x78] sm:$0xff] }
 0x206   : > { %v3770_v56 = vshll.u32 %v3657_v63, 16  ;;  %v3658_v34 = vsel %vm12919_vm2, %v9970_v37, 0  ;;  %v6203_v45 = vrot.slane %v6201_v53, 5  ;;  %v6209_v44 = vrot.slane %v6207_v47, 4  ;;  %v10003_v47 = vld [vmem:[#allocation2 + $0x68] sm:$0xff]  ;;  %vm2297_vm2 = vmpackc.low %vm9936_vm3, %vm9936_vm3 }
 0x207   : > { %v6212_v52 = vrot.slane %v6210_v31, 5  ;;  %v9987_v50 = vsel %vm3635_vm15, %v9827_v54, 0  ;;  %v2652_v32 = vrot.slane %v9957_v5, 4  ;;  %v13228_v60 = vand.u32 7, %v8849_v20 }
 0x208   : > { %7730 = vmatmul.mubr.msk.bf16.gmra.mrb[132].mxu0 %vm701_vm0, %v3756_v7  ;;  %v13227_v7 = vrot.slane %v9849_v18, 4  ;;  %v10001_v31 = vor.u32 %v6185_v4, %v6182_v41  ;;  %v3776_v27 = vshrl.u32 %v3658_v34, 16  ;;  %v3779_v53 = vshll.u32 %v3658_v34, 16 }
 0x209   : > { %7733 = vmatprep.mubr.msk.bf16.mxu0 %vm8349_vm9, %v13180_v14  ;;  %vm9997_vm5 = vcmp.gt.s32.totalorder %v13228_v60, 0  ;;  %vm3643_vm15 = vcmp.ne.s16.totalorder %v9946_v2, 0  ;;  %v13231_v63 = vand.u32 7, %v9123_v16  ;;  %v3765_v4 = vsel %vm2414_vm8, %v3755_v26, %v9979_v46 }
 0x20a   : > { %v2651_v38 = vsel %vm12953_vm1, %v13227_v7, %v2650_v8  ;;  %v3772_v41 = vrot.slane %v3770_v56, 5  ;;  %v10021_v7 = vor.u32 %v6194_v15, %v6191_v6  ;;  %v10023_v34 = vor.u32 %v6203_v45, %v6200_v48  ;;  %vm2299_vm6 = vmpackc.low %vm9997_vm5, %vm9997_vm5 }
 0x20b   : > { %7590 = vmatmul.mubr.msk.bf16.gmra.mrb[64].mxu1 %vm701_vm0, %v2651_v38  ;;  %v9991_v38 = vor.u32 %v6176_v62, %v6173_v12  ;;  %vm10011_vm10 = vcmp.gt.s32.totalorder %v13231_v63, 0  ;;  %v6216_v12 = vshrl.u32 %v9987_v50, 16  ;;  %v3769_v62 = vrot.slane %v3767_v42, 4  ;;  %v10029_v63 = vld [vmem:[#allocation2 + $0x70] sm:$0xff] }
 0x20c   : > { %7593 = vmatprep.mubr.msk.bf16.mxu1 %vm8349_vm9, %v13180_v14  ;;  %13234 = vst [vmem:[#allocation32_spill] sm:$0xff] %v10021_v7  ;;  %13235 = vst [vmem:[#allocation34_spill] sm:$0xff] %v10023_v34  ;;  %v10025_v16 = vor.u32 %v6212_v52, %v6209_v44  ;;  %v10037_v56 = vsel %vm3636_vm4, %v9849_v18, 0  ;;  %v2653_v42 = vsel %vm12953_vm1, %v2650_v8, %v2652_v32  ;;  %v2654_v26 = vrot.slane %v9970_v37, 4 }
 0x20d   : > { %v3659_v6 = vsel %vm3641_vm13, %v10003_v47, 0  ;;  %vm2300_vm11 = vmpackc.low %vm10011_vm10, %vm10011_vm10  ;;  %v3778_v15 = vrot.slane %v3776_v27, 4  ;;  %v3781_v48 = vrot.slane %v3779_v53, 5  ;;  %v2331_v35 = vsel %vm2297_vm2, 65537, %v13025_v58 }
 0x20e   : > { %13236 = vst [vmem:[#allocation35_spill] sm:$0xff] %v10025_v16  ;;  %v2332_v8 = vsel %vm2298_vm7, 65537, %v13025_v58  ;;  %v10061_v45 = vrot.slane %v6216_v12, 4  ;;  %v3773_v44 = vor.u32 %v3772_v41, %v3769_v62  ;;  %v3660_v55 = vsel %vm3642_vm14, %v10029_v63, 0 }
 0x20f   : > { %v3785_v27 = vshrl.u32 %v3659_v6, 16  ;;  %v3788_v53 = vshll.u32 %v3659_v6, 16  ;;  %vm12934_vm10 = vcmp.ne.s16.totalorder %v9964_v24, 0  ;;  %v2333_v57 = vsel %vm2299_vm6, 65537, %v13025_v58 }
 0x210   : > { %7734 = vmatmul.mubr.msk.bf16.gmra.mrb[136].mxu0 %vm701_vm0, %v3765_v4  ;;  %v2334_v20 = vsel %vm2300_vm11, 65537, %v13025_v58  ;;  %v2655_v62 = vsel %vm12953_vm1, %v2652_v32, %v2654_v26  ;;  %v10081_v41 = vcombine.low %v2331_v35, %v2332_v8  ;;  %v3794_v6 = vshrl.u32 %v3660_v55, 16 }
 0x211   : > { %7737 = vmatprep.mubr.msk.bf16.mxu0 %vm8349_vm9, %v13180_v14  ;;  %v3797_v60 = vshll.u32 %v3660_v55, 16  ;;  %v12926_v52 = vshrl.u32 %v9801_v49, 16  ;;  %v3774_v28 = vsel %vm2414_vm8, %v9979_v46, %v3773_v44  ;;  %v12927_v16 = vshll.u32 %v9801_v49, 16 }
 0x212   : > { %13237 = vst [vmem:[#allocation36_spill] sm:$0xff] %v10081_v41  ;;  %v10089_v34 = vcombine.low %v2333_v57, %v2334_v20  ;;  %v13239_v4 = vand.u32 7, %v9164_v11  ;;  %v3787_v35 = vrot.slane %v3785_v27, 4  ;;  %v3790_v8 = vrot.slane %v3788_v53, 5 }
 0x213   : > { %7594 = vmatmul.mubr.msk.bf16.gmra.mrb[68].mxu1 %vm701_vm0, %v2653_v42  ;;  %v3782_v42 = vor.u32 %v3781_v48, %v3778_v15  ;;  %v13242_v15 = vrot.slane %v10003_v47, 4  ;;  %v13243_v46 = vand.u32 7, %v9186_v21  ;;  %v2658_v11 = vrot.slane %v10029_v63, 4 }
 0x214   : > { %7597 = vmatprep.mubr.msk.bf16.mxu1 %vm8349_vm9, %v13180_v14  ;;  %13238 = vst [vmem:[#allocation68_spill] sm:$0xff] %v10089_v34  ;;  %vm10093_vm11 = vcmp.gt.s32.totalorder %v13239_v4, 0  ;;  %v3661_v57 = vsel %vm3643_vm15, %v10083_v30, 0  ;;  %v12928_v20 = vshrl.u32 %v10081_v41, 16  ;;  %v3796_v21 = vrot.slane %v3794_v6, 4 }
 0x215   : > { %v2657_v48 = vsel %vm12953_vm1, %v2654_v26, %v13242_v15  ;;  %vm10103_vm2 = vcmp.gt.s32.totalorder %v13243_v46, 0  ;;  %v12929_v26 = vshll.u32 %v10081_v41, 16  ;;  %v3783_v27 = vsel %vm2414_vm8, %v3773_v44, %v3782_v42  ;;  %vm2301_vm4 = vmpackc.low %vm10093_vm11, %vm10093_vm11 }
 0x216   : > { %v3799_v53 = vrot.slane %v3797_v60, 5  ;;  %v2418_v4 = vrot.slane %v12926_v52, 4  ;;  %v12933_v15 = vshrl.u32 %v10089_v34, 16  ;;  %vm2302_vm6 = vmpackc.low %vm10103_vm2, %vm10103_vm2  ;;  %v13246_v60 = vand.u32 7, %v9374_v29 }
 0x217   : > { %v3803_v6 = vshrl.u32 %v3661_v57, 16  ;;  %v3806_v52 = vshll.u32 %v3661_v57, 16  ;;  %v13249_v12 = vand.u32 7, %v9385_v0  ;;  %v2660_v29 = vrot.slane %v10083_v30, 4 }
 0x218   : > { %7738 = vmatmul.mubr.msk.bf16.gmra.mrb[140].mxu0 %vm701_vm0, %v3774_v28  ;;  %v2421_v28 = vrot.slane %v12927_v16, 5  ;;  %vm10131_vm7 = vcmp.gt.s32.totalorder %v13246_v60, 0  ;;  %v10137_v16 = vld [vmem:[#allocation2 + $0x80] sm:$0xff]  ;;  %v2426_v60 = vrot.slane %v12928_v20, 4  ;;  %v2429_v46 = vrot.slane %v12929_v26, 5 }
 0x219   : > { %7741 = vmatprep.mubr.msk.bf16.mxu0 %vm8349_vm9, %v13180_v14  ;;  %vm10141_vm3 = vcmp.gt.s32.totalorder %v13249_v12, 0  ;;  %v3800_v57 = vor.u32 %v3799_v53, %v3796_v21  ;;  %v2335_v0 = vsel %vm2301_vm4, 65537, %v13025_v58  ;;  %v2336_v12 = vsel %vm2302_vm6, 65537, %v13025_v58  ;;  %vm2303_vm5 = vmpackc.low %vm10131_vm7, %vm10131_vm7 }
 0x21a   : > { %v3662_v21 = vsel %vm12934_vm10, %v10137_v16, 0  ;;  %v10175_v53 = vor.u32 %v2421_v28, %v2418_v4  ;;  %v2435_v32 = vrot.slane %v12933_v15, 4  ;;  %v13259_v20 = vshll.u32 %v10089_v34, 16  ;;  %vm2304_vm11 = vmpackc.low %vm10141_vm3, %vm10141_vm3  ;;  %v3288_v4 = vld [vmem:[#allocation2 + $0x88] sm:$0x1f]  ;;  %v13287_v34 = vld [vmem:[#allocation31_spill] sm:$0xff] }
 0x21b   : > { %7598 = vmatmul.mubr.msk.bf16.gmra.mrb[72].mxu1 %vm701_vm0, %v2655_v62  ;;  %v3791_v62 = vor.u32 %v3790_v8, %v3787_v35  ;;  %v13252_v35 = vand.u32 7, %v9519_v10  ;;  %v13255_v10 = vand.u32 7, %v9542_v33  ;;  %v13260_v33 = vrot.slane %v10003_v47, 4 }
 0x21c   : > { %7601 = vmatprep.mubr.msk.bf16.mxu1 %vm8349_vm9, %v13180_v14  ;;  %13258 = vst [vmem:[#allocation63_spill] sm:$0xff] %v10175_v53  ;;  %v2438_v26 = vrot.slane %v13259_v20, 5  ;;  %v3805_v24 = vrot.slane %v3803_v6, 4  ;;  %v3808_v41 = vrot.slane %v3806_v52, 5  ;;  %v10196_v28 = vsel %vm12953_vm1, %v2658_v11, %v2660_v29 }
 0x21d   : > { %vm10152_vm12 = vcmp.gt.s32.totalorder %v13252_v35, 0  ;;  %vm10168_vm2 = vcmp.gt.s32.totalorder %v13255_v10, 0  ;;  %v2659_v10 = vsel %vm12953_vm1, %v13260_v33, %v2658_v11  ;;  %v3792_v20 = vsel %vm2414_vm8, %v3782_v42, %v3791_v62  ;;  %v2209_v35 = vld [vmem:[#allocation2] sm:$0xf8] }
 0x21e   : > { %vm2305_vm4 = vmpackc.low %vm10152_vm12, %vm10152_vm12  ;;  %v10198_v15 = vcombine.low %v2335_v0, %v2336_v12  ;;  %v10204_v52 = vsel %vm2414_vm8, %v3791_v62, %v3800_v57  ;;  %v3812_v6 = vshrl.u32 %v3662_v21, 16  ;;  %v3815_v33 = vshll.u32 %v3662_v21, 16 }
 0x21f   : > { %vm2306_vm6 = vmpackc.low %vm10168_vm2, %vm10168_vm2  ;;  %vm12937_vm10 = vcmp.ne.s16.totalorder %v9928_v22, 0  ;;  %v10212_v11 = vor.u32 %v2438_v26, %v2435_v32  ;;  %v10228_v62 = vor.u32 %v3808_v41, %v3805_v24  ;;  %v13263_v26 = vrot.slane %v10137_v16, 4 }
 0x220   : > { %7742 = vmatmul.mubr.msk.bf16.gmra.mrb[144].mxu0 %vm701_vm0, %v3783_v27  ;;  %v2430_v27 = vor.u32 %v2429_v46, %v2426_v60  ;;  %13261 = vst [vmem:[#allocation71_spill] sm:$0xff] %v10198_v15  ;;  %v2337_v46 = vsel %vm2303_vm5, 65537, %v13025_v58  ;;  %v2339_v44 = vsel %vm2305_vm4, 65537, %v13025_v58  ;;  %v2340_v55 = vsel %vm2306_vm6, 65537, %v13025_v58 }
 0x221   : > { %7745 = vmatprep.mubr.msk.bf16.mxu0 %vm8349_vm9, %v13180_v14  ;;  %v10233_v60 = vsel %vm12953_vm1, %v2660_v29, %v13263_v26  ;;  %v3663_v0 = vsel %vm12937_vm10, %v3288_v4, 0  ;;  %v12935_v24 = vshrl.u32 %v10198_v15, 16  ;;  %v12936_v41 = vshll.u32 %v10198_v15, 16 }
 0x222   : > { %v10210_v42 = vsel %vm2414_vm8, %v10175_v53, %v2430_v27  ;;  %v13264_v12 = vand.u32 7, %v9581_v3  ;;  %vm12956_vm3 = vcmp.ne.s16.totalorder %v10175_v53, 0  ;;  %v13268_v21 = vand.u32 7, %v9593_v13 }
 0x223   : > { %7602 = vmatmul.mubr.msk.bf16.gmra.mrb[76].mxu1 %vm701_vm0, %v2657_v48  ;;  %13262 = vst [vmem:[#allocation66_spill] sm:$0xff] %v10210_v42  ;;  %v2338_v48 = vsel %vm2304_vm11, 65537, %v13025_v58  ;;  %vm12952_vm12 = vcmp.ne.s16.totalorder %v10210_v42, 0  ;;  %v10262_v4 = vrot.slane %v3812_v6, 4  ;;  %v10264_v3 = vrot.slane %v3815_v33, 5 }
 0x224   : > { %7605 = vmatprep.mubr.msk.bf16.mxu1 %vm8349_vm9, %v13180_v14  ;;  %vm10248_vm7 = vcmp.gt.s32.totalorder %v13264_v12, 0  ;;  %v10254_v8 = vcombine.low %v2337_v46, %v2338_v48  ;;  %vm10258_vm5 = vcmp.gt.s32.totalorder %v13268_v21, 0  ;;  %v10268_v26 = vsel %vm2414_vm8, %v2430_v27, %v10212_v11 }
 0x225   : > { %13271 = vst [vmem:[#allocation18_spill] sm:$0xff] %v10268_v26  ;;  %v10270_v12 = vcombine.low %v2339_v44, %v2340_v55  ;;  %v10275_v46 = vsel %vm2414_vm8, %v3800_v57, %v10228_v62  ;;  %v13273_v13 = vshrl.u32 %v9303_v61, 16  ;;  %v3821_v6 = vshrl.u32 %v3663_v0, 16  ;;  %vm2307_vm2 = vmpackc.low %vm10248_vm7, %vm10248_vm7 }
 0x226   : > { %13267 = vst [vmem:[#allocation16_spill] sm:$0xff] %v10254_v8  ;;  %v3824_v21 = vshll.u32 %v3663_v0, 16  ;;  %v2586_v57 = vsel %vm12952_vm12, %v9622_v23, 0  ;;  %v2444_v27 = vrot.slane %v12935_v24, 4  ;;  %v2447_v33 = vrot.slane %v12936_v41, 5  ;;  %vm2308_vm11 = vmpackc.low %vm10258_vm5, %vm10258_vm5  ;;  %v13274_v0 = vld [vmem:[#allocation4_spill] sm:$0xff] }
 0x227   : > { %13272 = vst [vmem:[#allocation20_spill] sm:$0xff] %v10270_v12  ;;  %v10279_v48 = vrot.slane %v13273_v13, 4  ;;  %vm12951_vm4 = vcmp.ne.s16.totalorder %v10268_v26, 0  ;;  %v13278_v41 = vld [vmem:[#allocation5_spill] sm:$0xff]  ;;  %v10328_v24 = vrot.slane %v3821_v6, 4  ;;  %v13282_v26 = vshrl.u32 %v10254_v8, 16 }
 0x228   : > { %7746 = vmatmul.mubr.msk.bf16.gmra.mrb[148].mxu0 %vm701_vm0, %v3792_v20  ;;  %v2585_v20 = vsel %vm12956_vm3, %v2209_v35, 0  ;;  %v13275_v35 = vand.u32 7, %v13274_v0  ;;  %v2587_v32 = vsel %vm12951_vm4, %v9618_v59, 0  ;;  %v13279_v44 = vand.u32 7, %v13278_v41 }
 0x229   : > { %7749 = vmatprep.mubr.msk.bf16.mxu0 %vm8349_vm9, %v13180_v14  ;;  %v2898_v0 = vshrl.u32 %v2585_v20, 16  ;;  %v2341_v59 = vsel %vm2307_vm2, 65537, %v13025_v58  ;;  %v2906_v41 = vshrl.u32 %v2586_v57, 16  ;;  %v2448_v13 = vor.u32 %v2447_v33, %v2444_v27 }
 0x22a   : > { %vm10303_vm6 = vcmp.gt.s32.totalorder %v13275_v35, 0  ;;  %vm10315_vm5 = vcmp.gt.s32.totalorder %v13279_v44, 0  ;;  %v2901_v35 = vshll.u32 %v2585_v20, 16  ;;  %v2909_v44 = vshll.u32 %v2586_v57, 16 }
 0x22b   : > { %7606 = vmatmul.mubr.msk.bf16.gmra.mrb[80].mxu1 %vm701_vm0, %v2659_v10  ;;  %v2342_v10 = vsel %vm2308_vm11, 65537, %v13025_v58  ;;  %vm2309_vm10 = vmpackc.low %vm10303_vm6, %vm10303_vm6  ;;  %v2915_v22 = vshrl.u32 %v2587_v32, 16  ;;  %v2918_v20 = vshll.u32 %v2587_v32, 16  ;;  %v2453_v15 = vrot.slane %v13282_v26, 4 }
 0x22c   : > { %7609 = vmatprep.mubr.msk.bf16.mxu1 %vm8349_vm9, %v13180_v14  ;;  %v13283_v29 = vshll.u32 %v10254_v8, 16  ;;  %vm2310_vm7 = vmpackc.low %vm10315_vm5, %vm10315_vm5  ;;  %v13284_v6 = vshrl.u32 %v10270_v12, 16  ;;  %v13285_v27 = vshll.u32 %v10270_v12, 16  ;;  %v10344_v53 = vcombine.low %v2341_v59, %v2342_v10  ;;  %v13291_v8 = vld [vmem:[#allocation33_spill] sm:$0xff] }
 0x22d   : > { %v13288_v32 = vand.u32 7, %v13287_v34  ;;  %v3826_v26 = vrot.slane %v3824_v21, 5  ;;  %v2900_v55 = vrot.slane %v2898_v0, 3  ;;  %v13292_v7 = vand.u32 7, %v13291_v8 }
 0x22e   : > { %v2456_v42 = vrot.slane %v13283_v29, 5  ;;  %v2462_v57 = vrot.slane %v13284_v6, 4  ;;  %v2465_v33 = vrot.slane %v13285_v27, 5  ;;  %13286 = vst [vmem:[#allocation22_spill] sm:$0xff] %v10344_v53  ;;  %v2903_v29 = vrot.slane %v2901_v35, 4  ;;  %v13296_v35 = vld [vmem:[#allocation6_spill] sm:$0xff] }
 0x22f   : > { %vm10348_vm2 = vcmp.gt.s32.totalorder %v13288_v32, 0  ;;  %vm10356_vm11 = vcmp.gt.s32.totalorder %v13292_v7, 0  ;;  %v2908_v34 = vrot.slane %v2906_v41, 3  ;;  %v10364_v59 = vsel %vm2414_vm8, %v10212_v11, %v2448_v13 }
 0x230   : > { %7750 = vmatmul.mubr.msk.bf16.gmra.mrb[152].mxu0 %vm701_vm0, %v10204_v52  ;;  %13295 = vst [vmem:[#allocation8_spill] sm:$0xff] %v10364_v59  ;;  %v2343_v52 = vsel %vm2309_vm10, 65537, %v13025_v58  ;;  %v2344_v7 = vsel %vm2310_vm7, 65537, %v13025_v58  ;;  %v2911_v8 = vrot.slane %v2909_v44, 4  ;;  %v2917_v21 = vrot.slane %v2915_v22, 3  ;;  %vm2313_vm4 = vmpackc.low %vm10348_vm2, %vm10348_vm2  ;;  %v13300_v22 = vld [vmem:[#allocation7_spill] sm:$0xff] }
 0x231   : > { %7753 = vmatprep.mubr.msk.bf16.mxu0 %vm8349_vm9, %v13180_v14  ;;  %v2920_v0 = vrot.slane %v2918_v20, 4  ;;  %v13297_v10 = vand.u32 7, %v13296_v35  ;;  %v2457_v11 = vor.u32 %v2456_v42, %v2453_v15  ;;  %v10384_v23 = vor.u32 %v2465_v33, %v2462_v57  ;;  %vm2314_vm6 = vmpackc.low %vm10356_vm11, %vm10356_vm11 }
 0x232   : > { %v12959_v44 = vshrl.u32 %v10344_v53, 16  ;;  %v13301_v20 = vand.u32 7, %v13300_v22  ;;  %vm12954_vm7 = vcmp.ne.s16.totalorder %v10364_v59, 0  ;;  %v12960_v15 = vshll.u32 %v10344_v53, 16 }
 0x233   : > { %vm10375_vm5 = vcmp.gt.s32.totalorder %v13297_v10, 0  ;;  %7610 = vmatmul.mubr.msk.bf16.gmra.mrb[84].mxu1 %vm701_vm0, %v10196_v28  ;;  %v12961_v28 = vshll.u32 %v9303_v61, 16  ;;  %v10401_v42 = vcombine.low %v2343_v52, %v2344_v7  ;;  %v3818_v57 = vor.u32 %v10264_v3, %v10262_v4 }
 0x234   : > { %vm10389_vm10 = vcmp.gt.s32.totalorder %v13301_v20, 0  ;;  %7613 = vmatprep.mubr.msk.bf16.mxu1 %vm8349_vm9, %v13180_v14  ;;  %v13305_v33 = vrot.slane %v9901_v39, 4  ;;  %v13306_v32 = vrot.slane %v10137_v16, 4  ;;  %v3827_v35 = vor.u32 %v3826_v26, %v10328_v24  ;;  %vm2311_vm11 = vmpackc.low %vm10375_vm5, %vm10375_vm5 }
 0x235   : > { %13304 = vst [vmem:[#allocation23_spill] sm:$0xff] %v10401_v42  ;;  %v2904_v10 = vor.u32 %v2903_v29, %v2900_v55  ;;  %v2912_v22 = vor.u32 %v2911_v8, %v2908_v34  ;;  %v10416_v52 = vor.u32 %v2920_v0, %v2917_v21  ;;  %vm2312_vm12 = vmpackc.low %vm10389_vm10, %vm10389_vm10  ;;  %v2347_v39 = vsel %vm2313_vm4, 65537, %v13025_v58  ;;  %v13309_v34 = vld [vmem:[#allocation37_spill] sm:$0xff]  ;;  %v13314_v0 = vld [vmem:[#allocation39_spill] sm:$0xff] }
 0x236   : > { %v10410_v6 = vsel %vm12953_vm1, %v13306_v32, %v13305_v33  ;;  %v2348_v24 = vsel %vm2314_vm6, 65537, %v13025_v58  ;;  %v2588_v4 = vsel %vm12954_vm7, %v9682_v9, 0  ;;  %v10432_v3 = vsel %vm2414_vm8, %v2448_v13, %v2457_v11 }
 0x237   : > { %13307 = vst [vmem:[#allocation38_spill] sm:$0xff] %v10432_v3  ;;  %v10436_v26 = vsel %vm2414_vm8, %v2457_v11, %v10384_v23  ;;  %v2471_v55 = vrot.slane %v12959_v44, 4  ;;  %v2474_v49 = vrot.slane %v12960_v15, 5  ;;  %v12957_v29 = vshrl.u32 %v10401_v42, 16  ;;  %v8285_v15 = vld [vmem:[%s12796_s3 + $0x30] sm:$0xff]  }
 0x238   : > { %13308 = vst [vmem:[#allocation47_spill] sm:$0xff] %v10436_v26  ;;  %7754 = vmatmul.mubr.msk.bf16.gmra.mrb[156].mxu0 %vm701_vm0, %v10275_v46  ;;  %v2345_v9 = vsel %vm2311_vm11, 65537, %v13025_v58  ;;  %v13310_v13 = vand.u32 7, %v13309_v34  ;;  %v12958_v8 = vshll.u32 %v10401_v42, 16  ;;  %v2346_v46 = vsel %vm2312_vm12, 65537, %v13025_v58  ;;  %v10810_v42 = vld [vmem:[#allocation2 + $0x10] sm:$0xff] }
 0x239   : > { %7757 = vmatprep.mubr.msk.bf16.mxu0 %vm8349_vm9, %v13180_v14  ;;  %v10456_v21 = vcombine.low %v2347_v39, %v2348_v24  ;;  %v13315_v41 = vand.u32 7, %v13314_v0  ;;  %v3819_v20 = vsel %vm2414_vm8, %v10228_v62, %v3818_v57  ;;  %v10468_v27 = vrot.slane %v12961_v28, 5  ;;  %v13319_v62 = vld [vmem:[#allocation41_spill] sm:$0xff] }
 0x23a   : > { %vm10448_vm4 = vcmp.gt.s32.totalorder %v13310_v13, 0  ;;  %v10471_v33 = vsel %vm2414_vm8, %v3818_v57, %v3827_v35  ;;  %v2924_v32 = vshrl.u32 %v2588_v4, 16  ;;  %vm13318_vm12 = vsmask.f32 4352  ;;  %v13324_v35 = vld [vmem:[#allocation42_spill] sm:$0xff] }
 0x23b   : > { %13313 = vst [vmem:[#allocation51_spill] sm:$0xff] %v10456_v21  ;;  %vm10460_vm2 = vcmp.gt.s32.totalorder %v13315_v41, 0  ;;  %7614 = vmatmul.mubr.msk.bf16.gmra.mrb[88].mxu1 %vm701_vm0, %v10233_v60  ;;  %v10476_v39 = vsel %vm13318_vm12, %v2904_v10, %v2912_v22  ;;  %v2927_v24 = vshll.u32 %v2588_v4, 16  ;;  %vm12955_vm5 = vcmp.ne.s16.totalorder %v10432_v3, 0  ;;  %vm2315_vm10 = vmpackc.low %vm10448_vm4, %vm10448_vm4 }
 0x23c   : > { %v13320_v34 = vand.u32 7, %v13319_v62  ;;  %7617 = vmatprep.mubr.msk.bf16.mxu1 %vm8349_vm9, %v13180_v14  ;;  %vm12962_vm11 = vcmp.ne.s16.totalorder %v10436_v26, 0  ;;  %v2475_v60 = vor.u32 %v2474_v49, %v2471_v55  ;;  %v10491_v57 = vcombine.low %v2345_v9, %v2346_v46  ;;  %vm2316_vm12 = vmpackc.low %vm10460_vm2, %vm10460_vm2 }
 0x23d   : > { %v13325_v10 = vand.u32 7, %v13324_v35  ;;  %vm13328_vm7 = vsmask.f32 4352  ;;  %v2480_v41 = vrot.slane %v12957_v29, 4  ;;  %v2483_v55 = vrot.slane %v12958_v8, 5  ;;  %v13337_v8 = vld [vmem:[#allocation56_spill] sm:$0xff] }
 0x23e   : > { %vm10484_vm6 = vcmp.gt.s32.totalorder %v13320_v34, 0  ;;  %13323 = vst [vmem:[#allocation55_spill] sm:$0xff] %v10491_v57  ;;  %v10504_v0 = vsel %vm13328_vm7, %v2912_v22, %v10416_v52  ;;  %v12963_v49 = vshrl.u32 %v10456_v21, 16  ;;  %v2926_v9 = vrot.slane %v2924_v32, 3  ;;  %v13329_v22 = vld [vmem:[#allocation44_spill] sm:$0xff] }
 0x23f   : > { %vm10498_vm1 = vcmp.gt.s32.totalorder %v13325_v10, 0  ;;  %v10514_v46 = vsel %vm12955_vm5, %v9714_v17, 0  ;;  %v12964_v11 = vshll.u32 %v10456_v21, 16  ;;  %vm2317_vm7 = vmpackc.low %vm10484_vm6, %vm10484_vm6  ;;  %v13330_v62 = vand.u32 7, %v13329_v22  ;;  %v13333_v10 = vld [vmem:[#allocation49_spill] sm:$0xff] }
 0x240   : > { %v10529_v32 = vsel %vm12962_vm11, %v9739_v1, 0  ;;  %v2349_v17 = vsel %vm2315_vm10, 65537, %v13025_v58  ;;  %v2350_v35 = vsel %vm2316_vm12, 65537, %v13025_v58  ;;  %vm2318_vm5 = vmpackc.low %vm10498_vm1, %vm10498_vm1  ;;  %v13334_v22 = vand.u32 7, %v13333_v10  ;;  %7758 = vmatmul.mubr.msk.bf16.gmra.mrb[160].mxu0 %vm701_vm0, %v3819_v20 }
 0x241   : > { %vm10522_vm2 = vcmp.gt.s32.totalorder %v13330_v62, 0  ;;  %v10550_v1 = vsel %vm2414_vm8, %v10384_v23, %v2475_v60  ;;  %v12965_v7 = vshrl.u32 %v10491_v57, 16  ;;  %v13338_v44 = vand.u32 7, %v13337_v8  ;;  %7761 = vmatprep.mubr.msk.bf16.mxu0 %vm8349_vm9, %v13180_v14  ;;  %v13341_v23 = vld [vmem:[#allocation57_spill] sm:$0xff]  ;;  %v13352_v8 = vld [vmem:[#allocation60_spill] sm:$0xff] }
 0x242   : > { %vm10543_vm3 = vcmp.gt.s32.totalorder %v13334_v22, 0  ;;  %v2929_v10 = vrot.slane %v2927_v24, 4  ;;  %v2484_v22 = vor.u32 %v2483_v55, %v2480_v41  ;;  %v2498_v20 = vrot.slane %v12963_v49, 4  ;;  %vm2319_vm10 = vmpackc.low %vm10522_vm2, %vm10522_vm2 }
 0x243   : > { %vm10556_vm4 = vcmp.gt.s32.totalorder %v13338_v44, 0  ;;  %v13342_v28 = vand.u32 7, %v13341_v23  ;;  %v2501_v44 = vrot.slane %v12964_v11, 5  ;;  %v10575_v29 = vcombine.low %v2349_v17, %v2350_v35  ;;  %vm2320_vm11 = vmpackc.low %vm10543_vm3, %vm10543_vm3  ;;  %7618 = vmatmul.mubr.msk.bf16.gmra.mrb[92].mxu1 %vm701_vm0, %v10410_v6  ;;  %v13347_v35 = vld [vmem:[#allocation59_spill] sm:$0xff]  ;;  %v8287_v23 = vld [vmem:[%s12796_s3 + $0x38] sm:$0xff]  }
 0x244   : > { %v2351_v24 = vsel %vm2317_vm7, 65537, %v13025_v58  ;;  %v2933_v41 = vshrl.u32 %v10514_v46, 16  ;;  %v2936_v13 = vshll.u32 %v10514_v46, 16  ;;  %vm2573_vm6 = vcmp.ne.s16.totalorder %v10550_v1, 0  ;;  %vm2321_vm1 = vmpackc.low %vm10556_vm4, %vm10556_vm4  ;;  %7625 = vmatprep.mubr.msk.bf16.mxu1 %vm8349_vm9, %v13180_v14 }
 0x245   : > { %vm10569_vm12 = vcmp.gt.s32.totalorder %v13342_v28, 0  ;;  %13345 = vst [vmem:[#allocation62_spill] sm:$0xff] %v10575_v29  ;;  %v2352_v28 = vsel %vm2318_vm5, 65537, %v13025_v58  ;;  %v10606_v4 = vsel %vm2573_vm6, %v9805_v43, 0  ;;  %v2489_v6 = vrot.slane %v12965_v7, 4 }
 0x246   : > { %v13346_v46 = vshll.u32 %v10491_v57, 16  ;;  %vm2322_vm3 = vmpackc.low %vm10569_vm12, %vm10569_vm12  ;;  %v13348_v62 = vand.u32 7, %v13347_v35  ;;  %v10621_v49 = vcombine.low %v2351_v24, %v2352_v28  ;;  %v2353_v43 = vsel %vm2319_vm10, 65537, %v13025_v58 }
 0x247   : > { %v13353_v11 = vand.u32 7, %v13352_v8  ;;  %v10637_v35 = vsel %vm2414_vm8, %v2475_v60, %v2484_v22  ;;  %v10639_v24 = vor.u32 %v2501_v44, %v2498_v20  ;;  %v2355_v60 = vsel %vm2321_vm1, 65537, %v13025_v58  ;;  %v13360_v20 = vld [vmem:[#allocation65_spill] sm:$0xff] }
 0x248   : > { %v2492_v17 = vrot.slane %v13346_v46, 5  ;;  %vm10617_vm5 = vcmp.gt.s32.totalorder %v13348_v62, 0  ;;  %13351 = vst [vmem:[#allocation70_spill] sm:$0xff] %v10621_v49  ;;  %v2354_v46 = vsel %vm2320_vm11, 65537, %v13025_v58  ;;  %v13356_v62 = vld [vmem:[#allocation64_spill] sm:$0xff]  ;;  %v13361_v44 = vand.u32 7, %v13360_v20  ;;  %7762 = vmatmul.mubr.msk.bf16.gmra.mrb[164].mxu0 %vm701_vm0, %v10471_v33 }
 0x249   : > { %vm10632_vm7 = vcmp.gt.s32.totalorder %v13353_v11, 0  ;;  %v13357_v55 = vand.u32 7, %v13356_v62  ;;  %v2356_v11 = vsel %vm2322_vm3, 65537, %v13025_v58  ;;  %vm2323_vm11 = vmpackc.low %vm10617_vm5, %vm10617_vm5  ;;  %v10670_v8 = vor.u32 %v2929_v10, %v2926_v9  ;;  %7841 = vmatprep.mubr.msk.bf16.mxu0 %vm8349_vm9, %v13180_v14 }
 0x24a   : > { %vm10661_vm2 = vcmp.gt.s32.totalorder %v13361_v44, 0  ;;  %v2493_v21 = vor.u32 %v2492_v17, %v2489_v6  ;;  %v10673_v28 = vcombine.low %v2353_v43, %v2354_v46  ;;  %vm2324_vm4 = vmpackc.low %vm10632_vm7, %vm10632_vm7  ;;  %v10680_v20 = vrot.slane %v2933_v41, 3 }
 0x24b   : > { %vm10644_vm12 = vcmp.gt.s32.totalorder %v13357_v55, 0  ;;  %vm2574_vm10 = vcmp.ne.s16.totalorder %v10637_v35, 0  ;;  %v12968_v33 = vshrl.u32 %v10621_v49, 16  ;;  %v12969_v9 = vshll.u32 %v10621_v49, 16  ;;  %vm2326_vm3 = vmpackc.low %vm10661_vm2, %vm10661_vm2  ;;  %7626 = vmatmul.mubr.msk.bf16.vlgmr.msra.gmra.mrb[96].mxu1 %vm701_vm0, %v10476_v39  ;;  %v10755_v49 = vld [vmem:[#allocation2 + $0x8] sm:$0xff] }
 0x24c   : > { %13364 = vst [vmem:[#allocation29_spill] sm:$0xff] %v10673_v28  ;;  %vm2325_vm1 = vmpackc.low %vm10644_vm12, %vm10644_vm12  ;;  %v10688_v10 = vrot.slane %v2936_v13, 4  ;;  %v5441_v6 = vshrl.u32 %v10606_v4, 16  ;;  %v10693_v17 = vsel %vm2414_vm8, %v2493_v21, %v10639_v24  ;;  %v10695_v41 = vcombine.low %v2355_v60, %v2356_v11  ;;  %7766 = vmatpush3.bf16.msra.mxu1 %v8285_v15  ;;  %7629 = vmatprep.mubr.msk.bf16.mxu1 %vm8349_vm9, %v13180_v14 }
 0x24d   : > { %v13365_v43 = vshrl.u32 %v10575_v29, 16  ;;  %v13366_v13 = vshll.u32 %v10575_v29, 16  ;;  %v2357_v60 = vsel %vm2323_vm11, 65537, %v13025_v58  ;;  %v2358_v39 = vsel %vm2324_vm4, 65537, %v13025_v58  ;;  %7767 = vmatprep.subr.bf16.mxu1 %v13180_v14 }
 0x24e   : > { %v5372_v11 = vsel %vm2574_vm10, %v9827_v54, 0  ;;  %v2516_v15 = vrot.slane %v12968_v33, 4  ;;  %v2519_v62 = vrot.slane %v12969_v9, 5  ;;  %v2359_v54 = vsel %vm2325_vm1, 65537, %v13025_v58 }
 0x24f   : > { %v2507_v46 = vrot.slane %v13365_v43, 4  ;;  %v2510_v44 = vrot.slane %v13366_v13, 5  ;;  %v10724_v43 = vsel %vm2414_vm8, %v2484_v22, %v2493_v21  ;;  %v2360_v21 = vsel %vm2326_vm3, 65537, %v13025_v58 }
 0x250   : > { %vm2576_vm5 = vcmp.ne.s16.totalorder %v10693_v17, 0  ;;  %v10751_v9 = vcombine.low %v2357_v60, %v2358_v39  ;;  %v5444_v7 = vshll.u32 %v10606_v4, 16  ;;  %v5450_v34 = vshrl.u32 %v5372_v11, 16  ;;  %7842 = vmatmul.mubr.msk.bf16.vlgmr.msra.gmra.mrb[168].mxu0 %vm701_vm0, %v10755_v49  ;;  %7768 = vmatpush3.bf16.msra.mxu1 %v8287_v23 }
 0x251   : > { %vm2575_vm7 = vcmp.ne.s16.totalorder %v10724_v43, 0  ;;  %v2511_v13 = vor.u32 %v2510_v44, %v2507_v46  ;;  %v13367_v55 = vshrl.u32 %v10673_v28, 16  ;;  %v13368_v39 = vshll.u32 %v10673_v28, 16  ;;  %7845 = vmatprep.mubr.msk.bf16.mxu0 %vm8349_vm9, %v13180_v14  ;;  %7909 = vmatprep.subr.bf16.mxu1 %v13180_v14  ;;  %v13405_v43 = vld [vmem:[#allocation25_spill] sm:$0xff] }
 0x252   : > { %v5373_v58 = vsel %vm2575_vm7, %v9849_v18, 0  ;;  %v10766_v33 = vcombine.low %v2359_v54, %v2360_v21  ;;  %v5443_v46 = vrot.slane %v5441_v6, 3  ;;  %v5453_v44 = vshll.u32 %v5372_v11, 16  ;;  %v8288_v18 = vld [vmem:[%s12796_s3 + $0x60] sm:$0xff]  }
 0x253   : > { %v2525_v60 = vrot.slane %v13367_v55, 4  ;;  %v2528_v4 = vrot.slane %v13368_v39, 5  ;;  %v5374_v22 = vsel %vm2576_vm5, %v9887_v19, 0  ;;  %v2520_v29 = vor.u32 %v2519_v62, %v2516_v15  ;;  %7630 = vmatmul.mubr.msk.bf16.gmra.mrb[100].mxu1 %vm701_vm0, %v10504_v0  ;;  %7982 = vmatpush3.bf16.msra.mxu0 %v8288_v18 }
 0x254   : > { %v13369_v23 = vshrl.u32 %v10695_v41, 16  ;;  %v13370_v21 = vshll.u32 %v10695_v41, 16  ;;  %v5446_v19 = vrot.slane %v5444_v7, 4  ;;  %v5459_v62 = vshrl.u32 %v5373_v58, 16  ;;  %7633 = vmatprep.mubr.msk.bf16.mxu1 %vm8349_vm9, %v13180_v14  ;;  %7983 = vmatprep.subr.bf16.mxu0 %v13180_v14 }
 0x255   : > { %v5462_v15 = vshll.u32 %v5373_v58, 16  ;;  %v10787_v39 = vsel %vm2414_vm8, %v10639_v24, %v2511_v13  ;;  %v5455_v0 = vrot.slane %v5453_v44, 4  ;;  %v5468_v7 = vshrl.u32 %v5374_v22, 16  ;;  %v8290_v24 = vld [vmem:[%s12796_s3 + $0x68] sm:$0xff]  }
 0x256   : > { %v2534_v54 = vrot.slane %v13369_v23, 4  ;;  %v2537_v55 = vrot.slane %v13370_v21, 5  ;;  %v5452_v23 = vrot.slane %v5450_v34, 3  ;;  %v2529_v21 = vor.u32 %v2528_v4, %v2525_v60 }
 0x257   : > { %v5471_v28 = vshll.u32 %v5374_v22, 16  ;;  %v10795_v58 = vsel %vm2414_vm8, %v2511_v13, %v2520_v29  ;;  %vm2577_vm12 = vcmp.ne.s16.totalorder %v10787_v39, 0  ;;  %v13371_v60 = vshrl.u32 %v10751_v9, 16  ;;  %7984 = vmatpush3.bf16.msra.mxu0 %v8290_v24 }
 0x258   : > { %v2538_v34 = vor.u32 %v2537_v55, %v2534_v54  ;;  %v13372_v18 = vshll.u32 %v10751_v9, 16  ;;  %v13373_v44 = vshrl.u32 %v10529_v32, 16  ;;  %v5461_v22 = vrot.slane %v5459_v62, 3  ;;  %7846 = vmatmul.mubr.msk.bf16.gmra.mrb[172].mxu0 %vm701_vm0, %v10810_v42  ;;  %8125 = vmatprep.subr.bf16.mxu0 %v13180_v14 }
 0x259   : > { %v2543_v4 = vrot.slane %v13371_v60, 4  ;;  %v5464_v57 = vrot.slane %v5462_v15, 4  ;;  %v5375_v13 = vsel %vm2577_vm12, %v9957_v5, 0  ;;  %vm2578_vm11 = vcmp.ne.s16.totalorder %v10795_v58, 0  ;;  %7849 = vmatprep.mubr.msk.bf16.mxu0 %vm8349_vm9, %v13180_v14 }
 0x25a   : > { %v2546_v11 = vrot.slane %v13372_v18, 5  ;;  %v2944_v6 = vrot.slane %v13373_v44, 3  ;;  %v10816_v54 = vsel %vm2414_vm8, %v2520_v29, %v2529_v21  ;;  %v13374_v55 = vshrl.u32 %v10766_v33, 16 }
 0x25b   : > { %v13375_v62 = vshll.u32 %v10766_v33, 16  ;;  %vm13376_vm2 = vsmask.f32 4352  ;;  %v13377_v24 = vshll.u32 %v10529_v32, 16  ;;  %v5456_v29 = vor.u32 %v5455_v0, %v5452_v23 }
 0x25c   : > { %v2552_v60 = vrot.slane %v13374_v55, 4  ;;  %v2931_v5 = vsel %vm13376_vm2, %v10416_v52, %v10670_v8  ;;  %v5470_v44 = vrot.slane %v5468_v7, 3  ;;  %v5473_v26 = vrot.slane %v5471_v28, 4  ;;  %vm13379_vm3 = vmmov %vm13376_vm2  ;;  %v10866_v7 = vld [vmem:[#allocation2 + $0x18] sm:$0xff] }
 0x25d   : > { %v2555_v15 = vrot.slane %v13375_v62, 5  ;;  %v2947_v18 = vrot.slane %v13377_v24, 4  ;;  %v10831_v55 = vsel %vm2414_vm8, %v2529_v21, %v2538_v34  ;;  %v2547_v53 = vor.u32 %v2546_v11, %v2543_v4  ;;  %7634 = vmatmul.mubr.msk.bf16.gmra.mrb[104].mxu1 %vm701_vm0, %v2931_v5 }
 0x25e   : > { %v10833_v62 = vor.u32 %v5446_v19, %v5443_v46  ;;  %v5477_v3 = vshrl.u32 %v5375_v13, 16  ;;  %v5480_v12 = vshll.u32 %v5375_v13, 16  ;;  %v5376_v52 = vsel %vm2578_vm11, %v9970_v37, 0  ;;  %7637 = vmatprep.mubr.msk.bf16.mxu1 %vm8349_vm9, %v13180_v14  ;;  %v10853_v37 = vld [vmem:[#allocation2 + $0x30] sm:$0xff] }
 0x25f   : > { %vm2579_vm4 = vcmp.ne.s16.totalorder %v10816_v54, 0  ;;  %v10842_v32 = vor.u32 %v10468_v27, %v10279_v48  ;;  %v5465_v28 = vor.u32 %v5464_v57, %v5461_v22  ;;  %v2556_v11 = vor.u32 %v2555_v15, %v2552_v60 }
 0x260   : > { %13378 = vst [vmem:[#allocation4_spill] sm:$0xff] %v10833_v62  ;;  %v5377_v46 = vsel %vm2579_vm4, %v10003_v47, 0  ;;  %v2939_v19 = vor.u32 %v10688_v10, %v10680_v20  ;;  %v10851_v23 = vor.u32 %v2947_v18, %v2944_v6  ;;  %v2591_v48 = vsel %vm2573_vm6, %v10853_v37, 0  ;;  %7850 = vmatmul.mubr.msk.bf16.gmra.mrb[176].mxu0 %vm701_vm0, %v10866_v7  ;;  %vm13381_vm6 = vmmov %vm13376_vm2  ;;  %v10893_v18 = vld [vmem:[#allocation2 + $0x88] sm:$0xff] }
 0x261   : > { %vm12986_vm1 = vcmp.ne.s16.totalorder %v10831_v55, 0  ;;  %v5486_v27 = vshrl.u32 %v5376_v52, 16  ;;  %v5489_v57 = vshll.u32 %v5376_v52, 16  ;;  %v10860_v21 = vsel %vm2414_vm8, %v2538_v34, %v2547_v53  ;;  %7853 = vmatprep.mubr.msk.bf16.mxu0 %vm8349_vm9, %v13180_v14 }
 0x262   : > { %v10864_v47 = vsel %vm13379_vm3, %v10833_v62, %v5456_v29  ;;  %v5474_v20 = vor.u32 %v5473_v26, %v5470_v44  ;;  %v5479_v10 = vrot.slane %v5477_v3, 3  ;;  %v5482_v6 = vrot.slane %v5480_v12, 4 }
 0x263   : > { %13380 = vst [vmem:[#allocation5_spill] sm:$0xff] %v10864_v47  ;;  %v5495_v0 = vshrl.u32 %v5377_v46, 16  ;;  %v5498_v1 = vshll.u32 %v5377_v46, 16  ;;  %v5378_v4 = vsel %vm12986_vm1, %v10029_v63, 0  ;;  %v10874_v34 = vsel %vm2414_vm8, %v2547_v53, %v2556_v11 }
 0x264   : > { %v10877_v22 = vsel %vm13381_vm6, %v5456_v29, %v5465_v28  ;;  %v2940_v12 = vsel %vm13376_vm2, %v10670_v8, %v2939_v19  ;;  %v2951_v3 = vshrl.u32 %v2591_v48, 16  ;;  %vm12987_vm3 = vcmp.ne.s16.totalorder %v10860_v21, 0 }
 0x265   : > { %13382 = vst [vmem:[#allocation31_spill] sm:$0xff] %v10877_v22  ;;  %v10886_v26 = vsel %vm2414_vm8, %v2556_v11, %v10842_v32  ;;  %v2954_v13 = vshll.u32 %v2591_v48, 16  ;;  %v5488_v60 = vrot.slane %v5486_v27, 3  ;;  %v5491_v53 = vrot.slane %v5489_v57, 4  ;;  %7638 = vmatmul.mubr.msk.bf16.gmra.mrb[108].mxu1 %vm701_vm0, %v2940_v12  ;;  %v10907_v12 = vld [vmem:[#allocation2 + $0x50] sm:$0xff] }
 0x266   : > { %v5379_v15 = vsel %vm12987_vm3, %v10083_v30, 0  ;;  %v5483_v8 = vor.u32 %v5482_v6, %v5479_v10  ;;  %v5504_v5 = vshrl.u32 %v5378_v4, 16  ;;  %v5507_v24 = vshll.u32 %v5378_v4, 16  ;;  %7641 = vmatprep.mubr.msk.bf16.mxu1 %vm8349_vm9, %v13180_v14 }
 0x267   : > { %vm2582_vm6 = vcmp.ne.s16.totalorder %v10874_v34, 0  ;;  %v5497_v29 = vrot.slane %v5495_v0, 3  ;;  %v5500_v44 = vrot.slane %v5498_v1, 4  ;;  %vm12992_vm2 = vcmp.ne.s16.totalorder %v10886_v26, 0 }
 0x268   : > { %vm13383_vm1 = vsmask.f32 4352  ;;  %v13385_v46 = vshll.u32 %v9987_v50, 16  ;;  %v13386_v48 = vshrl.u32 %v10037_v56, 16  ;;  %v5513_v57 = vshrl.u32 %v5379_v15, 16 }
 0x269   : > { %v10899_v52 = vsel %vm13383_vm1, %v5465_v28, %v5474_v20  ;;  %v5516_v10 = vshll.u32 %v5379_v15, 16  ;;  %v13387_v6 = vshll.u32 %v10037_v56, 16  ;;  %vm13388_vm3 = vcmp.ne.s16.totalorder %v9840_v25, 0 }
 0x26a   : > { %13384 = vst [vmem:[#allocation33_spill] sm:$0xff] %v10899_v52  ;;  %v6221_v11 = vrot.slane %v13385_v46, 5  ;;  %v6227_v27 = vrot.slane %v13386_v48, 4  ;;  %v10912_v0 = vsel %vm13388_vm3, %v10907_v12, 0  ;;  %v5492_v28 = vor.u32 %v5491_v53, %v5488_v60  ;;  %v10922_v48 = vld [vmem:[#allocation2 + $0x20] sm:$0xff]  ;;  %vm13390_vm3 = vmmov %vm13383_vm1 }
 0x26b   : > { %v6230_v4 = vrot.slane %v13387_v6, 5  ;;  %v5380_v50 = vsel %vm2582_vm6, %v10137_v16, 0  ;;  %v2949_v1 = vsel %vm13383_vm1, %v2939_v19, %v10851_v23  ;;  %v5506_v46 = vrot.slane %v5504_v5, 3  ;;  %13389 = vst [vmem:[#allocation6_spill] sm:$0xff] %v10922_v48  ;;  %7854 = vmatmul.mubr.msk.bf16.gmra.mrb[180].mxu0 %vm701_vm0, %v10922_v48  ;;  %v10931_v19 = vld [vmem:[#allocation2 + $0x38] sm:$0xff] }
 0x26c   : > { %v5509_v15 = vrot.slane %v5507_v24, 4  ;;  %v5381_v56 = vsel %vm12992_vm2, %v10893_v18, 0  ;;  %v2953_v25 = vrot.slane %v2951_v3, 3  ;;  %v2956_v60 = vrot.slane %v2954_v13, 4  ;;  %7857 = vmatprep.mubr.msk.bf16.mxu0 %vm8349_vm9, %v13180_v14 }
 0x26d   : > { %v5501_v53 = vor.u32 %v5500_v44, %v5497_v29  ;;  %v10927_v6 = vsel %vm13390_vm3, %v5474_v20, %v5483_v8  ;;  %v2592_v5 = vsel %vm2574_vm10, %v10931_v19, 0  ;;  %v5515_v24 = vrot.slane %v5513_v57, 3  ;;  %7642 = vmatmul.mubr.msk.bf16.gmra.mrb[112].mxu1 %vm701_vm0, %v2949_v1  ;;  %v13393_v57 = vld [vmem:[#allocation17_spill] sm:$0xff]  ;;  %vm13395_vm3 = vmmov %vm13383_vm1 }
 0x26e   : > { %13391 = vst [vmem:[#allocation7_spill] sm:$0xff] %v10927_v6  ;;  %v5518_v52 = vrot.slane %v5516_v10, 4  ;;  %v5522_v22 = vshrl.u32 %v5380_v50, 16  ;;  %v5525_v47 = vshll.u32 %v5380_v50, 16  ;;  %v5531_v62 = vshrl.u32 %v5381_v56, 16  ;;  %7645 = vmatprep.mubr.msk.bf16.mxu1 %vm8349_vm9, %v13180_v14 }
 0x26f   : > { %v5534_v3 = vshll.u32 %v5381_v56, 16  ;;  %v10937_v13 = vsel %vm13383_vm1, %v5483_v8, %v5492_v28  ;;  %v10940_v20 = vor.u32 %v6221_v11, %v10061_v45  ;;  %v6234_v29 = vshrl.u32 %v10912_v0, 16 }
 0x270   : > { %13392 = vst [vmem:[#allocation37_spill] sm:$0xff] %v10937_v13  ;;  %v6237_v44 = vshll.u32 %v10912_v0, 16  ;;  %v5510_v35 = vor.u32 %v5509_v15, %v5506_v46  ;;  %vm13394_vm10 = vcmp.ne.s16.totalorder %v13393_v57, 0  ;;  %v2960_v50 = vshrl.u32 %v2592_v5, 16 }
 0x271   : > { %v6132_v10 = vsel %vm13394_vm10, %v10810_v42, 0  ;;  %v2963_v8 = vshll.u32 %v2592_v5, 16  ;;  %v10951_v56 = vsel %vm13395_vm3, %v5492_v28, %v5501_v53  ;;  %v10953_v45 = vor.u32 %v6230_v4, %v6227_v27  ;;  %v10966_v4 = vld [vmem:[#allocation2 + $0x58] sm:$0xff]  ;;  %vm13402_vm3 = vmmov %vm13383_vm1 }
 0x272   : > { %v10955_v11 = vor.u32 %v2956_v60, %v2953_v25  ;;  %v5519_v0 = vor.u32 %v5518_v52, %v5515_v24  ;;  %v5524_v13 = vrot.slane %v5522_v22, 3  ;;  %v5527_v1 = vrot.slane %v5525_v47, 4  ;;  %v13399_v52 = vld [vmem:[#allocation24_spill] sm:$0xff] }
 0x273   : > { %v5533_v46 = vrot.slane %v5531_v62, 3  ;;  %v5536_v15 = vrot.slane %v5534_v3, 4  ;;  %v13396_v57 = vshll.u32 %v10695_v41, 16  ;;  %v6162_v59 = vshrl.u32 %v6132_v10, 16  ;;  %v10971_v62 = vld [vmem:[#allocation2 + $0x28] sm:$0xff] }
 0x274   : > { %v6165_v48 = vshll.u32 %v6132_v10, 16  ;;  %v10962_v5 = vsel %vm13383_vm1, %v5501_v53, %v5510_v35  ;;  %v13398_v28 = vshll.u32 %v10751_v9, 16  ;;  %vm13400_vm10 = vcmp.ne.s16.totalorder %v13399_v52, 0  ;;  %7858 = vmatmul.mubr.msk.bf16.gmra.mrb[184].mxu0 %vm701_vm0, %v10971_v62  ;;  %v10985_v10 = vld [vmem:[#allocation2 + $0x40] sm:$0xff] }
 0x275   : > { %v10959_v6 = vrot.slane %v13396_v57, 1  ;;  %13397 = vst [vmem:[#allocation39_spill] sm:$0xff] %v10962_v5  ;;  %v6141_v47 = vsel %vm13400_vm10, %v10966_v4, 0  ;;  %v2962_v22 = vrot.slane %v2960_v50, 3  ;;  %v2965_v25 = vrot.slane %v2963_v8, 4  ;;  %7861 = vmatprep.mubr.msk.bf16.mxu0 %vm8349_vm9, %v13180_v14  ;;  %vm13403_vm10 = vmmov %vm13402_vm3 }
 0x276   : > { %v4135_v27 = vrot.slane %v13398_v28, 1  ;;  %v13401_v60 = vshrl.u32 %v10695_v41, 16  ;;  %v10978_v24 = vrot.slane %v6234_v29, 4  ;;  %v2958_v3 = vsel %vm13402_vm3, %v10851_v23, %v10955_v11 }
 0x277   : > { %v2593_v50 = vsel %vm2575_vm7, %v10985_v10, 0  ;;  %vm4093_vm1 = vsmask.f32 7424  ;;  %v5528_v8 = vor.u32 %v5527_v1, %v5524_v13  ;;  %v10990_v41 = vor.u32 %v5536_v15, %v5533_v46  ;;  %7646 = vmatmul.mubr.msk.bf16.gmra.mrb[116].mxu1 %vm701_vm0, %v2958_v3 }
 0x278   : > { %v4134_v53 = vor.u32 %v10959_v6, %v13401_v60  ;;  %v10994_v57 = vsel %vm13403_vm10, %v5510_v35, %v5519_v0  ;;  %v6164_v28 = vrot.slane %v6162_v59, 4  ;;  %v6167_v23 = vrot.slane %v6165_v48, 5  ;;  %v10997_v60 = vld [vmem:[#allocation2 + $0x60] sm:$0xff]  ;;  %7649 = vmatprep.mubr.msk.bf16.mxu1 %vm8349_vm9, %v13180_v14 }
 0x279   : > { %13404 = vst [vmem:[#allocation41_spill] sm:$0xff] %v10994_v57  ;;  %v6243_v52 = vshrl.u32 %v6141_v47, 16  ;;  %vm13406_vm7 = vcmp.ne.s16.totalorder %v13405_v43, 0  ;;  %v11004_v13 = vor.u32 %v2965_v25, %v2962_v22  ;;  %v13407_v35 = vshrl.u32 %v10751_v9, 16  ;;  %v13432_v57 = vld [vmem:[#allocation14_spill] sm:$0xff] }
 0x27a   : > { %v4136_v29 = vsel %vm4093_vm1, %v4134_v53, %v4135_v27  ;;  %v6142_v5 = vsel %vm13406_vm7, %v10997_v60, 0  ;;  %v13408_v59 = vshll.u32 %v10766_v33, 16  ;;  %v2969_v46 = vshrl.u32 %v2593_v50, 16  ;;  %vm13413_vm7 = vmmov %vm13403_vm10 }
 0x27b   : > { %vm4158_vm3 = vcmp.ne.s16.totalorder %v4136_v29, 0  ;;  %v4137_v1 = vor.u32 %v4135_v27, %v13407_v35  ;;  %v2972_v15 = vshll.u32 %v2593_v50, 16  ;;  %v13409_v53 = vshll.u32 %v9303_v61, 16 }
 0x27c   : > { %v4138_v48 = vrot.slane %v13408_v59, 1  ;;  %v11015_v29 = vsel %vm4158_vm3, %v10029_v63, 0  ;;  %v11019_v22 = vsel %vm13403_vm10, %v5519_v0, %v5528_v8  ;;  %v13412_v9 = vshrl.u32 %v10766_v33, 16  ;;  %7862 = vmatmul.mubr.msk.bf16.gmra.mrb[188].mxu0 %vm701_vm0, %v10853_v37  ;;  %vm13417_vm10 = vmmov %vm13413_vm7  ;;  %v11051_v37 = vld [vmem:[#allocation2 + $0x48] sm:$0xff] }
 0x27d   : > { %v11012_v3 = vrot.slane %v13409_v53, 1  ;;  %13411 = vst [vmem:[#allocation44_spill] sm:$0xff] %v11019_v22  ;;  %v11025_v25 = vsel %vm13413_vm7, %v5528_v8, %v10990_v41  ;;  %v11027_v50 = vor.u32 %v6167_v23, %v6164_v28  ;;  %v11029_v35 = vrot.slane %v6237_v44, 5  ;;  %v11031_v53 = vld [vmem:[#allocation2 + $0x68] sm:$0xff]  ;;  %7865 = vmatprep.mubr.msk.bf16.mxu0 %vm8349_vm9, %v13180_v14 }
 0x27e   : > { %v4139_v43 = vsel %vm4093_vm1, %v4137_v1, %v4138_v48  ;;  %v4140_v27 = vor.u32 %v4138_v48, %v13412_v9  ;;  %13414 = vst [vmem:[#allocation49_spill] sm:$0xff] %v11025_v25  ;;  %v6246_v59 = vshll.u32 %v6141_v47, 16  ;;  %v6252_v63 = vshrl.u32 %v6142_v5, 16 }
 0x27f   : > { %13410 = vst [vmem:[#allocation42_spill] sm:$0xff] %v11012_v3  ;;  %13415 = vst [vmem:[#allocation56_spill] sm:$0xff] %v11027_v50  ;;  %vm4159_vm2 = vcmp.ne.s16.totalorder %v4139_v43, 0  ;;  %vm13416_vm3 = vcmp.ne.s16.totalorder %v9895_v51, 0  ;;  %v2971_v44 = vrot.slane %v2969_v46, 3  ;;  %v2974_v47 = vrot.slane %v2972_v15, 4 }
 0x280   : > { %v11036_v0 = vsel %vm13416_vm3, %v11031_v53, 0  ;;  %v4177_v33 = vsel %vm4159_vm2, %v10083_v30, 0  ;;  %v4142_v8 = vsel %vm4093_vm1, %v4140_v27, %v11012_v3  ;;  %v4294_v28 = vshrl.u32 %v11015_v29, 16 }
 0x281   : > { %v4302_v23 = vshrl.u32 %v4177_v33, 16  ;;  %v11046_v1 = vrot.slane %v6243_v52, 4  ;;  %v2967_v51 = vsel %vm13417_vm10, %v10955_v11, %v11004_v13  ;;  %v2594_v30 = vsel %vm2576_vm5, %v11051_v37, 0 }
 0x282   : > { %vm4160_vm2 = vcmp.ne.s16.totalorder %v4142_v8, 0  ;;  %v6255_v48 = vshll.u32 %v6142_v5, 16  ;;  %7650 = vmatmul.mubr.msk.bf16.gmra.mrb[120].mxu1 %vm701_vm0, %v2967_v51  ;;  %v4305_v15 = vshll.u32 %v4177_v33, 16  ;;  %v11058_v52 = vrot.slane %v6246_v59, 5 }
 0x283   : > { %v4304_v46 = vrot.slane %v4302_v23, 7  ;;  %v4178_v43 = vsel %vm4160_vm2, %v10137_v16, 0  ;;  %v11060_v9 = vrot.slane %v6252_v63, 4  ;;  %v6261_v11 = vshrl.u32 %v11036_v0, 16  ;;  %7653 = vmatprep.mubr.msk.bf16.mxu1 %vm8349_vm9, %v13180_v14 }
 0x284   : > { %v4310_v27 = vshrl.u32 %v4178_v43, 16  ;;  %v11065_v17 = vor.u32 %v2974_v47, %v2971_v44  ;;  %v2978_v8 = vshrl.u32 %v2594_v30, 16  ;;  %v11067_v5 = vrot.slane %v4294_v28, 7  ;;  %v11079_v28 = vld [vmem:[#allocation2 + $0x70] sm:$0xff]  ;;  %7866 = vmatmul.mubr.msk.bf16.gmra.mrb[192].mxu0 %vm701_vm0, %v10931_v19 }
 0x285   : > { %v4307_v51 = vor.u32 %v4305_v15, %v4304_v46  ;;  %v2981_v23 = vshll.u32 %v2594_v30, 16  ;;  %vm4184_vm5 = vsmask.f32 256  ;;  %v4313_v59 = vshll.u32 %v4178_v43, 16  ;;  %7869 = vmatprep.mubr.msk.bf16.mxu0 %vm8349_vm9, %v13180_v14 }
 0x286   : > { %13418 = vst [vmem:[#allocation57_spill] sm:$0xff] %v11067_v5  ;;  %v11069_v33 = vrot.slane %v4310_v27, 7  ;;  %v6257_v25 = vrot.slane %v6255_v48, 5  ;;  %v6264_v63 = vshll.u32 %v11036_v0, 16  ;;  %v2595_v22 = vsel %vm2577_vm12, %v10907_v12, 0  ;;  %v11090_v48 = vld [vmem:[#allocation2 + $0x78] sm:$0xff] }
 0x287   : > { %v11077_v44 = vsel %vm4184_vm5, %v11067_v5, %v4307_v51  ;;  %v6263_v47 = vrot.slane %v6261_v11, 4  ;;  %v6144_v30 = vsel %vm3641_vm13, %v11079_v28, 0  ;;  %v2596_v0 = vsel %vm2578_vm11, %v10966_v4, 0  ;;  %vm13421_vm13 = vmmov %vm13413_vm7 }
 0x288   : > { %13419 = vst [vmem:[#allocation59_spill] sm:$0xff] %v11069_v33  ;;  %13420 = vst [vmem:[#allocation60_spill] sm:$0xff] %v11077_v44  ;;  %v4315_v39 = vor.u32 %v4313_v59, %v11069_v33  ;;  %v6145_v15 = vsel %vm3642_vm14, %v11090_v48, 0  ;;  %v6146_v36 = vsel %vm3643_vm15, %v10137_v16, 0  ;;  %v2976_v19 = vsel %vm13421_vm13, %v11004_v13, %v11065_v17 }
 0x289   : > { %v11106_v58 = vsel %vm2414_vm8, %v11027_v50, %v9991_v38  ;;  %v2980_v43 = vrot.slane %v2978_v8, 3  ;;  %v2983_v11 = vrot.slane %v2981_v23, 4  ;;  %v2987_v40 = vshrl.u32 %v2595_v22, 16  ;;  %v13425_v8 = vld [vmem:[#allocation32_spill] sm:$0xff]  ;;  %vm13433_vm15 = vmmov %vm13413_vm7 }
 0x28a   : > { %13422 = vst [vmem:[#allocation64_spill] sm:$0xff] %v11106_v58  ;;  %v11109_v27 = vsel %vm4184_vm5, %v4304_v46, %v4315_v39  ;;  %7654 = vmatmul.mubr.msk.bf16.gmra.mrb[124].mxu1 %vm701_vm0, %v2976_v19  ;;  %v2990_v2 = vshll.u32 %v2595_v22, 16  ;;  %v2996_v16 = vshrl.u32 %v2596_v0, 16  ;;  %v2999_v51 = vshll.u32 %v2596_v0, 16  ;;  %v13427_v0 = vld [vmem:[#allocation34_spill] sm:$0xff]  ;;  %vm13438_vm11 = vmmov %vm13413_vm7 }
 0x28b   : > { %13423 = vst [vmem:[#allocation65_spill] sm:$0xff] %v11109_v27  ;;  %v11115_v13 = vsel %vm2414_vm8, %v9991_v38, %v10001_v31  ;;  %v6270_v59 = vshrl.u32 %v6144_v30, 16  ;;  %v6273_v33 = vshll.u32 %v6144_v30, 16  ;;  %v6279_v50 = vshrl.u32 %v6145_v15, 16  ;;  %7657 = vmatprep.mubr.msk.bf16.mxu1 %vm8349_vm9, %v13180_v14  ;;  %v13429_v30 = vld [vmem:[#allocation46_spill] sm:$0xff] }
 0x28c   : > { %13424 = vst [vmem:[#allocation17_spill] sm:$0xff] %v11115_v13  ;;  %v11122_v46 = vsel %vm2414_vm8, %v10001_v31, %v13425_v8  ;;  %v6282_v23 = vshll.u32 %v6145_v15, 16  ;;  %v2597_v22 = vsel %vm2579_vm4, %v10997_v60, 0  ;;  %v11130_v38 = vsel %vm2414_vm8, %v13425_v8, %v13427_v0  ;;  %7870 = vmatmul.mubr.msk.bf16.gmra.mrb[196].mxu0 %vm701_vm0, %v10985_v10  ;;  %vm13439_vm4 = vmmov %vm13413_vm7 }
 0x28d   : > { %13426 = vst [vmem:[#allocation24_spill] sm:$0xff] %v11122_v46  ;;  %13428 = vst [vmem:[#allocation25_spill] sm:$0xff] %v11130_v38  ;;  %v13430_v39 = vshrl.u32 %v13429_v30, 16  ;;  %v6288_v13 = vshrl.u32 %v6146_v36, 16  ;;  %v6291_v58 = vshll.u32 %v6146_v36, 16  ;;  %v2984_v27 = vor.u32 %v2983_v11, %v2980_v43  ;;  %7873 = vmatprep.mubr.msk.bf16.mxu0 %vm8349_vm9, %v13180_v14 }
 0x28e   : > { %v2989_v44 = vrot.slane %v2987_v40, 3  ;;  %v2992_v31 = vrot.slane %v2990_v2, 4  ;;  %v2998_v46 = vrot.slane %v2996_v16, 3  ;;  %v3001_v15 = vrot.slane %v2999_v51, 4 }
 0x28f   : > { %v11134_v19 = vrot.slane %v13430_v39, 7  ;;  %v6266_v3 = vrot.slane %v6264_v63, 5  ;;  %v6272_v61 = vrot.slane %v6270_v59, 4  ;;  %v3005_v8 = vshrl.u32 %v2597_v22, 16  ;;  %v13443_v59 = vld [vmem:[#allocation13_spill] sm:$0xff] }
 0x290   : > { %v3008_v38 = vshll.u32 %v2597_v22, 16  ;;  %v6275_v39 = vrot.slane %v6273_v33, 5  ;;  %v6281_v30 = vrot.slane %v6279_v50, 4  ;;  %v6284_v5 = vrot.slane %v6282_v23, 5  ;;  %v13445_v23 = vld [vmem:[#allocation45_spill] sm:$0xff]  ;;  %v13446_v22 = vld [vmem:[#allocation27_spill] sm:$0xff] }
 0x291   : > { %13431 = vst [vmem:[#allocation32_spill] sm:$0xff] %v11134_v19  ;;  %v4893_v54 = vsel %vm4184_vm5, %v11134_v19, %v13432_v57  ;;  %v6290_v36 = vrot.slane %v6288_v13, 4  ;;  %v6293_v43 = vrot.slane %v6291_v58, 5  ;;  %v2985_v11 = vsel %vm13433_vm15, %v11065_v17, %v2984_v27 }
 0x292   : > { %vm4928_vm14 = vcmp.ne.s16.totalorder %v4893_v54, 0  ;;  %vm13434_vm12 = vcmp.ne.s16.totalorder %v10831_v55, 0  ;;  %v6240_v63 = vor.u32 %v11029_v35, %v10978_v24  ;;  %7658 = vmatmul.mubr.msk.bf16.gmra.mrb[128].mxu1 %vm701_vm0, %v2985_v11  ;;  %v2993_v50 = vor.u32 %v2992_v31, %v2989_v44  ;;  %v13448_v54 = vld [vmem:[#allocation52_spill] sm:$0xff] }
 0x293   : > { %v2598_v57 = vsel %vm13434_vm12, %v11031_v53, 0  ;;  %v11151_v33 = vor.u32 %v3001_v15, %v2998_v46  ;;  %v4946_v40 = vsel %vm4928_vm14, %v10985_v10, 0  ;;  %v6249_v58 = vor.u32 %v11058_v52, %v11046_v1  ;;  %7661 = vmatprep.mubr.msk.bf16.mxu1 %vm8349_vm9, %v13180_v14  ;;  %v13436_v1 = vld [vmem:[#allocation35_spill] sm:$0xff]  ;;  %vm13470_vm12 = vmmov %vm13439_vm4 }
 0x294   : > { %v11157_v2 = vor.u32 %v6257_v25, %v11060_v9  ;;  %v3007_v55 = vrot.slane %v3005_v8, 3  ;;  %v3010_v17 = vrot.slane %v3008_v38, 4  ;;  %v11161_v16 = vor.u32 %v6266_v3, %v6263_v47  ;;  %7874 = vmatmul.mubr.msk.bf16.gmra.mrb[200].mxu0 %vm701_vm0, %v11051_v37  ;;  %v13442_v47 = vld [vmem:[#allocation30_spill] sm:$0xff]  ;;  %v13449_v8 = vld [vmem:[#allocation43_spill] sm:$0xff] }
 0x295   : > { %v3014_v24 = vshrl.u32 %v2598_v57, 16  ;;  %v3017_v35 = vshll.u32 %v2598_v57, 16  ;;  %v5017_v44 = vshll.u32 %v4946_v40, 16  ;;  %v11163_v51 = vor.u32 %v6275_v39, %v6272_v61  ;;  %7877 = vmatprep.mubr.msk.bf16.mxu0 %vm8349_vm9, %v13180_v14 }
 0x296   : > { %v11165_v13 = vor.u32 %v6284_v5, %v6281_v30  ;;  %v11167_v10 = vor.u32 %v6293_v43, %v6290_v36  ;;  %v11172_v25 = vsel %vm2414_vm8, %v13427_v0, %v13436_v1  ;;  %v2994_v52 = vsel %vm13438_vm11, %v2984_v27, %v2993_v50 }
 0x297   : > { %13437 = vst [vmem:[#allocation14_spill] sm:$0xff] %v11172_v25  ;;  %v3003_v3 = vsel %vm13439_vm4, %v2993_v50, %v11151_v33  ;;  %v11177_v9 = vrot.slane %v5017_v44, 1  ;;  %v11182_v61 = vsel %vm2414_vm8, %v13436_v1, %v10940_v20  ;;  %v11186_v5 = vor.u32 %v3010_v17, %v3007_v55  ;;  %v13451_v17 = vld [vmem:[#allocation54_spill] sm:$0xff]  ;;  %v11229_v1 = vpop.f32.mrb[28].mxu1 }
 0x298   : > { %13435 = vst [vmem:[#allocation34_spill] sm:$0xff] %v11167_v10  ;;  %13441 = vst [vmem:[#allocation79_spill] sm:$0xff] %v11182_v61  ;;  %v4896_v46 = vsel %vm4184_vm5, %v13443_v59, %v13442_v47  ;;  %v11194_v27 = vsel %vm2414_vm8, %v10940_v20, %v10953_v45  ;;  %v4899_v0 = vsel %vm4184_vm5, %v13446_v22, %v13445_v23  ;;  %v11201_v38 = vrot.slane %v3014_v24, 3  ;;  %v13452_v24 = vld [vmem:[#allocation50_spill] sm:$0xff] }
 0x299   : > { %13440 = vst [vmem:[#allocation35_spill] sm:$0xff] %v11177_v9  ;;  %13444 = vst [vmem:[#allocation30_spill] sm:$0xff] %v11194_v27  ;;  %v11203_v30 = vrot.slane %v3017_v35, 4  ;;  %v5021_v31 = vshrl.u32 %v4946_v40, 16  ;;  %vm4929_vm7 = vcmp.ne.s16.totalorder %v4896_v46, 0  ;;  %vm4930_vm3 = vcmp.ne.s16.totalorder %v4899_v0, 0 }
 0x29a   : > { %v4947_v15 = vsel %vm4929_vm7, %v11051_v37, 0  ;;  %v11208_v20 = vsel %vm2414_vm8, %v10953_v45, %v6240_v63  ;;  %v4902_v39 = vsel %vm4184_vm5, %v13449_v8, %v13448_v54  ;;  %7662 = vmatmul.mubr.msk.bf16.gmra.mrb[132].mxu1 %vm701_vm0, %v2994_v52  ;;  %v4948_v11 = vsel %vm4930_vm3, %v10907_v12, 0  ;;  %v7555_v46 = vpop.f32.mrb[29].mxu1  ;;  %v13455_v0 = vld [vmem:[#allocation61_spill] sm:$0xff]  ;;  %vm13481_vm3 = vmmov %vm13470_vm12 }
 0x29b   : > { %13447 = vst [vmem:[#allocation13_spill] sm:$0xff] %v11208_v20  ;;  %v5023_v36 = vor.u32 %v5021_v31, %v11177_v9  ;;  %v5025_v43 = vshll.u32 %v4947_v15, 16  ;;  %v5029_v57 = vshrl.u32 %v4947_v15, 16  ;;  %7665 = vmatprep.mubr.msk.bf16.mxu1 %vm8349_vm9, %v13180_v14  ;;  %v5033_v37 = vshll.u32 %v4948_v11, 16  ;;  %v13456_v31 = vld [vmem:[#allocation53_spill] sm:$0xff]  ;;  %v11238_v54 = vpop.f32.mrb[30].mxu1 }
 0x29c   : > { %vm4931_vm10 = vcmp.ne.s16.totalorder %v4902_v39, 0  ;;  %v5037_v50 = vshrl.u32 %v4948_v11, 16  ;;  %v11219_v45 = vsel %vm2414_vm8, %v6240_v63, %v6249_v58  ;;  %v4905_v35 = vsel %vm4184_vm5, %v13452_v24, %v13451_v17  ;;  %7878 = vmatmul.mubr.msk.bf16.gmra.mrb[204].mxu0 %vm701_vm0, %v10907_v12  ;;  %v11257_v17 = vpop.f32.mrb[100].mxu0  ;;  %v13460_v24 = vld [vmem:[#allocation69_spill] sm:$0xff]  ;;  %v13496_v20 = vld [vmem:[#allocation66_spill] sm:$0xff] }
 0x29d   : > { %13450 = vst [vmem:[#allocation45_spill] sm:$0xff] %v11219_v45  ;;  %v5027_v40 = vrot.slane %v5025_v43, 1  ;;  %v4949_v55 = vsel %vm4931_vm10, %v10966_v4, 0  ;;  %v11227_v44 = vsel %vm2414_vm8, %v6249_v58, %v11157_v2  ;;  %v5035_v52 = vrot.slane %v5033_v37, 1  ;;  %v7556_v43 = vpop.f32.mrb[31].mxu1  ;;  %7881 = vmatprep.mubr.msk.bf16.mxu0 %vm8349_vm9, %v13180_v14  ;;  %v13463_v46 = vld [vmem:[#allocation73_spill] sm:$0xff] }
 0x29e   : > { %13453 = vst [vmem:[#allocation27_spill] sm:$0xff] %v11227_v44  ;;  %v5041_v47 = vshll.u32 %v4949_v55, 16  ;;  %vm4932_vm2 = vcmp.ne.s16.totalorder %v4905_v35, 0  ;;  %v5045_v59 = vshrl.u32 %v4949_v55, 16  ;;  %v4908_v15 = vsel %vm4184_vm5, %v13456_v31, %v13455_v0  ;;  %v13461_v35 = vld [vmem:[#allocation58_spill] sm:$0xff] }
 0x29f   : > { %v11232_v63 = vsel %vm4093_vm1, %v5023_v36, %v5027_v40  ;;  %v5031_v23 = vor.u32 %v5029_v57, %v5027_v40  ;;  %v4950_v22 = vsel %vm4932_vm2, %v10997_v60, 0  ;;  %v5039_v58 = vor.u32 %v5037_v50, %v5035_v52 }
 0x2a0   : > { %13454 = vst [vmem:[#allocation52_spill] sm:$0xff] %v11232_v63  ;;  %v5043_v8 = vrot.slane %v5041_v47, 1  ;;  %v5049_v39 = vshll.u32 %v4950_v22, 16  ;;  %vm4933_vm13 = vcmp.ne.s16.totalorder %v4908_v15, 0  ;;  %v5053_v57 = vshrl.u32 %v4950_v22, 16  ;;  %v7699_v22 = vpop.f32.mrb[101].mxu0 }
 0x2a1   : > { %v11245_v36 = vsel %vm4093_vm1, %v5031_v23, %v5035_v52  ;;  %v4951_v11 = vsel %vm4933_vm13, %v11031_v53, 0  ;;  %v11251_v37 = vsel %vm2414_vm8, %v11157_v2, %v11161_v16  ;;  %v4911_v52 = vsel %vm4184_vm5, %v13461_v35, %v13460_v24  ;;  %v13464_v23 = vld [vmem:[#allocation67_spill] sm:$0xff]  ;;  %v11275_v15 = vpop.f32.mrb[102].mxu0  ;;  %v11299_v22 = vld [vmem:[#allocation2 + $0x80] sm:$0xff]  ;;  %vm13487_vm13 = vmmov %vm13481_vm3 }
 0x2a2   : > { %13457 = vst [vmem:[#allocation43_spill] sm:$0xff] %v11245_v36  ;;  %13458 = vst [vmem:[#allocation54_spill] sm:$0xff] %v11251_v37  ;;  %v11254_v12 = vsel %vm4093_vm1, %v5039_v58, %v5043_v8  ;;  %v5047_v50 = vor.u32 %v5045_v59, %v5043_v8  ;;  %v5051_v40 = vrot.slane %v5049_v39, 1  ;;  %v5057_v55 = vshll.u32 %v4951_v11, 16  ;;  %7666 = vmatmul.mubr.msk.bf16.gmra.mrb[136].mxu1 %vm701_vm0, %v3003_v3  ;;  %v13467_v8 = vld [vmem:[#allocation75_spill] sm:$0xff]  ;;  %v13468_v39 = vld [vmem:[#allocation72_spill] sm:$0xff] }
 0x2a3   : > { %13459 = vst [vmem:[#allocation50_spill] sm:$0xff] %v11254_v12  ;;  %v5061_v47 = vshrl.u32 %v4951_v11, 16  ;;  %v11265_v2 = vsel %vm2414_vm8, %v11161_v16, %v11163_v51  ;;  %v4914_v59 = vsel %vm4184_vm5, %v13464_v23, %v13463_v46  ;;  %7669 = vmatprep.mubr.msk.bf16.mxu1 %vm8349_vm9, %v13180_v14  ;;  %vm4934_vm14 = vcmp.ne.s16.totalorder %v4911_v52, 0  ;;  %v11286_v11 = vpop.f32.mrb[32].mxu1  ;;  %v13494_v12 = vld [vmem:[#allocation63_spill] sm:$0xff] }
 0x2a4   : > { %13462 = vst [vmem:[#allocation61_spill] sm:$0xff] %v11265_v2  ;;  %v11273_v3 = vsel %vm4093_vm1, %v5047_v50, %v5051_v40  ;;  %v5055_v0 = vor.u32 %v5053_v57, %v5051_v40  ;;  %v5059_v31 = vrot.slane %v5057_v55, 1  ;;  %v4952_v58 = vsel %vm4934_vm14, %v11079_v28, 0  ;;  %v7700_v50 = vpop.f32.mrb[103].mxu0  ;;  %v7559_v35 = vpop.f32.mrb[33].mxu1  ;;  %7882 = vmatmul.mubr.msk.bf16.gmra.mrb[208].mxu0 %vm701_vm0, %v10966_v4 }
 0x2a5   : > { %13465 = vst [vmem:[#allocation53_spill] sm:$0xff] %v11273_v3  ;;  %vm4935_vm15 = vcmp.ne.s16.totalorder %v4914_v59, 0  ;;  %v11281_v16 = vsel %vm2414_vm8, %v11163_v51, %v11165_v13  ;;  %v4917_v43 = vsel %vm4184_vm5, %v13468_v39, %v13467_v8  ;;  %v5065_v55 = vshll.u32 %v4952_v58, 16  ;;  %v11295_v23 = vpop.f32.mrb[34].mxu1  ;;  %7885 = vmatprep.mubr.msk.bf16.mxu0 %vm8349_vm9, %v13180_v14 }
 0x2a6   : > { %13466 = vst [vmem:[#allocation69_spill] sm:$0xff] %v11281_v16  ;;  %v11289_v57 = vsel %vm4093_vm1, %v5055_v0, %v5059_v31  ;;  %v5063_v40 = vor.u32 %v5061_v47, %v5059_v31  ;;  %v4953_v24 = vsel %vm4935_vm15, %v11090_v48, 0  ;;  %v3012_v51 = vsel %vm13470_vm12, %v11151_v33, %v11186_v5  ;;  %v13472_v31 = vld [vmem:[#allocation77_spill] sm:$0xff]  ;;  %v13473_v33 = vld [vmem:[#allocation74_spill] sm:$0xff]  ;;  %v7560_v8 = vpop.f32.mrb[35].mxu1  ;;  %vm13491_vm15 = vmmov %vm13481_vm3 }
 0x2a7   : > { %13469 = vst [vmem:[#allocation58_spill] sm:$0xff] %v11289_v57  ;;  %v5069_v52 = vshrl.u32 %v4952_v58, 16  ;;  %v5073_v46 = vshll.u32 %v4953_v24, 16  ;;  %vm4936_vm11 = vcmp.ne.s16.totalorder %v4917_v43, 0  ;;  %v5067_v59 = vrot.slane %v5065_v55, 1 }
 0x2a8   : > { %v4954_v47 = vsel %vm4936_vm11, %v11299_v22, 0  ;;  %v11305_v0 = vsel %vm2414_vm8, %v11165_v13, %v11167_v10  ;;  %v4920_v58 = vsel %vm4184_vm5, %v13473_v33, %v13472_v31  ;;  %v5077_v4 = vshrl.u32 %v4953_v24, 16  ;;  %v11322_v31 = vpop.f32.mrb[104].mxu0 }
 0x2a9   : > { %13471 = vst [vmem:[#allocation73_spill] sm:$0xff] %v11305_v0  ;;  %v5075_v39 = vrot.slane %v5073_v46, 1  ;;  %v5081_v43 = vshll.u32 %v4954_v47, 16  ;;  %vm4937_vm4 = vcmp.ne.s16.totalorder %v4920_v58, 0  ;;  %vm13474_vm7 = vcmp.ne.s16.totalorder %v10860_v21, 0  ;;  %v7703_v8 = vpop.f32.mrb[105].mxu0 }
 0x2aa   : > { %v2599_v50 = vsel %vm13474_vm7, %v11079_v28, 0  ;;  %v11316_v55 = vsel %vm4093_vm1, %v5063_v40, %v5067_v59  ;;  %v5071_v13 = vor.u32 %v5069_v52, %v5067_v59  ;;  %v11319_v35 = vsel %vm4937_vm4, %v10893_v18, 0  ;;  %7670 = vmatmul.mubr.msk.bf16.gmra.mrb[140].mxu1 %vm701_vm0, %v3012_v51  ;;  %v11330_v40 = vpop.f32.mrb[106].mxu0  ;;  %v11337_v59 = vpop.f32.mrb[36].mxu1 }
 0x2ab   : > { %13475 = vst [vmem:[#allocation67_spill] sm:$0xff] %v11316_v55  ;;  %13476 = vst [vmem:[#allocation75_spill] sm:$0xff] %v11319_v35  ;;  %v5079_v33 = vor.u32 %v5077_v4, %v5075_v39  ;;  %v5083_v46 = vrot.slane %v5081_v43, 1  ;;  %v5085_v24 = vshrl.u32 %v4954_v47, 16  ;;  %v5089_v58 = vshll.u32 %v11319_v35, 16  ;;  %7673 = vmatprep.mubr.msk.bf16.mxu1 %vm8349_vm9, %v13180_v14  ;;  %v7704_v47 = vpop.f32.mrb[107].mxu0 }
 0x2ac   : > { %v11328_v21 = vsel %vm4093_vm1, %v5071_v13, %v5075_v39  ;;  %v3020_v4 = vor.u32 %v11203_v30, %v11201_v38  ;;  %v3023_v43 = vshrl.u32 %v2599_v50, 16  ;;  %v3026_v8 = vshll.u32 %v2599_v50, 16  ;;  %v7563_v10 = vpop.f32.mrb[37].mxu1  ;;  %7886 = vmatmul.mubr.msk.bf16.gmra.mrb[212].mxu0 %vm701_vm0, %v10997_v60 }
 0x2ad   : > { %13477 = vst [vmem:[#allocation72_spill] sm:$0xff] %v11328_v21  ;;  %v11333_v18 = vsel %vm4093_vm1, %v5079_v33, %v5083_v46  ;;  %v5087_v51 = vor.u32 %v5085_v24, %v5083_v46  ;;  %v11335_v52 = vrot.slane %v5089_v58, 1  ;;  %v11345_v13 = vpop.f32.mrb[38].mxu1  ;;  %7889 = vmatprep.mubr.msk.bf16.mxu0 %vm8349_vm9, %v13180_v14  ;;  %v11354_v10 = vpop.f32.mrb[108].mxu0  ;;  %v2600_v50 = vsel %vm2582_vm6, %v11090_v48, 0  ;;  %vm13482_vm6 = vmmov %vm13481_vm3 }
 0x2ae   : > { %13478 = vst [vmem:[#allocation77_spill] sm:$0xff] %v11333_v18  ;;  %v7564_v33 = vpop.f32.mrb[39].mxu1  ;;  %v3021_v46 = vsel %vm13481_vm3, %v11186_v5, %v3020_v4  ;;  %v3025_v38 = vrot.slane %v3023_v43, 3  ;;  %v3028_v30 = vrot.slane %v3026_v8, 4  ;;  %v7707_v24 = vpop.f32.mrb[109].mxu0  ;;  %v3032_v47 = vshrl.u32 %v2600_v50, 16 }
 0x2af   : > { %13479 = vst [vmem:[#allocation74_spill] sm:$0xff] %v11335_v52  ;;  %v11343_v39 = vsel %vm4093_vm1, %v5087_v51, %v11335_v52  ;;  %v11361_v60 = vpop.f32.mrb[110].mxu0  ;;  %v11363_v58 = vpop.f32.mrb[40].mxu1  ;;  %v3035_v43 = vshll.u32 %v2600_v50, 16  ;;  %vm13483_vm10 = vcmp.ne.s16.totalorder %v10886_v26, 0  ;;  %v13484_v50 = vld [vmem:[#allocation48_spill] sm:$0xff] }
 0x2b0   : > { %13480 = vst [vmem:[#allocation80_spill] sm:$0xff] %v11343_v39  ;;  %v7708_v51 = vpop.f32.mrb[111].mxu0  ;;  %v3029_v5 = vor.u32 %v3028_v30, %v3025_v38  ;;  %v7567_v8 = vpop.f32.mrb[41].mxu1  ;;  %v3034_v24 = vrot.slane %v3032_v47, 3  ;;  %v2601_v38 = vsel %vm13483_vm10, %v11299_v22, 0  ;;  %vm2584_vm2 = vcmp.ne.s16.totalorder %v10842_v32, 0 }
 0x2b1   : > { %v11365_v33 = vpop.f32.mrb[42].mxu1  ;;  %v3037_v39 = vrot.slane %v3035_v43, 4  ;;  %v13485_v8 = vshll.u32 %v13484_v50, 16  ;;  %v3044_v0 = vshll.u32 %v2601_v38, 16  ;;  %vm13495_vm11 = vcmp.ne.s16.totalorder %v13494_v12, 0 }
 0x2b2   : > { %7674 = vmatmul.mubr.msk.bf16.gmra.mrb[144].mxu1 %vm701_vm0, %v3021_v46  ;;  %v7568_v34 = vpop.f32.mrb[43].mxu1  ;;  %v3030_v46 = vsel %vm13482_vm6, %v3020_v4, %v3029_v5  ;;  %vm13497_vm4 = vcmp.ne.s16.totalorder %v13496_v20, 0 }
 0x2b3   : > { %7677 = vmatprep.mubr.msk.bf16.mxu1 %vm8349_vm9, %v13180_v14  ;;  %v11373_v51 = vpop.f32.mrb[112].mxu0  ;;  %v4094_v34 = vrot.slane %v13485_v8, 1  ;;  %v3038_v43 = vor.u32 %v3037_v39, %v3034_v24  ;;  %v13486_v8 = vshrl.u32 %v13484_v50, 16  ;;  %v3046_v24 = vrot.slane %v3044_v0, 4 }
 0x2b4   : > { %7890 = vmatmul.mubr.msk.bf16.gmra.mrb[216].mxu0 %vm701_vm0, %v11031_v53  ;;  %v7711_v30 = vpop.f32.mrb[113].mxu0 }
 0x2b5   : > { %7893 = vmatprep.mubr.msk.bf16.mxu0 %vm8349_vm9, %v13180_v14  ;;  %v11380_v53 = vpop.f32.mrb[114].mxu0  ;;  %v4095_v16 = vor.u32 %v4094_v34, %v13486_v8  ;;  %vm4144_vm12 = vcmp.ne.s16.totalorder %v4094_v34, 0 }
 0x2b6   : > { %v11384_v4 = vpop.f32.mrb[44].mxu1  ;;  %v7712_v47 = vpop.f32.mrb[115].mxu0 }
 0x2b7   : > { %v7571_v18 = vpop.f32.mrb[45].mxu1  ;;  %v3039_v47 = vsel %vm13487_vm13, %v3029_v5, %v3038_v43 }
 0x2b8   : > { %v11387_v26 = vpop.f32.mrb[46].mxu1 }
 0x2b9   : > { %v7572_v30 = vpop.f32.mrb[47].mxu1 }
 0x2ba   : > { %7678 = vmatmul.mubr.msk.bf16.gmra.mrb[148].mxu1 %vm701_vm0, %v3030_v46  ;;  %v3041_v46 = vshrl.u32 %v2601_v38, 16  ;;  %v8313_v38 = vld [vmem:[#allocation2 + $0x88] sm:$0xf] }
 0x2bb   : > { %7681 = vmatprep.mubr.msk.bf16.mxu1 %vm8349_vm9, %v13180_v14  ;;  %v2602_v18 = vsel %vm2584_vm2, %v8313_v38, 0  ;;  %v11399_v21 = vpop.f32.mrb[116].mxu0 }
 0x2bc   : > { %7894 = vmatmul.mubr.msk.bf16.gmra.mrb[220].mxu0 %vm701_vm0, %v11079_v28  ;;  %v3043_v39 = vrot.slane %v3041_v46, 3  ;;  %v13488_v28 = vld [vmem:[#allocation36_spill] sm:$0xff]  ;;  %v7715_v55 = vpop.f32.mrb[117].mxu0  ;;  %v3050_v38 = vshrl.u32 %v2602_v18, 16  ;;  %v3053_v37 = vshll.u32 %v2602_v18, 16 }
 0x2bd   : > { %7897 = vmatprep.mubr.msk.bf16.mxu0 %vm8349_vm9, %v13180_v14  ;;  %v13489_v30 = vshll.u32 %v13488_v28, 16  ;;  %v11405_v50 = vpop.f32.mrb[118].mxu0  ;;  %v4091_v18 = vld [vmem:[#allocation2] sm:$0x80] }
 0x2be   : > { %v11408_v0 = vpop.f32.mrb[48].mxu1  ;;  %v7716_v46 = vpop.f32.mrb[119].mxu0  ;;  %v3047_v8 = vor.u32 %v3046_v24, %v3043_v39  ;;  %v3055_v39 = vrot.slane %v3053_v37, 4  ;;  %v4162_v34 = vsel %vm4144_vm12, %v4091_v18, 0 }
 0x2bf   : > { %v4096_v2 = vrot.slane %v13489_v30, 1  ;;  %v13490_v30 = vshrl.u32 %v13488_v28, 16  ;;  %v3052_v46 = vrot.slane %v3050_v38, 3 }
 0x2c0   : > { %v3048_v44 = vsel %vm13491_vm15, %v3038_v43, %v3047_v8  ;;  %v5364_v43 = vld [vmem:[#allocation2 + $0x90] sm:$0xf] }
 0x2c1   : > { %v4097_v5 = vsel %vm4093_vm1, %v4095_v16, %v4096_v2  ;;  %v4098_v16 = vor.u32 %v4096_v2, %v13490_v30  ;;  %v5363_v2 = vld [vmem:[#allocation2 + $0x8] sm:$0xf8]  ;;  %v3056_v30 = vor.u32 %v3055_v39, %v3052_v46  ;;  %v4186_v39 = vshrl.u32 %v4162_v34, 16 }
 0x2c2   : > { %7682 = vmatmul.mubr.msk.bf16.gmra.mrb[152].mxu1 %vm701_vm0, %v3039_v47  ;;  %v7575_v47 = vpop.f32.mrb[49].mxu1  ;;  %vm4145_vm14 = vcmp.ne.s16.totalorder %v4097_v5, 0  ;;  %v13492_v5 = vld [vmem:[#allocation68_spill] sm:$0xff] }
 0x2c3   : > { %7685 = vmatprep.mubr.msk.bf16.mxu1 %vm8349_vm9, %v13180_v14  ;;  %v11410_v57 = vpop.f32.mrb[50].mxu1  ;;  %v11420_v24 = vpop.f32.mrb[120].mxu0  ;;  %v13493_v47 = vshll.u32 %v13492_v5, 16  ;;  %v3057_v12 = vsel %vm13481_vm3, %v3047_v8, %v3056_v30  ;;  %v13499_v30 = vld [vmem:[#allocation71_spill] sm:$0xff]  ;;  %v4188_v61 = vrot.slane %v4186_v39, 7 }
 0x2c4   : > { %7898 = vmatmul.mubr.msk.bf16.gmra.mrb[224].mxu0 %vm701_vm0, %v11090_v48  ;;  %v7576_v55 = vpop.f32.mrb[51].mxu1  ;;  %v4163_v48 = vsel %vm4145_vm14, %v10755_v49, 0  ;;  %v7719_v3 = vpop.f32.mrb[121].mxu0  ;;  %v8289_v39 = vld [vmem:[%s12796_s3 + $0x50] sm:$0xff]  }
 0x2c5   : > { %7901 = vmatprep.mubr.msk.bf16.mxu0 %vm8349_vm9, %v13180_v14  ;;  %v4099_v55 = vrot.slane %v13493_v47, 1  ;;  %v11427_v28 = vpop.f32.mrb[122].mxu0  ;;  %v4190_v45 = vshrl.u32 %v4163_v48, 16  ;;  %v5365_v47 = vsel %vm13495_vm11, %v5363_v2, 0 }
 0x2c6   : > { %v7720_v38 = vpop.f32.mrb[123].mxu0  ;;  %v5388_v2 = vshrl.u32 %v5365_v47, 16 }
 0x2c7   : > { %v4100_v37 = vsel %vm4093_vm1, %v4098_v16, %v4099_v55  ;;  %v5366_v16 = vsel %vm13497_vm4, %v10810_v42, 0  ;;  %v5382_v38 = vsel %vm2584_vm2, %v5364_v43, 0  ;;  %v11446_v18 = vrot.slane %v4190_v45, 7  ;;  %vm13507_vm2 = vmmov %vm13481_vm3 }
 0x2c8   : > { %vm4146_vm7 = vcmp.ne.s16.totalorder %v4100_v37, 0  ;;  %v5396_v20 = vshrl.u32 %v5366_v16, 16  ;;  %v5399_v37 = vshll.u32 %v5366_v16, 16  ;;  %v13498_v43 = vshrl.u32 %v13492_v5, 16  ;;  %vm13513_vm15 = vmmov %vm13507_vm2 }
 0x2c9   : > { %v4164_v32 = vsel %vm4146_vm7, %v10810_v42, 0  ;;  %v5540_v36 = vshrl.u32 %v5382_v38, 16  ;;  %v5543_v27 = vshll.u32 %v5382_v38, 16  ;;  %v4193_v45 = vshll.u32 %v4163_v48, 16  ;;  %v11463_v38 = vld [vmem:[#allocation2 + $0x88] sm:$0xff]  ;;  %vm13518_vm12 = vmmov %vm13507_vm2 }
 0x2ca   : > { %7686 = vmatmul.mubr.msk.bf16.gmra.mrb[156].mxu1 %vm701_vm0, %v3048_v44  ;;  %v11430_v44 = vpop.f32.mrb[52].mxu1  ;;  %v5390_v5 = vrot.slane %v5388_v2, 3  ;;  %v5398_v9 = vrot.slane %v5396_v20, 3  ;;  %v5401_v25 = vrot.slane %v5399_v37, 4  ;;  %v13503_v37 = vld [vmem:[#allocation16_spill] sm:$0xff]  ;;  %vm13528_vm7 = vmmov %vm13507_vm2 }
 0x2cb   : > { %7689 = vmatprep.mubr.msk.bf16.mxu1 %vm8349_vm9, %v13180_v14  ;;  %v7579_v49 = vpop.f32.mrb[53].mxu1  ;;  %v4195_v42 = vor.u32 %v4193_v45, %v11446_v18  ;;  %v5542_v19 = vrot.slane %v5540_v36, 3  ;;  %v5545_v52 = vrot.slane %v5543_v27, 4 }
 0x2cc   : > { %v11434_v3 = vpop.f32.mrb[54].mxu1  ;;  %7902 = vmatmul.mubr.msk.bf16.gmra.mrb[228].mxu0 %vm701_vm0, %v11299_v22  ;;  %v5391_v49 = vshll.u32 %v5365_v47, 16  ;;  %v11449_v22 = vpop.f32.mrb[124].mxu0  ;;  %v13500_v47 = vshll.u32 %v13499_v30, 16 }
 0x2cd   : > { %v7580_v46 = vpop.f32.mrb[55].mxu1  ;;  %7905 = vmatprep.mubr.msk.bf16.mxu0 %vm8349_vm9, %v13180_v14  ;;  %v7723_v34 = vpop.f32.mrb[125].mxu0  ;;  %v4196_v27 = vsel %vm4184_vm5, %v4188_v61, %v4195_v42  ;;  %v4201_v61 = vshll.u32 %v4164_v32, 16  ;;  %v8291_v42 = vld [vmem:[%s12796_s3 + $0x58] sm:$0xff]  }
 0x2ce   : > { %v4101_v46 = vor.u32 %v4099_v55, %v13498_v43  ;;  %v11456_v8 = vpop.f32.mrb[126].mxu0  ;;  %v11460_v63 = vpop.f32.mrb[56].mxu1  ;;  %v4198_v55 = vshrl.u32 %v4164_v32, 16  ;;  %v5393_v34 = vrot.slane %v5391_v49, 4  ;;  %v13502_v49 = vshrl.u32 %v13499_v30, 16 }
 0x2cf   : > { %v7724_v16 = vpop.f32.mrb[127].mxu0  ;;  %v7583_v43 = vpop.f32.mrb[57].mxu1  ;;  %v5546_v30 = vor.u32 %v5545_v52, %v5542_v19 }
 0x2d0   : > { %v11466_v35 = vpop.f32.mrb[58].mxu1  ;;  %v11480_v45 = vrot.slane %v4198_v55, 7 }
 0x2d1   : > { %13501 = vst [vmem:[#allocation48_spill] sm:$0xff] %v11466_v35  ;;  %v7584_v2 = vpop.f32.mrb[59].mxu1  ;;  %v5402_v35 = vor.u32 %v5401_v25, %v5398_v9 }
 0x2d2   : > { %7690 = vmatmul.mubr.msk.bf16.gmra.mrb[160].mxu1 %vm701_vm0, %v3057_v12  ;;  %v4102_v12 = vrot.slane %v13500_v47, 1  ;;  %v13505_v47 = vld [vmem:[#allocation18_spill] sm:$0xff]  ;;  %v5394_v2 = vor.u32 %v5393_v34, %v5390_v5  ;;  %v4203_v9 = vor.u32 %v4201_v61, %v11480_v45  ;;  %v13512_v61 = vshrl.u32 %v13503_v37, 16 }
 0x2d3   : > { %7769 = vmatprep.mubr.msk.bf16.mxu1 %vm8349_vm9, %v13180_v14  ;;  %vm13506_vm6 = vcmp.ne.s16.totalorder %v13505_v47, 0  ;;  %v11485_v43 = vpop.f32.mrb[128].mxu0  ;;  %v13510_v47 = vld [vmem:[#allocation8_spill] sm:$0xff] }
 0x2d4   : > { %v4103_v48 = vsel %vm4093_vm1, %v4101_v46, %v4102_v12  ;;  %7906 = vmatmul.mubr.msk.bf16.gmra.mrb[232].mxu0 %vm701_vm0, %v11463_v38  ;;  %v4104_v20 = vor.u32 %v4102_v12, %v13502_v49  ;;  %v13504_v46 = vshll.u32 %v13503_v37, 16  ;;  %v5367_v16 = vsel %vm13506_vm6, %v10866_v7, 0  ;;  %v7727_v12 = vpop.f32.mrb[129].mxu0 }
 0x2d5   : > { %7985 = vmatprep.mubr.msk.bf16.mxu0 %vm8349_vm9, %v13180_v14  ;;  %vm4147_vm10 = vcmp.ne.s16.totalorder %v4103_v48, 0  ;;  %v11493_v55 = vpop.f32.mrb[130].mxu0  ;;  %v5405_v48 = vshrl.u32 %v5367_v16, 16  ;;  %v5408_v49 = vshll.u32 %v5367_v16, 16  ;;  %v5403_v32 = vsel %vm13507_vm2, %v5394_v2, %v5402_v35 }
 0x2d6   : > { %v4105_v36 = vrot.slane %v13504_v46, 1  ;;  %v4165_v46 = vsel %vm4147_vm10, %v10866_v7, 0  ;;  %v11498_v19 = vpop.f32.mrb[60].mxu1  ;;  %v7728_v25 = vpop.f32.mrb[131].mxu0  ;;  %vm13511_vm13 = vcmp.ne.s16.totalorder %v13510_v47, 0  ;;  %vm13537_vm10 = vmmov %vm13507_vm2 }
 0x2d7   : > { %v7587_v52 = vpop.f32.mrb[61].mxu1  ;;  %v5407_v16 = vrot.slane %v5405_v48, 3  ;;  %v5410_v12 = vrot.slane %v5408_v49, 4  ;;  %v11514_v25 = vsel %vm13513_vm15, %v10990_v41, %v5546_v30  ;;  %v13515_v49 = vld [vmem:[#allocation20_spill] sm:$0xff]  ;;  %vm13553_vm15 = vmmov %vm13528_vm7 }
 0x2d8   : > { %v4106_v5 = vsel %vm4093_vm1, %v4104_v20, %v4105_v36  ;;  %v11502_v34 = vpop.f32.mrb[62].mxu1  ;;  %v4107_v2 = vor.u32 %v4105_v36, %v13512_v61  ;;  %v8292_v52 = vld [vmem:[%s12796_s3 + $0x80] sm:$0xff]   ;;  %v13516_v41 = vshll.u32 %v13515_v49, 16 }
 0x2d9   : > { %13508 = vst [vmem:[#allocation36_spill] sm:$0xff] %v11502_v34  ;;  %vm4148_vm14 = vcmp.ne.s16.totalorder %v4106_v5, 0  ;;  %v7588_v20 = vpop.f32.mrb[63].mxu1 }
 0x2da   : > { %7770 = vmatmul.mubr.msk.bf16.vlgmr.msra.gmra.mrb[164].mxu1 %vm701_vm0, %v4196_v27  ;;  %v13509_v27 = vld [vmem:[#allocation6_spill] sm:$0xff]  ;;  %v4108_v30 = vrot.slane %v13516_v41, 1 }
 0x2db   : > { %7910 = vmatpush3.bf16.msra.mxu1 %v8289_v39  ;;  %7773 = vmatprep.mubr.msk.bf16.mxu1 %vm8349_vm9, %v13180_v14  ;;  %v4206_v39 = vshrl.u32 %v4165_v46, 16  ;;  %v5368_v7 = vsel %vm13511_vm13, %v13509_v27, 0  ;;  %v11522_v5 = vpop.f32.mrb[132].mxu0  ;;  %v4166_v36 = vsel %vm4148_vm14, %v13509_v27, 0  ;;  %v8294_v27 = vld [vmem:[%s12796_s3 + $0x88] sm:$0xff]   ;;  %vm13544_vm13 = vmmov %vm13528_vm7 }
 0x2dc   : > { %7911 = vmatprep.subr.bf16.mxu1 %v13180_v14  ;;  %7986 = vmatmul.mubr.msk.bf16.vlgmr.msra.gmra.mrb[236].mxu0 %vm701_vm0, %v5403_v32  ;;  %13514 = vst [vmem:[#allocation68_spill] sm:$0xff] %v11522_v5  ;;  %v5414_v48 = vshrl.u32 %v5368_v7, 16  ;;  %v5417_v37 = vshll.u32 %v5368_v7, 16  ;;  %v7731_v32 = vpop.f32.mrb[133].mxu0  ;;  %v4109_v20 = vsel %vm4093_vm1, %v4107_v2, %v4108_v30 }
 0x2dd   : > { %7989 = vmatprep.mubr.msk.bf16.mxu0 %vm8349_vm9, %v13180_v14  ;;  %8126 = vmatpush3.bf16.msra.mxu0 %v8292_v52  ;;  %v4208_v47 = vrot.slane %v4206_v39, 7  ;;  %v4209_v52 = vshll.u32 %v4165_v46, 16  ;;  %vm4149_vm4 = vcmp.ne.s16.totalorder %v4109_v20, 0  ;;  %v13522_v46 = vshrl.u32 %v13515_v49, 16 }
 0x2de   : > { %8127 = vmatprep.subr.bf16.mxu0 %v13180_v14  ;;  %v11537_v7 = vpop.f32.mrb[64].mxu1  ;;  %v5416_v39 = vrot.slane %v5414_v48, 3  ;;  %v5419_v5 = vrot.slane %v5417_v37, 4  ;;  %v13523_v48 = vld [vmem:[#allocation22_spill] sm:$0xff]  ;;  %v4217_v49 = vshll.u32 %v4166_v36, 16 }
 0x2df   : > { %7912 = vmatpush3.bf16.msra.mxu1 %v8291_v42  ;;  %v4204_v42 = vsel %vm4184_vm5, %v11446_v18, %v4203_v9  ;;  %v11531_v18 = vpop.f32.mrb[134].mxu0  ;;  %v5411_v9 = vor.u32 %v5410_v12, %v5407_v16  ;;  %v7591_v41 = vpop.f32.mrb[65].mxu1  ;;  %v4211_v16 = vor.u32 %v4209_v52, %v4208_v47  ;;  %v13520_v12 = vld [vmem:[#allocation38_spill] sm:$0xff]  ;;  %v13524_v37 = vshll.u32 %v13523_v48, 16 }
 0x2e0   : > { %8053 = vmatprep.subr.bf16.mxu1 %v13180_v14  ;;  %13517 = vst [vmem:[#allocation63_spill] sm:$0xff] %v11531_v18  ;;  %v7732_v61 = vpop.f32.mrb[135].mxu0  ;;  %v11540_v34 = vpop.f32.mrb[66].mxu1  ;;  %vm13521_vm11 = vcmp.ne.s16.totalorder %v13520_v12, 0  ;;  %v4167_v12 = vsel %vm4149_vm4, %v10971_v62, 0 }
 0x2e1   : > { %v5412_v32 = vsel %vm13518_vm12, %v5402_v35, %v5411_v9  ;;  %8128 = vmatpush3.bf16.msra.mxu0 %v8294_v27  ;;  %13519 = vst [vmem:[#allocation66_spill] sm:$0xff] %v11540_v34  ;;  %v5369_v2 = vsel %vm13521_vm11, %v10971_v62, 0  ;;  %v7592_v18 = vpop.f32.mrb[67].mxu1  ;;  %v4110_v35 = vor.u32 %v4108_v30, %v13522_v46  ;;  %v4111_v27 = vrot.slane %v13524_v37, 1  ;;  %v11566_v62 = vld [vmem:[#allocation2 + $0x30] sm:$0xff] }
 0x2e2   : > { %7774 = vmatmul.mubr.msk.bf16.gmra.mrb[168].mxu1 %vm701_vm0, %v4204_v42  ;;  %v4214_v42 = vshrl.u32 %v4166_v36, 16  ;;  %v4212_v61 = vsel %vm4184_vm5, %v11480_v45, %v4211_v16  ;;  %v5423_v20 = vshrl.u32 %v5369_v2, 16  ;;  %v5426_v18 = vshll.u32 %v5369_v2, 16 }
 0x2e3   : > { %7777 = vmatprep.mubr.msk.bf16.mxu1 %vm8349_vm9, %v13180_v14  ;;  %v11554_v52 = vpop.f32.mrb[136].mxu0  ;;  %v4112_v46 = vsel %vm4093_vm1, %v4110_v35, %v4111_v27  ;;  %v4222_v37 = vshrl.u32 %v4167_v12, 16 }
 0x2e4   : > { %7990 = vmatmul.mubr.msk.bf16.gmra.mrb[240].mxu0 %vm701_vm0, %v5412_v32  ;;  %v4216_v41 = vrot.slane %v4214_v42, 7  ;;  %13525 = vst [vmem:[#allocation71_spill] sm:$0xff] %v11554_v52  ;;  %v5420_v32 = vor.u32 %v5419_v5, %v5416_v39  ;;  %v7735_v34 = vpop.f32.mrb[137].mxu0  ;;  %v5425_v39 = vrot.slane %v5423_v20, 3  ;;  %v5428_v2 = vrot.slane %v5426_v18, 4 }
 0x2e5   : > { %7993 = vmatprep.mubr.msk.bf16.mxu0 %vm8349_vm9, %v13180_v14  ;;  %v11560_v30 = vpop.f32.mrb[138].mxu0  ;;  %v13529_v34 = vld [vmem:[#allocation47_spill] sm:$0xff]  ;;  %vm4150_vm6 = vcmp.ne.s16.totalorder %v4112_v46, 0  ;;  %v4224_v18 = vrot.slane %v4222_v37, 7 }
 0x2e6   : > { %13526 = vst [vmem:[#allocation16_spill] sm:$0xff] %v11560_v30  ;;  %v11563_v45 = vpop.f32.mrb[68].mxu1  ;;  %v7736_v42 = vpop.f32.mrb[139].mxu0  ;;  %v4219_v16 = vor.u32 %v4217_v49, %v4216_v41  ;;  %v5421_v5 = vsel %vm13528_vm7, %v5411_v9, %v5420_v32  ;;  %vm13530_vm3 = vcmp.ne.s16.totalorder %v13529_v34, 0  ;;  %v13532_v49 = vshrl.u32 %v13523_v48, 16  ;;  %v13534_v46 = vld [vmem:[#allocation23_spill] sm:$0xff] }
 0x2e7   : > { %13527 = vst [vmem:[#allocation18_spill] sm:$0xff] %v11563_v45  ;;  %v5370_v36 = vsel %vm13530_vm3, %v11566_v62, 0  ;;  %v5429_v34 = vor.u32 %v5428_v2, %v5425_v39  ;;  %v4225_v48 = vshll.u32 %v4167_v12, 16 }
 0x2e8   : > { %v4113_v9 = vor.u32 %v4111_v27, %v13532_v49  ;;  %v4220_v20 = vsel %vm4184_vm5, %v4208_v47, %v4219_v16  ;;  %v5432_v42 = vshrl.u32 %v5370_v36, 16 }
 0x2e9   : > { %v4227_v49 = vor.u32 %v4225_v48, %v4224_v18 }
 0x2ea   : > { %7778 = vmatmul.mubr.msk.bf16.gmra.mrb[172].mxu1 %vm701_vm0, %v4212_v61  ;;  %v7595_v61 = vpop.f32.mrb[69].mxu1 }
 0x2eb   : > { %7781 = vmatprep.mubr.msk.bf16.mxu1 %vm8349_vm9, %v13180_v14  ;;  %v11571_v52 = vpop.f32.mrb[70].mxu1  ;;  %v11579_v61 = vpop.f32.mrb[140].mxu0 }
 0x2ec   : > { %13531 = vst [vmem:[#allocation6_spill] sm:$0xff] %v11571_v52  ;;  %7994 = vmatmul.mubr.msk.bf16.gmra.mrb[244].mxu0 %vm701_vm0, %v5421_v5  ;;  %v7596_v35 = vpop.f32.mrb[71].mxu1  ;;  %13533 = vst [vmem:[#allocation8_spill] sm:$0xff] %v11579_v61  ;;  %v5435_v52 = vshll.u32 %v5370_v36, 16  ;;  %v4168_v5 = vsel %vm4150_vm6, %v11566_v62, 0  ;;  %v7739_v45 = vpop.f32.mrb[141].mxu0  ;;  %v5430_v36 = vsel %vm13537_vm10, %v5420_v32, %v5429_v34 }
 0x2ed   : > { %7997 = vmatprep.mubr.msk.bf16.mxu0 %vm8349_vm9, %v13180_v14  ;;  %v13535_v35 = vshll.u32 %v13534_v46, 16  ;;  %v11587_v27 = vpop.f32.mrb[142].mxu0  ;;  %v4230_v39 = vshrl.u32 %v4168_v5, 16  ;;  %v13538_v45 = vshrl.u32 %v13534_v46, 16 }
 0x2ee   : > { %13536 = vst [vmem:[#allocation20_spill] sm:$0xff] %v11587_v27  ;;  %v11590_v16 = vpop.f32.mrb[72].mxu1  ;;  %v7740_v37 = vpop.f32.mrb[143].mxu0  ;;  %v5437_v61 = vrot.slane %v5435_v52, 4 }
 0x2ef   : > { %v4114_v30 = vrot.slane %v13535_v35, 1  ;;  %v7599_v2 = vpop.f32.mrb[73].mxu1  ;;  %v13539_v37 = vld [vmem:[#allocation55_spill] sm:$0xff]  ;;  %v4232_v32 = vrot.slane %v4230_v39, 7 }
 0x2f0   : > { %v11593_v35 = vpop.f32.mrb[74].mxu1  ;;  %v13540_v48 = vshll.u32 %v13539_v37, 16  ;;  %v4228_v2 = vsel %vm4184_vm5, %v4216_v41, %v4227_v49 }
 0x2f1   : > { %v4115_v47 = vsel %vm4093_vm1, %v4113_v9, %v4114_v30  ;;  %v7600_v12 = vpop.f32.mrb[75].mxu1  ;;  %v4116_v9 = vor.u32 %v4114_v30, %v13538_v45  ;;  %v4233_v30 = vshll.u32 %v4168_v5, 16  ;;  %v13546_v5 = vshrl.u32 %v13539_v37, 16 }
 0x2f2   : > { %7782 = vmatmul.mubr.msk.bf16.gmra.mrb[176].mxu1 %vm701_vm0, %v4220_v20  ;;  %v5434_v20 = vrot.slane %v5432_v42, 3  ;;  %vm4151_vm2 = vcmp.ne.s16.totalorder %v4115_v47, 0  ;;  %v4117_v27 = vrot.slane %v13540_v48, 1 }
 0x2f3   : > { %7785 = vmatprep.mubr.msk.bf16.mxu1 %vm8349_vm9, %v13180_v14  ;;  %v11603_v42 = vpop.f32.mrb[144].mxu0  ;;  %v4235_v39 = vor.u32 %v4233_v30, %v4232_v32 }
 0x2f4   : > { %7998 = vmatmul.mubr.msk.bf16.gmra.mrb[248].mxu0 %vm701_vm0, %v5430_v36  ;;  %13541 = vst [vmem:[#allocation38_spill] sm:$0xff] %v11603_v42  ;;  %v5438_v52 = vor.u32 %v5437_v61, %v5434_v20  ;;  %v11606_v36 = vld [vmem:[#allocation2 + $0x38] sm:$0xff]  ;;  %v7743_v12 = vpop.f32.mrb[145].mxu0  ;;  %v4118_v45 = vsel %vm4093_vm1, %v4116_v9, %v4117_v27  ;;  %v4119_v9 = vor.u32 %v4117_v27, %v13546_v5 }
 0x2f5   : > { %8001 = vmatprep.mubr.msk.bf16.mxu0 %vm8349_vm9, %v13180_v14  ;;  %v4169_v47 = vsel %vm4151_vm2, %v11606_v36, 0  ;;  %v11611_v46 = vpop.f32.mrb[146].mxu0  ;;  %vm4152_vm14 = vcmp.ne.s16.totalorder %v4118_v45, 0 }
 0x2f6   : > { %13542 = vst [vmem:[#allocation22_spill] sm:$0xff] %v11611_v46  ;;  %v11614_v41 = vpop.f32.mrb[76].mxu1  ;;  %v7744_v49 = vpop.f32.mrb[147].mxu0  ;;  %v4238_v48 = vshrl.u32 %v4169_v47, 16  ;;  %v5439_v61 = vsel %vm13544_vm13, %v5429_v34, %v5438_v52  ;;  %v4236_v46 = vsel %vm4184_vm5, %v4224_v18, %v4235_v39  ;;  %v8316_v34 = vld [vmem:[#allocation2 + $0x40] sm:$0xff] }
 0x2f7   : > { %13543 = vst [vmem:[#allocation47_spill] sm:$0xff] %v11614_v41 }
 0x2f8   : > { %v4240_v49 = vrot.slane %v4238_v48, 7 }
 0x2fa   : > { %7786 = vmatmul.mubr.msk.bf16.gmra.mrb[180].mxu1 %vm701_vm0, %v4228_v2  ;;  %v7603_v2 = vpop.f32.mrb[77].mxu1 }
 0x2fb   : > { %7789 = vmatprep.mubr.msk.bf16.mxu1 %vm8349_vm9, %v13180_v14  ;;  %v11617_v20 = vpop.f32.mrb[78].mxu1  ;;  %v11625_v30 = vpop.f32.mrb[148].mxu0  ;;  %v4170_v2 = vsel %vm4152_vm14, %v8316_v34, 0 }
 0x2fc   : > { %13545 = vst [vmem:[#allocation23_spill] sm:$0xff] %v11617_v20  ;;  %8002 = vmatmul.mubr.msk.bf16.gmra.mrb[252].mxu0 %vm701_vm0, %v5439_v61  ;;  %v7604_v12 = vpop.f32.mrb[79].mxu1  ;;  %13547 = vst [vmem:[#allocation55_spill] sm:$0xff] %v11625_v30  ;;  %v13548_v20 = vld [vmem:[#allocation51_spill] sm:$0xff]  ;;  %v7747_v45 = vpop.f32.mrb[149].mxu0  ;;  %v4246_v48 = vshrl.u32 %v4170_v2, 16 }
 0x2fd   : > { %8005 = vmatprep.mubr.msk.bf16.mxu0 %vm8349_vm9, %v13180_v14  ;;  %v13549_v41 = vshll.u32 %v13548_v20, 16  ;;  %v4241_v12 = vshll.u32 %v4169_v47, 16  ;;  %v11632_v42 = vpop.f32.mrb[150].mxu0  ;;  %v13554_v47 = vshrl.u32 %v13548_v20, 16  ;;  %v13555_v45 = vld [vmem:[#allocation62_spill] sm:$0xff] }
 0x2fe   : > { %13550 = vst [vmem:[#allocation51_spill] sm:$0xff] %v11632_v42  ;;  %v11635_v18 = vpop.f32.mrb[80].mxu1  ;;  %v7748_v37 = vpop.f32.mrb[151].mxu0 }
 0x2ff   : > { %v4120_v61 = vrot.slane %v13549_v41, 1  ;;  %13551 = vst [vmem:[#allocation81_spill] sm:$0xff] %v11635_v18  ;;  %v4243_v39 = vor.u32 %v4241_v12, %v4240_v49  ;;  %v7607_v34 = vpop.f32.mrb[81].mxu1  ;;  %v13556_v37 = vshll.u32 %v13555_v45, 16  ;;  %v4248_v18 = vrot.slane %v4246_v48, 7 }
 0x300   : > { %v11639_v30 = vpop.f32.mrb[82].mxu1  ;;  %v4249_v34 = vshll.u32 %v4170_v2, 16  ;;  %v13562_v2 = vshrl.u32 %v13555_v45, 16 }
 0x301   : > { %v4121_v27 = vsel %vm4093_vm1, %v4119_v9, %v4120_v61  ;;  %v7608_v41 = vpop.f32.mrb[83].mxu1  ;;  %v4122_v9 = vor.u32 %v4120_v61, %v13554_v47  ;;  %v4123_v12 = vrot.slane %v13556_v37, 1  ;;  %v4244_v42 = vsel %vm4184_vm5, %v4232_v32, %v4243_v39 }
 0x302   : > { %7790 = vmatmul.mubr.msk.bf16.gmra.mrb[184].mxu1 %vm701_vm0, %v4236_v46  ;;  %v13552_v46 = vld [vmem:[#allocation4_spill] sm:$0xff]  ;;  %vm4153_vm12 = vcmp.ne.s16.totalorder %v4121_v27, 0  ;;  %v4251_v32 = vor.u32 %v4249_v34, %v4248_v18  ;;  %v8318_v34 = vld [vmem:[#allocation2 + $0x50] sm:$0xff] }
 0x303   : > { %7793 = vmatprep.mubr.msk.bf16.mxu1 %vm8349_vm9, %v13180_v14  ;;  %v5448_v5 = vsel %vm13553_vm15, %v5438_v52, %v13552_v46  ;;  %v11649_v52 = vpop.f32.mrb[152].mxu0  ;;  %v8317_v46 = vld [vmem:[#allocation2 + $0x48] sm:$0xff]  ;;  %v4124_v20 = vsel %vm4093_vm1, %v4122_v9, %v4123_v12 }
 0x304   : > { %8006 = vmatmul.mubr.msk.bf16.gmra.mrb[0].mxu0 %vm701_vm0, %v5448_v5  ;;  %13557 = vst [vmem:[#allocation4_spill] sm:$0xff] %v11649_v52  ;;  %v4171_v5 = vsel %vm4153_vm12, %v8317_v46, 0  ;;  %v7751_v27 = vpop.f32.mrb[153].mxu0  ;;  %vm4154_vm11 = vcmp.ne.s16.totalorder %v4124_v20, 0  ;;  %v4252_v9 = vsel %vm4184_vm5, %v4240_v49, %v4251_v32 }
 0x305   : > { %8009 = vmatprep.mubr.msk.bf16.mxu0 %vm8349_vm9, %v13180_v14  ;;  %v11654_v41 = vpop.f32.mrb[154].mxu0  ;;  %v4254_v39 = vshrl.u32 %v4171_v5, 16  ;;  %v4125_v27 = vor.u32 %v4123_v12, %v13562_v2 }
 0x306   : > { %13558 = vst [vmem:[#allocation62_spill] sm:$0xff] %v11654_v41  ;;  %v11657_v61 = vpop.f32.mrb[84].mxu1  ;;  %v7752_v47 = vpop.f32.mrb[155].mxu0 }
 0x307   : > { %13559 = vst [vmem:[#allocation82_spill] sm:$0xff] %v11657_v61  ;;  %v7611_v48 = vpop.f32.mrb[85].mxu1  ;;  %v4256_v41 = vrot.slane %v4254_v39, 7 }
 0x308   : > { %v11659_v37 = vpop.f32.mrb[86].mxu1  ;;  %v4172_v48 = vsel %vm4154_vm11, %v8318_v34, 0  ;;  %v13569_v34 = vld [vmem:[#allocation31_spill] sm:$0xff] }
 0x309   : > { %13560 = vst [vmem:[#allocation83_spill] sm:$0xff] %v11659_v37  ;;  %v7612_v46 = vpop.f32.mrb[87].mxu1  ;;  %v13564_v37 = vld [vmem:[#allocation70_spill] sm:$0xff]  ;;  %v4262_v39 = vshrl.u32 %v4172_v48, 16 }
 0x30a   : > { %7794 = vmatmul.mubr.msk.bf16.gmra.mrb[188].mxu1 %vm701_vm0, %v4244_v42  ;;  %v13561_v42 = vld [vmem:[#allocation5_spill] sm:$0xff]  ;;  %v13565_v61 = vshll.u32 %v13564_v37, 16  ;;  %v4257_v46 = vshll.u32 %v4171_v5, 16  ;;  %v13570_v5 = vshrl.u32 %v13564_v37, 16 }
 0x30b   : > { %7797 = vmatprep.mubr.msk.bf16.mxu1 %vm8349_vm9, %v13180_v14  ;;  %v11668_v47 = vpop.f32.mrb[156].mxu0 }
 0x30c   : > { %8010 = vmatmul.mubr.msk.bf16.gmra.mrb[4].mxu0 %vm701_vm0, %v13561_v42  ;;  %13563 = vst [vmem:[#allocation5_spill] sm:$0xff] %v11668_v47  ;;  %v4126_v42 = vrot.slane %v13565_v61, 1  ;;  %v7755_v20 = vpop.f32.mrb[157].mxu0  ;;  %v4259_v32 = vor.u32 %v4257_v46, %v4256_v41 }
 0x30d   : > { %8013 = vmatprep.mubr.msk.bf16.mxu0 %vm8349_vm9, %v13180_v14  ;;  %v11675_v52 = vpop.f32.mrb[158].mxu0 }
 0x30e   : > { %13566 = vst [vmem:[#allocation70_spill] sm:$0xff] %v11675_v52  ;;  %v4127_v45 = vsel %vm4093_vm1, %v4125_v27, %v4126_v42  ;;  %v11678_v49 = vpop.f32.mrb[88].mxu1  ;;  %v7756_v12 = vpop.f32.mrb[159].mxu0  ;;  %v4128_v20 = vor.u32 %v4126_v42, %v13570_v5  ;;  %v13571_v27 = vld [vmem:[#allocation29_spill] sm:$0xff]  ;;  %v4260_v46 = vsel %vm4184_vm5, %v4248_v18, %v4259_v32 }
 0x30f   : > { %13567 = vst [vmem:[#allocation84_spill] sm:$0xff] %v11678_v49  ;;  %v7615_v2 = vpop.f32.mrb[89].mxu1  ;;  %vm4155_vm4 = vcmp.ne.s16.totalorder %v4127_v45, 0  ;;  %v13572_v52 = vshll.u32 %v13571_v27, 16  ;;  %v4264_v12 = vrot.slane %v4262_v39, 7 }
 0x311   : > { %v4129_v49 = vrot.slane %v13572_v52, 1 }
 0x312   : > { %7798 = vmatmul.mubr.msk.bf16.gmra.mrb[192].mxu1 %vm701_vm0, %v4252_v9  ;;  %v11680_v9 = vpop.f32.mrb[90].mxu1 }
 0x313   : > { %7801 = vmatprep.mubr.msk.bf16.mxu1 %vm8349_vm9, %v13180_v14  ;;  %13568 = vst [vmem:[#allocation85_spill] sm:$0xff] %v11680_v9  ;;  %v7616_v61 = vpop.f32.mrb[91].mxu1  ;;  %v11691_v2 = vpop.f32.mrb[160].mxu0  ;;  %v8319_v9 = vld [vmem:[#allocation2 + $0x58] sm:$0xff]  ;;  %v4130_v37 = vsel %vm4093_vm1, %v4128_v20, %v4129_v49 }
 0x314   : > { %8014 = vmatmul.mubr.msk.bf16.gmra.mrb[8].mxu0 %vm701_vm0, %v13569_v34  ;;  %13573 = vst [vmem:[#allocation31_spill] sm:$0xff] %v11691_v2  ;;  %v4173_v34 = vsel %vm4155_vm4, %v8319_v9, 0  ;;  %v7759_v45 = vpop.f32.mrb[161].mxu0  ;;  %v4265_v61 = vshll.u32 %v4172_v48, 16  ;;  %v13574_v2 = vld [vmem:[#allocation33_spill] sm:$0xff]  ;;  %vm4156_vm7 = vcmp.ne.s16.totalorder %v4130_v37, 0 }
 0x315   : > { %8017 = vmatprep.mubr.msk.bf16.mxu0 %vm8349_vm9, %v13180_v14  ;;  %v11696_v47 = vpop.f32.mrb[162].mxu0  ;;  %v4270_v18 = vshrl.u32 %v4173_v34, 16  ;;  %v13575_v48 = vshrl.u32 %v13571_v27, 16 }
 0x316   : > { %v2891_v42 = vpop.f32.mrb[92].mxu1  ;;  %v7760_v52 = vpop.f32.mrb[163].mxu0  ;;  %v4267_v5 = vor.u32 %v4265_v61, %v4264_v12  ;;  %v8320_v61 = vld [vmem:[#allocation2 + $0x60] sm:$0xff] }
 0x317   : > { %v7619_v32 = vpop.f32.mrb[93].mxu1  ;;  %v4272_v20 = vrot.slane %v4270_v18, 7  ;;  %v4174_v52 = vsel %vm4156_vm7, %v8320_v61, 0 }
 0x318   : > { %v2893_v39 = vpop.f32.mrb[94].mxu1  ;;  %v4268_v45 = vsel %vm4184_vm5, %v4256_v41, %v4267_v5 }
 0x319   : > { %v7620_v9 = vpop.f32.mrb[95].mxu1 }
 0x31a   : > { %7802 = vmatmul.mubr.msk.bf16.gmra.mrb[196].mxu1 %vm701_vm0, %v4260_v46  ;;  %v4131_v46 = vor.u32 %v4129_v49, %v13575_v48  ;;  %v4278_v48 = vshrl.u32 %v4174_v52, 16 }
 0x31b   : > { %7805 = vmatprep.mubr.msk.bf16.mxu1 %vm8349_vm9, %v13180_v14  ;;  %v4054_v42 = vpop.f32.mrb[164].mxu0 }
 0x31c   : > { %8018 = vmatmul.mubr.msk.bf16.gmra.mrb[12].mxu0 %vm701_vm0, %v13574_v2  ;;  %v7763_v32 = vpop.f32.mrb[165].mxu0  ;;  %v4273_v2 = vshll.u32 %v4173_v34, 16  ;;  %v4133_v39 = vsel %vm4093_vm1, %v4131_v46, %v10959_v6  ;;  %v4280_v34 = vrot.slane %v4278_v48, 7 }
 0x31d   : > { %8021 = vmatprep.mubr.msk.bf16.mxu0 %vm8349_vm9, %v13180_v14  ;;  %v4056_v37 = vpop.f32.mrb[166].mxu0  ;;  %vm4157_vm3 = vcmp.ne.s16.totalorder %v4133_v39, 0 }
 0x31e   : > { %v3155_v9 = vpop.f32.mrb[96].mxu1  ;;  %v7764_v27 = vpop.f32.mrb[167].mxu0  ;;  %v4275_v49 = vor.u32 %v4273_v2, %v4272_v20 }
 0x31f   : > { %v3156_v41 = vadd.f32 %v3155_v9, %v11229_v1  ;;  %v7627_v5 = vpop.f32.mrb[97].mxu1  ;;  %v8321_v1 = vld [vmem:[#allocation2 + $0x68] sm:$0xff] }
 0x320   : > { %v3158_v18 = vpop.f32.mrb[98].mxu1  ;;  %v4276_v6 = vsel %vm4184_vm5, %v4264_v12, %v4275_v49  ;;  %v4175_v32 = vsel %vm4157_vm3, %v8321_v1, 0  ;;  %vm13703_vm3 = vcmask 1043456  }
 0x321   : > { %v3159_v42 = vadd.f32 %v3158_v18, %v11238_v54  ;;  %v7628_v61 = vpop.f32.mrb[99].mxu1  ;;  %v11722_v2 = vadd.f32 %v11257_v17, %v3156_v41  ;;  %v4281_v54 = vshll.u32 %v4174_v52, 16  ;;  %v4286_v49 = vshrl.u32 %v4175_v32, 16  ;;  %v13577_v17 = vld [vmem:[#allocation37_spill] sm:$0xff] }
 0x322   : > { %7806 = vmatmul.mubr.msk.bf16.gmra.mrb[200].mxu1 %vm701_vm0, %v4268_v45  ;;  %v13576_v45 = vld [vmem:[#allocation7_spill] sm:$0xff] }
 0x323   : > { %7809 = vmatprep.mubr.msk.bf16.mxu1 %vm8349_vm9, %v13180_v14  ;;  %v11719_v46 = vpop.f32.mrb[168].mxu0  ;;  %v4283_v12 = vor.u32 %v4281_v54, %v4280_v34  ;;  %v11730_v18 = vadd.f32 %v11275_v15, %v3159_v42  ;;  %v4289_v15 = vshll.u32 %v4175_v32, 16 }
 0x324   : > { %8022 = vmatmul.mubr.msk.bf16.gmra.mrb[16].mxu0 %vm701_vm0, %v13576_v45  ;;  %v7843_v37 = vpop.f32.mrb[169].mxu0 }
 0x325   : > { %8025 = vmatprep.mubr.msk.bf16.mxu0 %vm8349_vm9, %v13180_v14  ;;  %v11726_v39 = vpop.f32.mrb[170].mxu0  ;;  %v4284_v52 = vsel %vm4184_vm5, %v4272_v20, %v4283_v12 }
 0x326   : > { %v3163_v9 = vpop.f32.mrb[100].mxu1  ;;  %v7844_v27 = vpop.f32.mrb[171].mxu0 }
 0x327   : > { %v3164_v48 = vadd.f32 %v3163_v9, %v11286_v11  ;;  %v7631_v5 = vpop.f32.mrb[101].mxu1 }
 0x328   : > { %v3166_v45 = vpop.f32.mrb[102].mxu1 }
 0x329   : > { %v3167_v41 = vadd.f32 %v3166_v45, %v11295_v23  ;;  %v7632_v61 = vpop.f32.mrb[103].mxu1  ;;  %v11746_v23 = vadd.f32 %v11322_v31, %v3164_v48 }
 0x32a   : > { %7810 = vmatmul.mubr.msk.bf16.gmra.mrb[204].mxu1 %vm701_vm0, %v4276_v6  ;;  %v4288_v6 = vrot.slane %v4286_v49, 7 }
 0x32b   : > { %7813 = vmatprep.mubr.msk.bf16.mxu1 %vm8349_vm9, %v13180_v14  ;;  %v11739_v11 = vpop.f32.mrb[172].mxu0  ;;  %v11750_v12 = vadd.f32 %v11330_v40, %v3167_v41  ;;  %v4297_v40 = vshll.u32 %v11015_v29, 16  ;;  %v13578_v41 = vld [vmem:[#allocation57_spill] sm:$0xff] }
 0x32c   : > { %8026 = vmatmul.mubr.msk.bf16.gmra.mrb[20].mxu0 %vm701_vm0, %v13577_v17  ;;  %v7847_v1 = vpop.f32.mrb[173].mxu0  ;;  %v4291_v9 = vor.u32 %v4289_v15, %v4288_v6 }
 0x32d   : > { %8029 = vmatprep.mubr.msk.bf16.mxu0 %vm8349_vm9, %v13180_v14  ;;  %v11743_v42 = vpop.f32.mrb[174].mxu0  ;;  %v4299_v61 = vor.u32 %v4297_v40, %v13578_v41  ;;  %v13584_v41 = vld [vmem:[#allocation11_spill] sm:$0xff] }
 0x32e   : > { %v7848_v54 = vpop.f32.mrb[175].mxu0  ;;  %v4292_v31 = vsel %vm4184_vm5, %v4280_v34, %v4291_v9 }
 0x330   : > { %v3171_v37 = vpop.f32.mrb[104].mxu1 }
 0x331   : > { %v3172_v20 = vadd.f32 %v3171_v37, %v11337_v59  ;;  %v7635_v27 = vpop.f32.mrb[105].mxu1  ;;  %v13579_v37 = vld [vmem:[#allocation39_spill] sm:$0xff] }
 0x332   : > { %7814 = vmatmul.mubr.msk.bf16.gmra.mrb[208].mxu1 %vm701_vm0, %v4284_v52  ;;  %v3174_v49 = vpop.f32.mrb[106].mxu1 }
 0x333   : > { %7817 = vmatprep.mubr.msk.bf16.mxu1 %vm8349_vm9, %v13180_v14  ;;  %v3175_v32 = vadd.f32 %v3174_v49, %v11345_v13  ;;  %v7636_v5 = vpop.f32.mrb[107].mxu1  ;;  %v11759_v48 = vpop.f32.mrb[176].mxu0 }
 0x334   : > { %8030 = vmatmul.mubr.msk.bf16.gmra.mrb[24].mxu0 %vm701_vm0, %v10951_v56  ;;  %v7851_v59 = vpop.f32.mrb[177].mxu0  ;;  %v11767_v56 = vadd.f32 %v11354_v10, %v3172_v20  ;;  %v4300_v10 = vsel %vm4184_vm5, %v4288_v6, %v4299_v61  ;;  %v13585_v61 = vshrl.u32 %v13584_v41, 16 }
 0x335   : > { %8033 = vmatprep.mubr.msk.bf16.mxu0 %vm8349_vm9, %v13180_v14  ;;  %v11764_v45 = vpop.f32.mrb[178].mxu0  ;;  %v11772_v1 = vadd.f32 %v11361_v60, %v3175_v32  ;;  %v13582_v60 = vld [vmem:[#allocation42_spill] sm:$0xff] }
 0x336   : > { %v7852_v17 = vpop.f32.mrb[179].mxu0 }
 0x337   : > { %v13583_v17 = vld [vmem:[#allocation41_spill] sm:$0xff] }
 0x338   : > { %v3179_v13 = vpop.f32.mrb[108].mxu1 }
 0x339   : > { %v3180_v34 = vadd.f32 %v3179_v13, %v11363_v58  ;;  %v7639_v52 = vpop.f32.mrb[109].mxu1  ;;  %v13580_v58 = vld [vmem:[#allocation78_spill] sm:$0xff] }
 0x33a   : > { %7818 = vmatmul.mubr.msk.bf16.gmra.mrb[212].mxu1 %vm701_vm0, %v4292_v31  ;;  %v3182_v15 = vpop.f32.mrb[110].mxu1  ;;  %v13581_v20 = vshrl.u32 %v13580_v58, 16  ;;  %v4871_v52 = vrot.slane %v13585_v61, 7  ;;  %v13591_v61 = vld [vmem:[#allocation44_spill] sm:$0xff] }
 0x33b   : > { %7821 = vmatprep.mubr.msk.bf16.mxu1 %vm8349_vm9, %v13180_v14  ;;  %v3183_v29 = vadd.f32 %v3182_v15, %v11365_v33  ;;  %v7640_v54 = vpop.f32.mrb[111].mxu1  ;;  %v11791_v33 = vadd.f32 %v11373_v51, %v3180_v34  ;;  %v13586_v34 = vld [vmem:[#allocation60_spill] sm:$0xff] }
 0x33c   : > { %8034 = vmatmul.mubr.msk.bf16.gmra.mrb[28].mxu0 %vm701_vm0, %v13579_v37  ;;  %v4143_v27 = vor.u32 %v13582_v60, %v13581_v20 }
 0x33d   : > { %8037 = vmatprep.mubr.msk.bf16.mxu0 %vm8349_vm9, %v13180_v14  ;;  %v11795_v40 = vadd.f32 %v11380_v53, %v3183_v29  ;;  %v13587_v29 = vshll.u32 %v13584_v41, 16 }
 0x33e   : > { %v11781_v9 = vpop.f32.mrb[180].mxu0  ;;  %vm4161_vm6 = vcmp.ne.s16.totalorder %v4143_v27, 0 }
 0x33f   : > { %v7855_v49 = vpop.f32.mrb[181].mxu0  ;;  %v4872_v54 = vor.u32 %v4871_v52, %v13587_v29 }
 0x340   : > { %v11788_v32 = vpop.f32.mrb[182].mxu0  ;;  %v3187_v5 = vpop.f32.mrb[112].mxu1 }
 0x341   : > { %v7856_v31 = vpop.f32.mrb[183].mxu0  ;;  %v3188_v6 = vadd.f32 %v3187_v5, %v11384_v4  ;;  %v7643_v59 = vpop.f32.mrb[113].mxu1  ;;  %v4179_v4 = vsel %vm4161_vm6, %v11463_v38, 0  ;;  %vm4921_vm10 = vcmp.ne.s16.totalorder %v4872_v54, 0  ;;  %vm13708_vm6 = vmmov %vm13703_vm3 }
 0x342   : > { %7822 = vmatmul.mubr.msk.bf16.gmra.mrb[216].mxu1 %vm701_vm0, %v4300_v10  ;;  %v3190_v13 = vpop.f32.mrb[114].mxu1  ;;  %v4318_v38 = vshrl.u32 %v4179_v4, 16 }
 0x343   : > { %7825 = vmatprep.mubr.msk.bf16.mxu1 %vm8349_vm9, %v13180_v14  ;;  %v3191_v15 = vadd.f32 %v3190_v13, %v11387_v26  ;;  %v7644_v51 = vpop.f32.mrb[115].mxu1  ;;  %v13588_v26 = vld [vmem:[#allocation9_spill] sm:$0xff]  ;;  %v11818_v60 = vadd.f32 %v11399_v21, %v3188_v6 }
 0x344   : > { %8038 = vmatmul.mubr.msk.bf16.gmra.mrb[32].mxu0 %vm701_vm0, %v13583_v17  ;;  %v13589_v58 = vshrl.u32 %v13588_v26, 16  ;;  %v13590_v59 = vshll.u32 %v13588_v26, 16  ;;  %v4853_v51 = vld [vmem:[#allocation2 + $0x8] sm:$0xff] }
 0x345   : > { %8041 = vmatprep.mubr.msk.bf16.mxu0 %vm8349_vm9, %v13180_v14  ;;  %v11824_v17 = vadd.f32 %v11405_v50, %v3191_v15  ;;  %v13594_v50 = vld [vmem:[#allocation65_spill] sm:$0xff]  ;;  %v4939_v54 = vsel %vm4921_vm10, %v4853_v51, 0  ;;  %vm13712_vm10 = vmmov %vm13703_vm3 }
 0x346   : > { %v4873_v20 = vrot.slane %v13589_v58, 7 }
 0x347   : > { %v11807_v53 = vpop.f32.mrb[184].mxu0 }
 0x348   : > { %v7859_v37 = vpop.f32.mrb[185].mxu0  ;;  %v4874_v13 = vor.u32 %v4873_v20, %v13590_v59 }
 0x349   : > { %v11813_v10 = vpop.f32.mrb[186].mxu0  ;;  %v13592_v37 = vld [vmem:[#allocation10_spill] sm:$0xff] }
 0x34a   : > { %7826 = vmatmul.mubr.msk.bf16.gmra.mrb[220].mxu1 %vm701_vm0, %v13586_v34  ;;  %v3195_v27 = vpop.f32.mrb[116].mxu1  ;;  %v7860_v49 = vpop.f32.mrb[187].mxu0  ;;  %v4321_v34 = vshll.u32 %v4179_v4, 16  ;;  %v13593_v29 = vshrl.u32 %v13592_v37, 16  ;;  %v4875_v58 = vsel %vm4184_vm5, %v4871_v52, %v4874_v13  ;;  %v13597_v13 = vld [vmem:[#allocation40_spill] sm:$0xff] }
 0x34b   : > { %7829 = vmatprep.mubr.msk.bf16.mxu1 %vm8349_vm9, %v13180_v14  ;;  %v3196_v5 = vadd.f32 %v3195_v27, %v11408_v0  ;;  %v7647_v31 = vpop.f32.mrb[117].mxu1  ;;  %v4320_v0 = vrot.slane %v4318_v38, 7  ;;  %v11840_v27 = vld [vmem:[#allocation2 + $0x8] sm:$0xf0]  ;;  %vm4922_vm2 = vcmp.ne.s16.totalorder %v4875_v58, 0  ;;  %vm13598_vm13 = vcmp.ne.s16.totalorder %v13597_v13, 0 }
 0x34c   : > { %v3198_v41 = vpop.f32.mrb[118].mxu1  ;;  %8042 = vmatmul.mubr.msk.bf16.gmra.mrb[36].mxu0 %vm701_vm0, %v13591_v61  ;;  %v11833_v26 = vrot.slane %v13593_v29, 7  ;;  %13595 = vst [vmem:[#allocation29_spill] sm:$0xff] %v11840_v27  ;;  %v13596_v61 = vshll.u32 %v13592_v37, 16  ;;  %v6131_v51 = vsel %vm13598_vm13, %v11840_v27, 0  ;;  %v8322_v37 = vld [vmem:[#allocation2 + $0x10] sm:$0xff] }
 0x34d   : > { %v3199_v21 = vadd.f32 %v3198_v41, %v11410_v57  ;;  %v7648_v6 = vpop.f32.mrb[119].mxu1  ;;  %8045 = vmatprep.mubr.msk.bf16.mxu0 %vm8349_vm9, %v13180_v14  ;;  %v11847_v4 = vadd.f32 %v11420_v24, %v3196_v5  ;;  %v4323_v49 = vor.u32 %v4321_v34, %v4320_v0  ;;  %v4964_v41 = vshll.u32 %v4939_v54, 16  ;;  %v13599_v5 = vld [vmem:[#allocation49_spill] sm:$0xff]  ;;  %v13602_v13 = vld [vmem:[#allocation12_spill] sm:$0xff] }
 0x34e   : > { %v4877_v52 = vor.u32 %v11833_v26, %v13596_v61  ;;  %v4940_v58 = vsel %vm4922_vm2, %v8322_v37, 0  ;;  %vm13717_vm2 = vmmov %vm13703_vm3 }
 0x34f   : > { %v11837_v15 = vpop.f32.mrb[188].mxu0  ;;  %vm13722_vm13 = vmmov %vm13717_vm2 }
 0x350   : > { %v7863_v57 = vpop.f32.mrb[189].mxu0 }
 0x351   : > { %v11844_v38 = vpop.f32.mrb[190].mxu0  ;;  %v6154_v57 = vshrl.u32 %v6131_v51, 16 }
 0x352   : > { %7830 = vmatmul.mubr.msk.bf16.gmra.mrb[224].mxu1 %vm701_vm0, %v13594_v50  ;;  %v7864_v59 = vpop.f32.mrb[191].mxu0  ;;  %v11857_v50 = vadd.f32 %v11427_v28, %v3199_v21  ;;  %v4878_v28 = vsel %vm4184_vm5, %v4873_v20, %v4877_v52  ;;  %v6157_v21 = vshll.u32 %v6131_v51, 16 }
 0x353   : > { %7833 = vmatprep.mubr.msk.bf16.mxu1 %vm8349_vm9, %v13180_v14  ;;  %v13600_v59 = vld [vmem:[#allocation59_spill] sm:$0xff]  ;;  %vm4923_vm14 = vcmp.ne.s16.totalorder %v4878_v28, 0 }
 0x354   : > { %8046 = vmatmul.mubr.msk.bf16.gmra.mrb[40].mxu0 %vm701_vm0, %v13599_v5  ;;  %v4962_v5 = vshrl.u32 %v4939_v54, 16 }
 0x355   : > { %v3203_v31 = vpop.f32.mrb[120].mxu1  ;;  %8049 = vmatprep.mubr.msk.bf16.mxu0 %vm8349_vm9, %v13180_v14 }
 0x356   : > { %v3204_v6 = vadd.f32 %v3203_v31, %v11430_v44  ;;  %v7651_v29 = vpop.f32.mrb[121].mxu1  ;;  %v4324_v44 = vsel %vm4184_vm5, %v13600_v59, %v4323_v49  ;;  %v4966_v31 = vrot.slane %v4964_v41, 1  ;;  %v6156_v49 = vrot.slane %v6154_v57, 4  ;;  %v11893_v57 = vld [vmem:[#allocation2 + $0x18] sm:$0xff] }
 0x357   : > { %v3206_v24 = vpop.f32.mrb[122].mxu1  ;;  %v11868_v61 = vpop.f32.mrb[192].mxu0  ;;  %v6159_v59 = vrot.slane %v6157_v21, 5  ;;  %13606 = vst [vmem:[#allocation37_spill] sm:$0xff] %v11893_v57 }
 0x358   : > { %v3207_v0 = vadd.f32 %v3206_v24, %v11434_v3  ;;  %v7652_v34 = vpop.f32.mrb[123].mxu1  ;;  %13601 = vst [vmem:[#allocation33_spill] sm:$0xff] %v11868_v61  ;;  %v13603_v3 = vshrl.u32 %v13602_v13, 16  ;;  %v7867_v24 = vpop.f32.mrb[193].mxu0  ;;  %v11879_v20 = vadd.f32 %v11449_v22, %v3204_v6  ;;  %v4967_v51 = vor.u32 %v4966_v31, %v4962_v5  ;;  %v8293_v6 = vld [vmem:[%s12796_s3 + $0x70] sm:$0xff]   ;;  %v13607_v31 = vld [vmem:[#allocation48_spill] sm:$0xff] }
 0x359   : > { %v4969_v34 = vshll.u32 %v4940_v58, 16  ;;  %v11876_v37 = vpop.f32.mrb[194].mxu0  ;;  %v13605_v24 = vshll.u32 %v13602_v13, 16  ;;  %v6160_v28 = vor.u32 %v6159_v59, %v6156_v49  ;;  %v8295_v49 = vld [vmem:[%s12796_s3 + $0x78] sm:$0xff]  }
 0x35a   : > { %7834 = vmatmul.mubr.msk.bf16.gmra.mrb[228].mxu1 %vm701_vm0, %v4324_v44  ;;  %v11872_v29 = vrot.slane %v13603_v3, 7  ;;  %13604 = vst [vmem:[#allocation7_spill] sm:$0xff] %v11876_v37  ;;  %v7868_v52 = vpop.f32.mrb[195].mxu0  ;;  %v11886_v54 = vadd.f32 %v11456_v8, %v3207_v0  ;;  %v13608_v8 = vld [vmem:[#allocation15_spill] sm:$0xff] }
 0x35b   : > { %7913 = vmatprep.mubr.msk.bf16.mxu1 %vm8349_vm9, %v13180_v14  ;;  %v4971_v22 = vrot.slane %v4969_v34, 1  ;;  %v13609_v0 = vshrl.u32 %v13608_v8, 16  ;;  %v13610_v34 = vld [vmem:[#allocation76_spill] sm:$0xff]  ;;  %v13613_v59 = vshll.u32 %v13608_v8, 16 }
 0x35c   : > { %v4880_v27 = vor.u32 %v11872_v29, %v13605_v24  ;;  %8050 = vmatmul.mubr.msk.bf16.gmra.mrb[44].mxu0 %vm701_vm0, %v11514_v25  ;;  %v4870_v25 = vld [vmem:[#allocation2 + $0x90] sm:$0x1]  ;;  %vm4938_vm15 = vcmp.ne.s16.totalorder %v13610_v34, 0  ;;  %v4973_v34 = vshrl.u32 %v4940_v58, 16 }
 0x35d   : > { %v3211_v41 = vpop.f32.mrb[124].mxu1  ;;  %8129 = vmatprep.mubr.msk.bf16.mxu0 %vm8349_vm9, %v13180_v14  ;;  %v11902_v5 = vrot.slane %v13609_v0, 7  ;;  %v4956_v24 = vsel %vm4938_vm15, %v4870_v25, 0  ;;  %vm13730_vm15 = vmmov %vm13717_vm2 }
 0x35e   : > { %v3212_v44 = vadd.f32 %v3211_v41, %v11460_v63  ;;  %v7655_v3 = vpop.f32.mrb[125].mxu1  ;;  %v4941_v63 = vsel %vm4923_vm14, %v11893_v57, 0  ;;  %v13611_v41 = vld [vmem:[#allocation75_spill] sm:$0xff]  ;;  %v5097_v0 = vshll.u32 %v4956_v24, 16  ;;  %v4975_v58 = vor.u32 %v4973_v34, %v4971_v22  ;;  %v13614_v24 = vld [vmem:[#allocation56_spill] sm:$0xff]  ;;  %vm13725_vm14 = vmmov %vm13717_vm2 }
 0x35f   : > { %v3214_v37 = vpop.f32.mrb[126].mxu1  ;;  %v5093_v52 = vshrl.u32 %v13611_v41, 16  ;;  %v4972_v3 = vsel %vm4093_vm1, %v4967_v51, %v4971_v22  ;;  %v11907_v57 = vpop.f32.mrb[196].mxu0  ;;  %v4977_v41 = vshll.u32 %v4941_v63, 16  ;;  %v13618_v34 = vld [vmem:[#allocation19_spill] sm:$0xff] }
 0x360   : > { %v3215_v21 = vadd.f32 %v3214_v37, %v13607_v31  ;;  %v7656_v13 = vpop.f32.mrb[127].mxu1  ;;  %v4881_v37 = vsel %vm4184_vm5, %v11833_v26, %v4880_v27  ;;  %v13612_v31 = vld [vmem:[#allocation74_spill] sm:$0xff]  ;;  %v7871_v61 = vpop.f32.mrb[197].mxu0  ;;  %v4883_v26 = vor.u32 %v11902_v5, %v13613_v59  ;;  %v5099_v27 = vrot.slane %v5097_v0, 1 }
 0x361   : > { %v5095_v13 = vor.u32 %v5093_v52, %v13612_v31  ;;  %v11918_v51 = vpop.f32.mrb[198].mxu0  ;;  %v11925_v61 = vadd.f32 %v11485_v43, %v3212_v44  ;;  %vm4924_vm12 = vcmp.ne.s16.totalorder %v4881_v37, 0  ;;  %v6169_v31 = vsel %vm2414_vm8, %v6160_v28, %v13614_v24  ;;  %v13615_v44 = vld [vmem:[#allocation36_spill] sm:$0xff] }
 0x362   : > { %7914 = vmatmul.mubr.msk.bf16.vlgmr.msra.gmra.mrb[232].mxu1 %vm701_vm0, %v4972_v3  ;;  %v7872_v25 = vpop.f32.mrb[199].mxu0  ;;  %v11934_v59 = vadd.f32 %v11493_v55, %v3215_v21  ;;  %v4979_v43 = vrot.slane %v4977_v41, 1  ;;  %v13619_v41 = vshrl.u32 %v13618_v34, 16  ;;  %v13621_v24 = vld [vmem:[#allocation68_spill] sm:$0xff] }
 0x363   : > { %8054 = vmatpush3.bf16.msra.mxu1 %v8293_v6  ;;  %7917 = vmatprep.mubr.msk.bf16.mxu1 %vm8349_vm9, %v13180_v14  ;;  %v11931_v8 = vsel %vm4093_vm1, %v5095_v13, %v5099_v27  ;;  %v4884_v13 = vsel %vm4184_vm5, %v11872_v29, %v4883_v26 }
 0x364   : > { %8055 = vmatprep.subr.bf16.mxu1 %v13180_v14  ;;  %8130 = vmatmul.mubr.msk.bf16.vlgmr.msra.gmra.mrb[48].mxu0 %vm701_vm0, %v6169_v31  ;;  %v4980_v55 = vsel %vm4093_vm1, %v4975_v58, %v4979_v43  ;;  %vm4925_vm11 = vcmp.ne.s16.totalorder %v4884_v13, 0 }
 0x365   : > { %v3219_v6 = vpop.f32.mrb[128].mxu1  ;;  %8133 = vmatprep.mubr.msk.bf16.mxu0 %vm8349_vm9, %v13180_v14 }
 0x366   : > { %v3220_v52 = vadd.f32 %v3219_v6, %v11498_v19  ;;  %v7659_v3 = vpop.f32.mrb[129].mxu1  ;;  %v11940_v19 = vld [vmem:[#allocation2 + $0x20] sm:$0xff]  ;;  %v4981_v6 = vshrl.u32 %v4941_v63, 16 }
 0x367   : > { %v3222_v0 = vpop.f32.mrb[130].mxu1  ;;  %8056 = vmatpush3.bf16.msra.mxu1 %v8295_v49  ;;  %13616 = vst [vmem:[#allocation57_spill] sm:$0xff] %v11940_v19  ;;  %v4942_v28 = vsel %vm4924_vm12, %v11940_v19, 0  ;;  %v11946_v21 = vpop.f32.mrb[200].mxu0  ;;  %v4885_v49 = vrot.slane %v13619_v41, 7  ;;  %v13623_v41 = vshll.u32 %v13618_v34, 16  ;;  %vm13733_vm12 = vmmov %vm13717_vm2 }
 0x368   : > { %v3223_v22 = vadd.f32 %v3222_v0, %v13615_v44  ;;  %v7660_v37 = vpop.f32.mrb[131].mxu1  ;;  %13617 = vst [vmem:[#allocation39_spill] sm:$0xff] %v11946_v21  ;;  %v7875_v27 = vpop.f32.mrb[201].mxu0  ;;  %v4985_v25 = vshll.u32 %v4942_v28, 16  ;;  %v11956_v29 = vadd.f32 %v13621_v24, %v3220_v52  ;;  %v4983_v31 = vor.u32 %v4981_v6, %v4979_v43  ;;  %v13626_v19 = vld [vmem:[#allocation64_spill] sm:$0xff]  ;;  %v13627_v24 = vld [vmem:[#allocation66_spill] sm:$0xff] }
 0x369   : > { %v11953_v3 = vpop.f32.mrb[202].mxu0  ;;  %v11959_v37 = vld [vmem:[#allocation2 + $0x28] sm:$0xff]  ;;  %v4886_v63 = vor.u32 %v4885_v49, %v13623_v41  ;;  %v13624_v27 = vld [vmem:[#allocation63_spill] sm:$0xff] }
 0x36a   : > { %7918 = vmatmul.mubr.msk.bf16.gmra.mrb[236].mxu1 %vm701_vm0, %v4980_v55  ;;  %13620 = vst [vmem:[#allocation78_spill] sm:$0xff] %v11953_v3  ;;  %v7876_v58 = vpop.f32.mrb[203].mxu0  ;;  %13622 = vst [vmem:[#allocation42_spill] sm:$0xff] %v11959_v37  ;;  %v4943_v55 = vsel %vm4925_vm11, %v11959_v37, 0  ;;  %v11965_v13 = vadd.f32 %v13624_v27, %v3223_v22  ;;  %v4987_v52 = vrot.slane %v4985_v25, 1  ;;  %v13630_v25 = vld [vmem:[#allocation46_spill] sm:$0xff] }
 0x36b   : > { %7921 = vmatprep.mubr.msk.bf16.mxu1 %vm8349_vm9, %v13180_v14  ;;  %v4887_v22 = vsel %vm4184_vm5, %v11902_v5, %v4886_v63  ;;  %v13633_v27 = vld [vmem:[#allocation71_spill] sm:$0xff]  ;;  %v4989_v37 = vshrl.u32 %v4942_v28, 16  ;;  %vm13735_vm11 = vmmov %vm13717_vm2 }
 0x36c   : > { %13625 = vst [vmem:[#allocation41_spill] sm:$0xff] %v11965_v13  ;;  %8134 = vmatmul.mubr.msk.bf16.gmra.mrb[52].mxu0 %vm701_vm0, %v13626_v19  ;;  %vm4926_vm4 = vcmp.ne.s16.totalorder %v4887_v22, 0 }
 0x36d   : > { %v3227_v26 = vpop.f32.mrb[132].mxu1  ;;  %8137 = vmatprep.mubr.msk.bf16.mxu0 %vm8349_vm9, %v13180_v14  ;;  %v4944_v28 = vsel %vm4926_vm4, %v11566_v62, 0  ;;  %vm13736_vm4 = vmmov %vm13717_vm2 }
 0x36e   : > { %v3228_v0 = vadd.f32 %v3227_v26, %v11537_v7  ;;  %v7663_v44 = vpop.f32.mrb[133].mxu1  ;;  %v4988_v7 = vsel %vm4093_vm1, %v4983_v31, %v4987_v52  ;;  %v4993_v26 = vshll.u32 %v4943_v55, 16 }
 0x36f   : > { %v3230_v3 = vpop.f32.mrb[134].mxu1  ;;  %v11973_v58 = vpop.f32.mrb[204].mxu0  ;;  %v13632_v44 = vld [vmem:[#allocation32_spill] sm:$0xff] }
 0x370   : > { %v3231_v43 = vadd.f32 %v3230_v3, %v13627_v24  ;;  %v7664_v6 = vpop.f32.mrb[135].mxu1  ;;  %13628 = vst [vmem:[#allocation11_spill] sm:$0xff] %v11973_v58  ;;  %v7879_v34 = vpop.f32.mrb[205].mxu0  ;;  %v13631_v3 = vshll.u32 %v13630_v25, 16  ;;  %v11986_v31 = vadd.f32 %v13633_v27, %v3228_v0  ;;  %v13634_v58 = vld [vmem:[#allocation18_spill] sm:$0xff]  ;;  %v4991_v25 = vor.u32 %v4989_v37, %v4987_v52 }
 0x371   : > { %v11980_v19 = vpop.f32.mrb[206].mxu0  ;;  %v13635_v34 = vld [vmem:[#allocation16_spill] sm:$0xff]  ;;  %v4997_v37 = vshrl.u32 %v4943_v55, 16 }
 0x372   : > { %7922 = vmatmul.mubr.msk.bf16.gmra.mrb[240].mxu1 %vm701_vm0, %v4988_v7  ;;  %13629 = vst [vmem:[#allocation60_spill] sm:$0xff] %v11980_v19  ;;  %v4889_v41 = vor.u32 %v13632_v44, %v13631_v3  ;;  %v7880_v6 = vpop.f32.mrb[207].mxu0  ;;  %v4995_v7 = vrot.slane %v4993_v26, 1  ;;  %v11990_v21 = vadd.f32 %v13635_v34, %v3231_v43  ;;  %v13636_v19 = vld [vmem:[#allocation17_spill] sm:$0xff]  ;;  %v13637_v3 = vld [vmem:[#allocation6_spill] sm:$0xff]  ;;  %v13639_v34 = vld [vmem:[#allocation20_spill] sm:$0xff] }
 0x373   : > { %7925 = vmatprep.mubr.msk.bf16.mxu1 %vm8349_vm9, %v13180_v14  ;;  %v13640_v55 = vld [vmem:[#allocation24_spill] sm:$0xff] }
 0x374   : > { %8138 = vmatmul.mubr.msk.bf16.gmra.mrb[56].mxu0 %vm701_vm0, %v13636_v19  ;;  %v4890_v26 = vsel %vm4184_vm5, %v4885_v49, %v4889_v41  ;;  %v13638_v19 = vld [vmem:[#allocation8_spill] sm:$0xff]  ;;  %v4999_v41 = vor.u32 %v4997_v37, %v4995_v7 }
 0x375   : > { %v3235_v24 = vpop.f32.mrb[136].mxu1  ;;  %8141 = vmatprep.mubr.msk.bf16.mxu0 %vm8349_vm9, %v13180_v14  ;;  %vm4927_vm7 = vcmp.ne.s16.totalorder %v4890_v26, 0 }
 0x376   : > { %v3236_v5 = vadd.f32 %v3235_v24, %v13634_v58  ;;  %v7667_v63 = vpop.f32.mrb[137].mxu1  ;;  %v4996_v58 = vsel %vm4093_vm1, %v4991_v25, %v4995_v7 }
 0x377   : > { %v3238_v13 = vpop.f32.mrb[138].mxu1  ;;  %v12000_v22 = vpop.f32.mrb[208].mxu0  ;;  %v4945_v63 = vsel %vm4927_vm7, %v11606_v36, 0  ;;  %vm13737_vm7 = vmmov %vm13717_vm2 }
 0x378   : > { %v3239_v44 = vadd.f32 %v3238_v13, %v13637_v3  ;;  %v7668_v0 = vpop.f32.mrb[139].mxu1  ;;  %v7883_v43 = vpop.f32.mrb[209].mxu0  ;;  %v5001_v13 = vshll.u32 %v4944_v28, 16  ;;  %v12008_v27 = vadd.f32 %v13638_v19, %v3236_v5  ;;  %v5005_v19 = vshrl.u32 %v4944_v28, 16 }
 0x379   : > { %v12005_v52 = vpop.f32.mrb[210].mxu0  ;;  %v13643_v43 = vld [vmem:[#allocation38_spill] sm:$0xff] }
 0x37a   : > { %7926 = vmatmul.mubr.msk.bf16.gmra.mrb[244].mxu1 %vm701_vm0, %v4996_v58  ;;  %v7884_v49 = vpop.f32.mrb[211].mxu0  ;;  %v12013_v25 = vadd.f32 %v13639_v34, %v3239_v44  ;;  %v5003_v0 = vrot.slane %v5001_v13, 1  ;;  %v13645_v34 = vld [vmem:[#allocation22_spill] sm:$0xff] }
 0x37b   : > { %7929 = vmatprep.mubr.msk.bf16.mxu1 %vm8349_vm9, %v13180_v14  ;;  %v13644_v49 = vld [vmem:[#allocation47_spill] sm:$0xff] }
 0x37c   : > { %8142 = vmatmul.mubr.msk.bf16.gmra.mrb[60].mxu0 %vm701_vm0, %v13640_v55  ;;  %v5004_v7 = vsel %vm4093_vm1, %v4999_v41, %v5003_v0 }
 0x37d   : > { %v3243_v62 = vpop.f32.mrb[140].mxu1  ;;  %8145 = vmatprep.mubr.msk.bf16.mxu0 %vm8349_vm9, %v13180_v14 }
 0x37e   : > { %v3244_v24 = vadd.f32 %v3243_v62, %v11590_v16  ;;  %v7671_v6 = vpop.f32.mrb[141].mxu1  ;;  %v5009_v16 = vshll.u32 %v4945_v63, 16 }
 0x37f   : > { %v3246_v3 = vpop.f32.mrb[142].mxu1  ;;  %v12021_v58 = vpop.f32.mrb[212].mxu0 }
 0x380   : > { %v3247_v26 = vadd.f32 %v3246_v3, %v11593_v35  ;;  %v7672_v5 = vpop.f32.mrb[143].mxu1  ;;  %13641 = vst [vmem:[#allocation9_spill] sm:$0xff] %v12021_v58  ;;  %v7887_v36 = vpop.f32.mrb[213].mxu0  ;;  %v12029_v37 = vadd.f32 %v13643_v43, %v3244_v24  ;;  %v5011_v62 = vrot.slane %v5009_v16, 1  ;;  %v5013_v16 = vshrl.u32 %v4945_v63, 16  ;;  %v13651_v63 = vld [vmem:[#allocation14_spill] sm:$0xff] }
 0x381   : > { %v12026_v44 = vpop.f32.mrb[214].mxu0  ;;  %v13646_v5 = vld [vmem:[#allocation25_spill] sm:$0xff]  ;;  %v13647_v36 = vld [vmem:[#allocation23_spill] sm:$0xff] }
 0x382   : > { %7930 = vmatmul.mubr.msk.bf16.gmra.mrb[248].mxu1 %vm701_vm0, %v5004_v7  ;;  %13642 = vst [vmem:[#allocation44_spill] sm:$0xff] %v12026_v44  ;;  %v7888_v13 = vpop.f32.mrb[215].mxu0  ;;  %v12033_v3 = vadd.f32 %v13645_v34, %v3247_v26  ;;  %v5007_v7 = vor.u32 %v5005_v19, %v5003_v0  ;;  %v13648_v0 = vld [vmem:[#allocation55_spill] sm:$0xff] }
 0x383   : > { %7933 = vmatprep.mubr.msk.bf16.mxu1 %vm8349_vm9, %v13180_v14 }
 0x384   : > { %8146 = vmatmul.mubr.msk.bf16.gmra.mrb[64].mxu0 %vm701_vm0, %v13646_v5  ;;  %v5012_v28 = vsel %vm4093_vm1, %v5007_v7, %v5011_v62 }
 0x385   : > { %v3251_v35 = vpop.f32.mrb[144].mxu1  ;;  %8149 = vmatprep.mubr.msk.bf16.mxu0 %vm8349_vm9, %v13180_v14 }
 0x386   : > { %v3252_v41 = vadd.f32 %v3251_v35, %v13644_v49  ;;  %v7675_v6 = vpop.f32.mrb[145].mxu1  ;;  %v13649_v49 = vld [vmem:[#allocation81_spill] sm:$0xff] }
 0x387   : > { %v3254_v55 = vpop.f32.mrb[146].mxu1  ;;  %v12041_v24 = vpop.f32.mrb[216].mxu0 }
 0x388   : > { %v3255_v44 = vadd.f32 %v3254_v55, %v13647_v36  ;;  %v7676_v58 = vpop.f32.mrb[147].mxu1  ;;  %v7891_v26 = vpop.f32.mrb[217].mxu0  ;;  %v12049_v35 = vadd.f32 %v13648_v0, %v3252_v41  ;;  %v13650_v55 = vld [vmem:[#allocation51_spill] sm:$0xff]  ;;  %v13655_v0 = vld [vmem:[#allocation4_spill] sm:$0xff] }
 0x389   : > { %v12046_v43 = vpop.f32.mrb[218].mxu0  ;;  %v5015_v58 = vor.u32 %v5013_v16, %v5011_v62  ;;  %v13652_v41 = vld [vmem:[#allocation35_spill] sm:$0xff] }
 0x38a   : > { %7934 = vmatmul.mubr.msk.bf16.gmra.mrb[252].mxu1 %vm701_vm0, %v5012_v28  ;;  %v7892_v19 = vpop.f32.mrb[219].mxu0  ;;  %v12053_v5 = vadd.f32 %v13650_v55, %v3255_v44 }
 0x38b   : > { %7937 = vmatprep.mubr.msk.bf16.mxu1 %vm8349_vm9, %v13180_v14  ;;  %v5020_v62 = vsel %vm4093_vm1, %v5015_v58, %v13652_v41  ;;  %v13660_v41 = vld [vmem:[#allocation83_spill] sm:$0xff] }
 0x38c   : > { %8150 = vmatmul.mubr.msk.bf16.gmra.mrb[68].mxu0 %vm701_vm0, %v13651_v63 }
 0x38d   : > { %v3259_v13 = vpop.f32.mrb[148].mxu1  ;;  %8153 = vmatprep.mubr.msk.bf16.mxu0 %vm8349_vm9, %v13180_v14 }
 0x38e   : > { %v3260_v6 = vadd.f32 %v3259_v13, %v13649_v49  ;;  %v7679_v34 = vpop.f32.mrb[149].mxu1  ;;  %v13656_v49 = vld [vmem:[#allocation82_spill] sm:$0xff] }
 0x38f   : > { %v3262_v7 = vpop.f32.mrb[150].mxu1  ;;  %v12062_v16 = vpop.f32.mrb[220].mxu0 }
 0x390   : > { %v3263_v36 = vadd.f32 %v3262_v7, %v11639_v30  ;;  %v7680_v28 = vpop.f32.mrb[151].mxu1  ;;  %13653 = vst [vmem:[#allocation10_spill] sm:$0xff] %v12062_v16  ;;  %v7895_v26 = vpop.f32.mrb[221].mxu0  ;;  %v12070_v13 = vadd.f32 %v13655_v0, %v3260_v6  ;;  %v13657_v7 = vld [vmem:[#allocation62_spill] sm:$0xff]  ;;  %v13662_v0 = vld [vmem:[#allocation52_spill] sm:$0xff] }
 0x391   : > { %v12067_v44 = vpop.f32.mrb[222].mxu0  ;;  %v13659_v28 = vld [vmem:[#allocation79_spill] sm:$0xff]  ;;  %v13666_v16 = vld [vmem:[#allocation30_spill] sm:$0xff] }
 0x392   : > { %7938 = vmatmul.mubr.msk.bf16.gmra.mrb[0].mxu1 %vm701_vm0, %v5020_v62  ;;  %13654 = vst [vmem:[#allocation65_spill] sm:$0xff] %v12067_v44  ;;  %v7896_v19 = vpop.f32.mrb[223].mxu0  ;;  %v12074_v58 = vadd.f32 %v13657_v7, %v3263_v36 }
 0x393   : > { %7941 = vmatprep.mubr.msk.bf16.mxu1 %vm8349_vm9, %v13180_v14  ;;  %v13663_v19 = vld [vmem:[#allocation5_spill] sm:$0xff] }
 0x394   : > { %13658 = vst [vmem:[#allocation40_spill] sm:$0xff] %v12074_v58  ;;  %8154 = vmatmul.mubr.msk.bf16.gmra.mrb[72].mxu0 %vm701_vm0, %v13659_v28 }
 0x395   : > { %v3267_v30 = vpop.f32.mrb[152].mxu1  ;;  %8157 = vmatprep.mubr.msk.bf16.mxu0 %vm8349_vm9, %v13180_v14 }
 0x396   : > { %v3268_v34 = vadd.f32 %v3267_v30, %v13656_v49  ;;  %v7683_v55 = vpop.f32.mrb[153].mxu1 }
 0x397   : > { %v3270_v63 = vpop.f32.mrb[154].mxu1  ;;  %v12081_v6 = vpop.f32.mrb[224].mxu0 }
 0x398   : > { %v3271_v62 = vadd.f32 %v3270_v63, %v13660_v41  ;;  %v7684_v26 = vpop.f32.mrb[155].mxu1  ;;  %13661 = vst [vmem:[#allocation49_spill] sm:$0xff] %v12081_v6  ;;  %v7899_v30 = vpop.f32.mrb[225].mxu0  ;;  %v12090_v49 = vadd.f32 %v13663_v19, %v3268_v34  ;;  %v13664_v63 = vld [vmem:[#allocation84_spill] sm:$0xff]  ;;  %v13668_v19 = vld [vmem:[#allocation43_spill] sm:$0xff] }
 0x399   : > { %v12087_v36 = vpop.f32.mrb[226].mxu0  ;;  %v13665_v26 = vld [vmem:[#allocation70_spill] sm:$0xff] }
 0x39a   : > { %7942 = vmatmul.mubr.msk.bf16.gmra.mrb[4].mxu1 %vm701_vm0, %v13662_v0  ;;  %v7900_v7 = vpop.f32.mrb[227].mxu0  ;;  %v12094_v44 = vadd.f32 %v13665_v26, %v3271_v62  ;;  %v13667_v0 = vld [vmem:[#allocation85_spill] sm:$0xff] }
 0x39b   : > { %7945 = vmatprep.mubr.msk.bf16.mxu1 %vm8349_vm9, %v13180_v14  ;;  %v13670_v7 = vld [vmem:[#allocation31_spill] sm:$0xff] }
 0x39c   : > { %8158 = vmatmul.mubr.msk.bf16.gmra.mrb[76].mxu0 %vm701_vm0, %v13666_v16 }
 0x39d   : > { %v3275_v55 = vpop.f32.mrb[156].mxu1  ;;  %8161 = vmatprep.mubr.msk.bf16.mxu0 %vm8349_vm9, %v13180_v14 }
 0x39e   : > { %v3276_v28 = vadd.f32 %v3275_v55, %v13664_v63  ;;  %v7687_v41 = vpop.f32.mrb[157].mxu1 }
 0x39f   : > { %v3278_v6 = vpop.f32.mrb[158].mxu1  ;;  %v12101_v34 = vpop.f32.mrb[228].mxu0 }
 0x3a0   : > { %v3279_v30 = vadd.f32 %v3278_v6, %v13667_v0  ;;  %v7688_v58 = vpop.f32.mrb[159].mxu1  ;;  %v7903_v55 = vpop.f32.mrb[229].mxu0  ;;  %v12110_v63 = vadd.f32 %v13670_v7, %v3276_v28  ;;  %v13671_v0 = vld [vmem:[#allocation13_spill] sm:$0xff] }
 0x3a1   : > { %v12107_v62 = vpop.f32.mrb[230].mxu0  ;;  %v13672_v55 = vld [vmem:[#allocation50_spill] sm:$0xff] }
 0x3a2   : > { %7946 = vmatmul.mubr.msk.bf16.gmra.mrb[8].mxu1 %vm701_vm0, %v13668_v19  ;;  %13669 = vst [vmem:[#allocation59_spill] sm:$0xff] %v12107_v62  ;;  %v7904_v6 = vpop.f32.mrb[231].mxu0  ;;  %v12113_v41 = vadd.f32 %v11696_v47, %v3279_v30 }
 0x3a3   : > { %7949 = vmatprep.mubr.msk.bf16.mxu1 %vm8349_vm9, %v13180_v14 }
 0x3a4   : > { %8162 = vmatmul.mubr.msk.bf16.gmra.mrb[80].mxu0 %vm701_vm0, %v13671_v0 }
 0x3a5   : > { %v3283_v16 = vpop.f32.mrb[160].mxu1  ;;  %8165 = vmatprep.mubr.msk.bf16.mxu0 %vm8349_vm9, %v13180_v14 }
 0x3a6   : > { %v7691_v58 = vpop.f32.mrb[161].mxu1 }
 0x3a7   : > { %v3285_v26 = vpop.f32.mrb[162].mxu1  ;;  %v4816_v62 = vpop.f32.mrb[232].mxu0 }
 0x3a8   : > { %v7692_v19 = vpop.f32.mrb[163].mxu1  ;;  %v7907_v28 = vpop.f32.mrb[233].mxu0  ;;  %v13673_v26 = vld [vmem:[#allocation45_spill] sm:$0xff] }
 0x3a9   : > { %v4818_v7 = vpop.f32.mrb[234].mxu0  ;;  %v13674_v62 = vld [vmem:[#allocation53_spill] sm:$0xff] }
 0x3aa   : > { %7950 = vmatmul.mubr.msk.bf16.gmra.mrb[12].mxu1 %vm701_vm0, %v13672_v55  ;;  %v7908_v47 = vpop.f32.mrb[235].mxu0 }
 0x3ab   : > { %7953 = vmatprep.mubr.msk.bf16.mxu1 %vm8349_vm9, %v13180_v14 }
 0x3ac   : > { %8166 = vmatmul.mubr.msk.bf16.gmra.mrb[84].mxu0 %vm701_vm0, %v13673_v26 }
 0x3ad   : > { %v4422_v16 = vpop.f32.mrb[164].mxu1  ;;  %8169 = vmatprep.mubr.msk.bf16.mxu0 %vm8349_vm9, %v13180_v14 }
 0x3ae   : > { %v4555_v30 = vadd.f32 %v4422_v16, %v11722_v2  ;;  %v7771_v6 = vpop.f32.mrb[165].mxu1 }
 0x3af   : > { %v4425_v58 = vpop.f32.mrb[166].mxu1  ;;  %v12131_v55 = vpop.f32.mrb[236].mxu0 }
 0x3b0   : > { %v4556_v0 = vadd.f32 %v4425_v58, %v11730_v18  ;;  %v7772_v19 = vpop.f32.mrb[167].mxu1  ;;  %v12134_v28 = vadd.f32 %v11719_v46, %v4555_v30  ;;  %v7987_v2 = vpop.f32.mrb[237].mxu0 }
 0x3b1   : > { %v12138_v7 = vpop.f32.mrb[238].mxu0  ;;  %v13675_v19 = vld [vmem:[#allocation27_spill] sm:$0xff] }
 0x3b2   : > { %7954 = vmatmul.mubr.msk.bf16.gmra.mrb[16].mxu1 %vm701_vm0, %v13674_v62  ;;  %v7988_v18 = vpop.f32.mrb[239].mxu0  ;;  %v12142_v58 = vadd.f32 %v11726_v39, %v4556_v0  ;;  %v13676_v62 = vld [vmem:[#allocation58_spill] sm:$0xff] }
 0x3b3   : > { %7957 = vmatprep.mubr.msk.bf16.mxu1 %vm8349_vm9, %v13180_v14 }
 0x3b4   : > { %8170 = vmatmul.mubr.msk.bf16.gmra.mrb[88].mxu0 %vm701_vm0, %v13675_v19 }
 0x3b5   : > { %v4430_v16 = vpop.f32.mrb[168].mxu1  ;;  %8173 = vmatprep.mubr.msk.bf16.mxu0 %vm8349_vm9, %v13180_v14 }
 0x3b6   : > { %v4557_v47 = vadd.f32 %v4430_v16, %v11746_v23  ;;  %v7775_v6 = vpop.f32.mrb[169].mxu1 }
 0x3b7   : > { %v4433_v26 = vpop.f32.mrb[170].mxu1  ;;  %v12151_v2 = vpop.f32.mrb[240].mxu0 }
 0x3b8   : > { %v4558_v46 = vadd.f32 %v4433_v26, %v11750_v12  ;;  %v7776_v30 = vpop.f32.mrb[171].mxu1  ;;  %v7991_v23 = vpop.f32.mrb[241].mxu0  ;;  %v12158_v0 = vadd.f32 %v11739_v11, %v4557_v47  ;;  %v13678_v11 = vld [vmem:[#allocation67_spill] sm:$0xff] }
 0x3b9   : > { %v12155_v39 = vpop.f32.mrb[242].mxu0  ;;  %v13677_v30 = vld [vmem:[#allocation54_spill] sm:$0xff] }
 0x3ba   : > { %7958 = vmatmul.mubr.msk.bf16.gmra.mrb[20].mxu1 %vm701_vm0, %v13676_v62  ;;  %v7992_v12 = vpop.f32.mrb[243].mxu0  ;;  %v12162_v26 = vadd.f32 %v11743_v42, %v4558_v46 }
 0x3bb   : > { %7961 = vmatprep.mubr.msk.bf16.mxu1 %vm8349_vm9, %v13180_v14 }
 0x3bc   : > { %8174 = vmatmul.mubr.msk.bf16.gmra.mrb[92].mxu0 %vm701_vm0, %v13677_v30 }
 0x3bd   : > { %v4438_v16 = vpop.f32.mrb[172].mxu1  ;;  %8177 = vmatprep.mubr.msk.bf16.mxu0 %vm8349_vm9, %v13180_v14 }
 0x3be   : > { %v4559_v18 = vadd.f32 %v4438_v16, %v11767_v56  ;;  %v7779_v6 = vpop.f32.mrb[173].mxu1 }
 0x3bf   : > { %v4441_v19 = vpop.f32.mrb[174].mxu1  ;;  %v12171_v47 = vpop.f32.mrb[244].mxu0 }
 0x3c0   : > { %v4560_v62 = vadd.f32 %v4441_v19, %v11772_v1  ;;  %v7780_v23 = vpop.f32.mrb[175].mxu1  ;;  %v7995_v56 = vpop.f32.mrb[245].mxu0  ;;  %v12178_v46 = vadd.f32 %v11759_v48, %v4559_v18  ;;  %v13681_v48 = vld [vmem:[#allocation72_spill] sm:$0xff] }
 0x3c1   : > { %v12175_v42 = vpop.f32.mrb[246].mxu0  ;;  %v13680_v23 = vld [vmem:[#allocation61_spill] sm:$0xff] }
 0x3c2   : > { %7962 = vmatmul.mubr.msk.bf16.gmra.mrb[24].mxu1 %vm701_vm0, %v13678_v11  ;;  %13679 = vst [vmem:[#allocation12_spill] sm:$0xff] %v12175_v42  ;;  %v7996_v1 = vpop.f32.mrb[247].mxu0  ;;  %v12182_v19 = vadd.f32 %v11764_v45, %v4560_v62 }
 0x3c3   : > { %7965 = vmatprep.mubr.msk.bf16.mxu1 %vm8349_vm9, %v13180_v14 }
 0x3c4   : > { %8178 = vmatmul.mubr.msk.bf16.gmra.mrb[96].mxu0 %vm701_vm0, %v13680_v23  ;;  %v12204_v23 = vld [vmem:[#allocation2 + $0x88] sm:$0xff] }
 0x3c5   : > { %v4446_v16 = vpop.f32.mrb[176].mxu1  ;;  %8181 = vmatprep.mubr.msk.bf16.mxu0 %vm8349_vm9, %v13180_v14 }
 0x3c6   : > { %v4561_v12 = vadd.f32 %v4446_v16, %v11791_v33  ;;  %v7783_v6 = vpop.f32.mrb[177].mxu1 }
 0x3c7   : > { %v4449_v30 = vpop.f32.mrb[178].mxu1  ;;  %v12191_v18 = vpop.f32.mrb[248].mxu0 }
 0x3c8   : > { %v4562_v11 = vadd.f32 %v4449_v30, %v11795_v40  ;;  %v7784_v56 = vpop.f32.mrb[179].mxu1  ;;  %13682 = vst [vmem:[#allocation48_spill] sm:$0xff] %v12191_v18  ;;  %v7999_v33 = vpop.f32.mrb[249].mxu0  ;;  %v12198_v62 = vadd.f32 %v11781_v9, %v4561_v12  ;;  %v13686_v18 = vld [vmem:[#allocation69_spill] sm:$0xff] }
 0x3c9   : > { %v12195_v45 = vpop.f32.mrb[250].mxu0  ;;  %v13684_v56 = vld [vmem:[#allocation28_spill] sm:$0xff] }
 0x3ca   : > { %7966 = vmatmul.mubr.msk.bf16.gmra.mrb[28].mxu1 %vm701_vm0, %v13681_v48  ;;  %13683 = vst [vmem:[#allocation15_spill] sm:$0xff] %v12195_v45  ;;  %v8000_v40 = vpop.f32.mrb[251].mxu0  ;;  %v12202_v30 = vadd.f32 %v11788_v32, %v4562_v11  ;;  %vm13685_vm1 = vcmp.ne.s16.totalorder %v13684_v56, 0  ;;  %v13687_v32 = vld [vmem:[#allocation77_spill] sm:$0xff] }
 0x3cb   : > { %7969 = vmatprep.mubr.msk.bf16.mxu1 %vm8349_vm9, %v13180_v14  ;;  %v6147_v48 = vsel %vm13685_vm1, %v12204_v23, 0  ;;  %vm13739_vm1 = vmmov %vm13717_vm2 }
 0x3cc   : > { %8182 = vmatmul.mubr.msk.bf16.gmra.mrb[100].mxu0 %vm701_vm0, %v13686_v18 }
 0x3cd   : > { %v4454_v16 = vpop.f32.mrb[180].mxu1  ;;  %8185 = vmatprep.mubr.msk.bf16.mxu0 %vm8349_vm9, %v13180_v14 }
 0x3ce   : > { %v4563_v1 = vadd.f32 %v4454_v16, %v11818_v60  ;;  %v7787_v6 = vpop.f32.mrb[181].mxu1  ;;  %v6297_v60 = vshrl.u32 %v6147_v48, 16  ;;  %v6300_v16 = vshll.u32 %v6147_v48, 16 }
 0x3cf   : > { %v4457_v33 = vpop.f32.mrb[182].mxu1  ;;  %v12216_v11 = vpop.f32.mrb[252].mxu0 }
 0x3d0   : > { %v4564_v9 = vadd.f32 %v4457_v33, %v11824_v17  ;;  %v7788_v12 = vpop.f32.mrb[183].mxu1  ;;  %13688 = vst [vmem:[#allocation76_spill] sm:$0xff] %v12216_v11  ;;  %v8003_v40 = vpop.f32.mrb[253].mxu0  ;;  %v12223_v18 = vadd.f32 %v11807_v53, %v4563_v1  ;;  %v6299_v33 = vrot.slane %v6297_v60, 4  ;;  %v13691_v1 = vld [vmem:[#allocation80_spill] sm:$0xff] }
 0x3d1   : > { %v12220_v6 = vpop.f32.mrb[254].mxu0  ;;  %v6302_v12 = vrot.slane %v6300_v16, 5  ;;  %v13690_v40 = vld [vmem:[#allocation73_spill] sm:$0xff] }
 0x3d2   : > { %7970 = vmatmul.mubr.msk.bf16.gmra.mrb[32].mxu1 %vm701_vm0, %v13687_v32  ;;  %13689 = vst [vmem:[#allocation75_spill] sm:$0xff] %v12220_v6  ;;  %v8004_v56 = vpop.f32.mrb[255].mxu0  ;;  %v12227_v32 = vadd.f32 %v11813_v10, %v4564_v9 }
 0x3d3   : > { %7973 = vmatprep.mubr.msk.bf16.mxu1 %vm8349_vm9, %v13180_v14  ;;  %v12234_v53 = vor.u32 %v6302_v12, %v6299_v33 }
 0x3d4   : > { %8186 = vmatmul.mubr.msk.bf16.gmra.mrb[104].mxu0 %vm701_vm0, %v13690_v40 }
 0x3d5   : > { %v4462_v17 = vpop.f32.mrb[184].mxu1  ;;  %8189 = vmatprep.mubr.msk.bf16.mxu0 %vm8349_vm9, %v13180_v14 }
 0x3d6   : > { %v4565_v48 = vadd.f32 %v4462_v17, %v11847_v4  ;;  %v7791_v45 = vpop.f32.mrb[185].mxu1 }
 0x3d7   : > { %v4465_v11 = vpop.f32.mrb[186].mxu1  ;;  %v12238_v4 = vpop.f32.mrb[0].mxu0 }
 0x3d8   : > { %v4566_v42 = vadd.f32 %v4465_v11, %v11857_v50  ;;  %v7792_v6 = vpop.f32.mrb[187].mxu1  ;;  %13692 = vst [vmem:[#allocation74_spill] sm:$0xff] %v12238_v4  ;;  %v8007_v45 = vpop.f32.mrb[1].mxu0  ;;  %v12245_v9 = vadd.f32 %v11837_v15, %v4565_v48  ;;  %v13697_v48 = vld [vmem:[#allocation33_spill] sm:$0xff] }
 0x3d9   : > { %v12242_v10 = vpop.f32.mrb[2].mxu0  ;;  %v13694_v6 = vld [vmem:[#allocation34_spill] sm:$0xff] }
 0x3da   : > { %7974 = vmatmul.mubr.msk.bf16.gmra.mrb[36].mxu1 %vm701_vm0, %v13691_v1  ;;  %13693 = vst [vmem:[#allocation56_spill] sm:$0xff] %v12242_v10  ;;  %v8008_v60 = vpop.f32.mrb[3].mxu0  ;;  %v6304_v17 = vsel %vm2414_vm8, %v13694_v6, %v12234_v53  ;;  %v12252_v56 = vadd.f32 %v11844_v38, %v4566_v42  ;;  %v6130_v38 = vld [vmem:[#allocation2 + $0x90] sm:$0x1f]  ;;  %v13702_v10 = vld [vmem:[#allocation21_spill] sm:$0xff] }
 0x3db   : > { %7977 = vmatprep.mubr.msk.bf16.mxu1 %vm8349_vm9, %v13180_v14 }
 0x3dc   : > { %8190 = vmatmul.mubr.msk.bf16.gmra.mrb[108].mxu0 %vm701_vm0, %v6304_v17 }
 0x3dd   : > { %v4470_v50 = vpop.f32.mrb[188].mxu1  ;;  %8193 = vmatprep.mubr.msk.bf16.mxu0 %vm8349_vm9, %v13180_v14 }
 0x3de   : > { %v4567_v16 = vadd.f32 %v4470_v50, %v11879_v20  ;;  %v7795_v11 = vpop.f32.mrb[189].mxu1 }
 0x3df   : > { %v4473_v33 = vpop.f32.mrb[190].mxu1  ;;  %v12260_v15 = vpop.f32.mrb[4].mxu0 }
 0x3e0   : > { %v4568_v12 = vadd.f32 %v4473_v33, %v11886_v54  ;;  %v7796_v40 = vpop.f32.mrb[191].mxu1  ;;  %13695 = vst [vmem:[#allocation36_spill] sm:$0xff] %v12260_v15  ;;  %v8011_v20 = vpop.f32.mrb[5].mxu0  ;;  %v12267_v1 = vadd.f32 %v13697_v48, %v4567_v16  ;;  %v13698_v54 = vld [vmem:[#allocation29_spill] sm:$0xff]  ;;  %v13700_v33 = vld [vmem:[#allocation26_spill] sm:$0xff] }
 0x3e1   : > { %v12264_v42 = vpop.f32.mrb[6].mxu0  ;;  %v5833_v45 = vrot.slane %v13698_v54, 4  ;;  %vm13701_vm5 = vcmp.ne.s16.totalorder %v13700_v33, 0 }
 0x3e2   : > { %7978 = vmatmul.mubr.msk.bf16.gmra.mrb[40].mxu1 %vm701_vm0, %v11931_v8  ;;  %13696 = vst [vmem:[#allocation19_spill] sm:$0xff] %v12264_v42  ;;  %v8012_v60 = vpop.f32.mrb[7].mxu0  ;;  %v13699_v8 = vld [vmem:[#allocation7_spill] sm:$0xff]  ;;  %v6148_v40 = vsel %vm13701_vm5, %v6130_v38, 0  ;;  %vm13741_vm5 = vmmov %vm13739_vm1 }
 0x3e3   : > { %8057 = vmatprep.mubr.msk.bf16.mxu1 %vm8349_vm9, %v13180_v14  ;;  %v12272_v17 = vadd.f32 %v13699_v8, %v4568_v12  ;;  %v5835_v16 = vsel %vm13703_vm3, %v5833_v45, %v13702_v10  ;;  %v6306_v48 = vshrl.u32 %v6148_v40, 16  ;;  %v6309_v54 = vshll.u32 %v6148_v40, 16  ;;  %v13706_v40 = vld [vmem:[#allocation37_spill] sm:$0xff] }
 0x3e5   : > { %v4478_v50 = vpop.f32.mrb[192].mxu1  ;;  %v6311_v60 = vrot.slane %v6309_v54, 5 }
 0x3e6   : > { %v4569_v11 = vadd.f32 %v4478_v50, %v11925_v61  ;;  %v7799_v6 = vpop.f32.mrb[193].mxu1  ;;  %v6308_v50 = vrot.slane %v6306_v48, 4 }
 0x3e7   : > { %v4481_v20 = vpop.f32.mrb[194].mxu1  ;;  %v12279_v4 = vpop.f32.mrb[8].mxu0 }
 0x3e8   : > { %v4570_v15 = vadd.f32 %v4481_v20, %v11934_v59  ;;  %v7800_v42 = vpop.f32.mrb[195].mxu1  ;;  %13704 = vst [vmem:[#allocation68_spill] sm:$0xff] %v12279_v4  ;;  %v8015_v61 = vpop.f32.mrb[9].mxu0  ;;  %v12287_v38 = vadd.f32 %v11907_v57, %v4569_v11  ;;  %v5836_v20 = vrot.slane %v13706_v40, 4  ;;  %v6312_v11 = vor.u32 %v6311_v60, %v6308_v50 }
 0x3e9   : > { %v12284_v12 = vpop.f32.mrb[10].mxu0 }
 0x3ea   : > { %8058 = vmatmul.mubr.msk.bf16.vlgmr.msra.gmra.mrb[44].mxu1 %vm701_vm0, %v5835_v16  ;;  %13705 = vst [vmem:[#allocation63_spill] sm:$0xff] %v12284_v12  ;;  %v8016_v42 = vpop.f32.mrb[11].mxu0  ;;  %v12291_v8 = vadd.f32 %v11918_v51, %v4570_v15  ;;  %v13707_v16 = vld [vmem:[#allocation41_spill] sm:$0xff]  ;;  %v5837_v57 = vsel %vm13708_vm6, %v13702_v10, %v5836_v20  ;;  %v6313_v60 = vsel %vm2414_vm8, %v12234_v53, %v6312_v11  ;;  %vm13716_vm8 = vmmov %vm13703_vm3 }
 0x3eb   : > { %8061 = vmatprep.mubr.msk.bf16.mxu1 %vm8349_vm9, %v13180_v14  ;;  %8194 = vmatmul.mubr.msk.bf16.gmra.mrb[112].mxu0 %vm701_vm0, %v6313_v60  ;;  %vm13744_vm3 = vmmov %vm13739_vm1 }
 0x3ec   : > { %vm13750_vm6 = vmmov %vm13739_vm1 }
 0x3ed   : > { %v4486_v59 = vpop.f32.mrb[196].mxu1 }
 0x3ee   : > { %v4571_v45 = vadd.f32 %v4486_v59, %v11956_v29  ;;  %v7803_v6 = vpop.f32.mrb[197].mxu1  ;;  %v13709_v29 = vld [vmem:[#allocation39_spill] sm:$0xff] }
 0x3ef   : > { %v4489_v33 = vpop.f32.mrb[198].mxu1  ;;  %v12297_v12 = vpop.f32.mrb[12].mxu0  ;;  %v13711_v6 = vld [vmem:[#allocation78_spill] sm:$0xff] }
 0x3f0   : > { %v4572_v61 = vadd.f32 %v4489_v33, %v13707_v16  ;;  %v7804_v4 = vpop.f32.mrb[199].mxu1  ;;  %v8019_v48 = vpop.f32.mrb[13].mxu0  ;;  %v12305_v15 = vadd.f32 %v13709_v29, %v4571_v45 }
 0x3f1   : > { %v12302_v51 = vpop.f32.mrb[14].mxu0  ;;  %v13710_v4 = vld [vmem:[#allocation57_spill] sm:$0xff] }
 0x3f2   : > { %8062 = vmatmul.mubr.msk.bf16.gmra.mrb[48].mxu1 %vm701_vm0, %v5837_v57  ;;  %v8020_v59 = vpop.f32.mrb[15].mxu0  ;;  %v5838_v42 = vrot.slane %v13710_v4, 4  ;;  %v12312_v33 = vadd.f32 %v13711_v6, %v4572_v61  ;;  %v13713_v61 = vld [vmem:[#allocation11_spill] sm:$0xff] }
 0x3f3   : > { %8065 = vmatprep.mubr.msk.bf16.mxu1 %vm8349_vm9, %v13180_v14  ;;  %v13714_v59 = vld [vmem:[#allocation42_spill] sm:$0xff] }
 0x3f4   : > { %v5839_v57 = vsel %vm13712_vm10, %v5836_v20, %v5838_v42  ;;  %vm13751_vm10 = vmmov %vm13739_vm1 }
 0x3f5   : > { %v4494_v54 = vpop.f32.mrb[200].mxu1 }
 0x3f6   : > { %v4573_v10 = vadd.f32 %v4494_v54, %v11986_v31  ;;  %v7807_v50 = vpop.f32.mrb[201].mxu1 }
 0x3f7   : > { %v4497_v40 = vpop.f32.mrb[202].mxu1  ;;  %v12317_v48 = vpop.f32.mrb[16].mxu0  ;;  %v13715_v50 = vld [vmem:[#allocation60_spill] sm:$0xff] }
 0x3f8   : > { %v4574_v16 = vadd.f32 %v4497_v40, %v11990_v21  ;;  %v7808_v45 = vpop.f32.mrb[203].mxu1  ;;  %v8023_v31 = vpop.f32.mrb[17].mxu0  ;;  %v12325_v11 = vadd.f32 %v13713_v61, %v4573_v10  ;;  %v5840_v21 = vrot.slane %v13714_v59, 4 }
 0x3f9   : > { %v12322_v53 = vpop.f32.mrb[18].mxu0 }
 0x3fa   : > { %8066 = vmatmul.mubr.msk.bf16.gmra.mrb[52].mxu1 %vm701_vm0, %v5839_v57  ;;  %v8024_v54 = vpop.f32.mrb[19].mxu0  ;;  %v12330_v60 = vadd.f32 %v13715_v50, %v4574_v16  ;;  %v5841_v57 = vsel %vm13716_vm8, %v5838_v42, %v5840_v21 }
 0x3fb   : > { %8069 = vmatprep.mubr.msk.bf16.mxu1 %vm8349_vm9, %v13180_v14  ;;  %v8327_v54 = vld [vmem:[#allocation2 + $0x30] sm:$0xff] }
 0x3fd   : > { %v4502_v29 = vpop.f32.mrb[204].mxu1 }
 0x3fe   : > { %v4575_v4 = vadd.f32 %v4502_v29, %v12008_v27  ;;  %v7811_v20 = vpop.f32.mrb[205].mxu1 }
 0x3ff   : > { %v4505_v6 = vpop.f32.mrb[206].mxu1  ;;  %v12334_v31 = vpop.f32.mrb[20].mxu0 }
 0x400   : > { %v4576_v40 = vadd.f32 %v4505_v6, %v12013_v25  ;;  %v7812_v45 = vpop.f32.mrb[207].mxu1  ;;  %v8027_v10 = vpop.f32.mrb[21].mxu0  ;;  %v12342_v27 = vadd.f32 %v12000_v22, %v4575_v4  ;;  %v5842_v25 = vrot.slane %v8327_v54, 4 }
 0x401   : > { %v12339_v61 = vpop.f32.mrb[22].mxu0 }
 0x402   : > { %8070 = vmatmul.mubr.msk.bf16.gmra.mrb[56].mxu1 %vm701_vm0, %v5841_v57  ;;  %v8028_v29 = vpop.f32.mrb[23].mxu0  ;;  %v12346_v20 = vadd.f32 %v12005_v52, %v4576_v40  ;;  %v5843_v57 = vsel %vm13717_vm2, %v5840_v21, %v5842_v25 }
 0x403   : > { %8073 = vmatprep.mubr.msk.bf16.mxu1 %vm8349_vm9, %v13180_v14  ;;  %v8328_v29 = vld [vmem:[#allocation2 + $0x38] sm:$0xff] }
 0x405   : > { %v4510_v16 = vpop.f32.mrb[208].mxu1 }
 0x406   : > { %v4577_v59 = vadd.f32 %v4510_v16, %v12029_v37  ;;  %v7815_v42 = vpop.f32.mrb[209].mxu1  ;;  %v13720_v37 = vld [vmem:[#allocation9_spill] sm:$0xff] }
 0x407   : > { %v4513_v50 = vpop.f32.mrb[210].mxu1  ;;  %v12350_v10 = vpop.f32.mrb[24].mxu0  ;;  %v13721_v42 = vld [vmem:[#allocation44_spill] sm:$0xff] }
 0x408   : > { %v4578_v6 = vadd.f32 %v4513_v50, %v12033_v3  ;;  %v7816_v45 = vpop.f32.mrb[211].mxu1  ;;  %13718 = vst [vmem:[#allocation64_spill] sm:$0xff] %v12350_v10  ;;  %v8031_v22 = vpop.f32.mrb[25].mxu0  ;;  %v12358_v16 = vadd.f32 %v13720_v37, %v4577_v59  ;;  %v5844_v3 = vrot.slane %v8328_v29, 4 }
 0x409   : > { %v12355_v4 = vpop.f32.mrb[26].mxu0 }
 0x40a   : > { %8074 = vmatmul.mubr.msk.bf16.gmra.mrb[60].mxu1 %vm701_vm0, %v5843_v57  ;;  %13719 = vst [vmem:[#allocation66_spill] sm:$0xff] %v12355_v4  ;;  %v8032_v40 = vpop.f32.mrb[27].mxu0  ;;  %v12362_v50 = vadd.f32 %v13721_v42, %v4578_v6  ;;  %v5845_v10 = vsel %vm13722_vm13, %v5842_v25, %v5844_v3  ;;  %v13724_v42 = vld [vmem:[#allocation40_spill] sm:$0xff] }
 0x40b   : > { %8077 = vmatprep.mubr.msk.bf16.mxu1 %vm8349_vm9, %v13180_v14  ;;  %v8329_v40 = vld [vmem:[#allocation2 + $0x40] sm:$0xff] }
 0x40d   : > { %v4518_v52 = vpop.f32.mrb[212].mxu1 }
 0x40e   : > { %v4579_v54 = vadd.f32 %v4518_v52, %v12049_v35  ;;  %v7819_v21 = vpop.f32.mrb[213].mxu1 }
 0x40f   : > { %v4521_v45 = vpop.f32.mrb[214].mxu1  ;;  %v12366_v4 = vpop.f32.mrb[28].mxu0 }
 0x410   : > { %v4580_v57 = vadd.f32 %v4521_v45, %v12053_v5  ;;  %v7820_v22 = vpop.f32.mrb[215].mxu1  ;;  %v8035_v59 = vpop.f32.mrb[29].mxu0  ;;  %v12374_v35 = vadd.f32 %v12041_v24, %v4579_v54  ;;  %v5846_v5 = vrot.slane %v8329_v40, 4 }
 0x411   : > { %v12371_v37 = vpop.f32.mrb[30].mxu0 }
 0x412   : > { %8078 = vmatmul.mubr.msk.bf16.gmra.mrb[64].mxu1 %vm701_vm0, %v5845_v10  ;;  %13723 = vst [vmem:[#allocation46_spill] sm:$0xff] %v12371_v37  ;;  %v8036_v52 = vpop.f32.mrb[31].mxu0  ;;  %v12378_v21 = vadd.f32 %v12046_v43, %v4580_v57  ;;  %v5847_v59 = vsel %vm13725_vm14, %v5844_v3, %v5846_v5 }
 0x413   : > { %8081 = vmatprep.mubr.msk.bf16.mxu1 %vm8349_vm9, %v13180_v14  ;;  %v8330_v52 = vld [vmem:[#allocation2 + $0x48] sm:$0xff] }
 0x414   : > { %v5848_v40 = vrot.slane %v8330_v52, 4  ;;  %v8331_v52 = vld [vmem:[#allocation2 + $0x50] sm:$0xff] }
 0x415   : > { %v4526_v6 = vpop.f32.mrb[216].mxu1 }
 0x416   : > { %v4581_v29 = vadd.f32 %v4526_v6, %v12070_v13  ;;  %v7823_v25 = vpop.f32.mrb[217].mxu1  ;;  %v13728_v13 = vld [vmem:[#allocation10_spill] sm:$0xff] }
 0x417   : > { %v4529_v10 = vpop.f32.mrb[218].mxu1  ;;  %v12382_v37 = vpop.f32.mrb[32].mxu0 }
 0x418   : > { %v4582_v45 = vadd.f32 %v4529_v10, %v13724_v42  ;;  %v7824_v22 = vpop.f32.mrb[219].mxu1  ;;  %13726 = vst [vmem:[#allocation32_spill] sm:$0xff] %v12382_v37  ;;  %v8039_v24 = vpop.f32.mrb[33].mxu0  ;;  %v12390_v6 = vadd.f32 %v13728_v13, %v4581_v29  ;;  %v13729_v10 = vld [vmem:[#allocation65_spill] sm:$0xff]  ;;  %v5849_v37 = vsel %vm13730_vm15, %v5846_v5, %v5848_v40 }
 0x419   : > { %v12387_v54 = vpop.f32.mrb[34].mxu0 }
 0x41a   : > { %8082 = vmatmul.mubr.msk.bf16.gmra.mrb[68].mxu1 %vm701_vm0, %v5847_v59  ;;  %13727 = vst [vmem:[#allocation71_spill] sm:$0xff] %v12387_v54  ;;  %v8040_v57 = vpop.f32.mrb[35].mxu0  ;;  %v12394_v42 = vadd.f32 %v13729_v10, %v4582_v45 }
 0x41b   : > { %8085 = vmatprep.mubr.msk.bf16.mxu1 %vm8349_vm9, %v13180_v14 }
 0x41d   : > { %v4534_v43 = vpop.f32.mrb[220].mxu1 }
 0x41e   : > { %v4583_v25 = vadd.f32 %v4534_v43, %v12090_v49  ;;  %v7827_v3 = vpop.f32.mrb[221].mxu1  ;;  %v13732_v49 = vld [vmem:[#allocation49_spill] sm:$0xff] }
 0x41f   : > { %v4537_v22 = vpop.f32.mrb[222].mxu1  ;;  %v12398_v54 = vpop.f32.mrb[36].mxu0 }
 0x420   : > { %v4584_v59 = vadd.f32 %v4537_v22, %v12094_v44  ;;  %v7828_v24 = vpop.f32.mrb[223].mxu1  ;;  %v8043_v29 = vpop.f32.mrb[37].mxu0  ;;  %v12406_v43 = vadd.f32 %v13732_v49, %v4583_v25  ;;  %v5850_v44 = vrot.slane %v8331_v52, 4  ;;  %v13734_v52 = vld [vmem:[#allocation59_spill] sm:$0xff] }
 0x421   : > { %v12403_v13 = vpop.f32.mrb[38].mxu0 }
 0x422   : > { %8086 = vmatmul.mubr.msk.bf16.gmra.mrb[72].mxu1 %vm701_vm0, %v5849_v37  ;;  %13731 = vst [vmem:[#allocation18_spill] sm:$0xff] %v12403_v13  ;;  %v8044_v57 = vpop.f32.mrb[39].mxu0  ;;  %v12410_v10 = vadd.f32 %v12087_v36, %v4584_v59  ;;  %v5851_v29 = vsel %vm13733_vm12, %v5848_v40, %v5850_v44 }
 0x423   : > { %8089 = vmatprep.mubr.msk.bf16.mxu1 %vm8349_vm9, %v13180_v14 }
 0x425   : > { %v4542_v45 = vpop.f32.mrb[224].mxu1 }
 0x426   : > { %v4585_v3 = vadd.f32 %v4542_v45, %v12110_v63  ;;  %v7831_v5 = vpop.f32.mrb[225].mxu1  ;;  %v8332_v45 = vld [vmem:[#allocation2 + $0x58] sm:$0xff] }
 0x427   : > { %v4545_v37 = vpop.f32.mrb[226].mxu1  ;;  %v12414_v13 = vpop.f32.mrb[40].mxu0 }
 0x428   : > { %v4586_v22 = vadd.f32 %v4545_v37, %v12113_v41  ;;  %v7832_v24 = vpop.f32.mrb[227].mxu1  ;;  %v8047_v25 = vpop.f32.mrb[41].mxu0  ;;  %v12422_v63 = vadd.f32 %v12101_v34, %v4585_v3  ;;  %v5852_v41 = vrot.slane %v8332_v45, 4 }
 0x429   : > { %v12419_v49 = vpop.f32.mrb[42].mxu0 }
 0x42a   : > { %8090 = vmatmul.mubr.msk.bf16.gmra.mrb[76].mxu1 %vm701_vm0, %v5851_v29  ;;  %v8048_v59 = vpop.f32.mrb[43].mxu0  ;;  %v12425_v40 = vadd.f32 %v13734_v52, %v4586_v22  ;;  %v5853_v24 = vsel %vm13735_vm11, %v5850_v44, %v5852_v41 }
 0x42b   : > { %8093 = vmatprep.mubr.msk.bf16.mxu1 %vm8349_vm9, %v13180_v14  ;;  %v8333_v59 = vld [vmem:[#allocation2 + $0x60] sm:$0xff] }
 0x42c   : > { %v5854_v45 = vrot.slane %v8333_v59, 4 }
 0x42d   : > { %v4550_v36 = vpop.f32.mrb[228].mxu1 }
 0x42e   : > { %v7835_v57 = vpop.f32.mrb[229].mxu1 }
 0x42f   : > { %v4552_v5 = vpop.f32.mrb[230].mxu1  ;;  %v5773_v29 = vpop.f32.mrb[44].mxu0 }
 0x430   : > { %v7836_v37 = vpop.f32.mrb[231].mxu1  ;;  %v8051_v25 = vpop.f32.mrb[45].mxu0 }
 0x431   : > { %v5775_v34 = vpop.f32.mrb[46].mxu0 }
 0x432   : > { %8094 = vmatmul.mubr.msk.bf16.gmra.mrb[80].mxu1 %vm701_vm0, %v5853_v24  ;;  %v8052_v36 = vpop.f32.mrb[47].mxu0  ;;  %v5855_v24 = vsel %vm13736_vm4, %v5852_v41, %v5854_v45 }
 0x433   : > { %8097 = vmatprep.mubr.msk.bf16.mxu1 %vm8349_vm9, %v13180_v14  ;;  %v8334_v36 = vld [vmem:[#allocation2 + $0x68] sm:$0xff] }
 0x435   : > { %v5198_v3 = vpop.f32.mrb[232].mxu1 }
 0x436   : > { %v5331_v57 = vadd.f32 %v5198_v3, %v12134_v28  ;;  %v7915_v22 = vpop.f32.mrb[233].mxu1 }
 0x437   : > { %v5201_v52 = vpop.f32.mrb[234].mxu1  ;;  %v12438_v29 = vpop.f32.mrb[48].mxu0 }
 0x438   : > { %v5332_v5 = vadd.f32 %v5201_v52, %v12142_v58  ;;  %v7916_v37 = vpop.f32.mrb[235].mxu1  ;;  %v12434_v44 = vadd.f32 %v12131_v55, %v5331_v57  ;;  %v8131_v25 = vpop.f32.mrb[49].mxu0  ;;  %v5856_v58 = vrot.slane %v8334_v36, 4  ;;  %v8335_v36 = vld [vmem:[#allocation2 + $0x70] sm:$0xff] }
 0x439   : > { %v12442_v34 = vpop.f32.mrb[50].mxu0 }
 0x43a   : > { %8098 = vmatmul.mubr.msk.bf16.gmra.mrb[84].mxu1 %vm701_vm0, %v5855_v24  ;;  %v8132_v3 = vpop.f32.mrb[51].mxu0  ;;  %v5857_v52 = vsel %vm13737_vm7, %v5854_v45, %v5856_v58 }
 0x43b   : > { %8101 = vmatprep.mubr.msk.bf16.mxu1 %vm8349_vm9, %v13180_v14  ;;  %v12455_v3 = vadd.f32 %v12138_v7, %v5332_v5 }
 0x43d   : > { %v5206_v28 = vpop.f32.mrb[236].mxu1 }
 0x43e   : > { %v5333_v59 = vadd.f32 %v5206_v28, %v12158_v0  ;;  %v7919_v55 = vpop.f32.mrb[237].mxu1 }
 0x43f   : > { %v5209_v57 = vpop.f32.mrb[238].mxu1  ;;  %v12448_v37 = vpop.f32.mrb[52].mxu0 }
 0x440   : > { %v5334_v41 = vadd.f32 %v5209_v57, %v12162_v26  ;;  %v7920_v22 = vpop.f32.mrb[239].mxu1  ;;  %13738 = vst [vmem:[#allocation16_spill] sm:$0xff] %v12448_v37  ;;  %v8135_v24 = vpop.f32.mrb[53].mxu0  ;;  %v5858_v26 = vrot.slane %v8335_v36, 4  ;;  %v12464_v7 = vadd.f32 %v12151_v2, %v5333_v59  ;;  %v8336_v36 = vld [vmem:[#allocation2 + $0x78] sm:$0xff] }
 0x441   : > { %v12452_v25 = vpop.f32.mrb[54].mxu0 }
 0x442   : > { %8102 = vmatmul.mubr.msk.bf16.gmra.mrb[88].mxu1 %vm701_vm0, %v5857_v52  ;;  %v8136_v28 = vpop.f32.mrb[55].mxu0  ;;  %v5859_v24 = vsel %vm13739_vm1, %v5856_v58, %v5858_v26  ;;  %v5860_v58 = vrot.slane %v8336_v36, 4 }
 0x443   : > { %8105 = vmatprep.mubr.msk.bf16.mxu1 %vm8349_vm9, %v13180_v14 }
 0x445   : > { %v5214_v0 = vpop.f32.mrb[240].mxu1 }
 0x446   : > { %v5335_v55 = vadd.f32 %v5214_v0, %v12178_v46  ;;  %v7923_v45 = vpop.f32.mrb[241].mxu1  ;;  %v12471_v46 = vadd.f32 %v12155_v39, %v5334_v41 }
 0x447   : > { %v5217_v57 = vpop.f32.mrb[242].mxu1  ;;  %v12461_v37 = vpop.f32.mrb[56].mxu0 }
 0x448   : > { %v5336_v22 = vadd.f32 %v5217_v57, %v12182_v19  ;;  %v7924_v52 = vpop.f32.mrb[243].mxu1  ;;  %v8139_v5 = vpop.f32.mrb[57].mxu0 }
 0x449   : > { %v12468_v28 = vpop.f32.mrb[58].mxu0 }
 0x44a   : > { %8106 = vmatmul.mubr.msk.bf16.gmra.mrb[92].mxu1 %vm701_vm0, %v5859_v24  ;;  %13740 = vst [vmem:[#allocation17_spill] sm:$0xff] %v12468_v28  ;;  %v8140_v0 = vpop.f32.mrb[59].mxu0  ;;  %v5861_v24 = vsel %vm13741_vm5, %v5858_v26, %v5860_v58 }
 0x44b   : > { %8109 = vmatprep.mubr.msk.bf16.mxu1 %vm8349_vm9, %v13180_v14 }
 0x44d   : > { %v5222_v19 = vpop.f32.mrb[244].mxu1 }
 0x44e   : > { %v5337_v45 = vadd.f32 %v5222_v19, %v12198_v62  ;;  %v7927_v57 = vpop.f32.mrb[245].mxu1  ;;  %v8337_v62 = vld [vmem:[#allocation2 + $0x80] sm:$0xff] }
 0x44f   : > { %v5225_v52 = vpop.f32.mrb[246].mxu1  ;;  %v12477_v5 = vpop.f32.mrb[60].mxu0  ;;  %v5862_v19 = vrot.slane %v8337_v62, 4 }
 0x450   : > { %v5338_v2 = vadd.f32 %v5225_v52, %v12202_v30  ;;  %v7928_v59 = vpop.f32.mrb[247].mxu1  ;;  %13742 = vst [vmem:[#allocation6_spill] sm:$0xff] %v12477_v5  ;;  %v8143_v28 = vpop.f32.mrb[61].mxu0 }
 0x451   : > { %v12481_v39 = vpop.f32.mrb[62].mxu0  ;;  %v5863_v59 = vsel %vm13744_vm3, %v5860_v58, %v5862_v19  ;;  %v13747_v58 = vld [vmem:[#allocation12_spill] sm:$0xff] }
 0x452   : > { %8110 = vmatmul.mubr.msk.bf16.gmra.mrb[96].mxu1 %vm701_vm0, %v5861_v24  ;;  %13743 = vst [vmem:[#allocation8_spill] sm:$0xff] %v12481_v39  ;;  %v8144_v0 = vpop.f32.mrb[63].mxu0 }
 0x453   : > { %8113 = vmatprep.mubr.msk.bf16.mxu1 %vm8349_vm9, %v13180_v14 }
 0x455   : > { %v5230_v41 = vpop.f32.mrb[248].mxu1 }
 0x456   : > { %v5339_v36 = vadd.f32 %v5230_v41, %v12223_v18  ;;  %v7931_v30 = vpop.f32.mrb[249].mxu1  ;;  %v5864_v18 = vrot.slane %v12204_v23, 4 }
 0x457   : > { %v5233_v57 = vpop.f32.mrb[250].mxu1  ;;  %v12487_v28 = vpop.f32.mrb[64].mxu0  ;;  %v12496_v30 = vadd.f32 %v12171_v47, %v5335_v55  ;;  %v8338_v47 = vld [vmem:[#allocation2 + $0x90] sm:$0xf] }
 0x458   : > { %v5340_v26 = vadd.f32 %v5233_v57, %v12227_v32  ;;  %v7932_v52 = vpop.f32.mrb[251].mxu1  ;;  %13745 = vst [vmem:[#allocation20_spill] sm:$0xff] %v12487_v28  ;;  %v8147_v24 = vpop.f32.mrb[65].mxu0  ;;  %v12499_v57 = vadd.f32 %v13747_v58, %v5336_v22  ;;  %v13749_v28 = vld [vmem:[#allocation15_spill] sm:$0xff]  ;;  %v5865_v23 = vsel %vm13750_vm6, %v5862_v19, %v5864_v18  ;;  %v5866_v55 = vrot.slane %v8338_v47, 4 }
 0x459   : > { %v12491_v0 = vpop.f32.mrb[66].mxu0  ;;  %v13748_v52 = vld [vmem:[#allocation48_spill] sm:$0xff]  ;;  %v12505_v5 = vadd.f32 %v13749_v28, %v5338_v2 }
 0x45a   : > { %8114 = vmatmul.mubr.msk.bf16.gmra.mrb[100].mxu1 %vm701_vm0, %v5863_v59  ;;  %13746 = vst [vmem:[#allocation24_spill] sm:$0xff] %v12491_v0  ;;  %v8148_v39 = vpop.f32.mrb[67].mxu0  ;;  %v12502_v59 = vadd.f32 %v13748_v52, %v5337_v45  ;;  %v5867_v19 = vsel %vm13751_vm10, %v5864_v18, %v5866_v55 }
 0x45b   : > { %8117 = vmatprep.mubr.msk.bf16.mxu1 %vm8349_vm9, %v13180_v14 }
 0x45d   : > { %v5238_v62 = vpop.f32.mrb[252].mxu1 }
 0x45e   : > { %v5341_v41 = vadd.f32 %v5238_v62, %v12245_v9  ;;  %v7935_v32 = vpop.f32.mrb[253].mxu1 }
 0x45f   : > { %v5241_v24 = vpop.f32.mrb[254].mxu1  ;;  %v12510_v9 = vpop.f32.mrb[68].mxu0 }
 0x460   : > { %v5342_v39 = vadd.f32 %v5241_v24, %v12252_v56  ;;  %v7936_v0 = vpop.f32.mrb[255].mxu1  ;;  %v8151_v22 = vpop.f32.mrb[69].mxu0 }
 0x461   : > { %v12514_v45 = vpop.f32.mrb[70].mxu0 }
 0x462   : > { %8118 = vmatmul.mubr.msk.bf16.gmra.mrb[104].mxu1 %vm701_vm0, %v5865_v23  ;;  %v8152_v2 = vpop.f32.mrb[71].mxu0 }
 0x463   : > { %8121 = vmatprep.mubr.msk.bf16.mxu1 %vm8349_vm9, %v13180_v14  ;;  %vm6751_vm9 = vcmask 519168  }
 0x465   : > { %v5246_v62 = vpop.f32.mrb[0].mxu1 }
 0x466   : > { %v5343_v28 = vadd.f32 %v5246_v62, %v12267_v1  ;;  %v7939_v56 = vpop.f32.mrb[1].mxu1  ;;  %v13754_v1 = vld [vmem:[#allocation76_spill] sm:$0xff] }
 0x467   : > { %v5249_v0 = vpop.f32.mrb[2].mxu1  ;;  %v12519_v52 = vpop.f32.mrb[72].mxu0  ;;  %v12526_v62 = vadd.f32 %v13754_v1, %v5339_v36  ;;  %v13755_v56 = vld [vmem:[#allocation75_spill] sm:$0xff] }
 0x468   : > { %v5344_v32 = vadd.f32 %v5249_v0, %v12272_v17  ;;  %v7940_v58 = vpop.f32.mrb[3].mxu1  ;;  %13752 = vst [vmem:[#allocation38_spill] sm:$0xff] %v12519_v52  ;;  %v8155_v24 = vpop.f32.mrb[73].mxu0  ;;  %v12529_v18 = vadd.f32 %v13755_v56, %v5340_v26  ;;  %v13756_v17 = vld [vmem:[#allocation74_spill] sm:$0xff] }
 0x469   : > { %v12522_v23 = vpop.f32.mrb[74].mxu0  ;;  %v12532_v55 = vadd.f32 %v13756_v17, %v5341_v41  ;;  %v13757_v58 = vld [vmem:[#allocation56_spill] sm:$0xff] }
 0x46a   : > { %8122 = vmatmul.mubr.msk.bf16.gmra.mrb[108].mxu1 %vm701_vm0, %v5867_v19  ;;  %13753 = vst [vmem:[#allocation47_spill] sm:$0xff] %v12522_v23  ;;  %v8156_v47 = vpop.f32.mrb[75].mxu0  ;;  %v12535_v19 = vadd.f32 %v13757_v58, %v5342_v39  ;;  %vm6663_vm0 = vcmask 523264  }
 0x46d   : > { %v5254_v14 = vpop.f32.mrb[4].mxu1 }
 0x46e   : > { %v5345_v22 = vadd.f32 %v5254_v14, %v12287_v38  ;;  %v7943_v2 = vpop.f32.mrb[5].mxu1 }
 0x46f   : > { %v5257_v0 = vpop.f32.mrb[6].mxu1  ;;  %v12538_v47 = vpop.f32.mrb[76].mxu0 }
 0x470   : > { %v5346_v24 = vadd.f32 %v5257_v0, %v12291_v8  ;;  %v7944_v23 = vpop.f32.mrb[7].mxu1  ;;  %13758 = vst [vmem:[#allocation22_spill] sm:$0xff] %v12538_v47  ;;  %v8159_v38 = vpop.f32.mrb[77].mxu0 }
 0x471   : > { %v12540_v14 = vpop.f32.mrb[78].mxu0 }
 0x472   : > { %13759 = vst [vmem:[#allocation25_spill] sm:$0xff] %v12540_v14  ;;  %v8160_v2 = vpop.f32.mrb[79].mxu0  ;;  %v13762_v14 = vld [vmem:[#allocation36_spill] sm:$0xff] }
 0x473   : > { %v12550_v47 = vadd.f32 %v13762_v14, %v5343_v28  ;;  %v13763_v2 = vld [vmem:[#allocation19_spill] sm:$0xff] }
 0x475   : > { %v5262_v36 = vpop.f32.mrb[8].mxu1 }
 0x476   : > { %v5347_v26 = vadd.f32 %v5262_v36, %v12305_v15  ;;  %v7947_v1 = vpop.f32.mrb[9].mxu1  ;;  %v12553_v15 = vadd.f32 %v13763_v2, %v5344_v32  ;;  %v13764_v36 = vld [vmem:[#allocation68_spill] sm:$0xff] }
 0x477   : > { %v5265_v56 = vpop.f32.mrb[10].mxu1  ;;  %v12544_v52 = vpop.f32.mrb[80].mxu0  ;;  %v12556_v1 = vadd.f32 %v13764_v36, %v5345_v22 }
 0x478   : > { %v5348_v41 = vadd.f32 %v5265_v56, %v12312_v33  ;;  %v7948_v17 = vpop.f32.mrb[11].mxu1  ;;  %13760 = vst [vmem:[#allocation23_spill] sm:$0xff] %v12544_v52  ;;  %v8163_v39 = vpop.f32.mrb[81].mxu0  ;;  %v13765_v56 = vld [vmem:[#allocation63_spill] sm:$0xff] }
 0x479   : > { %v12546_v58 = vpop.f32.mrb[82].mxu0  ;;  %v12559_v17 = vadd.f32 %v13765_v56, %v5346_v24 }
 0x47a   : > { %13761 = vst [vmem:[#allocation55_spill] sm:$0xff] %v12546_v58  ;;  %v8164_v23 = vpop.f32.mrb[83].mxu0 }
 0x47d   : > { %v5270_v8 = vpop.f32.mrb[12].mxu1 }
 0x47e   : > { %v5349_v0 = vadd.f32 %v5270_v8, %v12325_v11  ;;  %v7951_v38 = vpop.f32.mrb[13].mxu1 }
 0x47f   : > { %v5273_v33 = vpop.f32.mrb[14].mxu1  ;;  %v12562_v23 = vpop.f32.mrb[84].mxu0 }
 0x480   : > { %v5350_v39 = vadd.f32 %v5273_v33, %v12330_v60  ;;  %v7952_v58 = vpop.f32.mrb[15].mxu1  ;;  %v8167_v11 = vpop.f32.mrb[85].mxu0 }
 0x481   : > { %v12564_v8 = vpop.f32.mrb[86].mxu0 }
 0x482   : > { %13766 = vst [vmem:[#allocation81_spill] sm:$0xff] %v12564_v8  ;;  %v8168_v14 = vpop.f32.mrb[87].mxu0  ;;  %v12574_v8 = vadd.f32 %v12297_v12, %v5347_v26 }
 0x483   : > { %v12583_v14 = vadd.f32 %v12322_v53, %v5350_v39 }
 0x485   : > { %v5278_v28 = vpop.f32.mrb[16].mxu1 }
 0x486   : > { %v5351_v32 = vadd.f32 %v5278_v28, %v12342_v27  ;;  %v7955_v38 = vpop.f32.mrb[17].mxu1  ;;  %v12577_v27 = vadd.f32 %v12302_v51, %v5348_v41  ;;  %v12580_v28 = vadd.f32 %v12317_v48, %v5349_v0 }
 0x487   : > { %v5281_v2 = vpop.f32.mrb[18].mxu1  ;;  %v12568_v52 = vpop.f32.mrb[88].mxu0 }
 0x488   : > { %v5352_v22 = vadd.f32 %v5281_v2, %v12346_v20  ;;  %v7956_v36 = vpop.f32.mrb[19].mxu1  ;;  %v8171_v24 = vpop.f32.mrb[89].mxu0 }
 0x489   : > { %v12570_v56 = vpop.f32.mrb[90].mxu0 }
 0x48a   : > { %v8172_v58 = vpop.f32.mrb[91].mxu0 }
 0x48d   : > { %v5286_v60 = vpop.f32.mrb[20].mxu1 }
 0x48e   : > { %v5353_v33 = vadd.f32 %v5286_v60, %v12358_v16  ;;  %v7959_v11 = vpop.f32.mrb[21].mxu1 }
 0x48f   : > { %v5289_v20 = vpop.f32.mrb[22].mxu1  ;;  %v12586_v36 = vpop.f32.mrb[92].mxu0 }
 0x490   : > { %v5354_v38 = vadd.f32 %v5289_v20, %v12362_v50  ;;  %v7960_v2 = vpop.f32.mrb[23].mxu1  ;;  %v8175_v16 = vpop.f32.mrb[93].mxu0 }
 0x491   : > { %v12588_v24 = vpop.f32.mrb[94].mxu0  ;;  %v12598_v16 = vadd.f32 %v12334_v31, %v5351_v32 }
 0x492   : > { %v8176_v26 = vpop.f32.mrb[95].mxu0 }
 0x495   : > { %v5294_v12 = vpop.f32.mrb[24].mxu1 }
 0x496   : > { %v5355_v51 = vadd.f32 %v5294_v12, %v12374_v35  ;;  %v7963_v41 = vpop.f32.mrb[25].mxu1  ;;  %v12601_v35 = vadd.f32 %v12339_v61, %v5352_v22  ;;  %v13768_v12 = vld [vmem:[#allocation64_spill] sm:$0xff] }
 0x497   : > { %v5297_v60 = vpop.f32.mrb[26].mxu1  ;;  %v12592_v58 = vpop.f32.mrb[96].mxu0  ;;  %v12604_v26 = vadd.f32 %v13768_v12, %v5353_v33  ;;  %v13769_v41 = vld [vmem:[#allocation66_spill] sm:$0xff] }
 0x498   : > { %v5356_v48 = vadd.f32 %v5297_v60, %v12378_v21  ;;  %v7964_v0 = vpop.f32.mrb[27].mxu1  ;;  %v8179_v53 = vpop.f32.mrb[97].mxu0  ;;  %v12607_v60 = vadd.f32 %v13769_v41, %v5354_v38 }
 0x499   : > { %v12594_v39 = vpop.f32.mrb[98].mxu0 }
 0x49a   : > { %13767 = vst [vmem:[#allocation51_spill] sm:$0xff] %v12594_v39  ;;  %v8180_v11 = vpop.f32.mrb[99].mxu0 }
 0x49d   : > { %v5302_v50 = vpop.f32.mrb[28].mxu1 }
 0x49e   : > { %v5357_v20 = vadd.f32 %v5302_v50, %v12390_v6  ;;  %v7967_v2 = vpop.f32.mrb[29].mxu1 }
 0x49f   : > { %v5305_v21 = vpop.f32.mrb[30].mxu1  ;;  %v12610_v11 = vpop.f32.mrb[100].mxu0 }
 0x4a0   : > { %v5358_v0 = vadd.f32 %v5305_v21, %v12394_v42  ;;  %v7968_v53 = vpop.f32.mrb[31].mxu1  ;;  %v8183_v6 = vpop.f32.mrb[101].mxu0 }
 0x4a1   : > { %v12612_v50 = vpop.f32.mrb[102].mxu0 }
 0x4a2   : > { %13770 = vst [vmem:[#allocation14_spill] sm:$0xff] %v12612_v50  ;;  %v8184_v32 = vpop.f32.mrb[103].mxu0  ;;  %v12622_v50 = vadd.f32 %v12366_v4, %v5355_v51 }
 0x4a3   : > { %v13773_v32 = vld [vmem:[#allocation46_spill] sm:$0xff] }
 0x4a5   : > { %v5310_v31 = vpop.f32.mrb[32].mxu1 }
 0x4a6   : > { %v5359_v61 = vadd.f32 %v5310_v31, %v12406_v43  ;;  %v7971_v22 = vpop.f32.mrb[33].mxu1  ;;  %v12625_v43 = vadd.f32 %v13773_v32, %v5356_v48  ;;  %v13774_v31 = vld [vmem:[#allocation32_spill] sm:$0xff] }
 0x4a7   : > { %v5313_v2 = vpop.f32.mrb[34].mxu1  ;;  %v12616_v39 = vpop.f32.mrb[104].mxu0  ;;  %v12628_v22 = vadd.f32 %v13774_v31, %v5357_v20 }
 0x4a8   : > { %v5360_v33 = vadd.f32 %v5313_v2, %v12410_v10  ;;  %v7972_v12 = vpop.f32.mrb[35].mxu1  ;;  %13771 = vst [vmem:[#allocation35_spill] sm:$0xff] %v12616_v39  ;;  %v8187_v38 = vpop.f32.mrb[105].mxu0  ;;  %v13775_v2 = vld [vmem:[#allocation71_spill] sm:$0xff] }
 0x4a9   : > { %v12618_v41 = vpop.f32.mrb[106].mxu0  ;;  %v12631_v12 = vadd.f32 %v13775_v2, %v5358_v0  ;;  %v12640_v0 = vadd.f32 %v12398_v54, %v5359_v61  ;;  %v13776_v2 = vld [vmem:[#allocation18_spill] sm:$0xff] }
 0x4aa   : > { %13772 = vst [vmem:[#allocation4_spill] sm:$0xff] %v12618_v41  ;;  %v8188_v21 = vpop.f32.mrb[107].mxu0 }
 0x4ad   : > { %v5318_v42 = vpop.f32.mrb[36].mxu1 }
 0x4ae   : > { %v5361_v53 = vadd.f32 %v5318_v42, %v12422_v63  ;;  %v7975_v6 = vpop.f32.mrb[37].mxu1 }
 0x4af   : > { %v5321_v10 = vpop.f32.mrb[38].mxu1  ;;  %v12634_v21 = vpop.f32.mrb[108].mxu0 }
 0x4b0   : > { %v5362_v38 = vadd.f32 %v5321_v10, %v12425_v40  ;;  %v7976_v41 = vpop.f32.mrb[39].mxu1  ;;  %v8191_v63 = vpop.f32.mrb[109].mxu0  ;;  %v12643_v40 = vadd.f32 %v13776_v2, %v5360_v33  ;;  %v12651_v10 = vld [vmem:[%s12797_s4] ss:$0 sm:$0xff] }
 0x4b1   : > { %v12636_v42 = vpop.f32.mrb[110].mxu0  ;;  %v12646_v41 = vadd.f32 %v12414_v13, %v5361_v53 }
 0x4b2   : > { %v8192_v51 = vpop.f32.mrb[111].mxu0 }
 0x4b5   : > { %v5326_v4 = vpop.f32.mrb[40].mxu1 }
 0x4b6   : > { %v7979_v6 = vpop.f32.mrb[41].mxu1  ;;  %v12654_v4 = vadd.f32 %v12419_v49, %v5362_v38 }
 0x4b7   : > { %v5328_v48 = vpop.f32.mrb[42].mxu1 }
 0x4b8   : > { %v7980_v32 = vpop.f32.mrb[43].mxu1 }
 0x4bd   : > { %v5965_v39 = vpop.f32.mrb[44].mxu1 }
 0x4be   : > { %v6098_v20 = vadd.f32 %v5965_v39, %v12434_v44  ;;  %v8059_v31 = vpop.f32.mrb[45].mxu1 }
 0x4bf   : > { %v5968_v63 = vpop.f32.mrb[46].mxu1  ;;  %v13777_v31 = vld [vmem:[#allocation16_spill] sm:$0xff] }
 0x4c0   : > { %v6544_v44 = vadd.f32 %v12438_v29, %v6098_v20  ;;  %v6099_v54 = vadd.f32 %v5968_v63, %v12455_v3  ;;  %v8060_v39 = vpop.f32.mrb[47].mxu1  ;;  %v6539_v63 = vpop.f32.mrb[112].mxu0 }
 0x4c2   : > { %v6583_v61 = vadd.f32 %v12651_v10, %v6544_v44  ;;  %v6545_v33 = vadd.f32 %v12442_v34, %v6099_v54  ;;  %v8195_v44 = vpop.f32.mrb[113].mxu0 }
 0x4c3   : > { %v6541_v54 = vpop.f32.mrb[114].mxu0 }
 0x4c4   : > { %v6584_v13 = vadd.f32 %v12651_v10, %v6545_v33  ;;  %v6615_v51 = vmax.f32 %v6583_v61, 0.0  ;;  %v8196_v61 = vpop.f32.mrb[115].mxu0 }
 0x4c5   : > { %v5973_v53 = vpop.f32.mrb[48].mxu1 }
 0x4c6   : > { %v6616_v6 = vmax.f32 %v6584_v13, 0.0  ;;  %v6100_v48 = vadd.f32 %v5973_v53, %v12464_v7  ;;  %v8063_v32 = vpop.f32.mrb[49].mxu1 }
 0x4c7   : > { %v5976_v49 = vpop.f32.mrb[50].mxu1 }
 0x4c8   : > { %v6647_v38 = vmax.f32 %v6615_v51, %v6616_v6  ;;  %v6546_v29 = vadd.f32 %v13777_v31, %v6100_v48  ;;  %v6101_v3 = vadd.f32 %v5976_v49, %v12471_v46  ;;  %v8064_v20 = vpop.f32.mrb[51].mxu1 }
 0x4ca   : > { %6664 = vst.msk [vmem:[#allocation3] sm:$0xff] %vm6663_vm0, %v6647_v38  ;;  %v6585_v34 = vadd.f32 %v12651_v10, %v6546_v29  ;;  %v6547_v2 = vadd.f32 %v12452_v25, %v6101_v3  ;;  %v13778_v38 = vld [vmem:[#allocation17_spill] sm:$0xff] }
 0x4cc   : > { %v6586_v7 = vadd.f32 %v12651_v10, %v6547_v2  ;;  %v6617_v33 = vmax.f32 %v6585_v34, 0.0 }
 0x4cd   : > { %v5981_v39 = vpop.f32.mrb[52].mxu1 }
 0x4ce   : > { %v6618_v13 = vmax.f32 %v6586_v7, 0.0  ;;  %v6102_v46 = vadd.f32 %v5981_v39, %v12496_v30  ;;  %v8067_v53 = vpop.f32.mrb[53].mxu1 }
 0x4cf   : > { %v5984_v51 = vpop.f32.mrb[54].mxu1 }
 0x4d0   : > { %v6648_v6 = vmax.f32 %v6617_v33, %v6618_v13  ;;  %v6548_v48 = vadd.f32 %v12461_v37, %v6102_v46  ;;  %v6103_v25 = vadd.f32 %v5984_v51, %v12499_v57  ;;  %v8068_v32 = vpop.f32.mrb[55].mxu1  ;;  %v13779_v57 = vld [vmem:[#allocation6_spill] sm:$0xff]  ;;  %v13780_v46 = vld [vmem:[#allocation8_spill] sm:$0xff] }
 0x4d2   : > { %6665 = vst.msk [vmem:[#allocation3 + $0x8] sm:$0xff] %vm6663_vm0, %v6648_v6  ;;  %v6587_v49 = vadd.f32 %v12651_v10, %v6548_v48  ;;  %v6549_v31 = vadd.f32 %v13778_v38, %v6103_v25 }
 0x4d4   : > { %v6588_v29 = vadd.f32 %v12651_v10, %v6549_v31  ;;  %v6619_v30 = vmax.f32 %v6587_v49, 0.0  ;;  %v13781_v31 = vld [vmem:[#allocation20_spill] sm:$0xff] }
 0x4d5   : > { %v5989_v3 = vpop.f32.mrb[56].mxu1 }
 0x4d6   : > { %v6620_v20 = vmax.f32 %v6588_v29, 0.0  ;;  %v6104_v34 = vadd.f32 %v5989_v3, %v12502_v59  ;;  %v8071_v2 = vpop.f32.mrb[57].mxu1 }
 0x4d7   : > { %v5992_v63 = vpop.f32.mrb[58].mxu1 }
 0x4d8   : > { %v6649_v37 = vmax.f32 %v6619_v30, %v6620_v20  ;;  %v6550_v44 = vadd.f32 %v13779_v57, %v6104_v34  ;;  %v6105_v7 = vadd.f32 %v5992_v63, %v12505_v5  ;;  %v8072_v54 = vpop.f32.mrb[59].mxu1  ;;  %v13782_v34 = vld [vmem:[#allocation24_spill] sm:$0xff] }
 0x4d9   : > { %v6680_v39 = vld [vmem:[#allocation3] ss:$2 sm:$0xff]  ;;  %v6696_v61 = vld [vmem:[#allocation3 + $0x1] ss:$2 sm:$0xff] }
 0x4da   : > { %v6711_v33 = vmax.f32 %v6680_v39, %v6696_v61  ;;  %6666 = vst.msk [vmem:[#allocation3 + $0x10] sm:$0xff] %vm6663_vm0, %v6649_v37  ;;  %v6589_v13 = vadd.f32 %v12651_v10, %v6550_v44  ;;  %v6551_v53 = vadd.f32 %v13780_v46, %v6105_v7 }
 0x4dc   : > { %v7172_v59 = vpack.c.bf16 %v6711_v33, %v6711_v33  ;;  %v6590_v5 = vadd.f32 %v12651_v10, %v6551_v53  ;;  %v6621_v6 = vmax.f32 %v6589_v13, 0.0 }
 0x4dd   : > { %v5997_v51 = vpop.f32.mrb[60].mxu1 }
 0x4de   : > { %6752 = vst.msk [vmem:[%s12686_s28] sm:$0xf] %vm6751_vm9, %v7172_v59  ;;  %v6622_v48 = vmax.f32 %v6590_v5, 0.0  ;;  %v6106_v25 = vadd.f32 %v5997_v51, %v12526_v62  ;;  %v8075_v32 = vpop.f32.mrb[61].mxu1 }
 0x4df   : > { %v6000_v49 = vpop.f32.mrb[62].mxu1 }
 0x4e0   : > { %v6650_v38 = vmax.f32 %v6621_v6, %v6622_v48  ;;  %v6552_v29 = vadd.f32 %v13781_v31, %v6106_v25  ;;  %v6107_v3 = vadd.f32 %v6000_v49, %v12529_v18  ;;  %v8076_v30 = vpop.f32.mrb[63].mxu1 }
 0x4e1   : > { %v13784_v30 = vld [vmem:[#allocation47_spill] sm:$0xff] }
 0x4e2   : > { %6667 = vst.msk [vmem:[#allocation3 + $0x18] sm:$0xff] %vm6663_vm0, %v6650_v38  ;;  %v6591_v20 = vadd.f32 %v12651_v10, %v6552_v29  ;;  %v6553_v2 = vadd.f32 %v13782_v34, %v6107_v3  ;;  %v13783_v38 = vld [vmem:[#allocation38_spill] sm:$0xff] }
 0x4e4   : > { %v6592_v63 = vadd.f32 %v12651_v10, %v6553_v2  ;;  %v6623_v57 = vmax.f32 %v6591_v20, 0.0 }
 0x4e5   : > { %v6005_v37 = vpop.f32.mrb[64].mxu1 }
 0x4e6   : > { %v6624_v44 = vmax.f32 %v6592_v63, 0.0  ;;  %v6108_v62 = vadd.f32 %v6005_v37, %v12532_v55  ;;  %v8079_v7 = vpop.f32.mrb[65].mxu1 }
 0x4e7   : > { %v6008_v54 = vpop.f32.mrb[66].mxu1  ;;  %v13785_v7 = vld [vmem:[#allocation22_spill] sm:$0xff] }
 0x4e8   : > { %v6651_v39 = vmax.f32 %v6623_v57, %v6624_v44  ;;  %v6554_v18 = vadd.f32 %v12510_v9, %v6108_v62  ;;  %v6109_v61 = vadd.f32 %v6008_v54, %v12535_v19  ;;  %v8080_v33 = vpop.f32.mrb[67].mxu1 }
 0x4e9   : > { %v6682_v13 = vld [vmem:[#allocation3 + $0x10] ss:$2 sm:$0xff]  ;;  %v6698_v46 = vld [vmem:[#allocation3 + $0x11] ss:$2 sm:$0xff] }
 0x4ea   : > { %v6712_v53 = vmax.f32 %v6682_v13, %v6698_v46  ;;  %6668 = vst.msk [vmem:[#allocation3 + $0x20] sm:$0xff] %vm6663_vm0, %v6651_v39  ;;  %v6593_v59 = vadd.f32 %v12651_v10, %v6554_v18  ;;  %v6555_v5 = vadd.f32 %v12514_v45, %v6109_v61  ;;  %v13786_v46 = vld [vmem:[#allocation25_spill] sm:$0xff] }
 0x4ec   : > { %v7173_v51 = vpack.c.bf16 %v6712_v53, %v6712_v53  ;;  %v6594_v55 = vadd.f32 %v12651_v10, %v6555_v5  ;;  %v6625_v48 = vmax.f32 %v6593_v59, 0.0 }
 0x4ed   : > { %v6013_v6 = vpop.f32.mrb[68].mxu1 }
 0x4ee   : > { %6753 = vst.msk [vmem:[%s12686_s28 + $0x4] sm:$0xf] %vm6751_vm9, %v7173_v51  ;;  %v6626_v9 = vmax.f32 %v6594_v55, 0.0  ;;  %v6110_v19 = vadd.f32 %v6013_v6, %v12550_v47  ;;  %v8083_v25 = vpop.f32.mrb[69].mxu1 }
 0x4ef   : > { %v6016_v32 = vpop.f32.mrb[70].mxu1 }
 0x4f0   : > { %v6652_v49 = vmax.f32 %v6625_v48, %v6626_v9  ;;  %v6556_v31 = vadd.f32 %v13783_v38, %v6110_v19  ;;  %v6111_v29 = vadd.f32 %v6016_v32, %v12553_v15  ;;  %v8084_v3 = vpop.f32.mrb[71].mxu1  ;;  %v13787_v19 = vld [vmem:[#allocation23_spill] sm:$0xff] }
 0x4f2   : > { %6669 = vst.msk [vmem:[#allocation3 + $0x28] sm:$0xff] %vm6663_vm0, %v6652_v49  ;;  %v6595_v45 = vadd.f32 %v12651_v10, %v6556_v31  ;;  %v6557_v20 = vadd.f32 %v13784_v30, %v6111_v29  ;;  %v13788_v31 = vld [vmem:[#allocation55_spill] sm:$0xff] }
 0x4f4   : > { %v6596_v34 = vadd.f32 %v12651_v10, %v6557_v20  ;;  %v6627_v63 = vmax.f32 %v6595_v45, 0.0 }
 0x4f5   : > { %v6021_v2 = vpop.f32.mrb[72].mxu1 }
 0x4f6   : > { %v6628_v37 = vmax.f32 %v6596_v34, 0.0  ;;  %v6112_v47 = vadd.f32 %v6021_v2, %v12556_v1  ;;  %v8087_v57 = vpop.f32.mrb[73].mxu1 }
 0x4f7   : > { %v6024_v44 = vpop.f32.mrb[74].mxu1 }
 0x4f8   : > { %v6653_v62 = vmax.f32 %v6627_v63, %v6628_v37  ;;  %v6558_v15 = vadd.f32 %v13785_v7, %v6112_v47  ;;  %v6113_v54 = vadd.f32 %v6024_v44, %v12559_v17  ;;  %v8088_v39 = vpop.f32.mrb[75].mxu1 }
 0x4f9   : > { %v6684_v18 = vld [vmem:[#allocation3 + $0x20] ss:$2 sm:$0xff]  ;;  %v6700_v61 = vld [vmem:[#allocation3 + $0x21] ss:$2 sm:$0xff] }
 0x4fa   : > { %v6713_v33 = vmax.f32 %v6684_v18, %v6700_v61  ;;  %6670 = vst.msk [vmem:[#allocation3 + $0x30] sm:$0xff] %vm6663_vm0, %v6653_v62  ;;  %v6597_v13 = vadd.f32 %v12651_v10, %v6558_v15  ;;  %v6559_v53 = vadd.f32 %v13786_v46, %v6113_v54  ;;  %v13789_v15 = vld [vmem:[#allocation81_spill] sm:$0xff] }
 0x4fc   : > { %v7174_v59 = vpack.c.bf16 %v6713_v33, %v6713_v33  ;;  %v6598_v1 = vadd.f32 %v12651_v10, %v6559_v53  ;;  %v6629_v51 = vmax.f32 %v6597_v13, 0.0 }
 0x4fd   : > { %v6029_v5 = vpop.f32.mrb[76].mxu1 }
 0x4fe   : > { %6754 = vst.msk [vmem:[%s12686_s28 + $0x8] sm:$0xf] %vm6751_vm9, %v7174_v59  ;;  %v6630_v55 = vmax.f32 %v6598_v1, 0.0  ;;  %v6114_v17 = vadd.f32 %v6029_v5, %v12574_v8  ;;  %v8091_v6 = vpop.f32.mrb[77].mxu1 }
 0x4ff   : > { %v6032_v48 = vpop.f32.mrb[78].mxu1 }
 0x500   : > { %v6654_v9 = vmax.f32 %v6629_v51, %v6630_v55  ;;  %v6560_v25 = vadd.f32 %v13787_v19, %v6114_v17  ;;  %v6115_v32 = vadd.f32 %v6032_v48, %v12577_v27  ;;  %v8092_v49 = vpop.f32.mrb[79].mxu1 }
 0x502   : > { %6671 = vst.msk [vmem:[#allocation3 + $0x38] sm:$0xff] %vm6663_vm0, %v6654_v9  ;;  %v6599_v38 = vadd.f32 %v12651_v10, %v6560_v25  ;;  %v6561_v29 = vadd.f32 %v13788_v31, %v6115_v32 }
 0x504   : > { %v6600_v3 = vadd.f32 %v12651_v10, %v6561_v29  ;;  %v6631_v30 = vmax.f32 %v6599_v38, 0.0 }
 0x505   : > { %v6037_v45 = vpop.f32.mrb[80].mxu1 }
 0x506   : > { %v6632_v20 = vmax.f32 %v6600_v3, 0.0  ;;  %v6116_v8 = vadd.f32 %v6037_v45, %v12580_v28  ;;  %v8095_v34 = vpop.f32.mrb[81].mxu1 }
 0x507   : > { %v6040_v2 = vpop.f32.mrb[82].mxu1 }
 0x508   : > { %v6655_v63 = vmax.f32 %v6631_v30, %v6632_v20  ;;  %v6562_v27 = vadd.f32 %v12562_v23, %v6116_v8  ;;  %v6117_v37 = vadd.f32 %v6040_v2, %v12583_v14  ;;  %v8096_v47 = vpop.f32.mrb[83].mxu1 }
 0x509   : > { %v6686_v57 = vld [vmem:[#allocation3 + $0x30] ss:$2 sm:$0xff]  ;;  %v6702_v44 = vld [vmem:[#allocation3 + $0x31] ss:$2 sm:$0xff] }
 0x50a   : > { %v6714_v62 = vmax.f32 %v6686_v57, %v6702_v44  ;;  %6672 = vst.msk [vmem:[#allocation3 + $0x40] sm:$0xff] %vm6663_vm0, %v6655_v63  ;;  %v6601_v7 = vadd.f32 %v12651_v10, %v6562_v27  ;;  %v6563_v54 = vadd.f32 %v13789_v15, %v6117_v37  ;;  %v13790_v37 = vld [vmem:[#allocation51_spill] sm:$0xff] }
 0x50c   : > { %v7175_v39 = vpack.c.bf16 %v6714_v62, %v6714_v62  ;;  %v6602_v28 = vadd.f32 %v12651_v10, %v6563_v54  ;;  %v6633_v61 = vmax.f32 %v6601_v7, 0.0 }
 0x50d   : > { %v6045_v18 = vpop.f32.mrb[84].mxu1 }
 0x50e   : > { %6755 = vst.msk [vmem:[%s12686_s28 + $0xc] sm:$0xf] %vm6751_vm9, %v7175_v39  ;;  %v6634_v23 = vmax.f32 %v6602_v28, 0.0  ;;  %v6118_v14 = vadd.f32 %v6045_v18, %v12598_v16  ;;  %v8099_v33 = vpop.f32.mrb[85].mxu1 }
 0x50f   : > { %v6048_v13 = vpop.f32.mrb[86].mxu1  ;;  %v13791_v33 = vld [vmem:[#allocation14_spill] sm:$0xff] }
 0x510   : > { %v6656_v46 = vmax.f32 %v6633_v61, %v6634_v23  ;;  %v6564_v53 = vadd.f32 %v12568_v52, %v6118_v14  ;;  %v6119_v59 = vadd.f32 %v6048_v13, %v12601_v35  ;;  %v8100_v1 = vpop.f32.mrb[87].mxu1 }
 0x512   : > { %6673 = vst.msk [vmem:[#allocation3 + $0x48] sm:$0xff] %vm6663_vm0, %v6656_v46  ;;  %v6603_v5 = vadd.f32 %v12651_v10, %v6564_v53  ;;  %v6565_v51 = vadd.f32 %v12570_v56, %v6119_v59 }
 0x514   : > { %v6604_v55 = vadd.f32 %v12651_v10, %v6565_v51  ;;  %v6635_v6 = vmax.f32 %v6603_v5, 0.0 }
 0x515   : > { %v6053_v17 = vpop.f32.mrb[88].mxu1 }
 0x516   : > { %v6636_v48 = vmax.f32 %v6604_v55, 0.0  ;;  %v6120_v16 = vadd.f32 %v6053_v17, %v12604_v26  ;;  %v8103_v9 = vpop.f32.mrb[89].mxu1  ;;  %v13792_v55 = vld [vmem:[#allocation35_spill] sm:$0xff] }
 0x517   : > { %v6056_v19 = vpop.f32.mrb[90].mxu1  ;;  %v13793_v9 = vld [vmem:[#allocation4_spill] sm:$0xff] }
 0x518   : > { %v6657_v52 = vmax.f32 %v6635_v6, %v6636_v48  ;;  %v6566_v35 = vadd.f32 %v12586_v36, %v6120_v16  ;;  %v6121_v25 = vadd.f32 %v6056_v19, %v12607_v60  ;;  %v8104_v32 = vpop.f32.mrb[91].mxu1 }
 0x519   : > { %v6688_v49 = vld [vmem:[#allocation3 + $0x40] ss:$2 sm:$0xff]  ;;  %v6704_v38 = vld [vmem:[#allocation3 + $0x41] ss:$2 sm:$0xff] }
 0x51a   : > { %v6715_v31 = vmax.f32 %v6688_v49, %v6704_v38  ;;  %6674 = vst.msk [vmem:[#allocation3 + $0x50] sm:$0xff] %vm6663_vm0, %v6657_v52  ;;  %v6605_v56 = vadd.f32 %v12651_v10, %v6566_v35  ;;  %v6567_v29 = vadd.f32 %v12588_v24, %v6121_v25 }
 0x51c   : > { %v7176_v3 = vpack.c.bf16 %v6715_v31, %v6715_v31  ;;  %v6606_v26 = vadd.f32 %v12651_v10, %v6567_v29  ;;  %v6637_v30 = vmax.f32 %v6605_v56, 0.0 }
 0x51d   : > { %v6061_v45 = vpop.f32.mrb[92].mxu1 }
 0x51e   : > { %6756 = vst.msk [vmem:[%s12686_s28 + $0x10] sm:$0xf] %vm6751_vm9, %v7176_v3  ;;  %v6638_v36 = vmax.f32 %v6606_v26, 0.0  ;;  %v6122_v60 = vadd.f32 %v6061_v45, %v12622_v50  ;;  %v8107_v20 = vpop.f32.mrb[93].mxu1 }
 0x51f   : > { %v6064_v8 = vpop.f32.mrb[94].mxu1 }
 0x520   : > { %v6658_v34 = vmax.f32 %v6637_v30, %v6638_v36  ;;  %v6568_v2 = vadd.f32 %v12592_v58, %v6122_v60  ;;  %v6123_v63 = vadd.f32 %v6064_v8, %v12625_v43  ;;  %v8108_v27 = vpop.f32.mrb[95].mxu1 }
 0x522   : > { %6675 = vst.msk [vmem:[#allocation3 + $0x58] sm:$0xff] %vm6663_vm0, %v6658_v34  ;;  %v6607_v24 = vadd.f32 %v12651_v10, %v6568_v2  ;;  %v6569_v47 = vadd.f32 %v13790_v37, %v6123_v63 }
 0x524   : > { %v6608_v57 = vadd.f32 %v12651_v10, %v6569_v47  ;;  %v6639_v62 = vmax.f32 %v6607_v24, 0.0 }
 0x525   : > { %v6069_v44 = vpop.f32.mrb[96].mxu1 }
 0x526   : > { %v6640_v7 = vmax.f32 %v6608_v57, 0.0  ;;  %v6124_v50 = vadd.f32 %v6069_v44, %v12628_v22  ;;  %v8111_v15 = vpop.f32.mrb[97].mxu1 }
 0x527   : > { %v6072_v54 = vpop.f32.mrb[98].mxu1 }
 0x528   : > { %v6659_v58 = vmax.f32 %v6639_v62, %v6640_v7  ;;  %v6570_v43 = vadd.f32 %v12610_v11, %v6124_v50  ;;  %v6125_v39 = vadd.f32 %v6072_v54, %v12631_v12  ;;  %v8112_v28 = vpop.f32.mrb[99].mxu1 }
 0x529   : > { %v6690_v18 = vld [vmem:[#allocation3 + $0x50] ss:$2 sm:$0xff]  ;;  %v6706_v61 = vld [vmem:[#allocation3 + $0x51] ss:$2 sm:$0xff] }
 0x52a   : > { %v6716_v23 = vmax.f32 %v6690_v18, %v6706_v61  ;;  %6676 = vst.msk [vmem:[#allocation3 + $0x60] sm:$0xff] %vm6663_vm0, %v6659_v58  ;;  %v6609_v14 = vadd.f32 %v12651_v10, %v6570_v43  ;;  %v6571_v13 = vadd.f32 %v13791_v33, %v6125_v39 }
 0x52c   : > { %v7177_v46 = vpack.c.bf16 %v6716_v23, %v6716_v23  ;;  %v6610_v22 = vadd.f32 %v12651_v10, %v6571_v13  ;;  %v6641_v59 = vmax.f32 %v6609_v14, 0.0 }
 0x52d   : > { %v6077_v53 = vpop.f32.mrb[100].mxu1 }
 0x52e   : > { %6757 = vst.msk [vmem:[%s12686_s28 + $0x14] sm:$0xf] %vm6751_vm9, %v7177_v46  ;;  %v6642_v11 = vmax.f32 %v6610_v22, 0.0  ;;  %v6126_v12 = vadd.f32 %v6077_v53, %v12640_v0  ;;  %v8115_v1 = vpop.f32.mrb[101].mxu1 }
 0x52f   : > { %v6080_v5 = vpop.f32.mrb[102].mxu1 }
 0x530   : > { %v6660_v51 = vmax.f32 %v6641_v59, %v6642_v11  ;;  %v6572_v17 = vadd.f32 %v13792_v55, %v6126_v12  ;;  %v6127_v6 = vadd.f32 %v6080_v5, %v12643_v40  ;;  %v8116_v48 = vpop.f32.mrb[103].mxu1 }
 0x532   : > { %6677 = vst.msk [vmem:[#allocation3 + $0x68] sm:$0xff] %vm6663_vm0, %v6660_v51  ;;  %v6611_v16 = vadd.f32 %v12651_v10, %v6572_v17  ;;  %v6573_v19 = vadd.f32 %v13793_v9, %v6127_v6 }
 0x534   : > { %v6612_v52 = vadd.f32 %v12651_v10, %v6573_v19  ;;  %v6643_v25 = vmax.f32 %v6611_v16, 0.0 }
 0x535   : > { %v6085_v35 = vpop.f32.mrb[104].mxu1 }
 0x536   : > { %v6644_v32 = vmax.f32 %v6612_v52, 0.0  ;;  %v6128_v0 = vadd.f32 %v6085_v35, %v12646_v41  ;;  %v8119_v49 = vpop.f32.mrb[105].mxu1 }
 0x537   : > { %v6088_v38 = vpop.f32.mrb[106].mxu1 }
 0x538   : > { %v6661_v31 = vmax.f32 %v6643_v25, %v6644_v32  ;;  %v6574_v40 = vadd.f32 %v12634_v21, %v6128_v0  ;;  %v6129_v56 = vadd.f32 %v6088_v38, %v12654_v4  ;;  %v8120_v29 = vpop.f32.mrb[107].mxu1 }
 0x539   : > { %v6692_v3 = vld [vmem:[#allocation3 + $0x60] ss:$2 sm:$0xff]  ;;  %v6708_v26 = vld [vmem:[#allocation3 + $0x61] ss:$2 sm:$0xff] }
 0x53a   : > { %v6717_v45 = vmax.f32 %v6692_v3, %v6708_v26  ;;  %6678 = vst.msk [vmem:[#allocation3 + $0x70] sm:$0xff] %vm6663_vm0, %v6661_v31  ;;  %v6613_v30 = vadd.f32 %v12651_v10, %v6574_v40  ;;  %v6575_v36 = vadd.f32 %v12636_v42, %v6129_v56 }
 0x53c   : > { %v7178_v41 = vpack.c.bf16 %v6717_v45, %v6717_v45  ;;  %v6614_v60 = vadd.f32 %v12651_v10, %v6575_v36  ;;  %v6645_v21 = vmax.f32 %v6613_v30, 0.0 }
 0x53d   : > { %v6093_v20 = vpop.f32.mrb[108].mxu1 }
 0x53e   : > { %6758 = vst.msk [vmem:[%s12686_s28 + $0x18] sm:$0xf] %vm6751_vm9, %v7178_v41  ;;  %v6646_v8 = vmax.f32 %v6614_v60, 0.0  ;;  %v8123_v4 = vpop.f32.mrb[109].mxu1 }
 0x53f   : > { %v6095_v34 = vpop.f32.mrb[110].mxu1 }
 0x540   : > { %v6662_v2 = vmax.f32 %v6645_v21, %v6646_v8  ;;  %v8124_v63 = vpop.f32.mrb[111].mxu1 }
 0x542   : > { %6679 = vst.msk [vmem:[#allocation3 + $0x78] sm:$0xff] %vm6663_vm0, %v6662_v2 }
 0x549   : > { %v6694_v27 = vld [vmem:[#allocation3 + $0x70] ss:$2 sm:$0xff]  ;;  %v6710_v24 = vld [vmem:[#allocation3 + $0x71] ss:$2 sm:$0xff] }
 0x54a   : > { %v6718_v37 = vmax.f32 %v6694_v27, %v6710_v24 }
 0x54c   : > { %v7179_v47 = vpack.c.bf16 %v6718_v37, %v6718_v37 }
 0x54e   : > { %6759 = vst.msk [vmem:[%s12686_s28 + $0x1c] sm:$0xf] %vm6751_vm9, %v7179_v47 }
 0x54f PF: > { %s15_s18 = sadd.s32 1, %s8345_s18  }
 0x550   : > { %p12_p5 = scmp.ge.s32.totalorder %s15_s18, 4  }
 0x552   :  { %14 = sbr.rel (!%p12_p5) target bundleno = 1 (0x1), region = 85 }

</bundles_post_ra>
